<compile_context>
chip_gen: v7x
topology: tpu7x:2x2x1
jax: 0.10.0
libtpu: 0.0.40
codegen_flags: <defaults>
</compile_context>

<pallas_src>
import functools

import jax
import jax.numpy as jnp
from jax.experimental import pallas as pl
from jax.experimental.pallas import tpu as pltpu

_EPS = 1e-5
# (a, b) = 2x2 output-relative shifts of the space-to-depth decomposition:
# a k=4, s=2 conv on the padded input == sum over (a, b) of a pointwise matmul
# of the s2d view shifted by (a, b), with per-tap weights of shape (4*Cin, Cout).
_TAPS = ((0, 0), (0, 1), (1, 0), (1, 1))


# ----------------------------- Pallas kernels --------------------------------
def _conv_in_relu_kernel(s_ref, w_ref, o_ref, *, hout, wout):
    """Conv(k=4,s=2,p=1,bias=False) + InstanceNorm + ReLU for one batch element.

    s_ref: (Hp/2, Wp/2, 4*Cin)  f32  space-to-depth of the zero-padded input
    w_ref: (4, 4*Cin, Cout)     bf16 per-tap weight matrices
    o_ref: (Hout, Wout, Cout)   f32
    """
    cout = o_ref.shape[-1]
    c4 = s_ref.shape[-1]

    acc = None
    for t, (a, b) in enumerate(_TAPS):
        lhs = s_ref[a:a + hout, b:b + wout, :]          # contiguous slice (f32)
        lhs = lhs.reshape(hout * wout, c4)              # tile-aligned: wout % 8 == 0
        part = jnp.dot(lhs.astype(w_ref.dtype), w_ref[t],
                       preferred_element_type=jnp.float32)
        acc = part if acc is None else acc + part       # (HW, Cout) f32 accumulator

    # InstanceNorm2d (affine=False, biased variance, eps=1e-5): per-channel stats
    # over spatial positions, single fused sum / sum-of-squares pass in f32.
    inv_n = 1.0 / float(hout * wout)
    mean = jnp.sum(acc, axis=0, keepdims=True) * inv_n
    var = jnp.sum(acc * acc, axis=0, keepdims=True) * inv_n - mean * mean
    y = jnp.maximum((acc - mean) * jax.lax.rsqrt(var + _EPS), 0.0)   # IN + ReLU

    o_ref[...] = y.reshape(hout, wout, cout).astype(o_ref.dtype)


def _conv4_conv5_kernel(s_ref, w4_ref, w5_ref, o_ref):
    """conv4 (+IN+ReLU) fused with conv5 for one batch element.

    s_ref : (5, 5, 512)     f32  s2d of the padded 8x8x128 conv3 activation
    w4_ref: (4, 512, 256)   bf16 conv4 per-tap weights
    w5_ref: (16, 256)       f32  conv5 weight, rows ordered (oy*4 + ox)
    o_ref : (1, 1)          f32  final logit
    """
    # conv4: 4 output rows x 4 taps of (4, 512) @ (512, 256) MXU dots.
    rows = []
    for oy in range(4):
        acc = None
        for t, (a, b) in enumerate(_TAPS):
            lhs = s_ref[oy + a, b:b + 4, :]             # (4, 512) f32 contiguous
            part = jnp.dot(lhs.astype(w4_ref.dtype), w4_ref[t],
                           preferred_element_type=jnp.float32)
            acc = part if acc is None else acc + part
        rows.append(acc)                                # (4, 256) f32

    # InstanceNorm stats over all 16 spatial positions (single sum/sumsq pass).
    s1 = jnp.sum(rows[0], axis=0, keepdims=True)
    s2 = jnp.sum(rows[0] * rows[0], axis=0, keepdims=True)
    for r in rows[1:]:
        s1 = s1 + jnp.sum(r, axis=0, keepdims=True)
        s2 = s2 + jnp.sum(r * r, axis=0, keepdims=True)
    mean = s1 * (1.0 / 16.0)
    var = s2 * (1.0 / 16.0) - mean * mean
    inv_std = jax.lax.rsqrt(var + _EPS)

    # conv5 (k=4, s=2, p=0 on a 4x4 input -> 1x1): full-window dot product on
    # the VPU (multiply + reduce); the conv4 activation never leaves the kernel.
    acc_pc = None
    for oy in range(4):
        a4 = jnp.maximum((rows[oy] - mean) * inv_std, 0.0)            # IN + ReLU
        contrib = jnp.sum(a4 * w5_ref[4 * oy:4 * oy + 4, :],
                          axis=0, keepdims=True)                      # (1, 256)
        acc_pc = contrib if acc_pc is None else acc_pc + contrib
    o_ref[...] = jnp.sum(acc_pc, axis=1, keepdims=True)               # (1, 1)


# ---------------------------- wrapper-side glue -------------------------------
def _pad_s2d(x_nhwc, pad=1):
    """Zero-pad spatially and space-to-depth by 2.

    (B, H, W, C) -> (B, (H+2p)/2, (W+2p)/2, 4*C); s2d channel order is
    (row-parity p, col-parity q, c), matching _tap_weights.
    """
    b, h, w, c = x_nhwc.shape
    xp = jnp.pad(x_nhwc, ((0, 0), (pad, pad), (pad, pad), (0, 0)))
    hp, wp = h + 2 * pad, w + 2 * pad
    s = xp.reshape(b, hp // 2, 2, wp // 2, 2, c)
    s = s.transpose(0, 1, 3, 2, 4, 5)                     # (B, m, n, p, q, c)
    return s.reshape(b, hp // 2, wp // 2, 4 * c)


def _tap_weights(w_oihw):
    """PyTorch (Cout, Cin, 4, 4) weight -> (4 taps, 4*Cin, Cout) matching _pad_s2d."""
    cout, cin, kh, kw = w_oihw.shape
    assert kh == 4 and kw == 4
    w = w_oihw.reshape(cout, cin, 2, 2, 2, 2)             # (co, ci, a, p, b, q)
    w = w.transpose(2, 4, 3, 5, 1, 0)                     # (a, b, p, q, ci, co)
    return w.reshape(4, 4 * cin, cout)


def _conv_in_relu_block(s2d, taps):
    """One fused Conv+IN+ReLU stage over the batch grid."""
    b, hp2, wp2, c4 = s2d.shape
    hout, wout = hp2 - 1, wp2 - 1
    cout = taps.shape[-1]
    assert wout % 8 == 0, "in-kernel reshape requires lane/sublane-tile alignment"

    kernel = functools.partial(_conv_in_relu_kernel, hout=hout, wout=wout)
    flops = 2 * b * hout * wout * (4 * c4) * cout
    bytes_accessed = (s2d.size * s2d.dtype.itemsize
                      + taps.size * taps.dtype.itemsize
                      + b * hout * wout * cout * 4)

    return pl.pallas_call(
        kernel,
        out_shape=jax.ShapeDtypeStruct((b, hout, wout, cout), jnp.float32),
        grid_spec=pltpu.PrefetchScalarGridSpec(
            num_scalar_prefetch=0,
            grid=(b,),
            in_specs=[
                # None == pl.Squeezed(): kernel refs drop the batch dim.
                pl.BlockSpec((None, hp2, wp2, c4), lambda i: (i, 0, 0, 0)),
                pl.BlockSpec((4, c4, cout), lambda i: (0, 0, 0)),
            ],
            out_specs=pl.BlockSpec((None, hout, wout, cout),
                                   lambda i: (i, 0, 0, 0)),
        ),
        compiler_params=pltpu.CompilerParams(dimension_semantics=("parallel",)),
        cost_estimate=pl.CostEstimate(flops=flops, transcendentals=b * cout,
                                      bytes_accessed=bytes_accessed),
    )(s2d, taps)


def _conv4_conv5_block(s2d, taps4, w5_mat):
    """Fused conv4(+IN+ReLU) + conv5 stage -> (B, 1, 1) logits."""
    b, hp2, wp2, c4 = s2d.shape
    cout4 = taps4.shape[-1]
    assert (hp2, wp2) == (5, 5), "fused conv4+conv5 expects 64x64 network inputs"

    flops = 2 * b * (16 * (4 * c4) * cout4 + 16 * cout4)
    bytes_accessed = (s2d.size * s2d.dtype.itemsize
                      + taps4.size * taps4.dtype.itemsize
                      + w5_mat.size * w5_mat.dtype.itemsize + b * 4)

    return pl.pallas_call(
        _conv4_conv5_kernel,
        out_shape=jax.ShapeDtypeStruct((b, 1, 1), jnp.float32),
        grid_spec=pltpu.PrefetchScalarGridSpec(
            num_scalar_prefetch=0,
            grid=(b,),
            in_specs=[
                pl.BlockSpec((None, hp2, wp2, c4), lambda i: (i, 0, 0, 0)),
                pl.BlockSpec((4, c4, cout4), lambda i: (0, 0, 0)),
                pl.BlockSpec((16, cout4), lambda i: (0, 0)),
            ],
            out_specs=pl.BlockSpec((None, 1, 1), lambda i: (i, 0, 0)),
        ),
        compiler_params=pltpu.CompilerParams(dimension_semantics=("parallel",)),
        cost_estimate=pl.CostEstimate(flops=flops, transcendentals=b * cout4,
                                      bytes_accessed=bytes_accessed),
    )(s2d, taps4, w5_mat)


# ------------------------------- model ---------------------------------------
def init_params(key):
    """Deterministic synthetic weights, PyTorch Conv2d layout (Cout, Cin, kH, kW)."""
    specs = [
        (32, 3, 4, 4),     # conv1
        (64, 32, 4, 4),    # conv2
        (128, 64, 4, 4),   # conv3
        (256, 128, 4, 4),  # conv4
        (1, 256, 4, 4),    # conv5
    ]
    params = []
    keys = jax.random.split(key, len(specs))
    for k, (cout, cin, kh, kw) in zip(keys, specs):
        fan_in = cin * kh * kw
        w = jax.random.normal(k, (cout, cin, kh, kw), jnp.float32) / jnp.sqrt(
            jnp.float32(fan_in))
        params.append(w)
    return params


def dc_discriminator_forward(x_nchw, params):
    """Forward pass matching DCDiscriminator(norm='instance'). NCHW in / NCHW out."""
    w1, w2, w3, w4, w5 = params
    cdt = jnp.bfloat16  # MXU input dtype; accumulation / IN stats / output stay f32

    x = jnp.transpose(x_nchw, (0, 2, 3, 1)).astype(jnp.float32)   # NCHW -> NHWC
    t1, t2, t3, t4 = (_tap_weights(w).astype(cdt) for w in (w1, w2, w3, w4))
    # conv5 weight (1, 256, 4, 4) -> (16, 256), rows ordered (ky*4 + kx).
    w5_mat = jnp.transpose(w5[0], (1, 2, 0)).reshape(16, 256).astype(jnp.float32)

    a = _conv_in_relu_block(_pad_s2d(x), t1)        # (B, 32, 32, 32)
    a = _conv_in_relu_block(_pad_s2d(a), t2)        # (B, 16, 16, 64)
    a = _conv_in_relu_block(_pad_s2d(a), t3)        # (B,  8,  8, 128)
    out = _conv4_conv5_block(_pad_s2d(a), t4, w5_mat)   # (B, 1, 1)
    return out.reshape(out.shape[0], 1, 1, 1)       # NCHW (B, 1, 1, 1)


# --------------------------- pure-JAX reference -------------------------------
def _reference_forward(x_nchw, params, cdt=jnp.bfloat16):
    """lax.conv reference with the same bf16-MXU / f32-accumulation quantization."""
    def conv(x, w, padding):
        return jax.lax.conv_general_dilated(
            x.astype(cdt), w.astype(cdt), window_strides=(2, 2),
            padding=[(padding, padding)] * 2,
            dimension_numbers=("NCHW", "OIHW", "NCHW"),
            preferred_element_type=jnp.float32)

    def inorm_relu(y):
        mean = jnp.mean(y, axis=(2, 3), keepdims=True)
        var = jnp.mean(jnp.square(y - mean), axis=(2, 3), keepdims=True)
        return jnp.maximum((y - mean) * jax.lax.rsqrt(var + _EPS), 0.0)

    w1, w2, w3, w4, w5 = params
    y = x_nchw.astype(jnp.float32)
    for w in (w1, w2, w3, w4):
        y = inorm_relu(conv(y, w, 1))
    return conv(y, w5, 0).astype(jnp.float32)


if __name__ == "__main__":
    key = jax.random.PRNGKey(0)
    k_param, k_input = jax.random.split(key)

    params = init_params(k_param)
    # 64x64 is the smallest spatial size for which conv5 (k=4, p=0) is valid.
    x = jax.random.normal(k_input, (2, 3, 64, 64), jnp.float32)

    fwd = jax.jit(dc_discriminator_forward)
    out = jax.block_until_ready(fwd(x, params))

    assert out.shape == (2, 1, 1, 1), out.shape
    assert bool(jnp.all(jnp.isfinite(out)))

    ref = jax.block_until_ready(_reference_forward(x, params))
    assert bool(jnp.allclose(out, ref, rtol=2e-2, atol=2e-2)), (out, ref)

    print("KERNEL_OK")
</pallas_src>

<mosaic_0001>
module attributes {stable_mosaic.version = 11 : i64} {
  func.func @_conv_in_relu_kernel(%arg0: i32, %arg1: memref<1x33x33x12xf32, #tpu.memory_space<vmem>>, %arg2: memref<4x12x32xbf16, #tpu.memory_space<vmem>>, %arg3: memref<1x32x32x32xf32, #tpu.memory_space<vmem>>) attributes {dimension_semantics = [#tpu.dimension_semantics<parallel>], iteration_bounds = array<i64: 2>, scalar_prefetch = 0 : i64, scratch_operands = 0 : i64, tpu.core_type = #tpu.core_type<tc>, window_params = [{transform_indices = @transform_0, window_bounds = array<i64: 1, 33, 33, 12>}, {pipeline_mode = #tpu.pipeline_mode<synchronous>, transform_indices = @transform_1, window_bounds = array<i64: 4, 12, 32>}, {transform_indices = @transform_2, window_bounds = array<i64: 1, 32, 32, 32>}]} {
    %c0 = arith.constant 0 : index
    %c0_0 = arith.constant 0 : index
    %c0_1 = arith.constant 0 : index
    %c0_2 = arith.constant 0 : index
    %0 = vector.load %arg1[%c0, %c0_0, %c0_1, %c0_2] : memref<1x33x33x12xf32, #tpu.memory_space<vmem>>, vector<1x32x32x12xf32>
    %1 = vector.shape_cast %0 : vector<1x32x32x12xf32> to vector<32x32x12xf32>
    %2 = vector.shape_cast %1 : vector<32x32x12xf32> to vector<1024x12xf32>
    %3 = arith.truncf %2 : vector<1024x12xf32> to vector<1024x12xbf16>
    %c0_3 = arith.constant 0 : index
    %c0_4 = arith.constant 0 : index
    %c0_5 = arith.constant 0 : index
    %4 = vector.load %arg2[%c0_3, %c0_4, %c0_5] : memref<4x12x32xbf16, #tpu.memory_space<vmem>>, vector<1x12x32xbf16>
    %5 = vector.shape_cast %4 : vector<1x12x32xbf16> to vector<12x32xbf16>
    %cst = arith.constant dense<0.000000e+00> : vector<1024x32xf32>
    %6 = tpu.matmul %3, %5, %cst {dimension_numbers = #tpu.dot_dimension_numbers<[1], [0], [0], [1], [0, 0, 1, 1], [], []>} : vector<1024x12xbf16>, vector<12x32xbf16>, vector<1024x32xf32> -> vector<1024x32xf32>
    %c0_6 = arith.constant 0 : index
    %c0_7 = arith.constant 0 : index
    %c1 = arith.constant 1 : index
    %c0_8 = arith.constant 0 : index
    %7 = vector.load %arg1[%c0_6, %c0_7, %c1, %c0_8] : memref<1x33x33x12xf32, #tpu.memory_space<vmem>>, vector<1x32x32x12xf32>
    %8 = vector.shape_cast %7 : vector<1x32x32x12xf32> to vector<32x32x12xf32>
    %9 = vector.shape_cast %8 : vector<32x32x12xf32> to vector<1024x12xf32>
    %10 = arith.truncf %9 : vector<1024x12xf32> to vector<1024x12xbf16>
    %c1_9 = arith.constant 1 : index
    %c0_10 = arith.constant 0 : index
    %c0_11 = arith.constant 0 : index
    %11 = vector.load %arg2[%c1_9, %c0_10, %c0_11] : memref<4x12x32xbf16, #tpu.memory_space<vmem>>, vector<1x12x32xbf16>
    %12 = vector.shape_cast %11 : vector<1x12x32xbf16> to vector<12x32xbf16>
    %cst_12 = arith.constant dense<0.000000e+00> : vector<1024x32xf32>
    %13 = tpu.matmul %10, %12, %cst_12 {dimension_numbers = #tpu.dot_dimension_numbers<[1], [0], [0], [1], [0, 0, 1, 1], [], []>} : vector<1024x12xbf16>, vector<12x32xbf16>, vector<1024x32xf32> -> vector<1024x32xf32>
    %14 = arith.addf %6, %13 : vector<1024x32xf32>
    %c0_13 = arith.constant 0 : index
    %c1_14 = arith.constant 1 : index
    %c0_15 = arith.constant 0 : index
    %c0_16 = arith.constant 0 : index
    %15 = vector.load %arg1[%c0_13, %c1_14, %c0_15, %c0_16] : memref<1x33x33x12xf32, #tpu.memory_space<vmem>>, vector<1x32x32x12xf32>
    %16 = vector.shape_cast %15 : vector<1x32x32x12xf32> to vector<32x32x12xf32>
    %17 = vector.shape_cast %16 : vector<32x32x12xf32> to vector<1024x12xf32>
    %18 = arith.truncf %17 : vector<1024x12xf32> to vector<1024x12xbf16>
    %c2 = arith.constant 2 : index
    %c0_17 = arith.constant 0 : index
    %c0_18 = arith.constant 0 : index
    %19 = vector.load %arg2[%c2, %c0_17, %c0_18] : memref<4x12x32xbf16, #tpu.memory_space<vmem>>, vector<1x12x32xbf16>
    %20 = vector.shape_cast %19 : vector<1x12x32xbf16> to vector<12x32xbf16>
    %cst_19 = arith.constant dense<0.000000e+00> : vector<1024x32xf32>
    %21 = tpu.matmul %18, %20, %cst_19 {dimension_numbers = #tpu.dot_dimension_numbers<[1], [0], [0], [1], [0, 0, 1, 1], [], []>} : vector<1024x12xbf16>, vector<12x32xbf16>, vector<1024x32xf32> -> vector<1024x32xf32>
    %22 = arith.addf %14, %21 : vector<1024x32xf32>
    %c0_20 = arith.constant 0 : index
    %c1_21 = arith.constant 1 : index
    %c1_22 = arith.constant 1 : index
    %c0_23 = arith.constant 0 : index
    %23 = vector.load %arg1[%c0_20, %c1_21, %c1_22, %c0_23] : memref<1x33x33x12xf32, #tpu.memory_space<vmem>>, vector<1x32x32x12xf32>
    %24 = vector.shape_cast %23 : vector<1x32x32x12xf32> to vector<32x32x12xf32>
    %25 = vector.shape_cast %24 : vector<32x32x12xf32> to vector<1024x12xf32>
    %26 = arith.truncf %25 : vector<1024x12xf32> to vector<1024x12xbf16>
    %c3 = arith.constant 3 : index
    %c0_24 = arith.constant 0 : index
    %c0_25 = arith.constant 0 : index
    %27 = vector.load %arg2[%c3, %c0_24, %c0_25] : memref<4x12x32xbf16, #tpu.memory_space<vmem>>, vector<1x12x32xbf16>
    %28 = vector.shape_cast %27 : vector<1x12x32xbf16> to vector<12x32xbf16>
    %cst_26 = arith.constant dense<0.000000e+00> : vector<1024x32xf32>
    %29 = tpu.matmul %26, %28, %cst_26 {dimension_numbers = #tpu.dot_dimension_numbers<[1], [0], [0], [1], [0, 0, 1, 1], [], []>} : vector<1024x12xbf16>, vector<12x32xbf16>, vector<1024x32xf32> -> vector<1024x32xf32>
    %30 = arith.addf %22, %29 : vector<1024x32xf32>
    %cst_27 = arith.constant dense<0.000000e+00> : vector<32xf32>
    %31 = vector.multi_reduction <add>, %30, %cst_27 [0] : vector<1024x32xf32> to vector<32xf32>
    %32 = vector.shape_cast %31 : vector<32xf32> to vector<1x32xf32>
    %cst_28 = arith.constant 9.765625E-4 : f32
    %33 = vector.broadcast %cst_28 : f32 to vector<1x32xf32>
    %34 = arith.mulf %32, %33 : vector<1x32xf32>
    %35 = arith.mulf %30, %30 : vector<1024x32xf32>
    %cst_29 = arith.constant dense<0.000000e+00> : vector<32xf32>
    %36 = vector.multi_reduction <add>, %35, %cst_29 [0] : vector<1024x32xf32> to vector<32xf32>
    %37 = vector.shape_cast %36 : vector<32xf32> to vector<1x32xf32>
    %cst_30 = arith.constant 9.765625E-4 : f32
    %38 = vector.broadcast %cst_30 : f32 to vector<1x32xf32>
    %39 = arith.mulf %37, %38 : vector<1x32xf32>
    %40 = arith.mulf %34, %34 : vector<1x32xf32>
    %41 = arith.subf %39, %40 : vector<1x32xf32>
    %42 = vector.broadcast %34 : vector<1x32xf32> to vector<1024x32xf32>
    %43 = arith.subf %30, %42 : vector<1024x32xf32>
    %cst_31 = arith.constant 9.99999974E-6 : f32
    %44 = vector.broadcast %cst_31 : f32 to vector<1x32xf32>
    %45 = arith.addf %41, %44 : vector<1x32xf32>
    %46 = math.rsqrt %45 : vector<1x32xf32>
    %47 = vector.broadcast %46 : vector<1x32xf32> to vector<1024x32xf32>
    %48 = arith.mulf %43, %47 : vector<1024x32xf32>
    %cst_32 = arith.constant 0.000000e+00 : f32
    %49 = vector.broadcast %cst_32 : f32 to vector<1024x32xf32>
    %50 = arith.maximumf %48, %49 : vector<1024x32xf32>
    %51 = vector.shape_cast %50 : vector<1024x32xf32> to vector<32x32x32xf32>
    %c0_33 = arith.constant 0 : index
    %c0_34 = arith.constant 0 : index
    %c0_35 = arith.constant 0 : index
    %c0_36 = arith.constant 0 : index
    %52 = vector.load %arg3[%c0_33, %c0_34, %c0_35, %c0_36] : memref<1x32x32x32xf32, #tpu.memory_space<vmem>>, vector<1x32x32x32xf32>
    %53 = vector.shape_cast %52 : vector<1x32x32x32xf32> to vector<32x32x32xf32>
    %54 = vector.shape_cast %51 : vector<32x32x32xf32> to vector<1x32x32x32xf32>
    tpu.vector_store %arg3[%c0_33, %c0_34, %c0_35, %c0_36], %54 {strides = array<i32>} : memref<1x32x32x32xf32, #tpu.memory_space<vmem>>, vector<1x32x32x32xf32>,
    return
  }
  func.func @transform_0(%arg0: i32) -> (i32, i32, i32, i32) {
    %c0_i32 = arith.constant 0 : i32
    %c0_i32_0 = arith.constant 0 : i32
    %c0_i32_1 = arith.constant 0 : i32
    %c0_i32_2 = arith.constant 0 : i32
    return %arg0, %c0_i32, %c0_i32_0, %c0_i32_1 : i32, i32, i32, i32
  }
  func.func @transform_1(%arg0: i32) -> (i32, i32, i32) {
    %c0_i32 = arith.constant 0 : i32
    %c0_i32_0 = arith.constant 0 : i32
    %c0_i32_1 = arith.constant 0 : i32
    %c0_i32_2 = arith.constant 0 : i32
    return %c0_i32, %c0_i32_0, %c0_i32_1 : i32, i32, i32
  }
  func.func @transform_2(%arg0: i32) -> (i32, i32, i32, i32) {
    %c0_i32 = arith.constant 0 : i32
    %c0_i32_0 = arith.constant 0 : i32
    %c0_i32_1 = arith.constant 0 : i32
    %c0_i32_2 = arith.constant 0 : i32
    return %arg0, %c0_i32, %c0_i32_0, %c0_i32_1 : i32, i32, i32, i32
  }
}

module attributes {stable_mosaic.version = 11 : i64} {
  func.func @_conv_in_relu_kernel(%arg0: i32, %arg1: memref<1x17x17x128xf32, #tpu.memory_space<vmem>>, %arg2: memref<4x128x64xbf16, #tpu.memory_space<vmem>>, %arg3: memref<1x16x16x64xf32, #tpu.memory_space<vmem>>) attributes {dimension_semantics = [#tpu.dimension_semantics<parallel>], iteration_bounds = array<i64: 2>, scalar_prefetch = 0 : i64, scratch_operands = 0 : i64, tpu.core_type = #tpu.core_type<tc>, window_params = [{transform_indices = @transform_0, window_bounds = array<i64: 1, 17, 17, 128>}, {pipeline_mode = #tpu.pipeline_mode<synchronous>, transform_indices = @transform_1, window_bounds = array<i64: 4, 128, 64>}, {transform_indices = @transform_2, window_bounds = array<i64: 1, 16, 16, 64>}]} {
    %c0 = arith.constant 0 : index
    %c0_0 = arith.constant 0 : index
    %c0_1 = arith.constant 0 : index
    %c0_2 = arith.constant 0 : index
    %0 = vector.load %arg1[%c0, %c0_0, %c0_1, %c0_2] : memref<1x17x17x128xf32, #tpu.memory_space<vmem>>, vector<1x16x16x128xf32>
    %1 = vector.shape_cast %0 : vector<1x16x16x128xf32> to vector<16x16x128xf32>
    %2 = vector.shape_cast %1 : vector<16x16x128xf32> to vector<256x128xf32>
    %3 = arith.truncf %2 : vector<256x128xf32> to vector<256x128xbf16>
    %c0_3 = arith.constant 0 : index
    %c0_4 = arith.constant 0 : index
    %c0_5 = arith.constant 0 : index
    %4 = vector.load %arg2[%c0_3, %c0_4, %c0_5] : memref<4x128x64xbf16, #tpu.memory_space<vmem>>, vector<1x128x64xbf16>
    %5 = vector.shape_cast %4 : vector<1x128x64xbf16> to vector<128x64xbf16>
    %cst = arith.constant dense<0.000000e+00> : vector<256x64xf32>
    %6 = tpu.matmul %3, %5, %cst {dimension_numbers = #tpu.dot_dimension_numbers<[1], [0], [0], [1], [0, 0, 1, 1], [], []>} : vector<256x128xbf16>, vector<128x64xbf16>, vector<256x64xf32> -> vector<256x64xf32>
    %c0_6 = arith.constant 0 : index
    %c0_7 = arith.constant 0 : index
    %c1 = arith.constant 1 : index
    %c0_8 = arith.constant 0 : index
    %7 = vector.load %arg1[%c0_6, %c0_7, %c1, %c0_8] : memref<1x17x17x128xf32, #tpu.memory_space<vmem>>, vector<1x16x16x128xf32>
    %8 = vector.shape_cast %7 : vector<1x16x16x128xf32> to vector<16x16x128xf32>
    %9 = vector.shape_cast %8 : vector<16x16x128xf32> to vector<256x128xf32>
    %10 = arith.truncf %9 : vector<256x128xf32> to vector<256x128xbf16>
    %c1_9 = arith.constant 1 : index
    %c0_10 = arith.constant 0 : index
    %c0_11 = arith.constant 0 : index
    %11 = vector.load %arg2[%c1_9, %c0_10, %c0_11] : memref<4x128x64xbf16, #tpu.memory_space<vmem>>, vector<1x128x64xbf16>
    %12 = vector.shape_cast %11 : vector<1x128x64xbf16> to vector<128x64xbf16>
    %cst_12 = arith.constant dense<0.000000e+00> : vector<256x64xf32>
    %13 = tpu.matmul %10, %12, %cst_12 {dimension_numbers = #tpu.dot_dimension_numbers<[1], [0], [0], [1], [0, 0, 1, 1], [], []>} : vector<256x128xbf16>, vector<128x64xbf16>, vector<256x64xf32> -> vector<256x64xf32>
    %14 = arith.addf %6, %13 : vector<256x64xf32>
    %c0_13 = arith.constant 0 : index
    %c1_14 = arith.constant 1 : index
    %c0_15 = arith.constant 0 : index
    %c0_16 = arith.constant 0 : index
    %15 = vector.load %arg1[%c0_13, %c1_14, %c0_15, %c0_16] : memref<1x17x17x128xf32, #tpu.memory_space<vmem>>, vector<1x16x16x128xf32>
    %16 = vector.shape_cast %15 : vector<1x16x16x128xf32> to vector<16x16x128xf32>
    %17 = vector.shape_cast %16 : vector<16x16x128xf32> to vector<256x128xf32>
    %18 = arith.truncf %17 : vector<256x128xf32> to vector<256x128xbf16>
    %c2 = arith.constant 2 : index
    %c0_17 = arith.constant 0 : index
    %c0_18 = arith.constant 0 : index
    %19 = vector.load %arg2[%c2, %c0_17, %c0_18] : memref<4x128x64xbf16, #tpu.memory_space<vmem>>, vector<1x128x64xbf16>
    %20 = vector.shape_cast %19 : vector<1x128x64xbf16> to vector<128x64xbf16>
    %cst_19 = arith.constant dense<0.000000e+00> : vector<256x64xf32>
    %21 = tpu.matmul %18, %20, %cst_19 {dimension_numbers = #tpu.dot_dimension_numbers<[1], [0], [0], [1], [0, 0, 1, 1], [], []>} : vector<256x128xbf16>, vector<128x64xbf16>, vector<256x64xf32> -> vector<256x64xf32>
    %22 = arith.addf %14, %21 : vector<256x64xf32>
    %c0_20 = arith.constant 0 : index
    %c1_21 = arith.constant 1 : index
    %c1_22 = arith.constant 1 : index
    %c0_23 = arith.constant 0 : index
    %23 = vector.load %arg1[%c0_20, %c1_21, %c1_22, %c0_23] : memref<1x17x17x128xf32, #tpu.memory_space<vmem>>, vector<1x16x16x128xf32>
    %24 = vector.shape_cast %23 : vector<1x16x16x128xf32> to vector<16x16x128xf32>
    %25 = vector.shape_cast %24 : vector<16x16x128xf32> to vector<256x128xf32>
    %26 = arith.truncf %25 : vector<256x128xf32> to vector<256x128xbf16>
    %c3 = arith.constant 3 : index
    %c0_24 = arith.constant 0 : index
    %c0_25 = arith.constant 0 : index
    %27 = vector.load %arg2[%c3, %c0_24, %c0_25] : memref<4x128x64xbf16, #tpu.memory_space<vmem>>, vector<1x128x64xbf16>
    %28 = vector.shape_cast %27 : vector<1x128x64xbf16> to vector<128x64xbf16>
    %cst_26 = arith.constant dense<0.000000e+00> : vector<256x64xf32>
    %29 = tpu.matmul %26, %28, %cst_26 {dimension_numbers = #tpu.dot_dimension_numbers<[1], [0], [0], [1], [0, 0, 1, 1], [], []>} : vector<256x128xbf16>, vector<128x64xbf16>, vector<256x64xf32> -> vector<256x64xf32>
    %30 = arith.addf %22, %29 : vector<256x64xf32>
    %cst_27 = arith.constant dense<0.000000e+00> : vector<64xf32>
    %31 = vector.multi_reduction <add>, %30, %cst_27 [0] : vector<256x64xf32> to vector<64xf32>
    %32 = vector.shape_cast %31 : vector<64xf32> to vector<1x64xf32>
    %cst_28 = arith.constant 3.906250e-03 : f32
    %33 = vector.broadcast %cst_28 : f32 to vector<1x64xf32>
    %34 = arith.mulf %32, %33 : vector<1x64xf32>
    %35 = arith.mulf %30, %30 : vector<256x64xf32>
    %cst_29 = arith.constant dense<0.000000e+00> : vector<64xf32>
    %36 = vector.multi_reduction <add>, %35, %cst_29 [0] : vector<256x64xf32> to vector<64xf32>
    %37 = vector.shape_cast %36 : vector<64xf32> to vector<1x64xf32>
    %cst_30 = arith.constant 3.906250e-03 : f32
    %38 = vector.broadcast %cst_30 : f32 to vector<1x64xf32>
    %39 = arith.mulf %37, %38 : vector<1x64xf32>
    %40 = arith.mulf %34, %34 : vector<1x64xf32>
    %41 = arith.subf %39, %40 : vector<1x64xf32>
    %42 = vector.broadcast %34 : vector<1x64xf32> to vector<256x64xf32>
    %43 = arith.subf %30, %42 : vector<256x64xf32>
    %cst_31 = arith.constant 9.99999974E-6 : f32
    %44 = vector.broadcast %cst_31 : f32 to vector<1x64xf32>
    %45 = arith.addf %41, %44 : vector<1x64xf32>
    %46 = math.rsqrt %45 : vector<1x64xf32>
    %47 = vector.broadcast %46 : vector<1x64xf32> to vector<256x64xf32>
    %48 = arith.mulf %43, %47 : vector<256x64xf32>
    %cst_32 = arith.constant 0.000000e+00 : f32
    %49 = vector.broadcast %cst_32 : f32 to vector<256x64xf32>
    %50 = arith.maximumf %48, %49 : vector<256x64xf32>
    %51 = vector.shape_cast %50 : vector<256x64xf32> to vector<16x16x64xf32>
    %c0_33 = arith.constant 0 : index
    %c0_34 = arith.constant 0 : index
    %c0_35 = arith.constant 0 : index
    %c0_36 = arith.constant 0 : index
    %52 = vector.load %arg3[%c0_33, %c0_34, %c0_35, %c0_36] : memref<1x16x16x64xf32, #tpu.memory_space<vmem>>, vector<1x16x16x64xf32>
    %53 = vector.shape_cast %52 : vector<1x16x16x64xf32> to vector<16x16x64xf32>
    %54 = vector.shape_cast %51 : vector<16x16x64xf32> to vector<1x16x16x64xf32>
    tpu.vector_store %arg3[%c0_33, %c0_34, %c0_35, %c0_36], %54 {strides = array<i32>} : memref<1x16x16x64xf32, #tpu.memory_space<vmem>>, vector<1x16x16x64xf32>,
    return
  }
  func.func @transform_0(%arg0: i32) -> (i32, i32, i32, i32) {
    %c0_i32 = arith.constant 0 : i32
    %c0_i32_0 = arith.constant 0 : i32
    %c0_i32_1 = arith.constant 0 : i32
    %c0_i32_2 = arith.constant 0 : i32
    return %arg0, %c0_i32, %c0_i32_0, %c0_i32_1 : i32, i32, i32, i32
  }
  func.func @transform_1(%arg0: i32) -> (i32, i32, i32) {
    %c0_i32 = arith.constant 0 : i32
    %c0_i32_0 = arith.constant 0 : i32
    %c0_i32_1 = arith.constant 0 : i32
    %c0_i32_2 = arith.constant 0 : i32
    return %c0_i32, %c0_i32_0, %c0_i32_1 : i32, i32, i32
  }
  func.func @transform_2(%arg0: i32) -> (i32, i32, i32, i32) {
    %c0_i32 = arith.constant 0 : i32
    %c0_i32_0 = arith.constant 0 : i32
    %c0_i32_1 = arith.constant 0 : i32
    %c0_i32_2 = arith.constant 0 : i32
    return %arg0, %c0_i32, %c0_i32_0, %c0_i32_1 : i32, i32, i32, i32
  }
}

module attributes {stable_mosaic.version = 11 : i64} {
  func.func @_conv_in_relu_kernel(%arg0: i32, %arg1: memref<1x9x9x256xf32, #tpu.memory_space<vmem>>, %arg2: memref<4x256x128xbf16, #tpu.memory_space<vmem>>, %arg3: memref<1x8x8x128xf32, #tpu.memory_space<vmem>>) attributes {dimension_semantics = [#tpu.dimension_semantics<parallel>], iteration_bounds = array<i64: 2>, scalar_prefetch = 0 : i64, scratch_operands = 0 : i64, tpu.core_type = #tpu.core_type<tc>, window_params = [{transform_indices = @transform_0, window_bounds = array<i64: 1, 9, 9, 256>}, {pipeline_mode = #tpu.pipeline_mode<synchronous>, transform_indices = @transform_1, window_bounds = array<i64: 4, 256, 128>}, {transform_indices = @transform_2, window_bounds = array<i64: 1, 8, 8, 128>}]} {
    %c0 = arith.constant 0 : index
    %c0_0 = arith.constant 0 : index
    %c0_1 = arith.constant 0 : index
    %c0_2 = arith.constant 0 : index
    %0 = vector.load %arg1[%c0, %c0_0, %c0_1, %c0_2] : memref<1x9x9x256xf32, #tpu.memory_space<vmem>>, vector<1x8x8x256xf32>
    %1 = vector.shape_cast %0 : vector<1x8x8x256xf32> to vector<8x8x256xf32>
    %2 = vector.shape_cast %1 : vector<8x8x256xf32> to vector<64x256xf32>
    %3 = arith.truncf %2 : vector<64x256xf32> to vector<64x256xbf16>
    %c0_3 = arith.constant 0 : index
    %c0_4 = arith.constant 0 : index
    %c0_5 = arith.constant 0 : index
    %4 = vector.load %arg2[%c0_3, %c0_4, %c0_5] : memref<4x256x128xbf16, #tpu.memory_space<vmem>>, vector<1x256x128xbf16>
    %5 = vector.shape_cast %4 : vector<1x256x128xbf16> to vector<256x128xbf16>
    %cst = arith.constant dense<0.000000e+00> : vector<64x128xf32>
    %6 = tpu.matmul %3, %5, %cst {dimension_numbers = #tpu.dot_dimension_numbers<[1], [0], [0], [1], [0, 0, 1, 1], [], []>} : vector<64x256xbf16>, vector<256x128xbf16>, vector<64x128xf32> -> vector<64x128xf32>
    %c0_6 = arith.constant 0 : index
    %c0_7 = arith.constant 0 : index
    %c1 = arith.constant 1 : index
    %c0_8 = arith.constant 0 : index
    %7 = vector.load %arg1[%c0_6, %c0_7, %c1, %c0_8] : memref<1x9x9x256xf32, #tpu.memory_space<vmem>>, vector<1x8x8x256xf32>
    %8 = vector.shape_cast %7 : vector<1x8x8x256xf32> to vector<8x8x256xf32>
    %9 = vector.shape_cast %8 : vector<8x8x256xf32> to vector<64x256xf32>
    %10 = arith.truncf %9 : vector<64x256xf32> to vector<64x256xbf16>
    %c1_9 = arith.constant 1 : index
    %c0_10 = arith.constant 0 : index
    %c0_11 = arith.constant 0 : index
    %11 = vector.load %arg2[%c1_9, %c0_10, %c0_11] : memref<4x256x128xbf16, #tpu.memory_space<vmem>>, vector<1x256x128xbf16>
    %12 = vector.shape_cast %11 : vector<1x256x128xbf16> to vector<256x128xbf16>
    %cst_12 = arith.constant dense<0.000000e+00> : vector<64x128xf32>
    %13 = tpu.matmul %10, %12, %cst_12 {dimension_numbers = #tpu.dot_dimension_numbers<[1], [0], [0], [1], [0, 0, 1, 1], [], []>} : vector<64x256xbf16>, vector<256x128xbf16>, vector<64x128xf32> -> vector<64x128xf32>
    %14 = arith.addf %6, %13 : vector<64x128xf32>
    %c0_13 = arith.constant 0 : index
    %c1_14 = arith.constant 1 : index
    %c0_15 = arith.constant 0 : index
    %c0_16 = arith.constant 0 : index
    %15 = vector.load %arg1[%c0_13, %c1_14, %c0_15, %c0_16] : memref<1x9x9x256xf32, #tpu.memory_space<vmem>>, vector<1x8x8x256xf32>
    %16 = vector.shape_cast %15 : vector<1x8x8x256xf32> to vector<8x8x256xf32>
    %17 = vector.shape_cast %16 : vector<8x8x256xf32> to vector<64x256xf32>
    %18 = arith.truncf %17 : vector<64x256xf32> to vector<64x256xbf16>
    %c2 = arith.constant 2 : index
    %c0_17 = arith.constant 0 : index
    %c0_18 = arith.constant 0 : index
    %19 = vector.load %arg2[%c2, %c0_17, %c0_18] : memref<4x256x128xbf16, #tpu.memory_space<vmem>>, vector<1x256x128xbf16>
    %20 = vector.shape_cast %19 : vector<1x256x128xbf16> to vector<256x128xbf16>
    %cst_19 = arith.constant dense<0.000000e+00> : vector<64x128xf32>
    %21 = tpu.matmul %18, %20, %cst_19 {dimension_numbers = #tpu.dot_dimension_numbers<[1], [0], [0], [1], [0, 0, 1, 1], [], []>} : vector<64x256xbf16>, vector<256x128xbf16>, vector<64x128xf32> -> vector<64x128xf32>
    %22 = arith.addf %14, %21 : vector<64x128xf32>
    %c0_20 = arith.constant 0 : index
    %c1_21 = arith.constant 1 : index
    %c1_22 = arith.constant 1 : index
    %c0_23 = arith.constant 0 : index
    %23 = vector.load %arg1[%c0_20, %c1_21, %c1_22, %c0_23] : memref<1x9x9x256xf32, #tpu.memory_space<vmem>>, vector<1x8x8x256xf32>
    %24 = vector.shape_cast %23 : vector<1x8x8x256xf32> to vector<8x8x256xf32>
    %25 = vector.shape_cast %24 : vector<8x8x256xf32> to vector<64x256xf32>
    %26 = arith.truncf %25 : vector<64x256xf32> to vector<64x256xbf16>
    %c3 = arith.constant 3 : index
    %c0_24 = arith.constant 0 : index
    %c0_25 = arith.constant 0 : index
    %27 = vector.load %arg2[%c3, %c0_24, %c0_25] : memref<4x256x128xbf16, #tpu.memory_space<vmem>>, vector<1x256x128xbf16>
    %28 = vector.shape_cast %27 : vector<1x256x128xbf16> to vector<256x128xbf16>
    %cst_26 = arith.constant dense<0.000000e+00> : vector<64x128xf32>
    %29 = tpu.matmul %26, %28, %cst_26 {dimension_numbers = #tpu.dot_dimension_numbers<[1], [0], [0], [1], [0, 0, 1, 1], [], []>} : vector<64x256xbf16>, vector<256x128xbf16>, vector<64x128xf32> -> vector<64x128xf32>
    %30 = arith.addf %22, %29 : vector<64x128xf32>
    %cst_27 = arith.constant dense<0.000000e+00> : vector<128xf32>
    %31 = vector.multi_reduction <add>, %30, %cst_27 [0] : vector<64x128xf32> to vector<128xf32>
    %32 = vector.shape_cast %31 : vector<128xf32> to vector<1x128xf32>
    %cst_28 = arith.constant 1.562500e-02 : f32
    %33 = vector.broadcast %cst_28 : f32 to vector<1x128xf32>
    %34 = arith.mulf %32, %33 : vector<1x128xf32>
    %35 = arith.mulf %30, %30 : vector<64x128xf32>
    %cst_29 = arith.constant dense<0.000000e+00> : vector<128xf32>
    %36 = vector.multi_reduction <add>, %35, %cst_29 [0] : vector<64x128xf32> to vector<128xf32>
    %37 = vector.shape_cast %36 : vector<128xf32> to vector<1x128xf32>
    %cst_30 = arith.constant 1.562500e-02 : f32
    %38 = vector.broadcast %cst_30 : f32 to vector<1x128xf32>
    %39 = arith.mulf %37, %38 : vector<1x128xf32>
    %40 = arith.mulf %34, %34 : vector<1x128xf32>
    %41 = arith.subf %39, %40 : vector<1x128xf32>
    %42 = vector.broadcast %34 : vector<1x128xf32> to vector<64x128xf32>
    %43 = arith.subf %30, %42 : vector<64x128xf32>
    %cst_31 = arith.constant 9.99999974E-6 : f32
    %44 = vector.broadcast %cst_31 : f32 to vector<1x128xf32>
    %45 = arith.addf %41, %44 : vector<1x128xf32>
    %46 = math.rsqrt %45 : vector<1x128xf32>
    %47 = vector.broadcast %46 : vector<1x128xf32> to vector<64x128xf32>
    %48 = arith.mulf %43, %47 : vector<64x128xf32>
    %cst_32 = arith.constant 0.000000e+00 : f32
    %49 = vector.broadcast %cst_32 : f32 to vector<64x128xf32>
    %50 = arith.maximumf %48, %49 : vector<64x128xf32>
    %51 = vector.shape_cast %50 : vector<64x128xf32> to vector<8x8x128xf32>
    %c0_33 = arith.constant 0 : index
    %c0_34 = arith.constant 0 : index
    %c0_35 = arith.constant 0 : index
    %c0_36 = arith.constant 0 : index
    %52 = vector.load %arg3[%c0_33, %c0_34, %c0_35, %c0_36] : memref<1x8x8x128xf32, #tpu.memory_space<vmem>>, vector<1x8x8x128xf32>
    %53 = vector.shape_cast %52 : vector<1x8x8x128xf32> to vector<8x8x128xf32>
    %54 = vector.shape_cast %51 : vector<8x8x128xf32> to vector<1x8x8x128xf32>
    tpu.vector_store %arg3[%c0_33, %c0_34, %c0_35, %c0_36], %54 {strides = array<i32>} : memref<1x8x8x128xf32, #tpu.memory_space<vmem>>, vector<1x8x8x128xf32>,
    return
  }
  func.func @transform_0(%arg0: i32) -> (i32, i32, i32, i32) {
    %c0_i32 = arith.constant 0 : i32
    %c0_i32_0 = arith.constant 0 : i32
    %c0_i32_1 = arith.constant 0 : i32
    %c0_i32_2 = arith.constant 0 : i32
    return %arg0, %c0_i32, %c0_i32_0, %c0_i32_1 : i32, i32, i32, i32
  }
  func.func @transform_1(%arg0: i32) -> (i32, i32, i32) {
    %c0_i32 = arith.constant 0 : i32
    %c0_i32_0 = arith.constant 0 : i32
    %c0_i32_1 = arith.constant 0 : i32
    %c0_i32_2 = arith.constant 0 : i32
    return %c0_i32, %c0_i32_0, %c0_i32_1 : i32, i32, i32
  }
  func.func @transform_2(%arg0: i32) -> (i32, i32, i32, i32) {
    %c0_i32 = arith.constant 0 : i32
    %c0_i32_0 = arith.constant 0 : i32
    %c0_i32_1 = arith.constant 0 : i32
    %c0_i32_2 = arith.constant 0 : i32
    return %arg0, %c0_i32, %c0_i32_0, %c0_i32_1 : i32, i32, i32, i32
  }
}

module attributes {stable_mosaic.version = 11 : i64} {
  func.func @_conv4_conv5_kernel(%arg0: i32, %arg1: memref<1x5x5x512xf32, #tpu.memory_space<vmem>>, %arg2: memref<4x512x256xbf16, #tpu.memory_space<vmem>>, %arg3: memref<16x256xf32, #tpu.memory_space<vmem>>, %arg4: memref<1x1x1xf32, #tpu.memory_space<vmem>>) attributes {dimension_semantics = [#tpu.dimension_semantics<parallel>], iteration_bounds = array<i64: 2>, scalar_prefetch = 0 : i64, scratch_operands = 0 : i64, tpu.core_type = #tpu.core_type<tc>, window_params = [{transform_indices = @transform_0, window_bounds = array<i64: 1, 5, 5, 512>}, {pipeline_mode = #tpu.pipeline_mode<synchronous>, transform_indices = @transform_1, window_bounds = array<i64: 4, 512, 256>}, {pipeline_mode = #tpu.pipeline_mode<synchronous>, transform_indices = @transform_2, window_bounds = array<i64: 16, 256>}, {transform_indices = @transform_3, window_bounds = array<i64: 1, 1, 1>}]} {
    %c0 = arith.constant 0 : index
    %c0_0 = arith.constant 0 : index
    %c0_1 = arith.constant 0 : index
    %c0_2 = arith.constant 0 : index
    %0 = vector.load %arg1[%c0, %c0_0, %c0_1, %c0_2] : memref<1x5x5x512xf32, #tpu.memory_space<vmem>>, vector<1x1x4x512xf32>
    %1 = vector.shape_cast %0 : vector<1x1x4x512xf32> to vector<4x512xf32>
    %2 = arith.truncf %1 : vector<4x512xf32> to vector<4x512xbf16>
    %c0_3 = arith.constant 0 : index
    %c0_4 = arith.constant 0 : index
    %c0_5 = arith.constant 0 : index
    %3 = vector.load %arg2[%c0_3, %c0_4, %c0_5] : memref<4x512x256xbf16, #tpu.memory_space<vmem>>, vector<1x512x256xbf16>
    %4 = vector.shape_cast %3 : vector<1x512x256xbf16> to vector<512x256xbf16>
    %cst = arith.constant dense<0.000000e+00> : vector<4x256xf32>
    %5 = tpu.matmul %2, %4, %cst {dimension_numbers = #tpu.dot_dimension_numbers<[1], [0], [0], [1], [0, 0, 1, 1], [], []>} : vector<4x512xbf16>, vector<512x256xbf16>, vector<4x256xf32> -> vector<4x256xf32>
    %c0_6 = arith.constant 0 : index
    %c0_7 = arith.constant 0 : index
    %c1 = arith.constant 1 : index
    %c0_8 = arith.constant 0 : index
    %6 = vector.load %arg1[%c0_6, %c0_7, %c1, %c0_8] : memref<1x5x5x512xf32, #tpu.memory_space<vmem>>, vector<1x1x4x512xf32>
    %7 = vector.shape_cast %6 : vector<1x1x4x512xf32> to vector<4x512xf32>
    %8 = arith.truncf %7 : vector<4x512xf32> to vector<4x512xbf16>
    %c1_9 = arith.constant 1 : index
    %c0_10 = arith.constant 0 : index
    %c0_11 = arith.constant 0 : index
    %9 = vector.load %arg2[%c1_9, %c0_10, %c0_11] : memref<4x512x256xbf16, #tpu.memory_space<vmem>>, vector<1x512x256xbf16>
    %10 = vector.shape_cast %9 : vector<1x512x256xbf16> to vector<512x256xbf16>
    %cst_12 = arith.constant dense<0.000000e+00> : vector<4x256xf32>
    %11 = tpu.matmul %8, %10, %cst_12 {dimension_numbers = #tpu.dot_dimension_numbers<[1], [0], [0], [1], [0, 0, 1, 1], [], []>} : vector<4x512xbf16>, vector<512x256xbf16>, vector<4x256xf32> -> vector<4x256xf32>
    %12 = arith.addf %5, %11 : vector<4x256xf32>
    %c0_13 = arith.constant 0 : index
    %c1_14 = arith.constant 1 : index
    %c0_15 = arith.constant 0 : index
    %c0_16 = arith.constant 0 : index
    %13 = vector.load %arg1[%c0_13, %c1_14, %c0_15, %c0_16] : memref<1x5x5x512xf32, #tpu.memory_space<vmem>>, vector<1x1x4x512xf32>
    %14 = vector.shape_cast %13 : vector<1x1x4x512xf32> to vector<4x512xf32>
    %15 = arith.truncf %14 : vector<4x512xf32> to vector<4x512xbf16>
    %c2 = arith.constant 2 : index
    %c0_17 = arith.constant 0 : index
    %c0_18 = arith.constant 0 : index
    %16 = vector.load %arg2[%c2, %c0_17, %c0_18] : memref<4x512x256xbf16, #tpu.memory_space<vmem>>, vector<1x512x256xbf16>
    %17 = vector.shape_cast %16 : vector<1x512x256xbf16> to vector<512x256xbf16>
    %cst_19 = arith.constant dense<0.000000e+00> : vector<4x256xf32>
    %18 = tpu.matmul %15, %17, %cst_19 {dimension_numbers = #tpu.dot_dimension_numbers<[1], [0], [0], [1], [0, 0, 1, 1], [], []>} : vector<4x512xbf16>, vector<512x256xbf16>, vector<4x256xf32> -> vector<4x256xf32>
    %19 = arith.addf %12, %18 : vector<4x256xf32>
    %c0_20 = arith.constant 0 : index
    %c1_21 = arith.constant 1 : index
    %c1_22 = arith.constant 1 : index
    %c0_23 = arith.constant 0 : index
    %20 = vector.load %arg1[%c0_20, %c1_21, %c1_22, %c0_23] : memref<1x5x5x512xf32, #tpu.memory_space<vmem>>, vector<1x1x4x512xf32>
    %21 = vector.shape_cast %20 : vector<1x1x4x512xf32> to vector<4x512xf32>
    %22 = arith.truncf %21 : vector<4x512xf32> to vector<4x512xbf16>
    %c3 = arith.constant 3 : index
    %c0_24 = arith.constant 0 : index
    %c0_25 = arith.constant 0 : index
    %23 = vector.load %arg2[%c3, %c0_24, %c0_25] : memref<4x512x256xbf16, #tpu.memory_space<vmem>>, vector<1x512x256xbf16>
    %24 = vector.shape_cast %23 : vector<1x512x256xbf16> to vector<512x256xbf16>
    %cst_26 = arith.constant dense<0.000000e+00> : vector<4x256xf32>
    %25 = tpu.matmul %22, %24, %cst_26 {dimension_numbers = #tpu.dot_dimension_numbers<[1], [0], [0], [1], [0, 0, 1, 1], [], []>} : vector<4x512xbf16>, vector<512x256xbf16>, vector<4x256xf32> -> vector<4x256xf32>
    %26 = arith.addf %19, %25 : vector<4x256xf32>
    %c0_27 = arith.constant 0 : index
    %c1_28 = arith.constant 1 : index
    %c0_29 = arith.constant 0 : index
    %c0_30 = arith.constant 0 : index
    %27 = vector.load %arg1[%c0_27, %c1_28, %c0_29, %c0_30] : memref<1x5x5x512xf32, #tpu.memory_space<vmem>>, vector<1x1x4x512xf32>
    %28 = vector.shape_cast %27 : vector<1x1x4x512xf32> to vector<4x512xf32>
    %29 = arith.truncf %28 : vector<4x512xf32> to vector<4x512xbf16>
    %c0_31 = arith.constant 0 : index
    %c0_32 = arith.constant 0 : index
    %c0_33 = arith.constant 0 : index
    %30 = vector.load %arg2[%c0_31, %c0_32, %c0_33] : memref<4x512x256xbf16, #tpu.memory_space<vmem>>, vector<1x512x256xbf16>
    %31 = vector.shape_cast %30 : vector<1x512x256xbf16> to vector<512x256xbf16>
    %cst_34 = arith.constant dense<0.000000e+00> : vector<4x256xf32>
    %32 = tpu.matmul %29, %31, %cst_34 {dimension_numbers = #tpu.dot_dimension_numbers<[1], [0], [0], [1], [0, 0, 1, 1], [], []>} : vector<4x512xbf16>, vector<512x256xbf16>, vector<4x256xf32> -> vector<4x256xf32>
    %c0_35 = arith.constant 0 : index
    %c1_36 = arith.constant 1 : index
    %c1_37 = arith.constant 1 : index
    %c0_38 = arith.constant 0 : index
    %33 = vector.load %arg1[%c0_35, %c1_36, %c1_37, %c0_38] : memref<1x5x5x512xf32, #tpu.memory_space<vmem>>, vector<1x1x4x512xf32>
    %34 = vector.shape_cast %33 : vector<1x1x4x512xf32> to vector<4x512xf32>
    %35 = arith.truncf %34 : vector<4x512xf32> to vector<4x512xbf16>
    %c1_39 = arith.constant 1 : index
    %c0_40 = arith.constant 0 : index
    %c0_41 = arith.constant 0 : index
    %36 = vector.load %arg2[%c1_39, %c0_40, %c0_41] : memref<4x512x256xbf16, #tpu.memory_space<vmem>>, vector<1x512x256xbf16>
    %37 = vector.shape_cast %36 : vector<1x512x256xbf16> to vector<512x256xbf16>
    %cst_42 = arith.constant dense<0.000000e+00> : vector<4x256xf32>
    %38 = tpu.matmul %35, %37, %cst_42 {dimension_numbers = #tpu.dot_dimension_numbers<[1], [0], [0], [1], [0, 0, 1, 1], [], []>} : vector<4x512xbf16>, vector<512x256xbf16>, vector<4x256xf32> -> vector<4x256xf32>
    %39 = arith.addf %32, %38 : vector<4x256xf32>
    %c0_43 = arith.constant 0 : index
    %c2_44 = arith.constant 2 : index
    %c0_45 = arith.constant 0 : index
    %c0_46 = arith.constant 0 : index
    %40 = vector.load %arg1[%c0_43, %c2_44, %c0_45, %c0_46] : memref<1x5x5x512xf32, #tpu.memory_space<vmem>>, vector<1x1x4x512xf32>
    %41 = vector.shape_cast %40 : vector<1x1x4x512xf32> to vector<4x512xf32>
    %42 = arith.truncf %41 : vector<4x512xf32> to vector<4x512xbf16>
    %c2_47 = arith.constant 2 : index
    %c0_48 = arith.constant 0 : index
    %c0_49 = arith.constant 0 : index
    %43 = vector.load %arg2[%c2_47, %c0_48, %c0_49] : memref<4x512x256xbf16, #tpu.memory_space<vmem>>, vector<1x512x256xbf16>
    %44 = vector.shape_cast %43 : vector<1x512x256xbf16> to vector<512x256xbf16>
    %cst_50 = arith.constant dense<0.000000e+00> : vector<4x256xf32>
    %45 = tpu.matmul %42, %44, %cst_50 {dimension_numbers = #tpu.dot_dimension_numbers<[1], [0], [0], [1], [0, 0, 1, 1], [], []>} : vector<4x512xbf16>, vector<512x256xbf16>, vector<4x256xf32> -> vector<4x256xf32>
    %46 = arith.addf %39, %45 : vector<4x256xf32>
    %c0_51 = arith.constant 0 : index
    %c2_52 = arith.constant 2 : index
    %c1_53 = arith.constant 1 : index
    %c0_54 = arith.constant 0 : index
    %47 = vector.load %arg1[%c0_51, %c2_52, %c1_53, %c0_54] : memref<1x5x5x512xf32, #tpu.memory_space<vmem>>, vector<1x1x4x512xf32>
    %48 = vector.shape_cast %47 : vector<1x1x4x512xf32> to vector<4x512xf32>
    %49 = arith.truncf %48 : vector<4x512xf32> to vector<4x512xbf16>
    %c3_55 = arith.constant 3 : index
    %c0_56 = arith.constant 0 : index
    %c0_57 = arith.constant 0 : index
    %50 = vector.load %arg2[%c3_55, %c0_56, %c0_57] : memref<4x512x256xbf16, #tpu.memory_space<vmem>>, vector<1x512x256xbf16>
    %51 = vector.shape_cast %50 : vector<1x512x256xbf16> to vector<512x256xbf16>
    %cst_58 = arith.constant dense<0.000000e+00> : vector<4x256xf32>
    %52 = tpu.matmul %49, %51, %cst_58 {dimension_numbers = #tpu.dot_dimension_numbers<[1], [0], [0], [1], [0, 0, 1, 1], [], []>} : vector<4x512xbf16>, vector<512x256xbf16>, vector<4x256xf32> -> vector<4x256xf32>
    %53 = arith.addf %46, %52 : vector<4x256xf32>
    %c0_59 = arith.constant 0 : index
    %c2_60 = arith.constant 2 : index
    %c0_61 = arith.constant 0 : index
    %c0_62 = arith.constant 0 : index
    %54 = vector.load %arg1[%c0_59, %c2_60, %c0_61, %c0_62] : memref<1x5x5x512xf32, #tpu.memory_space<vmem>>, vector<1x1x4x512xf32>
    %55 = vector.shape_cast %54 : vector<1x1x4x512xf32> to vector<4x512xf32>
    %56 = arith.truncf %55 : vector<4x512xf32> to vector<4x512xbf16>
    %c0_63 = arith.constant 0 : index
    %c0_64 = arith.constant 0 : index
    %c0_65 = arith.constant 0 : index
    %57 = vector.load %arg2[%c0_63, %c0_64, %c0_65] : memref<4x512x256xbf16, #tpu.memory_space<vmem>>, vector<1x512x256xbf16>
    %58 = vector.shape_cast %57 : vector<1x512x256xbf16> to vector<512x256xbf16>
    %cst_66 = arith.constant dense<0.000000e+00> : vector<4x256xf32>
    %59 = tpu.matmul %56, %58, %cst_66 {dimension_numbers = #tpu.dot_dimension_numbers<[1], [0], [0], [1], [0, 0, 1, 1], [], []>} : vector<4x512xbf16>, vector<512x256xbf16>, vector<4x256xf32> -> vector<4x256xf32>
    %c0_67 = arith.constant 0 : index
    %c2_68 = arith.constant 2 : index
    %c1_69 = arith.constant 1 : index
    %c0_70 = arith.constant 0 : index
    %60 = vector.load %arg1[%c0_67, %c2_68, %c1_69, %c0_70] : memref<1x5x5x512xf32, #tpu.memory_space<vmem>>, vector<1x1x4x512xf32>
    %61 = vector.shape_cast %60 : vector<1x1x4x512xf32> to vector<4x512xf32>
    %62 = arith.truncf %61 : vector<4x512xf32> to vector<4x512xbf16>
    %c1_71 = arith.constant 1 : index
    %c0_72 = arith.constant 0 : index
    %c0_73 = arith.constant 0 : index
    %63 = vector.load %arg2[%c1_71, %c0_72, %c0_73] : memref<4x512x256xbf16, #tpu.memory_space<vmem>>, vector<1x512x256xbf16>
    %64 = vector.shape_cast %63 : vector<1x512x256xbf16> to vector<512x256xbf16>
    %cst_74 = arith.constant dense<0.000000e+00> : vector<4x256xf32>
    %65 = tpu.matmul %62, %64, %cst_74 {dimension_numbers = #tpu.dot_dimension_numbers<[1], [0], [0], [1], [0, 0, 1, 1], [], []>} : vector<4x512xbf16>, vector<512x256xbf16>, vector<4x256xf32> -> vector<4x256xf32>
    %66 = arith.addf %59, %65 : vector<4x256xf32>
    %c0_75 = arith.constant 0 : index
    %c3_76 = arith.constant 3 : index
    %c0_77 = arith.constant 0 : index
    %c0_78 = arith.constant 0 : index
    %67 = vector.load %arg1[%c0_75, %c3_76, %c0_77, %c0_78] : memref<1x5x5x512xf32, #tpu.memory_space<vmem>>, vector<1x1x4x512xf32>
    %68 = vector.shape_cast %67 : vector<1x1x4x512xf32> to vector<4x512xf32>
    %69 = arith.truncf %68 : vector<4x512xf32> to vector<4x512xbf16>
    %c2_79 = arith.constant 2 : index
    %c0_80 = arith.constant 0 : index
    %c0_81 = arith.constant 0 : index
    %70 = vector.load %arg2[%c2_79, %c0_80, %c0_81] : memref<4x512x256xbf16, #tpu.memory_space<vmem>>, vector<1x512x256xbf16>
    %71 = vector.shape_cast %70 : vector<1x512x256xbf16> to vector<512x256xbf16>
    %cst_82 = arith.constant dense<0.000000e+00> : vector<4x256xf32>
    %72 = tpu.matmul %69, %71, %cst_82 {dimension_numbers = #tpu.dot_dimension_numbers<[1], [0], [0], [1], [0, 0, 1, 1], [], []>} : vector<4x512xbf16>, vector<512x256xbf16>, vector<4x256xf32> -> vector<4x256xf32>
    %73 = arith.addf %66, %72 : vector<4x256xf32>
    %c0_83 = arith.constant 0 : index
    %c3_84 = arith.constant 3 : index
    %c1_85 = arith.constant 1 : index
    %c0_86 = arith.constant 0 : index
    %74 = vector.load %arg1[%c0_83, %c3_84, %c1_85, %c0_86] : memref<1x5x5x512xf32, #tpu.memory_space<vmem>>, vector<1x1x4x512xf32>
    %75 = vector.shape_cast %74 : vector<1x1x4x512xf32> to vector<4x512xf32>
    %76 = arith.truncf %75 : vector<4x512xf32> to vector<4x512xbf16>
    %c3_87 = arith.constant 3 : index
    %c0_88 = arith.constant 0 : index
    %c0_89 = arith.constant 0 : index
    %77 = vector.load %arg2[%c3_87, %c0_88, %c0_89] : memref<4x512x256xbf16, #tpu.memory_space<vmem>>, vector<1x512x256xbf16>
    %78 = vector.shape_cast %77 : vector<1x512x256xbf16> to vector<512x256xbf16>
    %cst_90 = arith.constant dense<0.000000e+00> : vector<4x256xf32>
    %79 = tpu.matmul %76, %78, %cst_90 {dimension_numbers = #tpu.dot_dimension_numbers<[1], [0], [0], [1], [0, 0, 1, 1], [], []>} : vector<4x512xbf16>, vector<512x256xbf16>, vector<4x256xf32> -> vector<4x256xf32>
    %80 = arith.addf %73, %79 : vector<4x256xf32>
    %c0_91 = arith.constant 0 : index
    %c3_92 = arith.constant 3 : index
    %c0_93 = arith.constant 0 : index
    %c0_94 = arith.constant 0 : index
    %81 = vector.load %arg1[%c0_91, %c3_92, %c0_93, %c0_94] : memref<1x5x5x512xf32, #tpu.memory_space<vmem>>, vector<1x1x4x512xf32>
    %82 = vector.shape_cast %81 : vector<1x1x4x512xf32> to vector<4x512xf32>
    %83 = arith.truncf %82 : vector<4x512xf32> to vector<4x512xbf16>
    %c0_95 = arith.constant 0 : index
    %c0_96 = arith.constant 0 : index
    %c0_97 = arith.constant 0 : index
    %84 = vector.load %arg2[%c0_95, %c0_96, %c0_97] : memref<4x512x256xbf16, #tpu.memory_space<vmem>>, vector<1x512x256xbf16>
    %85 = vector.shape_cast %84 : vector<1x512x256xbf16> to vector<512x256xbf16>
    %cst_98 = arith.constant dense<0.000000e+00> : vector<4x256xf32>
    %86 = tpu.matmul %83, %85, %cst_98 {dimension_numbers = #tpu.dot_dimension_numbers<[1], [0], [0], [1], [0, 0, 1, 1], [], []>} : vector<4x512xbf16>, vector<512x256xbf16>, vector<4x256xf32> -> vector<4x256xf32>
    %c0_99 = arith.constant 0 : index
    %c3_100 = arith.constant 3 : index
    %c1_101 = arith.constant 1 : index
    %c0_102 = arith.constant 0 : index
    %87 = vector.load %arg1[%c0_99, %c3_100, %c1_101, %c0_102] : memref<1x5x5x512xf32, #tpu.memory_space<vmem>>, vector<1x1x4x512xf32>
    %88 = vector.shape_cast %87 : vector<1x1x4x512xf32> to vector<4x512xf32>
    %89 = arith.truncf %88 : vector<4x512xf32> to vector<4x512xbf16>
    %c1_103 = arith.constant 1 : index
    %c0_104 = arith.constant 0 : index
    %c0_105 = arith.constant 0 : index
    %90 = vector.load %arg2[%c1_103, %c0_104, %c0_105] : memref<4x512x256xbf16, #tpu.memory_space<vmem>>, vector<1x512x256xbf16>
    %91 = vector.shape_cast %90 : vector<1x512x256xbf16> to vector<512x256xbf16>
    %cst_106 = arith.constant dense<0.000000e+00> : vector<4x256xf32>
    %92 = tpu.matmul %89, %91, %cst_106 {dimension_numbers = #tpu.dot_dimension_numbers<[1], [0], [0], [1], [0, 0, 1, 1], [], []>} : vector<4x512xbf16>, vector<512x256xbf16>, vector<4x256xf32> -> vector<4x256xf32>
    %93 = arith.addf %86, %92 : vector<4x256xf32>
    %c0_107 = arith.constant 0 : index
    %c4 = arith.constant 4 : index
    %c0_108 = arith.constant 0 : index
    %c0_109 = arith.constant 0 : index
    %94 = vector.load %arg1[%c0_107, %c4, %c0_108, %c0_109] : memref<1x5x5x512xf32, #tpu.memory_space<vmem>>, vector<1x1x4x512xf32>
    %95 = vector.shape_cast %94 : vector<1x1x4x512xf32> to vector<4x512xf32>
    %96 = arith.truncf %95 : vector<4x512xf32> to vector<4x512xbf16>
    %c2_110 = arith.constant 2 : index
    %c0_111 = arith.constant 0 : index
    %c0_112 = arith.constant 0 : index
    %97 = vector.load %arg2[%c2_110, %c0_111, %c0_112] : memref<4x512x256xbf16, #tpu.memory_space<vmem>>, vector<1x512x256xbf16>
    %98 = vector.shape_cast %97 : vector<1x512x256xbf16> to vector<512x256xbf16>
    %cst_113 = arith.constant dense<0.000000e+00> : vector<4x256xf32>
    %99 = tpu.matmul %96, %98, %cst_113 {dimension_numbers = #tpu.dot_dimension_numbers<[1], [0], [0], [1], [0, 0, 1, 1], [], []>} : vector<4x512xbf16>, vector<512x256xbf16>, vector<4x256xf32> -> vector<4x256xf32>
    %100 = arith.addf %93, %99 : vector<4x256xf32>
    %c0_114 = arith.constant 0 : index
    %c4_115 = arith.constant 4 : index
    %c1_116 = arith.constant 1 : index
    %c0_117 = arith.constant 0 : index
    %101 = vector.load %arg1[%c0_114, %c4_115, %c1_116, %c0_117] : memref<1x5x5x512xf32, #tpu.memory_space<vmem>>, vector<1x1x4x512xf32>
    %102 = vector.shape_cast %101 : vector<1x1x4x512xf32> to vector<4x512xf32>
    %103 = arith.truncf %102 : vector<4x512xf32> to vector<4x512xbf16>
    %c3_118 = arith.constant 3 : index
    %c0_119 = arith.constant 0 : index
    %c0_120 = arith.constant 0 : index
    %104 = vector.load %arg2[%c3_118, %c0_119, %c0_120] : memref<4x512x256xbf16, #tpu.memory_space<vmem>>, vector<1x512x256xbf16>
    %105 = vector.shape_cast %104 : vector<1x512x256xbf16> to vector<512x256xbf16>
    %cst_121 = arith.constant dense<0.000000e+00> : vector<4x256xf32>
    %106 = tpu.matmul %103, %105, %cst_121 {dimension_numbers = #tpu.dot_dimension_numbers<[1], [0], [0], [1], [0, 0, 1, 1], [], []>} : vector<4x512xbf16>, vector<512x256xbf16>, vector<4x256xf32> -> vector<4x256xf32>
    %107 = arith.addf %100, %106 : vector<4x256xf32>
    %cst_122 = arith.constant dense<0.000000e+00> : vector<256xf32>
    %108 = vector.multi_reduction <add>, %26, %cst_122 [0] : vector<4x256xf32> to vector<256xf32>
    %109 = vector.shape_cast %108 : vector<256xf32> to vector<1x256xf32>
    %110 = arith.mulf %26, %26 : vector<4x256xf32>
    %cst_123 = arith.constant dense<0.000000e+00> : vector<256xf32>
    %111 = vector.multi_reduction <add>, %110, %cst_123 [0] : vector<4x256xf32> to vector<256xf32>
    %112 = vector.shape_cast %111 : vector<256xf32> to vector<1x256xf32>
    %cst_124 = arith.constant dense<0.000000e+00> : vector<256xf32>
    %113 = vector.multi_reduction <add>, %53, %cst_124 [0] : vector<4x256xf32> to vector<256xf32>
    %114 = vector.shape_cast %113 : vector<256xf32> to vector<1x256xf32>
    %115 = arith.addf %109, %114 : vector<1x256xf32>
    %116 = arith.mulf %53, %53 : vector<4x256xf32>
    %cst_125 = arith.constant dense<0.000000e+00> : vector<256xf32>
    %117 = vector.multi_reduction <add>, %116, %cst_125 [0] : vector<4x256xf32> to vector<256xf32>
    %118 = vector.shape_cast %117 : vector<256xf32> to vector<1x256xf32>
    %119 = arith.addf %112, %118 : vector<1x256xf32>
    %cst_126 = arith.constant dense<0.000000e+00> : vector<256xf32>
    %120 = vector.multi_reduction <add>, %80, %cst_126 [0] : vector<4x256xf32> to vector<256xf32>
    %121 = vector.shape_cast %120 : vector<256xf32> to vector<1x256xf32>
    %122 = arith.addf %115, %121 : vector<1x256xf32>
    %123 = arith.mulf %80, %80 : vector<4x256xf32>
    %cst_127 = arith.constant dense<0.000000e+00> : vector<256xf32>
    %124 = vector.multi_reduction <add>, %123, %cst_127 [0] : vector<4x256xf32> to vector<256xf32>
    %125 = vector.shape_cast %124 : vector<256xf32> to vector<1x256xf32>
    %126 = arith.addf %119, %125 : vector<1x256xf32>
    %cst_128 = arith.constant dense<0.000000e+00> : vector<256xf32>
    %127 = vector.multi_reduction <add>, %107, %cst_128 [0] : vector<4x256xf32> to vector<256xf32>
    %128 = vector.shape_cast %127 : vector<256xf32> to vector<1x256xf32>
    %129 = arith.addf %122, %128 : vector<1x256xf32>
    %130 = arith.mulf %107, %107 : vector<4x256xf32>
    %cst_129 = arith.constant dense<0.000000e+00> : vector<256xf32>
    %131 = vector.multi_reduction <add>, %130, %cst_129 [0] : vector<4x256xf32> to vector<256xf32>
    %132 = vector.shape_cast %131 : vector<256xf32> to vector<1x256xf32>
    %133 = arith.addf %126, %132 : vector<1x256xf32>
    %cst_130 = arith.constant 6.250000e-02 : f32
    %134 = vector.broadcast %cst_130 : f32 to vector<1x256xf32>
    %135 = arith.mulf %129, %134 : vector<1x256xf32>
    %cst_131 = arith.constant 6.250000e-02 : f32
    %136 = vector.broadcast %cst_131 : f32 to vector<1x256xf32>
    %137 = arith.mulf %133, %136 : vector<1x256xf32>
    %138 = arith.mulf %135, %135 : vector<1x256xf32>
    %139 = arith.subf %137, %138 : vector<1x256xf32>
    %cst_132 = arith.constant 9.99999974E-6 : f32
    %140 = vector.broadcast %cst_132 : f32 to vector<1x256xf32>
    %141 = arith.addf %139, %140 : vector<1x256xf32>
    %142 = math.rsqrt %141 : vector<1x256xf32>
    %143 = vector.broadcast %135 : vector<1x256xf32> to vector<4x256xf32>
    %144 = arith.subf %26, %143 : vector<4x256xf32>
    %145 = vector.broadcast %142 : vector<1x256xf32> to vector<4x256xf32>
    %146 = arith.mulf %144, %145 : vector<4x256xf32>
    %cst_133 = arith.constant 0.000000e+00 : f32
    %147 = vector.broadcast %cst_133 : f32 to vector<4x256xf32>
    %148 = arith.maximumf %146, %147 : vector<4x256xf32>
    %c0_134 = arith.constant 0 : index
    %c0_135 = arith.constant 0 : index
    %149 = vector.load %arg3[%c0_134, %c0_135] : memref<16x256xf32, #tpu.memory_space<vmem>>, vector<4x256xf32>
    %150 = arith.mulf %148, %149 : vector<4x256xf32>
    %cst_136 = arith.constant dense<0.000000e+00> : vector<256xf32>
    %151 = vector.multi_reduction <add>, %150, %cst_136 [0] : vector<4x256xf32> to vector<256xf32>
    %152 = vector.shape_cast %151 : vector<256xf32> to vector<1x256xf32>
    %153 = vector.broadcast %135 : vector<1x256xf32> to vector<4x256xf32>
    %154 = arith.subf %53, %153 : vector<4x256xf32>
    %155 = vector.broadcast %142 : vector<1x256xf32> to vector<4x256xf32>
    %156 = arith.mulf %154, %155 : vector<4x256xf32>
    %cst_137 = arith.constant 0.000000e+00 : f32
    %157 = vector.broadcast %cst_137 : f32 to vector<4x256xf32>
    %158 = arith.maximumf %156, %157 : vector<4x256xf32>
    %c4_138 = arith.constant 4 : index
    %c0_139 = arith.constant 0 : index
    %159 = vector.load %arg3[%c4_138, %c0_139] : memref<16x256xf32, #tpu.memory_space<vmem>>, vector<4x256xf32>
    %160 = arith.mulf %158, %159 : vector<4x256xf32>
    %cst_140 = arith.constant dense<0.000000e+00> : vector<256xf32>
    %161 = vector.multi_reduction <add>, %160, %cst_140 [0] : vector<4x256xf32> to vector<256xf32>
    %162 = vector.shape_cast %161 : vector<256xf32> to vector<1x256xf32>
    %163 = arith.addf %152, %162 : vector<1x256xf32>
    %164 = vector.broadcast %135 : vector<1x256xf32> to vector<4x256xf32>
    %165 = arith.subf %80, %164 : vector<4x256xf32>
    %166 = vector.broadcast %142 : vector<1x256xf32> to vector<4x256xf32>
    %167 = arith.mulf %165, %166 : vector<4x256xf32>
    %cst_141 = arith.constant 0.000000e+00 : f32
    %168 = vector.broadcast %cst_141 : f32 to vector<4x256xf32>
    %169 = arith.maximumf %167, %168 : vector<4x256xf32>
    %c8 = arith.constant 8 : index
    %c0_142 = arith.constant 0 : index
    %170 = vector.load %arg3[%c8, %c0_142] : memref<16x256xf32, #tpu.memory_space<vmem>>, vector<4x256xf32>
    %171 = arith.mulf %169, %170 : vector<4x256xf32>
    %cst_143 = arith.constant dense<0.000000e+00> : vector<256xf32>
    %172 = vector.multi_reduction <add>, %171, %cst_143 [0] : vector<4x256xf32> to vector<256xf32>
    %173 = vector.shape_cast %172 : vector<256xf32> to vector<1x256xf32>
    %174 = arith.addf %163, %173 : vector<1x256xf32>
    %175 = vector.broadcast %135 : vector<1x256xf32> to vector<4x256xf32>
    %176 = arith.subf %107, %175 : vector<4x256xf32>
    %177 = vector.broadcast %142 : vector<1x256xf32> to vector<4x256xf32>
    %178 = arith.mulf %176, %177 : vector<4x256xf32>
    %cst_144 = arith.constant 0.000000e+00 : f32
    %179 = vector.broadcast %cst_144 : f32 to vector<4x256xf32>
    %180 = arith.maximumf %178, %179 : vector<4x256xf32>
    %c12 = arith.constant 12 : index
    %c0_145 = arith.constant 0 : index
    %181 = vector.load %arg3[%c12, %c0_145] : memref<16x256xf32, #tpu.memory_space<vmem>>, vector<4x256xf32>
    %182 = arith.mulf %180, %181 : vector<4x256xf32>
    %cst_146 = arith.constant dense<0.000000e+00> : vector<256xf32>
    %183 = vector.multi_reduction <add>, %182, %cst_146 [0] : vector<4x256xf32> to vector<256xf32>
    %184 = vector.shape_cast %183 : vector<256xf32> to vector<1x256xf32>
    %185 = arith.addf %174, %184 : vector<1x256xf32>
    %cst_147 = arith.constant dense<0.000000e+00> : vector<1xf32>
    %186 = vector.multi_reduction <add>, %185, %cst_147 [1] : vector<1x256xf32> to vector<1xf32>
    %187 = vector.shape_cast %186 : vector<1xf32> to vector<1x1xf32>
    %c0_148 = arith.constant 0 : index
    %c0_149 = arith.constant 0 : index
    %c0_150 = arith.constant 0 : index
    %188 = vector.load %arg4[%c0_148, %c0_149, %c0_150] : memref<1x1x1xf32, #tpu.memory_space<vmem>>, vector<1x1x1xf32>
    %189 = vector.shape_cast %188 : vector<1x1x1xf32> to vector<1x1xf32>
    %190 = vector.shape_cast %187 : vector<1x1xf32> to vector<1x1x1xf32>
    tpu.vector_store %arg4[%c0_148, %c0_149, %c0_150], %190 {strides = array<i32>} : memref<1x1x1xf32, #tpu.memory_space<vmem>>, vector<1x1x1xf32>,
    return
  }
  func.func @transform_0(%arg0: i32) -> (i32, i32, i32, i32) {
    %c0_i32 = arith.constant 0 : i32
    %c0_i32_0 = arith.constant 0 : i32
    %c0_i32_1 = arith.constant 0 : i32
    %c0_i32_2 = arith.constant 0 : i32
    return %arg0, %c0_i32, %c0_i32_0, %c0_i32_1 : i32, i32, i32, i32
  }
  func.func @transform_1(%arg0: i32) -> (i32, i32, i32) {
    %c0_i32 = arith.constant 0 : i32
    %c0_i32_0 = arith.constant 0 : i32
    %c0_i32_1 = arith.constant 0 : i32
    %c0_i32_2 = arith.constant 0 : i32
    return %c0_i32, %c0_i32_0, %c0_i32_1 : i32, i32, i32
  }
  func.func @transform_2(%arg0: i32) -> (i32, i32) {
    %c0_i32 = arith.constant 0 : i32
    %c0_i32_0 = arith.constant 0 : i32
    %c0_i32_1 = arith.constant 0 : i32
    return %c0_i32, %c0_i32_0 : i32, i32
  }
  func.func @transform_3(%arg0: i32) -> (i32, i32, i32) {
    %c0_i32 = arith.constant 0 : i32
    %c0_i32_0 = arith.constant 0 : i32
    %c0_i32_1 = arith.constant 0 : i32
    return %arg0, %c0_i32, %c0_i32_0 : i32, i32, i32
  }
}

</mosaic_0001>

<bundles_post_ra>
// kernel: dc_discriminator_forward.4
= control target key start
LH: loop header
LB: loop body
LE: loop exit
PB: predicated region body
PF: predicated region fallthrough
CT: control target
= control target key end

     0   :  { %s7126_s9 = smov 0   ;;  %s10366_s0 = inlined_call_operand.vmem [shape: f32[2,33,33,12], index: 0, kind: input, shape index: {}]   ;;  %s10367_s1 = inlined_call_operand.vmem [shape: bf16[4,12,32], index: 1, kind: input, shape index: {}]   ;;  %s10368_s2 = inlined_call_operand.vmem [shape: f32[2,32,32,32], index: 2, kind: output, shape index: {}]  }
   0x1 LB: > { %s5387_s10 = sadd.s32 4294967295, %s7109_s9   ;;  %p5391_p0 = scmp.ge.s32.totalorder %s7109_s9, 1  ;;  %s7109_s9 = sphi %s7126_s9, %s12_s9  }
   0x2   : > { %p112_p1 = scmp.lt.s32.totalorder %s7109_s9, 3 }
   0x4   : > { %p113_p2 = pnand %p5391_p0, %p112_p1 }
   0x6   : > { %116 = sbr.rel (%p113_p2) target bundleno = 959 (0x3bf), region = 28 }
   0xd   : > { %v7097_v0 = vld [vmem:[%s10367_s1 + $0x8] sm:$0x3f]   ;;  %vm732_vm0 = vcmask 1045504   ;;  %p134_p3 = scmp.lt.s32.totalorder %s5387_s10, 1  ;;  %v7098_v1 = vld [vmem:[%s10367_s1 + $0x10] sm:$0x3f]  }
   0xe   : > { %7084 = vmatprep.subr.msk.bf16.mxu1 %vm732_vm0, %v7097_v0  ;;  %v734_v2 = vsel %vm732_vm0, %v7097_v0, 0  ;;  %v7099_v3 = vld [vmem:[%s10367_s1] sm:$0x3f]   ;;  %7086 = vmatprep.subr.msk.bf16.mxu0 %vm732_vm0, %v7098_v1  ;;  %v2420_v4 = vsel %vm732_vm0, %v7098_v1, 0  ;;  %v7100_v5 = vld [vmem:[%s10367_s1 + $0x18] sm:$0x3f]  }
   0xf   : > { %6181 = vmatpush3.bf16.msra.mxu1 %v734_v2  ;;  %s11090_s10 = smov (!%p134_p3, %s5387_s10), 1  ;;  %6441 = vmatpush3.bf16.msra.mxu0 %v2420_v4  ;;  %vm539_vm1 = vcmask 97280   ;;  %v1479_v15 = vsel %vm732_vm0, %v7099_v3, 0  ;;  %v3488_v20 = vsel %vm732_vm0, %v7100_v5, 0  ;;  %vm4163_vm2 = vcmask 261120  }
  0x10   : > { %s7088_s17 = smul.u32 1320, %s11090_s10  ;;  %7085 = vmatprep.subr.msk.bf16.mxu1 %vm732_vm0, %v7099_v3  ;;  %7087 = vmatprep.subr.msk.bf16.mxu0 %vm732_vm0, %v7100_v5  ;;  %s5919_s23 = sshll.u32 %s11090_s10, 10 }
  0x11   : > { %s9953_s26 = scalar_lea.vmem %s10368_s2, %s5919_s23 }
  0x12   : > { %s7157_s22 = scalar_lea.vmem %s10366_s0, %s7088_s17 }
  0x13   : > { %v339_v6 = vld [vmem:[%s7157_s22 + $0x1] sm:$0xff]  ;;  %v340_v7 = vld [vmem:[%s7157_s22 + $0x9] sm:$0xff]  ;;  %v341_v11 = vld [vmem:[%s7157_s22 + $0x11] sm:$0xff] }
  0x14   : > { %v5527_v8 = vld [vmem:[%s7157_s22 + $0x28] sm:$0xff]  ;;  %v467_v9 = vpack.c.bf16 %v340_v7, %v339_v6  ;;  %v5528_v10 = vld [vmem:[%s7157_s22 + $0x30] sm:$0xff]  ;;  %v342_v12 = vld [vmem:[%s7157_s22 + $0x19] sm:$0xff] }
  0x15   : > { %v2155_v13 = vpack.c.bf16 %v5528_v10, %v5527_v8  ;;  %v468_v14 = vpack.c.bf16 %v342_v12, %v341_v11  ;;  %v5529_v16 = vld [vmem:[%s7157_s22 + $0x38] sm:$0xff]  ;;  %v5530_v17 = vld [vmem:[%s7157_s22 + $0x40] sm:$0xff]  ;;  %v343_v18 = vld [vmem:[%s7157_s22 + $0x29] sm:$0xff] }
  0x16   : > { %6182 = vmatprep.mubr.msk.bf16.mxu1 %vm539_vm1, %v467_v9  ;;  %v2156_v19 = vpack.c.bf16 %v5530_v17, %v5529_v16  ;;  %v344_v21 = vld [vmem:[%s7157_s22 + $0x31] sm:$0xff]  ;;  %v345_v26 = vld [vmem:[%s7157_s22 + $0x39] sm:$0xff]  ;;  %v346_v27 = vld [vmem:[%s7157_s22 + $0x41] sm:$0xff] }
  0x17   : > { %v5531_v22 = vld [vmem:[%s7157_s22 + $0x50] sm:$0xff]  ;;  %v5532_v23 = vld [vmem:[%s7157_s22 + $0x58] sm:$0xff]  ;;  %6442 = vmatprep.mubr.msk.bf16.mxu0 %vm539_vm1, %v2155_v13  ;;  %6183 = vmatmul.mubr.msk.bf16.vlgmr.msra.gmra.mrb[0].mxu1 %vm539_vm1, %v468_v14  ;;  %v7177_v24 = vpack.c.bf16 %v344_v21, %v343_v18  ;;  %v5533_v28 = vld [vmem:[%s7157_s22 + $0x60] sm:$0xff]  ;;  %v7191_v34 = vpack.c.bf16 %v346_v27, %v345_v26 }
  0x18   : > { %v2157_v25 = vpack.c.bf16 %v5532_v23, %v5531_v22  ;;  %6311 = vmatpush3.bf16.msra.mxu1 %v1479_v15  ;;  %6443 = vmatmul.mubr.msk.bf16.vlgmr.msra.gmra.mrb[0].mxu0 %vm539_vm1, %v2156_v19  ;;  %v5534_v29 = vld [vmem:[%s7157_s22 + $0x68] sm:$0xff]  ;;  %v347_v30 = vld [vmem:[%s7157_s22 + $0x51] sm:$0xff]  ;;  %v348_v31 = vld [vmem:[%s7157_s22 + $0x59] sm:$0xff] }
  0x19   : > { %6571 = vmatpush3.bf16.msra.mxu0 %v3488_v20  ;;  %6186 = vmatprep.mubr.msk.bf16.mxu1 %vm539_vm1, %v7177_v24  ;;  %v5535_v32 = vld [vmem:[%s7157_s22 + $0x78] sm:$0xff]  ;;  %v5536_v33 = vld [vmem:[%s7157_s22 + $0x80] sm:$0xff]  ;;  %v2158_v35 = vpack.c.bf16 %v5534_v29, %v5533_v28  ;;  %v7193_v36 = vpack.c.bf16 %v348_v31, %v347_v30  ;;  %v350_v39 = vld [vmem:[%s7157_s22 + $0x69] sm:$0xff] }
  0x1a   : > { %6446 = vmatprep.mubr.msk.bf16.mxu0 %vm539_vm1, %v2157_v25  ;;  %v2159_v37 = vpack.c.bf16 %v5536_v33, %v5535_v32  ;;  %v349_v38 = vld [vmem:[%s7157_s22 + $0x61] sm:$0xff]  ;;  %v5538_v41 = vld [vmem:[%s7157_s22 + $0x90] sm:$0xff]  ;;  %v351_v42 = vld [vmem:[%s7157_s22 + $0x79] sm:$0xff] }
  0x1b   : > { %v5537_v40 = vld [vmem:[%s7157_s22 + $0x88] sm:$0xff]  ;;  %v5539_v44 = vld [vmem:[%s7157_s22 + $0xa0] sm:$0xff]  ;;  %v7209_v46 = vpack.c.bf16 %v350_v39, %v349_v38  ;;  %v354_v51 = vld [vmem:[%s7157_s22 + $0x91] sm:$0xff] }
  0x1c   : > { %v352_v43 = vld [vmem:[%s7157_s22 + $0x81] sm:$0xff]  ;;  %v2160_v47 = vpack.c.bf16 %v5538_v41, %v5537_v40  ;;  %v353_v50 = vld [vmem:[%s7157_s22 + $0x89] sm:$0xff]  ;;  %v5542_v53 = vld [vmem:[%s7157_s22 + $0xb8] sm:$0xff] }
  0x1d   : > { %v5540_v45 = vld [vmem:[%s7157_s22 + $0xa8] sm:$0xff]  ;;  %v7211_v48 = vpack.c.bf16 %v352_v43, %v351_v42  ;;  %v5541_v52 = vld [vmem:[%s7157_s22 + $0xb0] sm:$0xff]  ;;  %v7227_v58 = vpack.c.bf16 %v354_v51, %v353_v50  ;;  %v358_v63 = vld [vmem:[%s7157_s22 + $0xb9] sm:$0xff] }
  0x1e   : > { %v2161_v49 = vpack.c.bf16 %v5540_v45, %v5539_v44  ;;  %v355_v54 = vld [vmem:[%s7157_s22 + $0xa1] sm:$0xff]  ;;  %v356_v55 = vld [vmem:[%s7157_s22 + $0xa9] sm:$0xff]  ;;  %v2162_v59 = vpack.c.bf16 %v5542_v53, %v5541_v52  ;;  %v357_v62 = vld [vmem:[%s7157_s22 + $0xb1] sm:$0xff] }
  0x1f   : > { %6187 = vmatmul.mubr.msk.bf16.gmra.mrb[4].mxu1 %vm539_vm1, %v7191_v34  ;;  %v5543_v56 = vld [vmem:[%s7157_s22 + $0xc8] sm:$0xff]  ;;  %v5544_v57 = vld [vmem:[%s7157_s22 + $0xd0] sm:$0xff]  ;;  %v7229_v60 = vpack.c.bf16 %v356_v55, %v355_v54  ;;  %v5545_v0 = vld [vmem:[%s7157_s22 + $0xd8] sm:$0xff]  ;;  %v7245_v6 = vpack.c.bf16 %v358_v63, %v357_v62 }
  0x20   : > { %6447 = vmatmul.mubr.msk.bf16.gmra.mrb[4].mxu0 %vm539_vm1, %v2158_v35  ;;  %6190 = vmatprep.mubr.msk.bf16.mxu1 %vm539_vm1, %v7193_v36  ;;  %v2163_v61 = vpack.c.bf16 %v5544_v57, %v5543_v56  ;;  %v5546_v1 = vld [vmem:[%s7157_s22 + $0xe0] sm:$0xff]  ;;  %v359_v2 = vld [vmem:[%s7157_s22 + $0xc9] sm:$0xff]  ;;  %v360_v3 = vld [vmem:[%s7157_s22 + $0xd1] sm:$0xff] }
  0x21   : > { %6450 = vmatprep.mubr.msk.bf16.mxu0 %vm539_vm1, %v2159_v37  ;;  %v5547_v4 = vld [vmem:[%s7157_s22 + $0xf0] sm:$0xff]  ;;  %v5548_v5 = vld [vmem:[%s7157_s22 + $0xf8] sm:$0xff]  ;;  %v2164_v7 = vpack.c.bf16 %v5546_v1, %v5545_v0  ;;  %v7247_v8 = vpack.c.bf16 %v360_v3, %v359_v2  ;;  %v362_v11 = vld [vmem:[%s7157_s22 + $0xe1] sm:$0xff] }
  0x22   : > { %v2165_v9 = vpack.c.bf16 %v5548_v5, %v5547_v4  ;;  %v361_v10 = vld [vmem:[%s7157_s22 + $0xd9] sm:$0xff]  ;;  %v5550_v13 = vld [vmem:[%s7157_s22 + $0x108] sm:$0xff]  ;;  %v363_v14 = vld [vmem:[%s7157_s22 + $0xf1] sm:$0xff] }
  0x23   : > { %v5549_v12 = vld [vmem:[%s7157_s22 + $0x100] sm:$0xff]  ;;  %v5551_v16 = vld [vmem:[%s7157_s22 + $0x118] sm:$0xff]  ;;  %v7263_v18 = vpack.c.bf16 %v362_v11, %v361_v10  ;;  %v366_v23 = vld [vmem:[%s7157_s22 + $0x109] sm:$0xff] }
  0x24   : > { %v364_v15 = vld [vmem:[%s7157_s22 + $0xf9] sm:$0xff]  ;;  %v2166_v19 = vpack.c.bf16 %v5550_v13, %v5549_v12  ;;  %v365_v22 = vld [vmem:[%s7157_s22 + $0x101] sm:$0xff]  ;;  %v5554_v26 = vld [vmem:[%s7157_s22 + $0x130] sm:$0xff] }
  0x25   : > { %v5552_v17 = vld [vmem:[%s7157_s22 + $0x120] sm:$0xff]  ;;  %v7265_v20 = vpack.c.bf16 %v364_v15, %v363_v14  ;;  %v5553_v25 = vld [vmem:[%s7157_s22 + $0x128] sm:$0xff]  ;;  %v7281_v31 = vpack.c.bf16 %v366_v23, %v365_v22  ;;  %v370_v38 = vld [vmem:[%s7157_s22 + $0x131] sm:$0xff] }
  0x26   : > { %v2167_v21 = vpack.c.bf16 %v5552_v17, %v5551_v16  ;;  %v367_v27 = vld [vmem:[%s7157_s22 + $0x119] sm:$0xff]  ;;  %v368_v28 = vld [vmem:[%s7157_s22 + $0x121] sm:$0xff]  ;;  %v2168_v32 = vpack.c.bf16 %v5554_v26, %v5553_v25  ;;  %v369_v37 = vld [vmem:[%s7157_s22 + $0x129] sm:$0xff] }
  0x27   : > { %6191 = vmatmul.mubr.msk.bf16.gmra.mrb[8].mxu1 %vm539_vm1, %v7209_v46  ;;  %v5555_v29 = vld [vmem:[%s7157_s22 + $0x140] sm:$0xff]  ;;  %v5556_v30 = vld [vmem:[%s7157_s22 + $0x148] sm:$0xff]  ;;  %v7283_v33 = vpack.c.bf16 %v368_v28, %v367_v27  ;;  %v5557_v39 = vld [vmem:[%s7157_s22 + $0x150] sm:$0xff]  ;;  %v7299_v45 = vpack.c.bf16 %v370_v38, %v369_v37 }
  0x28   : > { %6451 = vmatmul.mubr.msk.bf16.gmra.mrb[8].mxu0 %vm539_vm1, %v2160_v47  ;;  %6194 = vmatprep.mubr.msk.bf16.mxu1 %vm539_vm1, %v7211_v48  ;;  %v2169_v35 = vpack.c.bf16 %v5556_v30, %v5555_v29  ;;  %v5558_v40 = vld [vmem:[%s7157_s22 + $0x158] sm:$0xff]  ;;  %v371_v41 = vld [vmem:[%s7157_s22 + $0x141] sm:$0xff]  ;;  %v372_v42 = vld [vmem:[%s7157_s22 + $0x149] sm:$0xff] }
  0x29   : > { %6454 = vmatprep.mubr.msk.bf16.mxu0 %vm539_vm1, %v2161_v49  ;;  %v5559_v43 = vld [vmem:[%s7157_s22 + $0x168] sm:$0xff]  ;;  %v5560_v44 = vld [vmem:[%s7157_s22 + $0x170] sm:$0xff]  ;;  %v2170_v47 = vpack.c.bf16 %v5558_v40, %v5557_v39  ;;  %v7301_v49 = vpack.c.bf16 %v372_v42, %v371_v41  ;;  %v374_v52 = vld [vmem:[%s7157_s22 + $0x159] sm:$0xff] }
  0x2a   : > { %v2171_v50 = vpack.c.bf16 %v5560_v44, %v5559_v43  ;;  %v373_v51 = vld [vmem:[%s7157_s22 + $0x151] sm:$0xff]  ;;  %v5562_v54 = vld [vmem:[%s7157_s22 + $0x180] sm:$0xff]  ;;  %v375_v55 = vld [vmem:[%s7157_s22 + $0x169] sm:$0xff] }
  0x2b   : > { %v5561_v53 = vld [vmem:[%s7157_s22 + $0x178] sm:$0xff]  ;;  %v5563_v57 = vld [vmem:[%s7157_s22 + $0x190] sm:$0xff]  ;;  %v378_v2 = vld [vmem:[%s7157_s22 + $0x181] sm:$0xff] }
  0x2c   : > { %v376_v56 = vld [vmem:[%s7157_s22 + $0x171] sm:$0xff]  ;;  %v2172_v62 = vpack.c.bf16 %v5562_v54, %v5561_v53  ;;  %v377_v1 = vld [vmem:[%s7157_s22 + $0x179] sm:$0xff]  ;;  %v5566_v4 = vld [vmem:[%s7157_s22 + $0x1a8] sm:$0xff] }
  0x2d   : > { %v7319_v63 = vpack.c.bf16 %v376_v56, %v375_v55  ;;  %v5565_v3 = vld [vmem:[%s7157_s22 + $0x1a0] sm:$0xff]  ;;  %v379_v5 = vld [vmem:[%s7157_s22 + $0x191] sm:$0xff]  ;;  %v7335_v11 = vpack.c.bf16 %v378_v2, %v377_v1  ;;  %v382_v16 = vld [vmem:[%s7157_s22 + $0x1a9] sm:$0xff] }
  0x2e   : > { %v5568_v10 = vld [vmem:[%s7157_s22 + $0x1c0] sm:$0xff]  ;;  %v2174_v12 = vpack.c.bf16 %v5566_v4, %v5565_v3  ;;  %v5569_v17 = vld [vmem:[%s7157_s22 + $0x1c8] sm:$0xff]  ;;  %v5574_v37 = vld [vmem:[%s7157_s22 + $0x1f8] sm:$0xff] }
  0x2f   : > { %6195 = vmatmul.mubr.msk.bf16.gmra.mrb[12].mxu1 %vm539_vm1, %v7227_v58  ;;  %v381_v15 = vld [vmem:[%s7157_s22 + $0x1a1] sm:$0xff]  ;;  %v385_v30 = vld [vmem:[%s7157_s22 + $0x1c9] sm:$0xff]  ;;  %v392_v55 = vld [vmem:[%s7157_s22 + $0x211] sm:$0xff] }
  0x30   : > { %6455 = vmatmul.mubr.msk.bf16.gmra.mrb[12].mxu0 %vm539_vm1, %v2162_v59  ;;  %6198 = vmatprep.mubr.msk.bf16.mxu1 %vm539_vm1, %v7229_v60  ;;  %v5564_v59 = vld [vmem:[%s7157_s22 + $0x198] sm:$0xff]  ;;  %v384_v22 = vld [vmem:[%s7157_s22 + $0x1c1] sm:$0xff]  ;;  %v7353_v26 = vpack.c.bf16 %v382_v16, %v381_v15  ;;  %v388_v39 = vld [vmem:[%s7157_s22 + $0x1e9] sm:$0xff] }
  0x31   : > { %6458 = vmatprep.mubr.msk.bf16.mxu0 %vm539_vm1, %v2163_v61  ;;  %v7317_v61 = vpack.c.bf16 %v374_v52, %v373_v51  ;;  %v2173_v0 = vpack.c.bf16 %v5564_v59, %v5563_v57  ;;  %v5571_v23 = vld [vmem:[%s7157_s22 + $0x1e0] sm:$0xff]  ;;  %v5572_v25 = vld [vmem:[%s7157_s22 + $0x1e8] sm:$0xff]  ;;  %v5576_v41 = vld [vmem:[%s7157_s22 + $0x210] sm:$0xff] }
  0x32   : > { %v2177_v29 = vpack.c.bf16 %v5572_v25, %v5571_v23  ;;  %v387_v38 = vld [vmem:[%s7157_s22 + $0x1e1] sm:$0xff]  ;;  %v390_v51 = vld [vmem:[%s7157_s22 + $0x1f9] sm:$0xff]  ;;  %v391_v54 = vld [vmem:[%s7157_s22 + $0x209] sm:$0xff] }
  0x33   : > { %v5575_v40 = vld [vmem:[%s7157_s22 + $0x208] sm:$0xff]  ;;  %v7373_v44 = vpack.c.bf16 %v388_v39, %v387_v38  ;;  %v5577_v52 = vld [vmem:[%s7157_s22 + $0x218] sm:$0xff]  ;;  %v5578_v53 = vld [vmem:[%s7157_s22 + $0x220] sm:$0xff] }
  0x34   : > { %v5579_v56 = vld [vmem:[%s7157_s22 + $0x230] sm:$0xff]  ;;  %v5580_v57 = vld [vmem:[%s7157_s22 + $0x238] sm:$0xff]  ;;  %v394_v3 = vld [vmem:[%s7157_s22 + $0x221] sm:$0xff] }
  0x35   : > { %v2181_v1 = vpack.c.bf16 %v5580_v57, %v5579_v56  ;;  %v393_v2 = vld [vmem:[%s7157_s22 + $0x219] sm:$0xff]  ;;  %v5586_v23 = vld [vmem:[%s7157_s22 + $0x270] sm:$0xff] }
  0x36   : > { %v5581_v4 = vld [vmem:[%s7157_s22 + $0x240] sm:$0xff]  ;;  %v401_v39 = vld [vmem:[%s7157_s22 + $0x269] sm:$0xff]  ;;  %v405_v57 = vld [vmem:[%s7157_s22 + $0x291] sm:$0xff] }
  0x37   : > { %6199 = vmatmul.mubr.msk.bf16.gmra.mrb[16].mxu1 %vm539_vm1, %v7245_v6  ;;  %v399_v25 = vld [vmem:[%s7157_s22 + $0x259] sm:$0xff] }
  0x38   : > { %6459 = vmatmul.mubr.msk.bf16.gmra.mrb[16].mxu0 %vm539_vm1, %v2164_v7  ;;  %6202 = vmatprep.mubr.msk.bf16.mxu1 %vm539_vm1, %v7247_v8  ;;  %v380_v7 = vld [vmem:[%s7157_s22 + $0x199] sm:$0xff] }
  0x39   : > { %6462 = vmatprep.mubr.msk.bf16.mxu0 %vm539_vm1, %v2165_v9  ;;  %v5567_v9 = vld [vmem:[%s7157_s22 + $0x1b8] sm:$0xff]  ;;  %v7337_v13 = vpack.c.bf16 %v380_v7, %v379_v5  ;;  %v5582_v5 = vld [vmem:[%s7157_s22 + $0x248] sm:$0xff] }
  0x3a   : > { %v2175_v14 = vpack.c.bf16 %v5568_v10, %v5567_v9  ;;  %v395_v7 = vld [vmem:[%s7157_s22 + $0x231] sm:$0xff]  ;;  %v396_v9 = vld [vmem:[%s7157_s22 + $0x239] sm:$0xff]  ;;  %v2182_v15 = vpack.c.bf16 %v5582_v5, %v5581_v4 }
  0x3b   : > { %v5583_v10 = vld [vmem:[%s7157_s22 + $0x258] sm:$0xff]  ;;  %v7409_v16 = vpack.c.bf16 %v396_v9, %v395_v7  ;;  %v5595_v5 = vld [vmem:[%s7157_s22 + $0x2d0] sm:$0xff] }
  0x3c   : > { %v408_v4 = vld [vmem:[%s7157_s22 + $0x2b1] sm:$0xff] }
  0x3d   : > { %v5596_v7 = vld [vmem:[%s7157_s22 + $0x2d8] sm:$0xff] }
  0x3f   : > { %6203 = vmatmul.mubr.msk.bf16.gmra.mrb[20].mxu1 %vm539_vm1, %v7263_v18 }
  0x40   : > { %6463 = vmatmul.mubr.msk.bf16.gmra.mrb[20].mxu0 %vm539_vm1, %v2166_v19  ;;  %6206 = vmatprep.mubr.msk.bf16.mxu1 %vm539_vm1, %v7265_v20  ;;  %v5570_v19 = vld [vmem:[%s7157_s22 + $0x1d0] sm:$0xff] }
  0x41   : > { %6466 = vmatprep.mubr.msk.bf16.mxu0 %vm539_vm1, %v2167_v21  ;;  %v383_v21 = vld [vmem:[%s7157_s22 + $0x1b9] sm:$0xff]  ;;  %v2176_v27 = vpack.c.bf16 %v5570_v19, %v5569_v17  ;;  %v397_v19 = vld [vmem:[%s7157_s22 + $0x241] sm:$0xff] }
  0x42   : > { %v7355_v28 = vpack.c.bf16 %v384_v22, %v383_v21  ;;  %v398_v21 = vld [vmem:[%s7157_s22 + $0x249] sm:$0xff] }
  0x43   : > { %v5585_v22 = vld [vmem:[%s7157_s22 + $0x268] sm:$0xff] }
  0x47   : > { %6207 = vmatmul.mubr.msk.bf16.gmra.mrb[24].mxu1 %vm539_vm1, %v7281_v31 }
  0x48   : > { %6467 = vmatmul.mubr.msk.bf16.gmra.mrb[24].mxu0 %vm539_vm1, %v2168_v32  ;;  %6210 = vmatprep.mubr.msk.bf16.mxu1 %vm539_vm1, %v7283_v33  ;;  %v386_v32 = vld [vmem:[%s7157_s22 + $0x1d1] sm:$0xff] }
  0x49   : > { %6470 = vmatprep.mubr.msk.bf16.mxu0 %vm539_vm1, %v2169_v35  ;;  %v5573_v35 = vld [vmem:[%s7157_s22 + $0x1f0] sm:$0xff]  ;;  %v7371_v42 = vpack.c.bf16 %v386_v32, %v385_v30  ;;  %v5588_v30 = vld [vmem:[%s7157_s22 + $0x288] sm:$0xff]  ;;  %v7425_v32 = vpack.c.bf16 %v398_v21, %v397_v19  ;;  %v5597_v21 = vld [vmem:[%s7157_s22 + $0x2e0] sm:$0xff] }
  0x4a   : > { %v2178_v43 = vpack.c.bf16 %v5574_v37, %v5573_v35  ;;  %v2184_v35 = vpack.c.bf16 %v5586_v23, %v5585_v22  ;;  %v410_v19 = vld [vmem:[%s7157_s22 + $0x2c1] sm:$0xff]  ;;  %v411_v23 = vld [vmem:[%s7157_s22 + $0x2d1] sm:$0xff] }
  0x4b   : > { %v5598_v22 = vld [vmem:[%s7157_s22 + $0x2e8] sm:$0xff] }
  0x4f   : > { %6211 = vmatmul.mubr.msk.bf16.gmra.mrb[28].mxu1 %vm539_vm1, %v7299_v45 }
  0x50   : > { %6471 = vmatmul.mubr.msk.bf16.gmra.mrb[28].mxu0 %vm539_vm1, %v2170_v47  ;;  %6214 = vmatprep.mubr.msk.bf16.mxu1 %vm539_vm1, %v7301_v49  ;;  %v2179_v47 = vpack.c.bf16 %v5576_v41, %v5575_v40  ;;  %v402_v40 = vld [vmem:[%s7157_s22 + $0x271] sm:$0xff] }
  0x51   : > { %6474 = vmatprep.mubr.msk.bf16.mxu0 %vm539_vm1, %v2171_v50  ;;  %v389_v50 = vld [vmem:[%s7157_s22 + $0x1f1] sm:$0xff] }
  0x52   : > { %v7389_v59 = vpack.c.bf16 %v390_v51, %v389_v50  ;;  %v5589_v41 = vld [vmem:[%s7157_s22 + $0x290] sm:$0xff]  ;;  %v5591_v51 = vld [vmem:[%s7157_s22 + $0x2a8] sm:$0xff] }
  0x53   : > { %v404_v50 = vld [vmem:[%s7157_s22 + $0x289] sm:$0xff] }
  0x57   : > { %6215 = vmatmul.mubr.msk.bf16.gmra.mrb[32].mxu1 %vm539_vm1, %v7317_v61 }
  0x58   : > { %6475 = vmatmul.mubr.msk.bf16.gmra.mrb[32].mxu0 %vm539_vm1, %v2172_v62  ;;  %6218 = vmatprep.mubr.msk.bf16.mxu1 %vm539_vm1, %v7319_v63  ;;  %v2180_v62 = vpack.c.bf16 %v5578_v53, %v5577_v52  ;;  %v5592_v52 = vld [vmem:[%s7157_s22 + $0x2b0] sm:$0xff]  ;;  %v7443_v53 = vpack.c.bf16 %v402_v40, %v401_v39  ;;  %v413_v40 = vld [vmem:[%s7157_s22 + $0x2e1] sm:$0xff] }
  0x59   : > { %6478 = vmatprep.mubr.msk.bf16.mxu0 %vm539_vm1, %v2173_v0  ;;  %v7391_v0 = vpack.c.bf16 %v392_v55, %v391_v54  ;;  %v2187_v56 = vpack.c.bf16 %v5592_v52, %v5591_v51  ;;  %v416_v51 = vld [vmem:[%s7157_s22 + $0x301] sm:$0xff] }
  0x5a   : > { %v5603_v52 = vld [vmem:[%s7157_s22 + $0x320] sm:$0xff] }
  0x5f   : > { %6219 = vmatmul.mubr.msk.bf16.gmra.mrb[36].mxu1 %vm539_vm1, %v7335_v11 }
  0x60   : > { %6479 = vmatmul.mubr.msk.bf16.gmra.mrb[36].mxu0 %vm539_vm1, %v2174_v12  ;;  %6222 = vmatprep.mubr.msk.bf16.mxu1 %vm539_vm1, %v7337_v13  ;;  %v5584_v12 = vld [vmem:[%s7157_s22 + $0x260] sm:$0xff] }
  0x61   : > { %6482 = vmatprep.mubr.msk.bf16.mxu0 %vm539_vm1, %v2175_v14  ;;  %v7407_v14 = vpack.c.bf16 %v394_v3, %v393_v2  ;;  %v2183_v17 = vpack.c.bf16 %v5584_v12, %v5583_v10  ;;  %v5594_v2 = vld [vmem:[%s7157_s22 + $0x2c0] sm:$0xff]  ;;  %v407_v3 = vld [vmem:[%s7157_s22 + $0x2a9] sm:$0xff] }
  0x62   : > { %v7463_v12 = vpack.c.bf16 %v408_v4, %v407_v3  ;;  %v418_v3 = vld [vmem:[%s7157_s22 + $0x311] sm:$0xff] }
  0x63   : > { %v5605_v4 = vld [vmem:[%s7157_s22 + $0x330] sm:$0xff] }
  0x67   : > { %6223 = vmatmul.mubr.msk.bf16.gmra.mrb[40].mxu1 %vm539_vm1, %v7353_v26 }
  0x68   : > { %6483 = vmatmul.mubr.msk.bf16.gmra.mrb[40].mxu0 %vm539_vm1, %v2176_v27  ;;  %6226 = vmatprep.mubr.msk.bf16.mxu1 %vm539_vm1, %v7355_v28  ;;  %v400_v27 = vld [vmem:[%s7157_s22 + $0x261] sm:$0xff] }
  0x69   : > { %6486 = vmatprep.mubr.msk.bf16.mxu0 %vm539_vm1, %v2177_v29  ;;  %v5587_v29 = vld [vmem:[%s7157_s22 + $0x280] sm:$0xff]  ;;  %v7427_v37 = vpack.c.bf16 %v400_v27, %v399_v25  ;;  %v5599_v27 = vld [vmem:[%s7157_s22 + $0x2f8] sm:$0xff] }
  0x6a   : > { %v2185_v38 = vpack.c.bf16 %v5588_v30, %v5587_v29  ;;  %v412_v25 = vld [vmem:[%s7157_s22 + $0x2d9] sm:$0xff] }
  0x6b   : > { %v5600_v29 = vld [vmem:[%s7157_s22 + $0x300] sm:$0xff] }
  0x6c   : > { %v2191_v39 = vpack.c.bf16 %v5600_v29, %v5599_v27  ;;  %v422_v27 = vld [vmem:[%s7157_s22 + $0x339] sm:$0xff] }
  0x6d   : > { %v5609_v29 = vld [vmem:[%s7157_s22 + $0x358] sm:$0xff] }
  0x6f   : > { %6227 = vmatmul.mubr.msk.bf16.gmra.mrb[44].mxu1 %vm539_vm1, %v7371_v42 }
  0x70   : > { %6487 = vmatmul.mubr.msk.bf16.gmra.mrb[44].mxu0 %vm539_vm1, %v2178_v43  ;;  %6230 = vmatprep.mubr.msk.bf16.mxu1 %vm539_vm1, %v7373_v44  ;;  %v5590_v43 = vld [vmem:[%s7157_s22 + $0x298] sm:$0xff] }
  0x71   : > { %6490 = vmatprep.mubr.msk.bf16.mxu0 %vm539_vm1, %v2179_v47  ;;  %v403_v47 = vld [vmem:[%s7157_s22 + $0x281] sm:$0xff]  ;;  %v2186_v54 = vpack.c.bf16 %v5590_v43, %v5589_v41  ;;  %v414_v41 = vld [vmem:[%s7157_s22 + $0x2e9] sm:$0xff] }
  0x72   : > { %v7445_v55 = vpack.c.bf16 %v404_v50, %v403_v47  ;;  %v5601_v43 = vld [vmem:[%s7157_s22 + $0x308] sm:$0xff]  ;;  %v5602_v47 = vld [vmem:[%s7157_s22 + $0x310] sm:$0xff]  ;;  %v415_v50 = vld [vmem:[%s7157_s22 + $0x2f9] sm:$0xff] }
  0x77   : > { %6231 = vmatmul.mubr.msk.bf16.gmra.mrb[48].mxu1 %vm539_vm1, %v7389_v59 }
  0x78   : > { %6491 = vmatmul.mubr.msk.bf16.gmra.mrb[48].mxu0 %vm539_vm1, %v2180_v62  ;;  %6234 = vmatprep.mubr.msk.bf16.mxu1 %vm539_vm1, %v7391_v0  ;;  %v406_v62 = vld [vmem:[%s7157_s22 + $0x299] sm:$0xff] }
  0x79   : > { %6494 = vmatprep.mubr.msk.bf16.mxu0 %vm539_vm1, %v2181_v1  ;;  %v5593_v1 = vld [vmem:[%s7157_s22 + $0x2b8] sm:$0xff]  ;;  %v7461_v9 = vpack.c.bf16 %v406_v62, %v405_v57  ;;  %v2192_v57 = vpack.c.bf16 %v5602_v47, %v5601_v43  ;;  %v7499_v62 = vpack.c.bf16 %v416_v51, %v415_v50 }
  0x7a   : > { %v2188_v10 = vpack.c.bf16 %v5594_v2, %v5593_v1  ;;  %v417_v2 = vld [vmem:[%s7157_s22 + $0x309] sm:$0xff]  ;;  %v5612_v43 = vld [vmem:[%s7157_s22 + $0x378] sm:$0xff] }
  0x7f   : > { %6235 = vmatmul.mubr.msk.bf16.gmra.mrb[52].mxu1 %vm539_vm1, %v7407_v14 }
  0x80   : > { %6495 = vmatmul.mubr.msk.bf16.gmra.mrb[52].mxu0 %vm539_vm1, %v2182_v15  ;;  %6238 = vmatprep.mubr.msk.bf16.mxu1 %vm539_vm1, %v7409_v16  ;;  %v2189_v15 = vpack.c.bf16 %v5596_v7, %v5595_v5  ;;  %v5606_v5 = vld [vmem:[%s7157_s22 + $0x338] sm:$0xff]  ;;  %v419_v7 = vld [vmem:[%s7157_s22 + $0x321] sm:$0xff] }
  0x81   : > { %6498 = vmatprep.mubr.msk.bf16.mxu0 %vm539_vm1, %v2183_v17  ;;  %v409_v17 = vld [vmem:[%s7157_s22 + $0x2b9] sm:$0xff] }
  0x82   : > { %v7479_v30 = vpack.c.bf16 %v410_v19, %v409_v17  ;;  %v5608_v17 = vld [vmem:[%s7157_s22 + $0x350] sm:$0xff]  ;;  %v7515_v19 = vpack.c.bf16 %v418_v3, %v417_v2  ;;  %v5614_v2 = vld [vmem:[%s7157_s22 + $0x388] sm:$0xff] }
  0x83   : > { %v427_v3 = vld [vmem:[%s7157_s22 + $0x371] sm:$0xff] }
  0x87   : > { %6239 = vmatmul.mubr.msk.bf16.gmra.mrb[56].mxu1 %vm539_vm1, %v7425_v32 }
  0x88   : > { %6499 = vmatmul.mubr.msk.bf16.gmra.mrb[56].mxu0 %vm539_vm1, %v2184_v35  ;;  %6242 = vmatprep.mubr.msk.bf16.mxu1 %vm539_vm1, %v7427_v37  ;;  %v2190_v35 = vpack.c.bf16 %v5598_v22, %v5597_v21  ;;  %v2194_v21 = vpack.c.bf16 %v5606_v5, %v5605_v4  ;;  %v428_v4 = vld [vmem:[%s7157_s22 + $0x379] sm:$0xff] }
  0x89   : > { %6502 = vmatprep.mubr.msk.bf16.mxu0 %vm539_vm1, %v2185_v38  ;;  %v7481_v38 = vpack.c.bf16 %v412_v25, %v411_v23  ;;  %v421_v25 = vld [vmem:[%s7157_s22 + $0x331] sm:$0xff] }
  0x8a   : > { %v7533_v47 = vpack.c.bf16 %v422_v27, %v421_v25  ;;  %v5615_v5 = vld [vmem:[%s7157_s22 + $0x398] sm:$0xff]  ;;  %v430_v25 = vld [vmem:[%s7157_s22 + $0x389] sm:$0xff] }
  0x8b   : > { %v5617_v27 = vld [vmem:[%s7157_s22 + $0x3a8] sm:$0xff] }
  0x8f   : > { %6243 = vmatmul.mubr.msk.bf16.gmra.mrb[60].mxu1 %vm539_vm1, %v7443_v53 }
  0x90   : > { %6503 = vmatmul.mubr.msk.bf16.gmra.mrb[60].mxu0 %vm539_vm1, %v2186_v54  ;;  %6246 = vmatprep.mubr.msk.bf16.mxu1 %vm539_vm1, %v7445_v55  ;;  %v5604_v54 = vld [vmem:[%s7157_s22 + $0x328] sm:$0xff] }
  0x91   : > { %6506 = vmatprep.mubr.msk.bf16.mxu0 %vm539_vm1, %v2187_v56  ;;  %v7497_v56 = vpack.c.bf16 %v414_v41, %v413_v40  ;;  %v2193_v1 = vpack.c.bf16 %v5604_v54, %v5603_v52  ;;  %v424_v40 = vld [vmem:[%s7157_s22 + $0x351] sm:$0xff]  ;;  %v425_v54 = vld [vmem:[%s7157_s22 + $0x359] sm:$0xff] }
  0x92   : > { %v5611_v41 = vld [vmem:[%s7157_s22 + $0x370] sm:$0xff] }
  0x93   : > { %v2197_v52 = vpack.c.bf16 %v5612_v43, %v5611_v41  ;;  %v5620_v41 = vld [vmem:[%s7157_s22 + $0x3c8] sm:$0xff] }
  0x97   : > { %6247 = vmatmul.mubr.msk.bf16.gmra.mrb[64].mxu1 %vm539_vm1, %v7461_v9 }
  0x98   : > { %6507 = vmatmul.mubr.msk.bf16.gmra.mrb[64].mxu0 %vm539_vm1, %v2188_v10  ;;  %6250 = vmatprep.mubr.msk.bf16.mxu1 %vm539_vm1, %v7463_v12  ;;  %v420_v10 = vld [vmem:[%s7157_s22 + $0x329] sm:$0xff] }
  0x99   : > { %6510 = vmatprep.mubr.msk.bf16.mxu0 %vm539_vm1, %v2189_v15  ;;  %v5607_v15 = vld [vmem:[%s7157_s22 + $0x348] sm:$0xff]  ;;  %v7517_v22 = vpack.c.bf16 %v420_v10, %v419_v7  ;;  %v5616_v7 = vld [vmem:[%s7157_s22 + $0x3a0] sm:$0xff] }
  0x9a   : > { %v2195_v23 = vpack.c.bf16 %v5608_v17, %v5607_v15  ;;  %v7553_v17 = vpack.c.bf16 %v428_v4, %v427_v3  ;;  %v5622_v3 = vld [vmem:[%s7157_s22 + $0x3d8] sm:$0xff]  ;;  %v435_v4 = vld [vmem:[%s7157_s22 + $0x3c1] sm:$0xff] }
  0x9f   : > { %6251 = vmatmul.mubr.msk.bf16.gmra.mrb[68].mxu1 %vm539_vm1, %v7479_v30 }
  0xa0   : > { %6511 = vmatmul.mubr.msk.bf16.gmra.mrb[68].mxu0 %vm539_vm1, %v2190_v35  ;;  %6254 = vmatprep.mubr.msk.bf16.mxu1 %vm539_vm1, %v7481_v38  ;;  %v5610_v35 = vld [vmem:[%s7157_s22 + $0x360] sm:$0xff] }
  0xa1   : > { %6514 = vmatprep.mubr.msk.bf16.mxu0 %vm539_vm1, %v2191_v39  ;;  %v423_v39 = vld [vmem:[%s7157_s22 + $0x349] sm:$0xff]  ;;  %v2196_v50 = vpack.c.bf16 %v5610_v35, %v5609_v29  ;;  %v431_v35 = vld [vmem:[%s7157_s22 + $0x399] sm:$0xff] }
  0xa2   : > { %v7535_v51 = vpack.c.bf16 %v424_v40, %v423_v39  ;;  %v5618_v29 = vld [vmem:[%s7157_s22 + $0x3b0] sm:$0xff]  ;;  %v432_v39 = vld [vmem:[%s7157_s22 + $0x3a1] sm:$0xff] }
  0xa3   : > { %v5619_v40 = vld [vmem:[%s7157_s22 + $0x3c0] sm:$0xff] }
  0xa7   : > { %6255 = vmatmul.mubr.msk.bf16.gmra.mrb[72].mxu1 %vm539_vm1, %v7497_v56 }
  0xa8   : > { %6515 = vmatmul.mubr.msk.bf16.gmra.mrb[72].mxu0 %vm539_vm1, %v2192_v57  ;;  %6258 = vmatprep.mubr.msk.bf16.mxu1 %vm539_vm1, %v7499_v62  ;;  %v426_v57 = vld [vmem:[%s7157_s22 + $0x361] sm:$0xff] }
  0xa9   : > { %6518 = vmatprep.mubr.msk.bf16.mxu0 %vm539_vm1, %v2193_v1  ;;  %v5613_v1 = vld [vmem:[%s7157_s22 + $0x380] sm:$0xff]  ;;  %v7551_v10 = vpack.c.bf16 %v426_v57, %v425_v54  ;;  %v2201_v54 = vpack.c.bf16 %v5620_v41, %v5619_v40  ;;  %v433_v57 = vld [vmem:[%s7157_s22 + $0x3a9] sm:$0xff] }
  0xaa   : > { %v2198_v15 = vpack.c.bf16 %v5614_v2, %v5613_v1  ;;  %v434_v1 = vld [vmem:[%s7157_s22 + $0x3b1] sm:$0xff]  ;;  %v5626_v40 = vld [vmem:[%s7157_s22 + $0x400] sm:$0xff]  ;;  %v439_v41 = vld [vmem:[%s7157_s22 + $0x3e9] sm:$0xff] }
  0xab   : > { %v5621_v2 = vld [vmem:[%s7157_s22 + $0x3d0] sm:$0xff] }
  0xaf   : > { %6259 = vmatmul.mubr.msk.bf16.gmra.mrb[76].mxu1 %vm539_vm1, %v7515_v19 }
  0xb0   : > { %6519 = vmatmul.mubr.msk.bf16.gmra.mrb[76].mxu0 %vm539_vm1, %v2194_v21  ;;  %6262 = vmatprep.mubr.msk.bf16.mxu1 %vm539_vm1, %v7517_v22  ;;  %v2199_v21 = vpack.c.bf16 %v5616_v7, %v5615_v5  ;;  %v436_v5 = vld [vmem:[%s7157_s22 + $0x3c9] sm:$0xff] }
  0xb1   : > { %6522 = vmatprep.mubr.msk.bf16.mxu0 %vm539_vm1, %v2195_v23  ;;  %v429_v23 = vld [vmem:[%s7157_s22 + $0x381] sm:$0xff] }
  0xb2   : > { %v7569_v43 = vpack.c.bf16 %v430_v25, %v429_v23  ;;  %v5623_v7 = vld [vmem:[%s7157_s22 + $0x3e8] sm:$0xff]  ;;  %v2202_v23 = vpack.c.bf16 %v5622_v3, %v5621_v2  ;;  %v7589_v25 = vpack.c.bf16 %v436_v5, %v435_v4  ;;  %v441_v5 = vld [vmem:[%s7157_s22 + $0x3f9] sm:$0xff] }
  0xb7   : > { %6263 = vmatmul.mubr.msk.bf16.gmra.mrb[80].mxu1 %vm539_vm1, %v7533_v47 }
  0xb8   : > { %6523 = vmatmul.mubr.msk.bf16.gmra.mrb[80].mxu0 %vm539_vm1, %v2196_v50  ;;  %6266 = vmatprep.mubr.msk.bf16.mxu1 %vm539_vm1, %v7535_v51  ;;  %v2200_v50 = vpack.c.bf16 %v5618_v29, %v5617_v27  ;;  %v437_v29 = vld [vmem:[%s7157_s22 + $0x3d1] sm:$0xff] }
  0xb9   : > { %6526 = vmatprep.mubr.msk.bf16.mxu0 %vm539_vm1, %v2197_v52  ;;  %v7571_v52 = vpack.c.bf16 %v432_v39, %v431_v35  ;;  %v438_v35 = vld [vmem:[%s7157_s22 + $0x3d9] sm:$0xff] }
  0xba   : > { %v5625_v39 = vld [vmem:[%s7157_s22 + $0x3f8] sm:$0xff] }
  0xbb   : > { %v2204_v2 = vpack.c.bf16 %v5626_v40, %v5625_v39  ;;  %v5632_v39 = vld [vmem:[%s7157_s22 + $0x440] sm:$0xff] }
  0xbf   : > { %6267 = vmatmul.mubr.msk.bf16.gmra.mrb[84].mxu1 %vm539_vm1, %v7551_v10 }
  0xc0   : > { %6527 = vmatmul.mubr.msk.bf16.gmra.mrb[84].mxu0 %vm539_vm1, %v2198_v15  ;;  %6270 = vmatprep.mubr.msk.bf16.mxu1 %vm539_vm1, %v7553_v17  ;;  %v5624_v15 = vld [vmem:[%s7157_s22 + $0x3f0] sm:$0xff] }
  0xc1   : > { %6530 = vmatprep.mubr.msk.bf16.mxu0 %vm539_vm1, %v2199_v21  ;;  %v7587_v21 = vpack.c.bf16 %v434_v1, %v433_v57  ;;  %v2203_v27 = vpack.c.bf16 %v5624_v15, %v5623_v7  ;;  %v5628_v57 = vld [vmem:[%s7157_s22 + $0x418] sm:$0xff]  ;;  %v7605_v1 = vpack.c.bf16 %v438_v35, %v437_v29  ;;  %v442_v7 = vld [vmem:[%s7157_s22 + $0x401] sm:$0xff] }
  0xc2   : > { %v5629_v15 = vld [vmem:[%s7157_s22 + $0x420] sm:$0xff]  ;;  %v5631_v35 = vld [vmem:[%s7157_s22 + $0x438] sm:$0xff]  ;;  %v7623_v40 = vpack.c.bf16 %v442_v7, %v441_v5  ;;  %v5634_v5 = vld [vmem:[%s7157_s22 + $0x450] sm:$0xff] }
  0xc3   : > { %v444_v29 = vld [vmem:[%s7157_s22 + $0x419] sm:$0xff] }
  0xc4   : > { %10552 = vst [vmem:[#allocation3_spill] sm:$0xff] %v7623_v40  ;;  %v447_v7 = vld [vmem:[%s7157_s22 + $0x439] sm:$0xff] }
  0xc7   : > { %6271 = vmatmul.mubr.msk.bf16.gmra.mrb[88].mxu1 %vm539_vm1, %v7569_v43 }
  0xc8   : > { %6531 = vmatmul.mubr.msk.bf16.gmra.mrb[88].mxu0 %vm539_vm1, %v2200_v50  ;;  %6274 = vmatprep.mubr.msk.bf16.mxu1 %vm539_vm1, %v7571_v52  ;;  %v440_v50 = vld [vmem:[%s7157_s22 + $0x3f1] sm:$0xff] }
  0xc9   : > { %6534 = vmatprep.mubr.msk.bf16.mxu0 %vm539_vm1, %v2201_v54  ;;  %v5627_v54 = vld [vmem:[%s7157_s22 + $0x410] sm:$0xff]  ;;  %v7607_v3 = vpack.c.bf16 %v440_v50, %v439_v41 }
  0xca   : > { %v2205_v4 = vpack.c.bf16 %v5628_v57, %v5627_v54  ;;  %v2207_v54 = vpack.c.bf16 %v5632_v39, %v5631_v35  ;;  %v445_v57 = vld [vmem:[%s7157_s22 + $0x421] sm:$0xff] }
  0xcb   : > { %10551 = vst [vmem:[#allocation2_spill] sm:$0xff] %v7607_v3 }
  0xcf   : > { %6275 = vmatmul.mubr.msk.bf16.gmra.mrb[92].mxu1 %vm539_vm1, %v7587_v21 }
  0xd0   : > { %6535 = vmatmul.mubr.msk.bf16.gmra.mrb[92].mxu0 %vm539_vm1, %v2202_v23  ;;  %6278 = vmatprep.mubr.msk.bf16.mxu1 %vm539_vm1, %v7589_v25  ;;  %v5630_v23 = vld [vmem:[%s7157_s22 + $0x428] sm:$0xff] }
  0xd1   : > { %6538 = vmatprep.mubr.msk.bf16.mxu0 %vm539_vm1, %v2203_v27  ;;  %v443_v27 = vld [vmem:[%s7157_s22 + $0x411] sm:$0xff]  ;;  %v2206_v41 = vpack.c.bf16 %v5630_v23, %v5629_v15  ;;  %v448_v15 = vld [vmem:[%s7157_s22 + $0x441] sm:$0xff] }
  0xd2   : > { %v7625_v50 = vpack.c.bf16 %v444_v29, %v443_v27  ;;  %v5635_v23 = vld [vmem:[%s7157_s22 + $0x460] sm:$0xff]  ;;  %v5636_v27 = vld [vmem:[%s7157_s22 + $0x468] sm:$0xff]  ;;  %v7643_v39 = vpack.c.bf16 %v448_v15, %v447_v7  ;;  %v5640_v7 = vld [vmem:[%s7157_s22 + $0x490] sm:$0xff] }
  0xd4   : > { %10553 = vst [vmem:[#allocation4_spill] sm:$0xff] %v7625_v50  ;;  %10555 = vst [vmem:[#allocation6_spill] sm:$0xff] %v7643_v39 }
  0xd7   : > { %6279 = vmatmul.mubr.msk.bf16.gmra.mrb[96].mxu1 %vm539_vm1, %v7605_v1 }
  0xd8   : > { %6539 = vmatmul.mubr.msk.bf16.gmra.mrb[96].mxu0 %vm539_vm1, %v2204_v2  ;;  %6282 = vmatprep.mubr.msk.bf16.mxu1 %vm539_vm1, %v7607_v3  ;;  %v446_v2 = vld [vmem:[%s7157_s22 + $0x429] sm:$0xff] }
  0xd9   : > { %6542 = vmatprep.mubr.msk.bf16.mxu0 %vm539_vm1, %v2205_v4  ;;  %v5633_v4 = vld [vmem:[%s7157_s22 + $0x448] sm:$0xff]  ;;  %v7641_v29 = vpack.c.bf16 %v446_v2, %v445_v57  ;;  %v5638_v57 = vld [vmem:[%s7157_s22 + $0x478] sm:$0xff] }
  0xda   : > { %v2208_v35 = vpack.c.bf16 %v5634_v5, %v5633_v4  ;;  %v451_v2 = vld [vmem:[%s7157_s22 + $0x461] sm:$0xff]  ;;  %v452_v4 = vld [vmem:[%s7157_s22 + $0x469] sm:$0xff] }
  0xdb   : > { %10554 = vst [vmem:[#allocation5_spill] sm:$0xff] %v7641_v29  ;;  %v5639_v5 = vld [vmem:[%s7157_s22 + $0x488] sm:$0xff] }
  0xdc   : > { %v5646_v3 = vld [vmem:[%s7157_s22 + $0x4c8] sm:$0xff] }
  0xdf   : > { %6283 = vmatmul.mubr.msk.bf16.gmra.mrb[100].mxu1 %vm539_vm1, %v7623_v40  ;;  %v5637_v40 = vld [vmem:[%s7157_s22 + $0x470] sm:$0xff] }
  0xe0   : > { %6543 = vmatmul.mubr.msk.bf16.gmra.mrb[100].mxu0 %vm539_vm1, %v2206_v41  ;;  %6286 = vmatprep.mubr.msk.bf16.mxu1 %vm539_vm1, %v7625_v50  ;;  %v2209_v41 = vpack.c.bf16 %v5636_v27, %v5635_v23  ;;  %v450_v50 = vld [vmem:[%s7157_s22 + $0x451] sm:$0xff]  ;;  %v2210_v23 = vpack.c.bf16 %v5638_v57, %v5637_v40  ;;  %v523_v27 = vpack.c.bf16 %v452_v4, %v451_v2  ;;  %v455_v40 = vld [vmem:[%s7157_s22 + $0x489] sm:$0xff] }
  0xe1   : > { %6546 = vmatprep.mubr.msk.bf16.mxu0 %vm539_vm1, %v2207_v54  ;;  %v449_v54 = vld [vmem:[%s7157_s22 + $0x449] sm:$0xff]  ;;  %v5644_v2 = vld [vmem:[%s7157_s22 + $0x4b8] sm:$0xff] }
  0xe2   : > { %v7659_v15 = vpack.c.bf16 %v450_v50, %v449_v54  ;;  %v5642_v50 = vld [vmem:[%s7157_s22 + $0x4a0] sm:$0xff]  ;;  %v456_v54 = vld [vmem:[%s7157_s22 + $0x491] sm:$0xff] }
  0xe3   : > { %v5643_v57 = vld [vmem:[%s7157_s22 + $0x4b0] sm:$0xff] }
  0xe4   : > { %10556 = vst [vmem:[#allocation7_spill] sm:$0xff] %v7659_v15 }
  0xe7   : > { %6287 = vmatmul.mubr.msk.bf16.gmra.mrb[104].mxu1 %vm539_vm1, %v7641_v29  ;;  %v5641_v29 = vld [vmem:[%s7157_s22 + $0x498] sm:$0xff] }
  0xe8   : > { %6547 = vmatmul.mubr.msk.bf16.gmra.mrb[104].mxu0 %vm539_vm1, %v2208_v35  ;;  %6290 = vmatprep.mubr.msk.bf16.mxu1 %vm539_vm1, %v7643_v39  ;;  %v2211_v35 = vpack.c.bf16 %v5640_v7, %v5639_v5  ;;  %v454_v39 = vld [vmem:[%s7157_s22 + $0x479] sm:$0xff]  ;;  %v2212_v5 = vpack.c.bf16 %v5642_v50, %v5641_v29  ;;  %v525_v7 = vpack.c.bf16 %v456_v54, %v455_v40 }
  0xe9   : > { %6550 = vmatprep.mubr.msk.bf16.mxu0 %vm539_vm1, %v2209_v41  ;;  %v453_v41 = vld [vmem:[%s7157_s22 + $0x471] sm:$0xff]  ;;  %v460_v29 = vld [vmem:[%s7157_s22 + $0x4b9] sm:$0xff] }
  0xea   : > { %v524_v4 = vpack.c.bf16 %v454_v39, %v453_v41  ;;  %v459_v39 = vld [vmem:[%s7157_s22 + $0x4b1] sm:$0xff]  ;;  %v5648_v50 = vld [vmem:[%s7157_s22 + $0x4e0] sm:$0xff] }
  0xeb   : > { %v5647_v41 = vld [vmem:[%s7157_s22 + $0x4d8] sm:$0xff] }
  0xef   : > { %6291 = vmatmul.mubr.msk.bf16.gmra.mrb[108].mxu1 %vm539_vm1, %v7659_v15  ;;  %v5645_v15 = vld [vmem:[%s7157_s22 + $0x4c0] sm:$0xff] }
  0xf0   : > { %6551 = vmatmul.mubr.msk.bf16.gmra.mrb[108].mxu0 %vm539_vm1, %v2210_v23  ;;  %6294 = vmatprep.mubr.msk.bf16.mxu1 %vm539_vm1, %v523_v27  ;;  %v2213_v23 = vpack.c.bf16 %v5644_v2, %v5643_v57  ;;  %v457_v27 = vld [vmem:[%s7157_s22 + $0x499] sm:$0xff]  ;;  %v2214_v54 = vpack.c.bf16 %v5646_v3, %v5645_v15  ;;  %v527_v57 = vpack.c.bf16 %v460_v29, %v459_v39  ;;  %v464_v3 = vld [vmem:[%s7157_s22 + $0x4e1] sm:$0xff] }
  0xf1   : > { %6554 = vmatprep.mubr.msk.bf16.mxu0 %vm539_vm1, %v2211_v35  ;;  %v458_v35 = vld [vmem:[%s7157_s22 + $0x4a1] sm:$0xff]  ;;  %v2215_v2 = vpack.c.bf16 %v5648_v50, %v5647_v41 }
  0xf2   : > { %v526_v40 = vpack.c.bf16 %v458_v35, %v457_v27  ;;  %v463_v27 = vld [vmem:[%s7157_s22 + $0x4d9] sm:$0xff]  ;;  %v5652_v35 = vld [vmem:[%s7157_s22 + $0x508] sm:$0xff] }
  0xf3   : > { %v5651_v15 = vld [vmem:[%s7157_s22 + $0x500] sm:$0xff]  ;;  %v529_v41 = vpack.c.bf16 %v464_v3, %v463_v27  ;;  %v147_v3 = vld [vmem:[%s7157_s22 + $0x10] sm:$0xff] }
  0xf4   : > { %v2217_v50 = vpack.c.bf16 %v5652_v35, %v5651_v15  ;;  %v148_v15 = vld [vmem:[%s7157_s22 + $0x18] sm:$0xff]  ;;  %v149_v35 = vld [vmem:[%s7157_s22 + $0x28] sm:$0xff] }
  0xf7   : > { %6295 = vmatmul.mubr.msk.bf16.gmra.mrb[112].mxu1 %vm539_vm1, %v524_v4  ;;  %v461_v4 = vld [vmem:[%s7157_s22 + $0x4c1] sm:$0xff] }
  0xf8   : > { %6555 = vmatmul.mubr.msk.bf16.gmra.mrb[112].mxu0 %vm539_vm1, %v2212_v5  ;;  %6298 = vmatprep.mubr.msk.bf16.mxu1 %vm539_vm1, %v525_v7  ;;  %v462_v5 = vld [vmem:[%s7157_s22 + $0x4c9] sm:$0xff] }
  0xf9   : > { %6558 = vmatprep.mubr.msk.bf16.mxu0 %vm539_vm1, %v2213_v23  ;;  %v5649_v7 = vld [vmem:[%s7157_s22 + $0x4e8] sm:$0xff]  ;;  %v5650_v23 = vld [vmem:[%s7157_s22 + $0x4f0] sm:$0xff]  ;;  %v528_v39 = vpack.c.bf16 %v462_v5, %v461_v4  ;;  %v145_v4 = vld [vmem:[%s7157_s22] sm:$0xff] }
  0xfa   : > { %v2216_v29 = vpack.c.bf16 %v5650_v23, %v5649_v7  ;;  %v146_v5 = vld [vmem:[%s7157_s22 + $0x8] sm:$0xff] }
  0xfb   : > { %v273_v27 = vpack.c.bf16 %v146_v5, %v145_v4  ;;  %v156_v4 = vld [vmem:[%s7157_s22 + $0x68] sm:$0xff]  ;;  %v158_v5 = vld [vmem:[%s7157_s22 + $0x80] sm:$0xff] }
  0xff   : > { %6299 = vmatmul.mubr.msk.bf16.gmra.mrb[116].mxu1 %vm539_vm1, %v526_v40  ;;  %v465_v40 = vld [vmem:[%s7157_s22 + $0x4e9] sm:$0xff] }
 0x100   : > { %6559 = vmatmul.mubr.msk.bf16.gmra.mrb[116].mxu0 %vm539_vm1, %v2214_v54  ;;  %6302 = vmatprep.mubr.msk.bf16.mxu1 %vm539_vm1, %v527_v57  ;;  %v466_v54 = vld [vmem:[%s7157_s22 + $0x4f1] sm:$0xff] }
 0x101   : > { %6562 = vmatprep.mubr.msk.bf16.mxu0 %vm539_vm1, %v2215_v2  ;;  %v5653_v57 = vld [vmem:[%s7157_s22 + $0x510] sm:$0xff]  ;;  %v5654_v2 = vld [vmem:[%s7157_s22 + $0x518] sm:$0xff]  ;;  %v530_v7 = vpack.c.bf16 %v466_v54, %v465_v40  ;;  %v152_v40 = vld [vmem:[%s7157_s22 + $0x40] sm:$0xff] }
 0x102   : > { %v2218_v23 = vpack.c.bf16 %v5654_v2, %v5653_v57  ;;  %v154_v54 = vld [vmem:[%s7157_s22 + $0x58] sm:$0xff] }
 0x107   : > { %6303 = vmatmul.mubr.msk.bf16.gmra.mrb[120].mxu1 %vm539_vm1, %v528_v39  ;;  %v150_v39 = vld [vmem:[%s7157_s22 + $0x30] sm:$0xff] }
 0x108   : > { %6563 = vmatmul.mubr.msk.bf16.gmra.mrb[120].mxu0 %vm539_vm1, %v2216_v29  ;;  %6306 = vmatprep.mubr.msk.bf16.mxu1 %vm539_vm1, %v529_v41  ;;  %v274_v29 = vpack.c.bf16 %v148_v15, %v147_v3  ;;  %v275_v41 = vpack.c.bf16 %v150_v39, %v149_v35  ;;  %v162_v3 = vld [vmem:[%s7157_s22 + $0xa8] sm:$0xff]  ;;  %v164_v39 = vld [vmem:[%s7157_s22 + $0xb8] sm:$0xff] }
 0x109   : > { %6566 = vmatprep.mubr.msk.bf16.mxu0 %vm539_vm1, %v2217_v50  ;;  %v151_v50 = vld [vmem:[%s7157_s22 + $0x38] sm:$0xff] }
 0x10a   : > { %v276_v57 = vpack.c.bf16 %v152_v40, %v151_v50  ;;  %v168_v40 = vld [vmem:[%s7157_s22 + $0xe0] sm:$0xff] }
 0x10f   : > { %6307 = vmatmul.mubr.msk.bf16.gmra.mrb[124].mxu1 %vm539_vm1, %v530_v7 }
 0x110   : > { %6567 = vmatmul.mubr.msk.bf16.gmra.mrb[124].mxu0 %vm539_vm1, %v2218_v23  ;;  %6312 = vmatprep.mubr.msk.bf16.mxu1 %vm539_vm1, %v273_v27  ;;  %v160_v27 = vld [vmem:[%s7157_s22 + $0x90] sm:$0xff] }
 0x111   : > { %6572 = vmatprep.mubr.msk.bf16.mxu0 %vm539_vm1, %v7177_v24  ;;  %v153_v24 = vld [vmem:[%s7157_s22 + $0x50] sm:$0xff] }
 0x112   : > { %v277_v2 = vpack.c.bf16 %v154_v54, %v153_v24  ;;  %v170_v24 = vld [vmem:[%s7157_s22 + $0xf8] sm:$0xff] }
 0x117   : > { %6313 = vmatmul.mubr.msk.bf16.vlgmr.msra.gmra.mrb[0].mxu1 %vm539_vm1, %v274_v29  ;;  %v166_v29 = vld [vmem:[%s7157_s22 + $0xd0] sm:$0xff] }
 0x118   : > { %6573 = vmatmul.mubr.msk.bf16.vlgmr.msra.gmra.mrb[0].mxu0 %vm539_vm1, %v7191_v34  ;;  %6316 = vmatprep.mubr.msk.bf16.mxu1 %vm539_vm1, %v275_v41  ;;  %v155_v34 = vld [vmem:[%s7157_s22 + $0x60] sm:$0xff] }
 0x119   : > { %6576 = vmatprep.mubr.msk.bf16.mxu0 %vm539_vm1, %v7193_v36  ;;  %v157_v36 = vld [vmem:[%s7157_s22 + $0x78] sm:$0xff]  ;;  %v278_v7 = vpack.c.bf16 %v156_v4, %v155_v34  ;;  %v174_v34 = vld [vmem:[%s7157_s22 + $0x120] sm:$0xff] }
 0x11a   : > { %v279_v23 = vpack.c.bf16 %v158_v5, %v157_v36  ;;  %v176_v5 = vld [vmem:[%s7157_s22 + $0x130] sm:$0xff] }
 0x11f   : > { %6317 = vmatmul.mubr.msk.bf16.gmra.mrb[4].mxu1 %vm539_vm1, %v276_v57 }
 0x120   : > { %6577 = vmatmul.mubr.msk.bf16.gmra.mrb[4].mxu0 %vm539_vm1, %v7209_v46  ;;  %6320 = vmatprep.mubr.msk.bf16.mxu1 %vm539_vm1, %v277_v2  ;;  %v159_v46 = vld [vmem:[%s7157_s22 + $0x88] sm:$0xff] }
 0x121   : > { %6580 = vmatprep.mubr.msk.bf16.mxu0 %vm539_vm1, %v7211_v48  ;;  %v161_v48 = vld [vmem:[%s7157_s22 + $0xa0] sm:$0xff]  ;;  %v280_v15 = vpack.c.bf16 %v160_v27, %v159_v46  ;;  %v172_v2 = vld [vmem:[%s7157_s22 + $0x108] sm:$0xff]  ;;  %v180_v27 = vld [vmem:[%s7157_s22 + $0x158] sm:$0xff] }
 0x122   : > { %v281_v35 = vpack.c.bf16 %v162_v3, %v161_v48  ;;  %v182_v48 = vld [vmem:[%s7157_s22 + $0x170] sm:$0xff] }
 0x127   : > { %6321 = vmatmul.mubr.msk.bf16.gmra.mrb[8].mxu1 %vm539_vm1, %v278_v7  ;;  %v178_v7 = vld [vmem:[%s7157_s22 + $0x148] sm:$0xff] }
 0x128   : > { %6581 = vmatmul.mubr.msk.bf16.gmra.mrb[8].mxu0 %vm539_vm1, %v7227_v58  ;;  %6324 = vmatprep.mubr.msk.bf16.mxu1 %vm539_vm1, %v279_v23  ;;  %v163_v58 = vld [vmem:[%s7157_s22 + $0xb0] sm:$0xff] }
 0x129   : > { %6584 = vmatprep.mubr.msk.bf16.mxu0 %vm539_vm1, %v7229_v60  ;;  %v165_v60 = vld [vmem:[%s7157_s22 + $0xc8] sm:$0xff]  ;;  %v282_v41 = vpack.c.bf16 %v164_v39, %v163_v58  ;;  %v186_v58 = vld [vmem:[%s7157_s22 + $0x198] sm:$0xff] }
 0x12a   : > { %v283_v50 = vpack.c.bf16 %v166_v29, %v165_v60  ;;  %v188_v29 = vld [vmem:[%s7157_s22 + $0x1a8] sm:$0xff] }
 0x12f   : > { %6325 = vmatmul.mubr.msk.bf16.gmra.mrb[12].mxu1 %vm539_vm1, %v280_v15 }
 0x130   : > { %6585 = vmatmul.mubr.msk.bf16.gmra.mrb[12].mxu0 %vm539_vm1, %v7245_v6  ;;  %6328 = vmatprep.mubr.msk.bf16.mxu1 %vm539_vm1, %v281_v35  ;;  %v167_v6 = vld [vmem:[%s7157_s22 + $0xd8] sm:$0xff]  ;;  %v184_v35 = vld [vmem:[%s7157_s22 + $0x180] sm:$0xff] }
 0x131   : > { %6588 = vmatprep.mubr.msk.bf16.mxu0 %vm539_vm1, %v7247_v8  ;;  %v169_v8 = vld [vmem:[%s7157_s22 + $0xf0] sm:$0xff]  ;;  %v284_v54 = vpack.c.bf16 %v168_v40, %v167_v6 }
 0x132   : > { %v285_v57 = vpack.c.bf16 %v170_v24, %v169_v8  ;;  %v192_v40 = vld [vmem:[%s7157_s22 + $0x1d0] sm:$0xff]  ;;  %v194_v8 = vld [vmem:[%s7157_s22 + $0x1e8] sm:$0xff] }
 0x137   : > { %6329 = vmatmul.mubr.msk.bf16.gmra.mrb[16].mxu1 %vm539_vm1, %v282_v41  ;;  %v190_v41 = vld [vmem:[%s7157_s22 + $0x1c0] sm:$0xff] }
 0x138   : > { %6589 = vmatmul.mubr.msk.bf16.gmra.mrb[16].mxu0 %vm539_vm1, %v7263_v18  ;;  %6332 = vmatprep.mubr.msk.bf16.mxu1 %vm539_vm1, %v283_v50  ;;  %v171_v18 = vld [vmem:[%s7157_s22 + $0x100] sm:$0xff] }
 0x139   : > { %6592 = vmatprep.mubr.msk.bf16.mxu0 %vm539_vm1, %v7265_v20  ;;  %v173_v20 = vld [vmem:[%s7157_s22 + $0x118] sm:$0xff]  ;;  %v286_v4 = vpack.c.bf16 %v172_v2, %v171_v18  ;;  %v198_v18 = vld [vmem:[%s7157_s22 + $0x210] sm:$0xff] }
 0x13a   : > { %v287_v36 = vpack.c.bf16 %v174_v34, %v173_v20  ;;  %v200_v34 = vld [vmem:[%s7157_s22 + $0x220] sm:$0xff] }
 0x13f   : > { %6333 = vmatmul.mubr.msk.bf16.gmra.mrb[20].mxu1 %vm539_vm1, %v284_v54 }
 0x140   : > { %6593 = vmatmul.mubr.msk.bf16.gmra.mrb[20].mxu0 %vm539_vm1, %v7281_v31  ;;  %6336 = vmatprep.mubr.msk.bf16.mxu1 %vm539_vm1, %v285_v57  ;;  %v175_v31 = vld [vmem:[%s7157_s22 + $0x128] sm:$0xff]  ;;  %v196_v57 = vld [vmem:[%s7157_s22 + $0x1f8] sm:$0xff] }
 0x141   : > { %6596 = vmatprep.mubr.msk.bf16.mxu0 %vm539_vm1, %v7283_v33  ;;  %v177_v33 = vld [vmem:[%s7157_s22 + $0x140] sm:$0xff]  ;;  %v288_v23 = vpack.c.bf16 %v176_v5, %v175_v31  ;;  %v204_v5 = vld [vmem:[%s7157_s22 + $0x248] sm:$0xff] }
 0x142   : > { %v289_v46 = vpack.c.bf16 %v178_v7, %v177_v33  ;;  %v206_v33 = vld [vmem:[%s7157_s22 + $0x260] sm:$0xff] }
 0x147   : > { %6337 = vmatmul.mubr.msk.bf16.gmra.mrb[24].mxu1 %vm539_vm1, %v286_v4  ;;  %v202_v4 = vld [vmem:[%s7157_s22 + $0x238] sm:$0xff] }
 0x148   : > { %6597 = vmatmul.mubr.msk.bf16.gmra.mrb[24].mxu0 %vm539_vm1, %v7299_v45  ;;  %6340 = vmatprep.mubr.msk.bf16.mxu1 %vm539_vm1, %v287_v36  ;;  %v179_v45 = vld [vmem:[%s7157_s22 + $0x150] sm:$0xff] }
 0x149   : > { %6600 = vmatprep.mubr.msk.bf16.mxu0 %vm539_vm1, %v7301_v49  ;;  %v181_v49 = vld [vmem:[%s7157_s22 + $0x168] sm:$0xff]  ;;  %v290_v3 = vpack.c.bf16 %v180_v27, %v179_v45 }
 0x14a   : > { %v291_v15 = vpack.c.bf16 %v182_v48, %v181_v49  ;;  %v210_v45 = vld [vmem:[%s7157_s22 + $0x288] sm:$0xff]  ;;  %v212_v48 = vld [vmem:[%s7157_s22 + $0x298] sm:$0xff] }
 0x14f   : > { %6341 = vmatmul.mubr.msk.bf16.gmra.mrb[28].mxu1 %vm539_vm1, %v288_v23 }
 0x150   : > { %6601 = vmatmul.mubr.msk.bf16.gmra.mrb[28].mxu0 %vm539_vm1, %v7317_v61  ;;  %6344 = vmatprep.mubr.msk.bf16.mxu1 %vm539_vm1, %v289_v46  ;;  %v183_v61 = vld [vmem:[%s7157_s22 + $0x178] sm:$0xff]  ;;  %v208_v46 = vld [vmem:[%s7157_s22 + $0x270] sm:$0xff] }
 0x151   : > { %6604 = vmatprep.mubr.msk.bf16.mxu0 %vm539_vm1, %v7319_v63  ;;  %v185_v63 = vld [vmem:[%s7157_s22 + $0x190] sm:$0xff]  ;;  %v292_v39 = vpack.c.bf16 %v184_v35, %v183_v61  ;;  %v216_v35 = vld [vmem:[%s7157_s22 + $0x2c0] sm:$0xff] }
 0x152   : > { %v293_v60 = vpack.c.bf16 %v186_v58, %v185_v63  ;;  %v218_v63 = vld [vmem:[%s7157_s22 + $0x2d8] sm:$0xff] }
 0x157   : > { %6345 = vmatmul.mubr.msk.bf16.gmra.mrb[32].mxu1 %vm539_vm1, %v290_v3  ;;  %v214_v3 = vld [vmem:[%s7157_s22 + $0x2b0] sm:$0xff] }
 0x158   : > { %6605 = vmatmul.mubr.msk.bf16.gmra.mrb[32].mxu0 %vm539_vm1, %v7335_v11  ;;  %6348 = vmatprep.mubr.msk.bf16.mxu1 %vm539_vm1, %v291_v15  ;;  %v187_v11 = vld [vmem:[%s7157_s22 + $0x1a0] sm:$0xff] }
 0x159   : > { %6608 = vmatprep.mubr.msk.bf16.mxu0 %vm539_vm1, %v7337_v13  ;;  %v189_v13 = vld [vmem:[%s7157_s22 + $0x1b8] sm:$0xff]  ;;  %v294_v50 = vpack.c.bf16 %v188_v29, %v187_v11  ;;  %v222_v11 = vld [vmem:[%s7157_s22 + $0x300] sm:$0xff] }
 0x15a   : > { %v295_v6 = vpack.c.bf16 %v190_v41, %v189_v13  ;;  %v224_v41 = vld [vmem:[%s7157_s22 + $0x310] sm:$0xff] }
 0x15f   : > { %6349 = vmatmul.mubr.msk.bf16.gmra.mrb[36].mxu1 %vm539_vm1, %v292_v39 }
 0x160   : > { %6609 = vmatmul.mubr.msk.bf16.gmra.mrb[36].mxu0 %vm539_vm1, %v7353_v26  ;;  %6352 = vmatprep.mubr.msk.bf16.mxu1 %vm539_vm1, %v293_v60  ;;  %v191_v26 = vld [vmem:[%s7157_s22 + $0x1c8] sm:$0xff] }
 0x161   : > { %6612 = vmatprep.mubr.msk.bf16.mxu0 %vm539_vm1, %v7355_v28  ;;  %v193_v28 = vld [vmem:[%s7157_s22 + $0x1e0] sm:$0xff]  ;;  %v296_v24 = vpack.c.bf16 %v192_v40, %v191_v26  ;;  %v220_v60 = vld [vmem:[%s7157_s22 + $0x2e8] sm:$0xff]  ;;  %v228_v40 = vld [vmem:[%s7157_s22 + $0x338] sm:$0xff] }
 0x162   : > { %v297_v54 = vpack.c.bf16 %v194_v8, %v193_v28  ;;  %v230_v28 = vld [vmem:[%s7157_s22 + $0x350] sm:$0xff] }
 0x167   : > { %6353 = vmatmul.mubr.msk.bf16.gmra.mrb[40].mxu1 %vm539_vm1, %v294_v50  ;;  %v226_v50 = vld [vmem:[%s7157_s22 + $0x328] sm:$0xff] }
 0x168   : > { %6613 = vmatmul.mubr.msk.bf16.gmra.mrb[40].mxu0 %vm539_vm1, %v7371_v42  ;;  %6356 = vmatprep.mubr.msk.bf16.mxu1 %vm539_vm1, %v295_v6  ;;  %v195_v42 = vld [vmem:[%s7157_s22 + $0x1f0] sm:$0xff] }
 0x169   : > { %6616 = vmatprep.mubr.msk.bf16.mxu0 %vm539_vm1, %v7373_v44  ;;  %v197_v44 = vld [vmem:[%s7157_s22 + $0x208] sm:$0xff]  ;;  %v298_v2 = vpack.c.bf16 %v196_v57, %v195_v42  ;;  %v234_v42 = vld [vmem:[%s7157_s22 + $0x378] sm:$0xff] }
 0x16a   : > { %v299_v20 = vpack.c.bf16 %v198_v18, %v197_v44  ;;  %v236_v18 = vld [vmem:[%s7157_s22 + $0x388] sm:$0xff] }
 0x16f   : > { %6357 = vmatmul.mubr.msk.bf16.gmra.mrb[44].mxu1 %vm539_vm1, %v296_v24 }
 0x170   : > { %6617 = vmatmul.mubr.msk.bf16.gmra.mrb[44].mxu0 %vm539_vm1, %v7389_v59  ;;  %6360 = vmatprep.mubr.msk.bf16.mxu1 %vm539_vm1, %v297_v54  ;;  %v199_v59 = vld [vmem:[%s7157_s22 + $0x218] sm:$0xff]  ;;  %v232_v54 = vld [vmem:[%s7157_s22 + $0x360] sm:$0xff] }
 0x171   : > { %6620 = vmatprep.mubr.msk.bf16.mxu0 %vm539_vm1, %v7391_v0  ;;  %v201_v0 = vld [vmem:[%s7157_s22 + $0x230] sm:$0xff]  ;;  %v300_v36 = vpack.c.bf16 %v200_v34, %v199_v59 }
 0x172   : > { %v301_v31 = vpack.c.bf16 %v202_v4, %v201_v0  ;;  %v240_v34 = vld [vmem:[%s7157_s22 + $0x3b0] sm:$0xff]  ;;  %v242_v0 = vld [vmem:[%s7157_s22 + $0x3c8] sm:$0xff] }
 0x177   : > { %6361 = vmatmul.mubr.msk.bf16.gmra.mrb[48].mxu1 %vm539_vm1, %v298_v2  ;;  %v238_v2 = vld [vmem:[%s7157_s22 + $0x3a0] sm:$0xff] }
 0x178   : > { %6621 = vmatmul.mubr.msk.bf16.gmra.mrb[48].mxu0 %vm539_vm1, %v7407_v14  ;;  %6364 = vmatprep.mubr.msk.bf16.mxu1 %vm539_vm1, %v299_v20  ;;  %v203_v14 = vld [vmem:[%s7157_s22 + $0x240] sm:$0xff] }
 0x179   : > { %6624 = vmatprep.mubr.msk.bf16.mxu0 %vm539_vm1, %v7409_v16  ;;  %v205_v16 = vld [vmem:[%s7157_s22 + $0x258] sm:$0xff]  ;;  %v302_v7 = vpack.c.bf16 %v204_v5, %v203_v14  ;;  %v10557_v14 = vld [vmem:[#allocation2_spill] sm:$0xff]  ;;  %v246_v5 = vld [vmem:[%s7157_s22 + $0x3f0] sm:$0xff] }
 0x17a   : > { %v303_v23 = vpack.c.bf16 %v206_v33, %v205_v16 }
 0x17f   : > { %6365 = vmatmul.mubr.msk.bf16.gmra.mrb[52].mxu1 %vm539_vm1, %v300_v36 }
 0x180   : > { %6625 = vmatmul.mubr.msk.bf16.gmra.mrb[52].mxu0 %vm539_vm1, %v7425_v32  ;;  %6368 = vmatprep.mubr.msk.bf16.mxu1 %vm539_vm1, %v301_v31  ;;  %v207_v32 = vld [vmem:[%s7157_s22 + $0x268] sm:$0xff]  ;;  %v244_v31 = vld [vmem:[%s7157_s22 + $0x3d8] sm:$0xff] }
 0x181   : > { %6628 = vmatprep.mubr.msk.bf16.mxu0 %vm539_vm1, %v7427_v37  ;;  %v209_v37 = vld [vmem:[%s7157_s22 + $0x280] sm:$0xff]  ;;  %v304_v27 = vpack.c.bf16 %v208_v46, %v207_v32  ;;  %v10559_v32 = vld [vmem:[#allocation4_spill] sm:$0xff] }
 0x182   : > { %v305_v49 = vpack.c.bf16 %v210_v45, %v209_v37  ;;  %v249_v46 = vld [vmem:[%s7157_s22 + $0x410] sm:$0xff]  ;;  %v250_v37 = vld [vmem:[%s7157_s22 + $0x418] sm:$0xff] }
 0x187   : > { %6369 = vmatmul.mubr.msk.bf16.gmra.mrb[56].mxu1 %vm539_vm1, %v302_v7  ;;  %v10558_v7 = vld [vmem:[#allocation3_spill] sm:$0xff] }
 0x188   : > { %6629 = vmatmul.mubr.msk.bf16.gmra.mrb[56].mxu0 %vm539_vm1, %v7443_v53  ;;  %6372 = vmatprep.mubr.msk.bf16.mxu1 %vm539_vm1, %v303_v23  ;;  %v211_v53 = vld [vmem:[%s7157_s22 + $0x290] sm:$0xff]  ;;  %v248_v23 = vld [vmem:[%s7157_s22 + $0x400] sm:$0xff] }
 0x189   : > { %6632 = vmatprep.mubr.msk.bf16.mxu0 %vm539_vm1, %v7445_v55  ;;  %v213_v55 = vld [vmem:[%s7157_s22 + $0x2a8] sm:$0xff]  ;;  %v306_v15 = vpack.c.bf16 %v212_v48, %v211_v53  ;;  %v251_v53 = vld [vmem:[%s7157_s22 + $0x420] sm:$0xff] }
 0x18a   : > { %v307_v61 = vpack.c.bf16 %v214_v3, %v213_v55  ;;  %v252_v48 = vld [vmem:[%s7157_s22 + $0x428] sm:$0xff]  ;;  %v10561_v55 = vld [vmem:[#allocation6_spill] sm:$0xff]  ;;  %v253_v3 = vld [vmem:[%s7157_s22 + $0x438] sm:$0xff] }
 0x18f   : > { %6373 = vmatmul.mubr.msk.bf16.gmra.mrb[60].mxu1 %vm539_vm1, %v304_v27  ;;  %v325_v27 = vpack.c.bf16 %v250_v37, %v249_v46 }
 0x190   : > { %6633 = vmatmul.mubr.msk.bf16.gmra.mrb[60].mxu0 %vm539_vm1, %v7461_v9  ;;  %6376 = vmatprep.mubr.msk.bf16.mxu1 %vm539_vm1, %v305_v49  ;;  %v215_v9 = vld [vmem:[%s7157_s22 + $0x2b8] sm:$0xff] }
 0x191   : > { %6636 = vmatprep.mubr.msk.bf16.mxu0 %vm539_vm1, %v7463_v12  ;;  %v217_v12 = vld [vmem:[%s7157_s22 + $0x2d0] sm:$0xff]  ;;  %v308_v58 = vpack.c.bf16 %v216_v35, %v215_v9  ;;  %v10560_v49 = vld [vmem:[#allocation5_spill] sm:$0xff]  ;;  %v326_v35 = vpack.c.bf16 %v252_v48, %v251_v53 }
 0x192   : > { %v309_v39 = vpack.c.bf16 %v218_v63, %v217_v12  ;;  %v5831_v9 = vld [vmem:[%s7157_s22 + $0x469] sm:$0xff] }
 0x197   : > { %6377 = vmatmul.mubr.msk.bf16.gmra.mrb[64].mxu1 %vm539_vm1, %v306_v15  ;;  %v254_v15 = vld [vmem:[%s7157_s22 + $0x440] sm:$0xff] }
 0x198   : > { %6637 = vmatmul.mubr.msk.bf16.gmra.mrb[64].mxu0 %vm539_vm1, %v7479_v30  ;;  %6380 = vmatprep.mubr.msk.bf16.mxu1 %vm539_vm1, %v307_v61  ;;  %v219_v30 = vld [vmem:[%s7157_s22 + $0x2e0] sm:$0xff]  ;;  %v327_v12 = vpack.c.bf16 %v254_v15, %v253_v3 }
 0x199   : > { %6640 = vmatprep.mubr.msk.bf16.mxu0 %vm539_vm1, %v7481_v38  ;;  %v221_v38 = vld [vmem:[%s7157_s22 + $0x2f8] sm:$0xff]  ;;  %v310_v29 = vpack.c.bf16 %v220_v60, %v219_v30  ;;  %v5830_v61 = vld [vmem:[%s7157_s22 + $0x461] sm:$0xff]  ;;  %v256_v30 = vld [vmem:[%s7157_s22 + $0x450] sm:$0xff] }
 0x19a   : > { %v311_v13 = vpack.c.bf16 %v222_v11, %v221_v38  ;;  %v3277_v63 = vpack.c.bf16 %v5831_v9, %v5830_v61  ;;  %v5832_v60 = vld [vmem:[%s7157_s22 + $0x471] sm:$0xff]  ;;  %v5833_v38 = vld [vmem:[%s7157_s22 + $0x479] sm:$0xff] }
 0x19b   : > { %v257_v11 = vld [vmem:[%s7157_s22 + $0x460] sm:$0xff] }
 0x19f   : > { %6381 = vmatmul.mubr.msk.bf16.gmra.mrb[68].mxu1 %vm539_vm1, %v308_v58  ;;  %v10562_v58 = vld [vmem:[#allocation7_spill] sm:$0xff] }
 0x1a0   : > { %6641 = vmatmul.mubr.msk.bf16.gmra.mrb[68].mxu0 %vm539_vm1, %v7497_v56  ;;  %6384 = vmatprep.mubr.msk.bf16.mxu1 %vm539_vm1, %v309_v39  ;;  %v223_v56 = vld [vmem:[%s7157_s22 + $0x308] sm:$0xff] }
 0x1a1   : > { %6644 = vmatprep.mubr.msk.bf16.mxu0 %vm539_vm1, %v7499_v62  ;;  %v225_v62 = vld [vmem:[%s7157_s22 + $0x320] sm:$0xff]  ;;  %v312_v6 = vpack.c.bf16 %v224_v41, %v223_v56  ;;  %v255_v39 = vld [vmem:[%s7157_s22 + $0x448] sm:$0xff]  ;;  %v5835_v41 = vld [vmem:[%s7157_s22 + $0x491] sm:$0xff] }
 0x1a2   : > { %v313_v26 = vpack.c.bf16 %v226_v50, %v225_v62  ;;  %v5834_v56 = vld [vmem:[%s7157_s22 + $0x489] sm:$0xff] }
 0x1a7   : > { %6385 = vmatmul.mubr.msk.bf16.gmra.mrb[72].mxu1 %vm539_vm1, %v310_v29  ;;  %v258_v29 = vld [vmem:[%s7157_s22 + $0x468] sm:$0xff] }
 0x1a8   : > { %6645 = vmatmul.mubr.msk.bf16.gmra.mrb[72].mxu0 %vm539_vm1, %v7515_v19  ;;  %6388 = vmatprep.mubr.msk.bf16.mxu1 %vm539_vm1, %v311_v13  ;;  %v227_v19 = vld [vmem:[%s7157_s22 + $0x330] sm:$0xff] }
 0x1a9   : > { %6648 = vmatprep.mubr.msk.bf16.mxu0 %vm539_vm1, %v7517_v22  ;;  %v229_v22 = vld [vmem:[%s7157_s22 + $0x348] sm:$0xff]  ;;  %v314_v8 = vpack.c.bf16 %v228_v40, %v227_v19 }
 0x1aa   : > { %v315_v24 = vpack.c.bf16 %v230_v28, %v229_v22  ;;  %v3278_v22 = vpack.c.bf16 %v5833_v38, %v5832_v60  ;;  %v329_v28 = vpack.c.bf16 %v258_v29, %v257_v11  ;;  %v263_v38 = vld [vmem:[%s7157_s22 + $0x498] sm:$0xff]  ;;  %v264_v11 = vld [vmem:[%s7157_s22 + $0x4a0] sm:$0xff] }
 0x1ab   : > { %v5840_v29 = vld [vmem:[%s7157_s22 + $0x4c1] sm:$0xff] }
 0x1af   : > { %6389 = vmatmul.mubr.msk.bf16.gmra.mrb[76].mxu1 %vm539_vm1, %v312_v6  ;;  %v328_v6 = vpack.c.bf16 %v256_v30, %v255_v39 }
 0x1b0   : > { %6649 = vmatmul.mubr.msk.bf16.gmra.mrb[76].mxu0 %vm539_vm1, %v7533_v47  ;;  %6392 = vmatprep.mubr.msk.bf16.mxu1 %vm539_vm1, %v313_v26  ;;  %v231_v47 = vld [vmem:[%s7157_s22 + $0x358] sm:$0xff] }
 0x1b1   : > { %6652 = vmatprep.mubr.msk.bf16.mxu0 %vm539_vm1, %v7535_v51  ;;  %v233_v51 = vld [vmem:[%s7157_s22 + $0x370] sm:$0xff]  ;;  %v316_v57 = vpack.c.bf16 %v232_v54, %v231_v47  ;;  %v3279_v54 = vpack.c.bf16 %v5835_v41, %v5834_v56 }
 0x1b2   : > { %v317_v44 = vpack.c.bf16 %v234_v42, %v233_v51  ;;  %v5841_v41 = vld [vmem:[%s7157_s22 + $0x4c9] sm:$0xff] }
 0x1b7   : > { %6393 = vmatmul.mubr.msk.bf16.gmra.mrb[80].mxu1 %vm539_vm1, %v314_v8 }
 0x1b8   : > { %6653 = vmatmul.mubr.msk.bf16.gmra.mrb[80].mxu0 %vm539_vm1, %v7551_v10  ;;  %6396 = vmatprep.mubr.msk.bf16.mxu1 %vm539_vm1, %v315_v24  ;;  %v235_v10 = vld [vmem:[%s7157_s22 + $0x380] sm:$0xff] }
 0x1b9   : > { %6656 = vmatprep.mubr.msk.bf16.mxu0 %vm539_vm1, %v7553_v17  ;;  %v237_v17 = vld [vmem:[%s7157_s22 + $0x398] sm:$0xff]  ;;  %v318_v20 = vpack.c.bf16 %v236_v18, %v235_v10  ;;  %v259_v10 = vld [vmem:[%s7157_s22 + $0x470] sm:$0xff] }
 0x1ba   : > { %v319_v59 = vpack.c.bf16 %v238_v2, %v237_v17  ;;  %v260_v18 = vld [vmem:[%s7157_s22 + $0x478] sm:$0xff]  ;;  %v5837_v2 = vld [vmem:[%s7157_s22 + $0x4a1] sm:$0xff] }
 0x1bb   : > { %v5836_v17 = vld [vmem:[%s7157_s22 + $0x499] sm:$0xff] }
 0x1bf   : > { %6397 = vmatmul.mubr.msk.bf16.gmra.mrb[84].mxu1 %vm539_vm1, %v316_v57 }
 0x1c0   : > { %6657 = vmatmul.mubr.msk.bf16.gmra.mrb[84].mxu0 %vm539_vm1, %v7569_v43  ;;  %6400 = vmatprep.mubr.msk.bf16.mxu1 %vm539_vm1, %v317_v44  ;;  %v239_v43 = vld [vmem:[%s7157_s22 + $0x3a8] sm:$0xff] }
 0x1c1   : > { %6660 = vmatprep.mubr.msk.bf16.mxu0 %vm539_vm1, %v7571_v52  ;;  %v241_v52 = vld [vmem:[%s7157_s22 + $0x3c0] sm:$0xff]  ;;  %v320_v4 = vpack.c.bf16 %v240_v34, %v239_v43 }
 0x1c2   : > { %v321_v36 = vpack.c.bf16 %v242_v0, %v241_v52  ;;  %v261_v52 = vld [vmem:[%s7157_s22 + $0x488] sm:$0xff]  ;;  %v262_v0 = vld [vmem:[%s7157_s22 + $0x490] sm:$0xff] }
 0x1c7   : > { %6401 = vmatmul.mubr.msk.bf16.gmra.mrb[88].mxu1 %vm539_vm1, %v318_v20 }
 0x1c8   : > { %6661 = vmatmul.mubr.msk.bf16.gmra.mrb[88].mxu0 %vm539_vm1, %v7587_v21  ;;  %6404 = vmatprep.mubr.msk.bf16.mxu1 %vm539_vm1, %v319_v59  ;;  %v243_v21 = vld [vmem:[%s7157_s22 + $0x3d0] sm:$0xff] }
 0x1c9   : > { %6664 = vmatprep.mubr.msk.bf16.mxu0 %vm539_vm1, %v7589_v25  ;;  %v245_v25 = vld [vmem:[%s7157_s22 + $0x3e8] sm:$0xff]  ;;  %v322_v16 = vpack.c.bf16 %v244_v31, %v243_v21  ;;  %v330_v31 = vpack.c.bf16 %v260_v18, %v259_v10 }
 0x1ca   : > { %v323_v33 = vpack.c.bf16 %v246_v5, %v245_v25  ;;  %v5839_v25 = vld [vmem:[%s7157_s22 + $0x4b9] sm:$0xff] }
 0x1cf   : > { %6405 = vmatmul.mubr.msk.bf16.gmra.mrb[92].mxu1 %vm539_vm1, %v320_v4 }
 0x1d0   : > { %6665 = vmatmul.mubr.msk.bf16.gmra.mrb[92].mxu0 %vm539_vm1, %v7605_v1  ;;  %6408 = vmatprep.mubr.msk.bf16.mxu1 %vm539_vm1, %v321_v36  ;;  %v247_v1 = vld [vmem:[%s7157_s22 + $0x3f8] sm:$0xff] }
 0x1d1   : > { %6668 = vmatprep.mubr.msk.bf16.mxu0 %vm539_vm1, %v10557_v14  ;;  %v324_v45 = vpack.c.bf16 %v248_v23, %v247_v1  ;;  %v5838_v14 = vld [vmem:[%s7157_s22 + $0x4b1] sm:$0xff]  ;;  %v3280_v23 = vpack.c.bf16 %v5837_v2, %v5836_v17  ;;  %v332_v17 = vpack.c.bf16 %v264_v11, %v263_v38  ;;  %v3282_v2 = vpack.c.bf16 %v5841_v41, %v5840_v29 }
 0x1d2   : > { %v3281_v61 = vpack.c.bf16 %v5839_v25, %v5838_v14 }
 0x1d7   : > { %6409 = vmatmul.mubr.msk.bf16.gmra.mrb[96].mxu1 %vm539_vm1, %v322_v16 }
 0x1d8   : > { %6669 = vmatmul.mubr.msk.bf16.gmra.mrb[96].mxu0 %vm539_vm1, %v10558_v7  ;;  %6412 = vmatprep.mubr.msk.bf16.mxu1 %vm539_vm1, %v323_v33 }
 0x1d9   : > { %6672 = vmatprep.mubr.msk.bf16.mxu0 %vm539_vm1, %v10559_v32 }
 0x1df   : > { %6413 = vmatmul.mubr.msk.bf16.gmra.mrb[100].mxu1 %vm539_vm1, %v324_v45 }
 0x1e0   : > { %6673 = vmatmul.mubr.msk.bf16.gmra.mrb[100].mxu0 %vm539_vm1, %v10560_v49  ;;  %6416 = vmatprep.mubr.msk.bf16.mxu1 %vm539_vm1, %v325_v27  ;;  %v331_v49 = vpack.c.bf16 %v262_v0, %v261_v52 }
 0x1e1   : > { %6676 = vmatprep.mubr.msk.bf16.mxu0 %vm539_vm1, %v10561_v55 }
 0x1e7   : > { %6417 = vmatmul.mubr.msk.bf16.gmra.mrb[104].mxu1 %vm539_vm1, %v326_v35 }
 0x1e8   : > { %6677 = vmatmul.mubr.msk.bf16.gmra.mrb[104].mxu0 %vm539_vm1, %v10562_v58  ;;  %6420 = vmatprep.mubr.msk.bf16.mxu1 %vm539_vm1, %v327_v12 }
 0x1e9   : > { %6680 = vmatprep.mubr.msk.bf16.mxu0 %vm539_vm1, %v3277_v63 }
 0x1ea   : > { %v6314_v13 = vpop.f32.mrb[0].mxu1 }
 0x1eb   : > { %v6574_v62 = vpop.f32.mrb[0].mxu0  ;;  %v1515_v50 = vpop.f32.mrb[1].mxu1 }
 0x1ec   : > { %v7992_v26 = vadd.f32 %v6574_v62, %v6314_v13  ;;  %v3524_v19 = vpop.f32.mrb[1].mxu0  ;;  %v6315_v40 = vpop.f32.mrb[2].mxu1  ;;  %v265_v62 = vld [vmem:[%s7157_s22 + $0x4b0] sm:$0xff] }
 0x1ed   : > { %v7994_v8 = vadd.f32 %v3524_v19, %v1515_v50  ;;  %v6575_v24 = vpop.f32.mrb[2].mxu0  ;;  %v1518_v47 = vpop.f32.mrb[3].mxu1  ;;  %v266_v50 = vld [vmem:[%s7157_s22 + $0x4b8] sm:$0xff] }
 0x1ee   : > { %v7996_v51 = vadd.f32 %v6575_v24, %v6315_v40  ;;  %v3527_v42 = vpop.f32.mrb[3].mxu0  ;;  %v4428_v20 = vmul.f32 %v7992_v26, %v7992_v26  ;;  %v4167_v5 = vsel %vm4163_vm2, %v7992_v26, 0.0 }
 0x1ef   : > { %v4426_v57 = vmul.f32 %v7994_v8, %v7994_v8  ;;  %v8000_v44 = vadd.f32 %v3527_v42, %v1518_v47  ;;  %6421 = vmatmul.mubr.msk.bf16.gmra.mrb[108].mxu1 %vm539_vm1, %v328_v6  ;;  %v4164_v59 = vsel %vm4163_vm2, %v7994_v8, 0.0  ;;  %v5843_v42 = vld [vmem:[%s7157_s22 + $0x4e1] sm:$0xff] }
 0x1f0   : > { %6681 = vmatmul.mubr.msk.bf16.gmra.mrb[108].mxu0 %vm539_vm1, %v3278_v22  ;;  %6424 = vmatprep.mubr.msk.bf16.mxu1 %vm539_vm1, %v329_v28  ;;  %v4429_v4 = vmul.f32 %v7996_v51, %v7996_v51  ;;  %v4557_v53 = vsel %vm4163_vm2, %v4428_v20, 0.0  ;;  %v4169_v48 = vsel %vm4163_vm2, %v7996_v51, 0.0  ;;  %v333_v20 = vpack.c.bf16 %v266_v50, %v265_v62 }
 0x1f1   : > { %v4165_v43 = vsel %vm4163_vm2, %v8000_v44, 0.0  ;;  %v4427_v34 = vmul.f32 %v8000_v44, %v8000_v44  ;;  %6684 = vmatprep.mubr.msk.bf16.mxu0 %vm539_vm1, %v3279_v54  ;;  %v4554_v16 = vsel %vm4163_vm2, %v4426_v57, 0.0  ;;  %v5842_v54 = vld [vmem:[%s7157_s22 + $0x4d9] sm:$0xff] }
 0x1f2   : > { %v4166_v36 = vadd.f32 %v4165_v43, %v4164_v59  ;;  %v6318_v21 = vpop.f32.mrb[4].mxu1  ;;  %v4559_v9 = vsel %vm4163_vm2, %v4429_v4, 0.0 }
 0x1f3   : > { %v4555_v33 = vsel %vm4163_vm2, %v4427_v34, 0.0  ;;  %v6578_v7 = vpop.f32.mrb[4].mxu0  ;;  %v1531_v1 = vpop.f32.mrb[5].mxu1 }
 0x1f4   : > { %v4168_v32 = vadd.f32 %v4167_v5, %v4166_v36  ;;  %v4556_v46 = vadd.f32 %v4555_v33, %v4554_v16  ;;  %v8028_v37 = vadd.f32 %v6578_v7, %v6318_v21  ;;  %v3540_v45 = vpop.f32.mrb[5].mxu0  ;;  %v6319_v27 = vpop.f32.mrb[6].mxu1  ;;  %v3283_v5 = vpack.c.bf16 %v5843_v42, %v5842_v54 }
 0x1f5   : > { %v8033_v55 = vadd.f32 %v3540_v45, %v1531_v1  ;;  %v6579_v3 = vpop.f32.mrb[6].mxu0  ;;  %v1534_v15 = vpop.f32.mrb[7].mxu1 }
 0x1f6   : > { %v4170_v35 = vadd.f32 %v4169_v48, %v4168_v32  ;;  %v4558_v12 = vadd.f32 %v4557_v53, %v4556_v46  ;;  %v3543_v63 = vpop.f32.mrb[7].mxu0  ;;  %v8040_v30 = vadd.f32 %v6579_v3, %v6319_v27  ;;  %v4432_v40 = vmul.f32 %v8028_v37, %v8028_v37  ;;  %v267_v27 = vld [vmem:[%s7157_s22 + $0x4c0] sm:$0xff]  ;;  %v5844_v3 = vld [vmem:[%s7157_s22 + $0x4e9] sm:$0xff] }
 0x1f7   : > { %v4171_v58 = vsel %vm4163_vm2, %v8033_v55, 0.0  ;;  %v4430_v39 = vmul.f32 %v8033_v55, %v8033_v55  ;;  %v8042_v60 = vadd.f32 %v3543_v63, %v1534_v15  ;;  %6425 = vmatmul.mubr.msk.bf16.gmra.mrb[112].mxu1 %vm539_vm1, %v330_v31  ;;  %v4175_v57 = vsel %vm4163_vm2, %v8028_v37, 0.0  ;;  %v5845_v15 = vld [vmem:[%s7157_s22 + $0x4f1] sm:$0xff] }
 0x1f8   : > { %v4560_v13 = vadd.f32 %v4559_v9, %v4558_v12  ;;  %v4172_v56 = vadd.f32 %v4171_v58, %v4170_v35  ;;  %6685 = vmatmul.mubr.msk.bf16.gmra.mrb[112].mxu0 %vm539_vm1, %v3280_v23  ;;  %6428 = vmatprep.mubr.msk.bf16.mxu1 %vm539_vm1, %v331_v49  ;;  %v4433_v59 = vmul.f32 %v8040_v30, %v8040_v30  ;;  %v4177_v36 = vsel %vm4163_vm2, %v8040_v30, 0.0  ;;  %v268_v49 = vld [vmem:[%s7157_s22 + $0x4c8] sm:$0xff]  ;;  %v269_v63 = vld [vmem:[%s7157_s22 + $0x4d8] sm:$0xff]  ;;  %v270_v58 = vld [vmem:[%s7157_s22 + $0x4e0] sm:$0xff] }
 0x1f9   : > { %v4561_v6 = vsel %vm4163_vm2, %v4430_v39, 0.0  ;;  %v4173_v19 = vsel %vm4163_vm2, %v8042_v60, 0.0  ;;  %6688 = vmatprep.mubr.msk.bf16.mxu0 %vm539_vm1, %v3281_v61  ;;  %v4431_v24 = vmul.f32 %v8042_v60, %v8042_v60  ;;  %v4565_v16 = vsel %vm4163_vm2, %v4432_v40, 0.0 }
 0x1fa   : > { %v4562_v22 = vadd.f32 %v4561_v6, %v4560_v13  ;;  %v4174_v28 = vadd.f32 %v4173_v19, %v4172_v56  ;;  %v6322_v47 = vpop.f32.mrb[8].mxu1  ;;  %v4567_v53 = vsel %vm4163_vm2, %v4433_v59, 0.0  ;;  %v334_v29 = vpack.c.bf16 %v268_v49, %v267_v27  ;;  %v5846_v13 = vld [vmem:[%s7157_s22 + $0x501] sm:$0xff]  ;;  %v5847_v56 = vld [vmem:[%s7157_s22 + $0x509] sm:$0xff]  ;;  %v5848_v27 = vld [vmem:[%s7157_s22 + $0x511] sm:$0xff] }
 0x1fb   : > { %v6582_v10 = vpop.f32.mrb[8].mxu0  ;;  %v1547_v18 = vpop.f32.mrb[9].mxu1  ;;  %v4563_v34 = vsel %vm4163_vm2, %v4431_v24, 0.0  ;;  %v3284_v40 = vpack.c.bf16 %v5845_v15, %v5844_v3  ;;  %v335_v42 = vpack.c.bf16 %v270_v58, %v269_v63  ;;  %v5849_v49 = vld [vmem:[%s7157_s22 + $0x519] sm:$0xff] }
 0x1fc   : > { %v4176_v43 = vadd.f32 %v4175_v57, %v4174_v28  ;;  %v8068_v52 = vadd.f32 %v6582_v10, %v6322_v47  ;;  %v3556_v0 = vpop.f32.mrb[9].mxu0  ;;  %v6323_v4 = vpop.f32.mrb[10].mxu1  ;;  %v4564_v21 = vadd.f32 %v4563_v34, %v4562_v22 }
 0x1fd   : > { %v8072_v31 = vadd.f32 %v3556_v0, %v1547_v18  ;;  %v6583_v14 = vpop.f32.mrb[10].mxu0  ;;  %v1550_v25 = vpop.f32.mrb[11].mxu1 }
 0x1fe   : > { %v4178_v33 = vadd.f32 %v4177_v36, %v4176_v43  ;;  %v8075_v7 = vadd.f32 %v6583_v14, %v6323_v4  ;;  %v3559_v1 = vpop.f32.mrb[11].mxu0  ;;  %v4566_v23 = vadd.f32 %v4565_v16, %v4564_v21  ;;  %v4436_v39 = vmul.f32 %v8068_v52, %v8068_v52  ;;  %v271_v16 = vld [vmem:[%s7157_s22 + $0x4e8] sm:$0xff] }
 0x1ff   : > { %v4179_v32 = vsel %vm4163_vm2, %v8072_v31, 0.0  ;;  %v4434_v46 = vmul.f32 %v8072_v31, %v8072_v31  ;;  %v8081_v45 = vadd.f32 %v3559_v1, %v1550_v25  ;;  %6429 = vmatmul.mubr.msk.bf16.gmra.mrb[116].mxu1 %vm539_vm1, %v332_v17  ;;  %v4183_v41 = vsel %vm4163_vm2, %v8068_v52, 0.0 }
 0x200   : > { %v4180_v48 = vadd.f32 %v4179_v32, %v4178_v33  ;;  %6689 = vmatmul.mubr.msk.bf16.gmra.mrb[116].mxu0 %vm539_vm1, %v3282_v2  ;;  %6432 = vmatprep.mubr.msk.bf16.mxu1 %vm539_vm1, %v333_v20  ;;  %v4568_v61 = vadd.f32 %v4567_v53, %v4566_v23  ;;  %v4437_v22 = vmul.f32 %v8075_v7, %v8075_v7  ;;  %v4185_v57 = vsel %vm4163_vm2, %v8075_v7, 0.0  ;;  %v272_v33 = vld [vmem:[%s7157_s22 + $0x4f0] sm:$0xff] }
 0x201   : > { %v4569_v9 = vsel %vm4163_vm2, %v4434_v46, 0.0  ;;  %v4181_v35 = vsel %vm4163_vm2, %v8081_v45, 0.0  ;;  %v4435_v12 = vmul.f32 %v8081_v45, %v8081_v45  ;;  %6692 = vmatprep.mubr.msk.bf16.mxu0 %vm539_vm1, %v3283_v5  ;;  %v3285_v20 = vpack.c.bf16 %v5847_v56, %v5846_v13 }
 0x202   : > { %v4182_v38 = vadd.f32 %v4181_v35, %v4180_v48  ;;  %v6326_v11 = vpop.f32.mrb[12].mxu1  ;;  %v4570_v62 = vadd.f32 %v4569_v9, %v4568_v61  ;;  %v4573_v59 = vsel %vm4163_vm2, %v4436_v39, 0.0  ;;  %v4575_v25 = vsel %vm4163_vm2, %v4437_v22, 0.0 }
 0x203   : > { %v4571_v50 = vsel %vm4163_vm2, %v4435_v12, 0.0  ;;  %v6586_v6 = vpop.f32.mrb[12].mxu0  ;;  %v1563_v19 = vpop.f32.mrb[13].mxu1  ;;  %v336_v63 = vpack.c.bf16 %v272_v33, %v271_v16  ;;  %v3286_v13 = vpack.c.bf16 %v5849_v49, %v5848_v27 }
 0x204   : > { %v4184_v28 = vadd.f32 %v4183_v41, %v4182_v38  ;;  %v8108_v24 = vadd.f32 %v6586_v6, %v6326_v11  ;;  %v3572_v47 = vpop.f32.mrb[13].mxu0  ;;  %v6327_v54 = vpop.f32.mrb[14].mxu1  ;;  %v4572_v10 = vadd.f32 %v4571_v50, %v4570_v62 }
 0x205   : > { %v8112_v18 = vadd.f32 %v3572_v47, %v1563_v19  ;;  %v6587_v17 = vpop.f32.mrb[14].mxu0  ;;  %v1566_v2 = vpop.f32.mrb[15].mxu1 }
 0x206   : > { %v4186_v43 = vadd.f32 %v4185_v57, %v4184_v28  ;;  %v8115_v34 = vadd.f32 %v6587_v17, %v6327_v54  ;;  %v3575_v0 = vpop.f32.mrb[15].mxu0  ;;  %v4574_v4 = vadd.f32 %v4573_v59, %v4572_v10  ;;  %v4440_v53 = vmul.f32 %v8108_v24, %v8108_v24 }
 0x207   : > { %v4187_v36 = vsel %vm4163_vm2, %v8112_v18, 0.0  ;;  %v4438_v21 = vmul.f32 %v8112_v18, %v8112_v18  ;;  %v8121_v14 = vadd.f32 %v3575_v0, %v1566_v2  ;;  %6433 = vmatmul.mubr.msk.bf16.gmra.mrb[120].mxu1 %vm539_vm1, %v334_v29  ;;  %v4191_v15 = vsel %vm4163_vm2, %v8108_v24, 0.0 }
 0x208   : > { %v4188_v5 = vadd.f32 %v4187_v36, %v4186_v43  ;;  %6693 = vmatmul.mubr.msk.bf16.gmra.mrb[120].mxu0 %vm539_vm1, %v3284_v40  ;;  %6436 = vmatprep.mubr.msk.bf16.mxu1 %vm539_vm1, %v335_v42  ;;  %v4576_v1 = vadd.f32 %v4575_v25, %v4574_v4  ;;  %v4441_v58 = vmul.f32 %v8115_v34, %v8115_v34  ;;  %v4193_v56 = vsel %vm4163_vm2, %v8115_v34, 0.0 }
 0x209   : > { %v4577_v23 = vsel %vm4163_vm2, %v4438_v21, 0.0  ;;  %v4189_v32 = vsel %vm4163_vm2, %v8121_v14, 0.0  ;;  %v4439_v46 = vmul.f32 %v8121_v14, %v8121_v14  ;;  %6696 = vmatprep.mubr.msk.bf16.mxu0 %vm539_vm1, %v3285_v20  ;;  %v4581_v19 = vsel %vm4163_vm2, %v4440_v53, 0.0 }
 0x20a   : > { %v4190_v48 = vadd.f32 %v4189_v32, %v4188_v5  ;;  %v6330_v3 = vpop.f32.mrb[16].mxu1  ;;  %v4578_v61 = vadd.f32 %v4577_v23, %v4576_v1  ;;  %v4583_v10 = vsel %vm4163_vm2, %v4441_v58, 0.0 }
 0x20b   : > { %v4579_v9 = vsel %vm4163_vm2, %v4439_v46, 0.0  ;;  %v6590_v35 = vpop.f32.mrb[16].mxu0  ;;  %v1579_v12 = vpop.f32.mrb[17].mxu1 }
 0x20c   : > { %v4192_v39 = vadd.f32 %v4191_v15, %v4190_v48  ;;  %v8144_v38 = vadd.f32 %v6590_v35, %v6330_v3  ;;  %v3588_v11 = vpop.f32.mrb[17].mxu0  ;;  %v6331_v29 = vpop.f32.mrb[18].mxu1  ;;  %v4580_v41 = vadd.f32 %v4579_v9, %v4578_v61 }
 0x20d   : > { %v8148_v62 = vadd.f32 %v3588_v11, %v1579_v12  ;;  %v6591_v50 = vpop.f32.mrb[18].mxu0  ;;  %v1582_v6 = vpop.f32.mrb[19].mxu1 }
 0x20e   : > { %v4194_v40 = vadd.f32 %v4193_v56, %v4192_v39  ;;  %v8151_v22 = vadd.f32 %v6591_v50, %v6331_v29  ;;  %v3591_v28 = vpop.f32.mrb[19].mxu0  ;;  %v4582_v47 = vadd.f32 %v4581_v19, %v4580_v41  ;;  %v4444_v0 = vmul.f32 %v8144_v38, %v8144_v38 }
 0x20f   : > { %v4195_v54 = vsel %vm4163_vm2, %v8148_v62, 0.0  ;;  %v4442_v42 = vmul.f32 %v8148_v62, %v8148_v62  ;;  %v8157_v57 = vadd.f32 %v3591_v28, %v1582_v6  ;;  %6437 = vmatmul.mubr.msk.bf16.gmra.mrb[124].mxu1 %vm539_vm1, %v336_v63  ;;  %v4199_v21 = vsel %vm4163_vm2, %v8144_v38, 0.0 }
 0x210   : > { %v4196_v17 = vadd.f32 %v4195_v54, %v4194_v40  ;;  %6697 = vmatmul.mubr.msk.bf16.gmra.mrb[124].mxu0 %vm539_vm1, %v3286_v13  ;;  %v4584_v2 = vadd.f32 %v4583_v10, %v4582_v47  ;;  %v4445_v1 = vmul.f32 %v8151_v22, %v8151_v22  ;;  %v4201_v49 = vsel %vm4163_vm2, %v8151_v22, 0.0 }
 0x211   : > { %v4585_v20 = vsel %vm4163_vm2, %v4442_v42, 0.0  ;;  %v4197_v59 = vsel %vm4163_vm2, %v8157_v57, 0.0  ;;  %v4443_v43 = vmul.f32 %v8157_v57, %v8157_v57  ;;  %v4589_v61 = vsel %vm4163_vm2, %v4444_v0, 0.0 }
 0x212   : > { %v4198_v4 = vadd.f32 %v4197_v59, %v4196_v17  ;;  %v6334_v36 = vpop.f32.mrb[20].mxu1  ;;  %v4586_v25 = vadd.f32 %v4585_v20, %v4584_v2  ;;  %v4591_v29 = vsel %vm4163_vm2, %v4445_v1, 0.0 }
 0x213   : > { %v4587_v5 = vsel %vm4163_vm2, %v4443_v43, 0.0  ;;  %v6594_v16 = vpop.f32.mrb[20].mxu0  ;;  %v1595_v33 = vpop.f32.mrb[21].mxu1 }
 0x214   : > { %v4200_v23 = vadd.f32 %v4199_v21, %v4198_v4  ;;  %v8174_v32 = vadd.f32 %v6594_v16, %v6334_v36  ;;  %v3604_v46 = vpop.f32.mrb[21].mxu0  ;;  %v6335_v27 = vpop.f32.mrb[22].mxu1  ;;  %v4588_v53 = vadd.f32 %v4587_v5, %v4586_v25 }
 0x215   : > { %v8178_v48 = vadd.f32 %v3604_v46, %v1595_v33  ;;  %v6595_v3 = vpop.f32.mrb[22].mxu0  ;;  %v1598_v15 = vpop.f32.mrb[23].mxu1 }
 0x216   : > { %v4202_v9 = vadd.f32 %v4201_v49, %v4200_v23  ;;  %v8181_v35 = vadd.f32 %v6595_v3, %v6335_v27  ;;  %v3607_v12 = vpop.f32.mrb[23].mxu0  ;;  %v4590_v63 = vadd.f32 %v4589_v61, %v4588_v53  ;;  %v4448_v19 = vmul.f32 %v8174_v32, %v8174_v32 }
 0x217   : > { %v4203_v58 = vsel %vm4163_vm2, %v8178_v48, 0.0  ;;  %v4446_v39 = vmul.f32 %v8178_v48, %v8178_v48  ;;  %v8187_v11 = vadd.f32 %v3607_v12, %v1598_v15  ;;  %v4207_v47 = vsel %vm4163_vm2, %v8174_v32, 0.0 }
 0x218   : > { %v4204_v13 = vadd.f32 %v4203_v58, %v4202_v9  ;;  %v4592_v56 = vadd.f32 %v4591_v29, %v4590_v63  ;;  %v4449_v2 = vmul.f32 %v8181_v35, %v8181_v35  ;;  %v4209_v4 = vsel %vm4163_vm2, %v8181_v35, 0.0 }
 0x219   : > { %v4593_v41 = vsel %vm4163_vm2, %v4446_v39, 0.0  ;;  %v4205_v50 = vsel %vm4163_vm2, %v8187_v11, 0.0  ;;  %v4447_v6 = vmul.f32 %v8187_v11, %v8187_v11  ;;  %v4597_v16 = vsel %vm4163_vm2, %v4448_v19, 0.0 }
 0x21a   : > { %v4206_v40 = vadd.f32 %v4205_v50, %v4204_v13  ;;  %v6338_v28 = vpop.f32.mrb[24].mxu1  ;;  %v4594_v54 = vadd.f32 %v4593_v41, %v4592_v56  ;;  %v4599_v3 = vsel %vm4163_vm2, %v4449_v2, 0.0 }
 0x21b   : > { %v4595_v42 = vsel %vm4163_vm2, %v4447_v6, 0.0  ;;  %v6598_v10 = vpop.f32.mrb[24].mxu0  ;;  %v1611_v17 = vpop.f32.mrb[25].mxu1 }
 0x21c   : > { %v4208_v20 = vadd.f32 %v4207_v47, %v4206_v40  ;;  %v8202_v59 = vadd.f32 %v6598_v10, %v6338_v28  ;;  %v3620_v43 = vpop.f32.mrb[25].mxu0  ;;  %v6339_v0 = vpop.f32.mrb[26].mxu1  ;;  %v4596_v36 = vadd.f32 %v4595_v42, %v4594_v54 }
 0x21d   : > { %v8206_v21 = vadd.f32 %v3620_v43, %v1611_v17  ;;  %v6599_v25 = vpop.f32.mrb[26].mxu0  ;;  %v1614_v5 = vpop.f32.mrb[27].mxu1 }
 0x21e   : > { %v4210_v33 = vadd.f32 %v4209_v4, %v4208_v20  ;;  %v8209_v1 = vadd.f32 %v6599_v25, %v6339_v0  ;;  %v3623_v23 = vpop.f32.mrb[27].mxu0  ;;  %v4598_v46 = vadd.f32 %v4597_v16, %v4596_v36  ;;  %v4452_v58 = vmul.f32 %v8202_v59, %v8202_v59 }
 0x21f   : > { %v4211_v27 = vsel %vm4163_vm2, %v8206_v21, 0.0  ;;  %v4450_v49 = vmul.f32 %v8206_v21, %v8206_v21  ;;  %v8215_v53 = vadd.f32 %v3623_v23, %v1614_v5  ;;  %v4215_v13 = vsel %vm4163_vm2, %v8202_v59, 0.0 }
 0x220   : > { %v4212_v15 = vadd.f32 %v4211_v27, %v4210_v33  ;;  %v4600_v61 = vadd.f32 %v4599_v3, %v4598_v46  ;;  %v4453_v19 = vmul.f32 %v8209_v1, %v8209_v1  ;;  %v4217_v42 = vsel %vm4163_vm2, %v8209_v1, 0.0 }
 0x221   : > { %v4601_v9 = vsel %vm4163_vm2, %v4450_v49, 0.0  ;;  %v4213_v12 = vsel %vm4163_vm2, %v8215_v53, 0.0  ;;  %v4451_v63 = vmul.f32 %v8215_v53, %v8215_v53  ;;  %v4605_v43 = vsel %vm4163_vm2, %v4452_v58, 0.0 }
 0x222   : > { %v4214_v39 = vadd.f32 %v4213_v12, %v4212_v15  ;;  %v6342_v29 = vpop.f32.mrb[28].mxu1  ;;  %v4602_v56 = vadd.f32 %v4601_v9, %v4600_v61  ;;  %v4607_v23 = vsel %vm4163_vm2, %v4453_v19, 0.0 }
 0x223   : > { %v4603_v41 = vsel %vm4163_vm2, %v4451_v63, 0.0  ;;  %v6602_v50 = vpop.f32.mrb[28].mxu0  ;;  %v1627_v6 = vpop.f32.mrb[29].mxu1 }
 0x224   : > { %v4216_v40 = vadd.f32 %v4215_v13, %v4214_v39  ;;  %v8230_v28 = vadd.f32 %v6602_v50, %v6342_v29  ;;  %v3636_v47 = vpop.f32.mrb[29].mxu0  ;;  %v6343_v54 = vpop.f32.mrb[30].mxu1  ;;  %v4604_v10 = vadd.f32 %v4603_v41, %v4602_v56 }
 0x225   : > { %v8234_v17 = vadd.f32 %v3636_v47, %v1627_v6  ;;  %v6603_v2 = vpop.f32.mrb[30].mxu0  ;;  %v1630_v20 = vpop.f32.mrb[31].mxu1 }
 0x226   : > { %v4218_v0 = vadd.f32 %v4217_v42, %v4216_v40  ;;  %v8237_v4 = vadd.f32 %v6603_v2, %v6343_v54  ;;  %v3639_v36 = vpop.f32.mrb[31].mxu0  ;;  %v4606_v25 = vadd.f32 %v4605_v43, %v4604_v10  ;;  %v4456_v61 = vmul.f32 %v8230_v28, %v8230_v28 }
 0x227   : > { %v4219_v5 = vsel %vm4163_vm2, %v8234_v17, 0.0  ;;  %v4454_v16 = vmul.f32 %v8234_v17, %v8234_v17  ;;  %v8243_v33 = vadd.f32 %v3639_v36, %v1630_v20  ;;  %v4223_v63 = vsel %vm4163_vm2, %v8230_v28, 0.0 }
 0x228   : > { %v4220_v46 = vadd.f32 %v4219_v5, %v4218_v0  ;;  %v4608_v27 = vadd.f32 %v4607_v23, %v4606_v25  ;;  %v4457_v56 = vmul.f32 %v8237_v4, %v8237_v4  ;;  %v4225_v40 = vsel %vm4163_vm2, %v8237_v4, 0.0 }
 0x229   : > { %v4609_v49 = vsel %vm4163_vm2, %v4454_v16, 0.0  ;;  %v4221_v3 = vsel %vm4163_vm2, %v8243_v33, 0.0  ;;  %v4455_v15 = vmul.f32 %v8243_v33, %v8243_v33  ;;  %v4613_v2 = vsel %vm4163_vm2, %v4456_v61, 0.0 }
 0x22a   : > { %v4222_v9 = vadd.f32 %v4221_v3, %v4220_v46  ;;  %v6346_v12 = vpop.f32.mrb[32].mxu1  ;;  %v4610_v58 = vadd.f32 %v4609_v49, %v4608_v27  ;;  %v4615_v23 = vsel %vm4163_vm2, %v4457_v56, 0.0 }
 0x22b   : > { %v4611_v39 = vsel %vm4163_vm2, %v4455_v15, 0.0  ;;  %v6606_v29 = vpop.f32.mrb[32].mxu0  ;;  %v1643_v13 = vpop.f32.mrb[33].mxu1 }
 0x22c   : > { %v4224_v41 = vadd.f32 %v4223_v63, %v4222_v9  ;;  %v8258_v50 = vadd.f32 %v6606_v29, %v6346_v12  ;;  %v3652_v6 = vpop.f32.mrb[33].mxu0  ;;  %v6347_v19 = vpop.f32.mrb[34].mxu1  ;;  %v4612_v47 = vadd.f32 %v4611_v39, %v4610_v58 }
 0x22d   : > { %v8262_v54 = vadd.f32 %v3652_v6, %v1643_v13  ;;  %v6607_v42 = vpop.f32.mrb[34].mxu0  ;;  %v1646_v10 = vpop.f32.mrb[35].mxu1 }
 0x22e   : > { %v4226_v20 = vadd.f32 %v4225_v40, %v4224_v41  ;;  %v8265_v43 = vadd.f32 %v6607_v42, %v6347_v19  ;;  %v3655_v0 = vpop.f32.mrb[35].mxu0  ;;  %v4614_v36 = vadd.f32 %v4613_v2, %v4612_v47  ;;  %v4460_v61 = vmul.f32 %v8258_v50, %v8258_v50 }
 0x22f   : > { %v4227_v25 = vsel %vm4163_vm2, %v8262_v54, 0.0  ;;  %v4458_v5 = vmul.f32 %v8262_v54, %v8262_v54  ;;  %v8271_v16 = vadd.f32 %v3655_v0, %v1646_v10  ;;  %v4231_v63 = vsel %vm4163_vm2, %v8258_v50, 0.0 }
 0x230   : > { %v4228_v46 = vadd.f32 %v4227_v25, %v4226_v20  ;;  %v4616_v27 = vadd.f32 %v4615_v23, %v4614_v36  ;;  %v4461_v56 = vmul.f32 %v8265_v43, %v8265_v43  ;;  %v4233_v47 = vsel %vm4163_vm2, %v8265_v43, 0.0 }
 0x231   : > { %v4617_v49 = vsel %vm4163_vm2, %v4458_v5, 0.0  ;;  %v4229_v3 = vsel %vm4163_vm2, %v8271_v16, 0.0  ;;  %v4459_v15 = vmul.f32 %v8271_v16, %v8271_v16  ;;  %v4621_v0 = vsel %vm4163_vm2, %v4460_v61, 0.0 }
 0x232   : > { %v4230_v9 = vadd.f32 %v4229_v3, %v4228_v46  ;;  %v6350_v12 = vpop.f32.mrb[36].mxu1  ;;  %v4618_v58 = vadd.f32 %v4617_v49, %v4616_v27  ;;  %v4623_v3 = vsel %vm4163_vm2, %v4461_v56, 0.0 }
 0x233   : > { %v4619_v39 = vsel %vm4163_vm2, %v4459_v15, 0.0  ;;  %v6610_v29 = vpop.f32.mrb[36].mxu0  ;;  %v1659_v13 = vpop.f32.mrb[37].mxu1 }
 0x234   : > { %v4232_v41 = vadd.f32 %v4231_v63, %v4230_v9  ;;  %v8286_v6 = vadd.f32 %v6610_v29, %v6350_v12  ;;  %v3668_v19 = vpop.f32.mrb[37].mxu0  ;;  %v6351_v40 = vpop.f32.mrb[38].mxu1  ;;  %v4620_v42 = vadd.f32 %v4619_v39, %v4618_v58 }
 0x235   : > { %v8290_v10 = vadd.f32 %v3668_v19, %v1659_v13  ;;  %v6611_v2 = vpop.f32.mrb[38].mxu0  ;;  %v1662_v20 = vpop.f32.mrb[39].mxu1 }
 0x236   : > { %v4234_v36 = vadd.f32 %v4233_v47, %v4232_v41  ;;  %v8293_v25 = vadd.f32 %v6611_v2, %v6351_v40  ;;  %v3671_v5 = vpop.f32.mrb[39].mxu0  ;;  %v4622_v23 = vadd.f32 %v4621_v0, %v4620_v42  ;;  %v4464_v58 = vmul.f32 %v8286_v6, %v8286_v6 }
 0x237   : > { %v4235_v46 = vsel %vm4163_vm2, %v8290_v10, 0.0  ;;  %v4462_v27 = vmul.f32 %v8290_v10, %v8290_v10  ;;  %v8299_v49 = vadd.f32 %v3671_v5, %v1662_v20  ;;  %v4239_v13 = vsel %vm4163_vm2, %v8286_v6, 0.0 }
 0x238   : > { %v4236_v15 = vadd.f32 %v4235_v46, %v4234_v36  ;;  %v4624_v9 = vadd.f32 %v4623_v3, %v4622_v23  ;;  %v4465_v47 = vmul.f32 %v8293_v25, %v8293_v25  ;;  %v4241_v36 = vsel %vm4163_vm2, %v8293_v25, 0.0 }
 0x239   : > { %v4625_v12 = vsel %vm4163_vm2, %v4462_v27, 0.0  ;;  %v4237_v61 = vsel %vm4163_vm2, %v8299_v49, 0.0  ;;  %v4463_v63 = vmul.f32 %v8299_v49, %v8299_v49  ;;  %v4629_v3 = vsel %vm4163_vm2, %v4464_v58, 0.0 }
 0x23a   : > { %v4238_v39 = vadd.f32 %v4237_v61, %v4236_v15  ;;  %v6354_v29 = vpop.f32.mrb[40].mxu1  ;;  %v4626_v41 = vadd.f32 %v4625_v12, %v4624_v9 }
 0x23b   : > { %v4627_v56 = vsel %vm4163_vm2, %v4463_v63, 0.0  ;;  %v6614_v19 = vpop.f32.mrb[40].mxu0  ;;  %v1675_v40 = vpop.f32.mrb[41].mxu1 }
 0x23c   : > { %v4240_v42 = vadd.f32 %v4239_v13, %v4238_v39  ;;  %v8314_v2 = vadd.f32 %v6614_v19, %v6354_v29  ;;  %v3684_v20 = vpop.f32.mrb[41].mxu0  ;;  %v6355_v0 = vpop.f32.mrb[42].mxu1  ;;  %v4628_v5 = vadd.f32 %v4627_v56, %v4626_v41  ;;  %v4631_v13 = vsel %vm4163_vm2, %v4465_v47, 0.0 }
 0x23d   : > { %v8318_v23 = vadd.f32 %v3684_v20, %v1675_v40  ;;  %v6615_v46 = vpop.f32.mrb[42].mxu0  ;;  %v1678_v27 = vpop.f32.mrb[43].mxu1 }
 0x23e   : > { %10563 = vst [vmem:[#allocation2_spill] sm:$0xff] %v8314_v2  ;;  %v4242_v15 = vadd.f32 %v4241_v36, %v4240_v42  ;;  %v8321_v9 = vadd.f32 %v6615_v46, %v6355_v0  ;;  %v3687_v12 = vpop.f32.mrb[43].mxu0  ;;  %v4630_v61 = vadd.f32 %v4629_v3, %v4628_v5  ;;  %v4468_v42 = vmul.f32 %v8314_v2, %v8314_v2 }
 0x23f   : > { %10564 = vst [vmem:[#allocation3_spill] sm:$0xff] %v8318_v23  ;;  %v4243_v63 = vsel %vm4163_vm2, %v8318_v23, 0.0  ;;  %v4466_v39 = vmul.f32 %v8318_v23, %v8318_v23  ;;  %v8327_v29 = vadd.f32 %v3687_v12, %v1678_v27  ;;  %v4247_v36 = vsel %vm4163_vm2, %v8314_v2, 0.0 }
 0x240   : > { %10565 = vst [vmem:[#allocation4_spill] sm:$0xff] %v8321_v9  ;;  %v4244_v41 = vadd.f32 %v4243_v63, %v4242_v15  ;;  %v4632_v56 = vadd.f32 %v4631_v13, %v4630_v61  ;;  %v4469_v3 = vmul.f32 %v8321_v9, %v8321_v9 }
 0x241   : > { %10566 = vst [vmem:[#allocation5_spill] sm:$0xff] %v8327_v29  ;;  %v4633_v19 = vsel %vm4163_vm2, %v4466_v39, 0.0  ;;  %v4245_v58 = vsel %vm4163_vm2, %v8327_v29, 0.0  ;;  %v4467_v40 = vmul.f32 %v8327_v29, %v8327_v29  ;;  %v4249_v39 = vsel %vm4163_vm2, %v8321_v9, 0.0 }
 0x242   : > { %v4246_v20 = vadd.f32 %v4245_v58, %v4244_v41  ;;  %v6358_v0 = vpop.f32.mrb[44].mxu1  ;;  %v4634_v5 = vadd.f32 %v4633_v19, %v4632_v56  ;;  %v4637_v19 = vsel %vm4163_vm2, %v4468_v42, 0.0 }
 0x243   : > { %v4635_v47 = vsel %vm4163_vm2, %v4467_v40, 0.0  ;;  %v6618_v46 = vpop.f32.mrb[44].mxu0  ;;  %v1691_v27 = vpop.f32.mrb[45].mxu1 }
 0x244   : > { %v4248_v15 = vadd.f32 %v4247_v36, %v4246_v20  ;;  %v8342_v12 = vadd.f32 %v6618_v46, %v6358_v0  ;;  %v3700_v61 = vpop.f32.mrb[45].mxu0  ;;  %v6359_v63 = vpop.f32.mrb[46].mxu1  ;;  %v4636_v13 = vadd.f32 %v4635_v47, %v4634_v5  ;;  %v4639_v5 = vsel %vm4163_vm2, %v4469_v3, 0.0 }
 0x245   : > { %v8346_v41 = vadd.f32 %v3700_v61, %v1691_v27  ;;  %v6619_v58 = vpop.f32.mrb[46].mxu0  ;;  %v1694_v56 = vpop.f32.mrb[47].mxu1 }
 0x246   : > { %10567 = vst [vmem:[#allocation6_spill] sm:$0xff] %v8342_v12  ;;  %v4250_v40 = vadd.f32 %v4249_v39, %v4248_v15  ;;  %v8349_v2 = vadd.f32 %v6619_v58, %v6359_v63  ;;  %v3703_v29 = vpop.f32.mrb[47].mxu0  ;;  %v4638_v23 = vadd.f32 %v4637_v19, %v4636_v13  ;;  %v4472_v61 = vmul.f32 %v8342_v12, %v8342_v12 }
 0x247   : > { %10568 = vst [vmem:[#allocation7_spill] sm:$0xff] %v8346_v41  ;;  %v4251_v20 = vsel %vm4163_vm2, %v8346_v41, 0.0  ;;  %v4470_v0 = vmul.f32 %v8346_v41, %v8346_v41  ;;  %v8355_v36 = vadd.f32 %v3703_v29, %v1694_v56  ;;  %v4255_v29 = vsel %vm4163_vm2, %v8342_v12, 0.0 }
 0x248   : > { %10569 = vst [vmem:[#allocation8_spill] sm:$0xff] %v8349_v2  ;;  %v4252_v47 = vadd.f32 %v4251_v20, %v4250_v40  ;;  %v4640_v46 = vadd.f32 %v4639_v5, %v4638_v23  ;;  %v4473_v56 = vmul.f32 %v8349_v2, %v8349_v2  ;;  %v4257_v5 = vsel %vm4163_vm2, %v8349_v2, 0.0 }
 0x249   : > { %10570 = vst [vmem:[#allocation9_spill] sm:$0xff] %v8355_v36  ;;  %v4641_v27 = vsel %vm4163_vm2, %v4470_v0, 0.0  ;;  %v4253_v42 = vsel %vm4163_vm2, %v8355_v36, 0.0  ;;  %v4471_v15 = vmul.f32 %v8355_v36, %v8355_v36 }
 0x24a   : > { %v4254_v63 = vadd.f32 %v4253_v42, %v4252_v47  ;;  %v6362_v39 = vpop.f32.mrb[48].mxu1  ;;  %v4642_v13 = vadd.f32 %v4641_v27, %v4640_v46  ;;  %v4645_v27 = vsel %vm4163_vm2, %v4472_v61, 0.0 }
 0x24b   : > { %v4643_v3 = vsel %vm4163_vm2, %v4471_v15, 0.0  ;;  %v6622_v23 = vpop.f32.mrb[48].mxu0  ;;  %v1707_v58 = vpop.f32.mrb[49].mxu1 }
 0x24c   : > { %v4256_v19 = vadd.f32 %v4255_v29, %v4254_v63  ;;  %v8370_v40 = vadd.f32 %v6622_v23, %v6362_v39  ;;  %v3716_v20 = vpop.f32.mrb[49].mxu0  ;;  %v6363_v0 = vpop.f32.mrb[50].mxu1  ;;  %v4644_v47 = vadd.f32 %v4643_v3, %v4642_v13  ;;  %v4647_v13 = vsel %vm4163_vm2, %v4473_v56, 0.0 }
 0x24d   : > { %v8374_v42 = vadd.f32 %v3716_v20, %v1707_v58  ;;  %v6623_v12 = vpop.f32.mrb[50].mxu0  ;;  %v1710_v46 = vpop.f32.mrb[51].mxu1 }
 0x24e   : > { %10571 = vst [vmem:[#allocation10_spill] sm:$0xff] %v8370_v40  ;;  %v4258_v15 = vadd.f32 %v4257_v5, %v4256_v19  ;;  %v8377_v36 = vadd.f32 %v6623_v12, %v6363_v0  ;;  %v3719_v41 = vpop.f32.mrb[51].mxu0  ;;  %v4646_v9 = vadd.f32 %v4645_v27, %v4644_v47  ;;  %v4476_v19 = vmul.f32 %v8370_v40, %v8370_v40 }
 0x24f   : > { %10572 = vst [vmem:[#allocation11_spill] sm:$0xff] %v8374_v42  ;;  %v4259_v63 = vsel %vm4163_vm2, %v8374_v42, 0.0  ;;  %v4474_v39 = vmul.f32 %v8374_v42, %v8374_v42  ;;  %v8383_v29 = vadd.f32 %v3719_v41, %v1710_v46  ;;  %v4263_v41 = vsel %vm4163_vm2, %v8370_v40, 0.0 }
 0x250   : > { %10573 = vst [vmem:[#allocation12_spill] sm:$0xff] %v8377_v36  ;;  %v4260_v3 = vadd.f32 %v4259_v63, %v4258_v15  ;;  %v4648_v23 = vadd.f32 %v4647_v13, %v4646_v9  ;;  %v4477_v46 = vmul.f32 %v8377_v36, %v8377_v36  ;;  %v4265_v13 = vsel %vm4163_vm2, %v8377_v36, 0.0 }
 0x251   : > { %10574 = vst [vmem:[#allocation13_spill] sm:$0xff] %v8383_v29  ;;  %v4649_v58 = vsel %vm4163_vm2, %v4474_v39, 0.0  ;;  %v4261_v12 = vsel %vm4163_vm2, %v8383_v29, 0.0  ;;  %v4475_v61 = vmul.f32 %v8383_v29, %v8383_v29 }
 0x252   : > { %v4262_v20 = vadd.f32 %v4261_v12, %v4260_v3  ;;  %v6366_v0 = vpop.f32.mrb[52].mxu1  ;;  %v4650_v5 = vadd.f32 %v4649_v58, %v4648_v23  ;;  %v4653_v58 = vsel %vm4163_vm2, %v4476_v19, 0.0 }
 0x253   : > { %v4651_v56 = vsel %vm4163_vm2, %v4475_v61, 0.0  ;;  %v6626_v9 = vpop.f32.mrb[52].mxu0  ;;  %v1723_v47 = vpop.f32.mrb[53].mxu1 }
 0x254   : > { %v4264_v27 = vadd.f32 %v4263_v41, %v4262_v20  ;;  %v8398_v15 = vadd.f32 %v6626_v9, %v6366_v0  ;;  %v3732_v63 = vpop.f32.mrb[53].mxu0  ;;  %v6367_v39 = vpop.f32.mrb[54].mxu1  ;;  %v4652_v3 = vadd.f32 %v4651_v56, %v4650_v5  ;;  %v4655_v5 = vsel %vm4163_vm2, %v4477_v46, 0.0 }
 0x255   : > { %v8402_v12 = vadd.f32 %v3732_v63, %v1723_v47  ;;  %v6627_v40 = vpop.f32.mrb[54].mxu0  ;;  %v1726_v23 = vpop.f32.mrb[55].mxu1 }
 0x256   : > { %10575 = vst [vmem:[#allocation14_spill] sm:$0xff] %v8398_v15  ;;  %v4266_v61 = vadd.f32 %v4265_v13, %v4264_v27  ;;  %v8405_v29 = vadd.f32 %v6627_v40, %v6367_v39  ;;  %v3735_v42 = vpop.f32.mrb[55].mxu0  ;;  %v4654_v2 = vadd.f32 %v4653_v58, %v4652_v3  ;;  %v4480_v27 = vmul.f32 %v8398_v15, %v8398_v15 }
 0x257   : > { %10576 = vst [vmem:[#allocation15_spill] sm:$0xff] %v8402_v12  ;;  %v4267_v20 = vsel %vm4163_vm2, %v8402_v12, 0.0  ;;  %v4478_v0 = vmul.f32 %v8402_v12, %v8402_v12  ;;  %v8411_v41 = vadd.f32 %v3735_v42, %v1726_v23  ;;  %v4271_v42 = vsel %vm4163_vm2, %v8398_v15, 0.0 }
 0x258   : > { %10577 = vst [vmem:[#allocation16_spill] sm:$0xff] %v8405_v29  ;;  %v4268_v56 = vadd.f32 %v4267_v20, %v4266_v61  ;;  %v4656_v9 = vadd.f32 %v4655_v5, %v4654_v2  ;;  %v4481_v23 = vmul.f32 %v8405_v29, %v8405_v29  ;;  %v4273_v5 = vsel %vm4163_vm2, %v8405_v29, 0.0 }
 0x259   : > { %10578 = vst [vmem:[#allocation17_spill] sm:$0xff] %v8411_v41  ;;  %v4657_v47 = vsel %vm4163_vm2, %v4478_v0, 0.0  ;;  %v4269_v40 = vsel %vm4163_vm2, %v8411_v41, 0.0  ;;  %v4479_v19 = vmul.f32 %v8411_v41, %v8411_v41 }
 0x25a   : > { %v4270_v63 = vadd.f32 %v4269_v40, %v4268_v56  ;;  %v6370_v39 = vpop.f32.mrb[56].mxu1  ;;  %v4658_v13 = vadd.f32 %v4657_v47, %v4656_v9  ;;  %v4661_v47 = vsel %vm4163_vm2, %v4480_v27, 0.0 }
 0x25b   : > { %v4659_v46 = vsel %vm4163_vm2, %v4479_v19, 0.0  ;;  %v6630_v2 = vpop.f32.mrb[56].mxu0  ;;  %v1739_v3 = vpop.f32.mrb[57].mxu1 }
 0x25c   : > { %v4272_v58 = vadd.f32 %v4271_v42, %v4270_v63  ;;  %v8426_v61 = vadd.f32 %v6630_v2, %v6370_v39  ;;  %v3748_v20 = vpop.f32.mrb[57].mxu0  ;;  %v6371_v0 = vpop.f32.mrb[58].mxu1  ;;  %v4660_v56 = vadd.f32 %v4659_v46, %v4658_v13  ;;  %v4663_v13 = vsel %vm4163_vm2, %v4481_v23, 0.0 }
 0x25d   : > { %v8430_v40 = vadd.f32 %v3748_v20, %v1739_v3  ;;  %v6631_v15 = vpop.f32.mrb[58].mxu0  ;;  %v1742_v9 = vpop.f32.mrb[59].mxu1 }
 0x25e   : > { %10579 = vst [vmem:[#allocation18_spill] sm:$0xff] %v8426_v61  ;;  %v4274_v19 = vadd.f32 %v4273_v5, %v4272_v58  ;;  %v8433_v41 = vadd.f32 %v6631_v15, %v6371_v0  ;;  %v3751_v12 = vpop.f32.mrb[59].mxu0  ;;  %v4662_v36 = vadd.f32 %v4661_v47, %v4660_v56  ;;  %v4484_v58 = vmul.f32 %v8426_v61, %v8426_v61 }
 0x25f   : > { %10580 = vst [vmem:[#allocation19_spill] sm:$0xff] %v8430_v40  ;;  %v4275_v63 = vsel %vm4163_vm2, %v8430_v40, 0.0  ;;  %v4482_v39 = vmul.f32 %v8430_v40, %v8430_v40  ;;  %v8439_v42 = vadd.f32 %v3751_v12, %v1742_v9  ;;  %v4279_v12 = vsel %vm4163_vm2, %v8426_v61, 0.0 }
 0x260   : > { %10581 = vst [vmem:[#allocation20_spill] sm:$0xff] %v8433_v41  ;;  %v4276_v46 = vadd.f32 %v4275_v63, %v4274_v19  ;;  %v4664_v2 = vadd.f32 %v4663_v13, %v4662_v36  ;;  %v4485_v9 = vmul.f32 %v8433_v41, %v8433_v41  ;;  %v4281_v13 = vsel %vm4163_vm2, %v8433_v41, 0.0 }
 0x261   : > { %10582 = vst [vmem:[#allocation21_spill] sm:$0xff] %v8439_v42  ;;  %v4665_v3 = vsel %vm4163_vm2, %v4482_v39, 0.0  ;;  %v4277_v15 = vsel %vm4163_vm2, %v8439_v42, 0.0  ;;  %v4483_v27 = vmul.f32 %v8439_v42, %v8439_v42 }
 0x262   : > { %v4278_v20 = vadd.f32 %v4277_v15, %v4276_v46  ;;  %v6374_v0 = vpop.f32.mrb[60].mxu1  ;;  %v4666_v5 = vadd.f32 %v4665_v3, %v4664_v2  ;;  %v4669_v3 = vsel %vm4163_vm2, %v4484_v58, 0.0 }
 0x263   : > { %v4667_v23 = vsel %vm4163_vm2, %v4483_v27, 0.0  ;;  %v6634_v36 = vpop.f32.mrb[60].mxu0  ;;  %v1755_v56 = vpop.f32.mrb[61].mxu1 }
 0x264   : > { %v4280_v47 = vadd.f32 %v4279_v12, %v4278_v20  ;;  %v8454_v19 = vadd.f32 %v6634_v36, %v6374_v0  ;;  %v3764_v63 = vpop.f32.mrb[61].mxu0  ;;  %v6375_v39 = vpop.f32.mrb[62].mxu1  ;;  %v4668_v46 = vadd.f32 %v4667_v23, %v4666_v5  ;;  %v4671_v5 = vsel %vm4163_vm2, %v4485_v9, 0.0 }
 0x265   : > { %v8458_v15 = vadd.f32 %v3764_v63, %v1755_v56  ;;  %v6635_v61 = vpop.f32.mrb[62].mxu0  ;;  %v1758_v2 = vpop.f32.mrb[63].mxu1 }
 0x266   : > { %10583 = vst [vmem:[#allocation22_spill] sm:$0xff] %v8454_v19  ;;  %v4282_v27 = vadd.f32 %v4281_v13, %v4280_v47  ;;  %v8461_v42 = vadd.f32 %v6635_v61, %v6375_v39  ;;  %v3767_v40 = vpop.f32.mrb[63].mxu0  ;;  %v4670_v29 = vadd.f32 %v4669_v3, %v4668_v46  ;;  %v4488_v47 = vmul.f32 %v8454_v19, %v8454_v19 }
 0x267   : > { %10584 = vst [vmem:[#allocation23_spill] sm:$0xff] %v8458_v15  ;;  %v4283_v20 = vsel %vm4163_vm2, %v8458_v15, 0.0  ;;  %v4486_v0 = vmul.f32 %v8458_v15, %v8458_v15  ;;  %v8467_v12 = vadd.f32 %v3767_v40, %v1758_v2  ;;  %v4287_v40 = vsel %vm4163_vm2, %v8454_v19, 0.0 }
 0x268   : > { %10585 = vst [vmem:[#allocation24_spill] sm:$0xff] %v8461_v42  ;;  %v4284_v23 = vadd.f32 %v4283_v20, %v4282_v27  ;;  %v4672_v36 = vadd.f32 %v4671_v5, %v4670_v29  ;;  %v4489_v2 = vmul.f32 %v8461_v42, %v8461_v42  ;;  %v4289_v5 = vsel %vm4163_vm2, %v8461_v42, 0.0 }
 0x269   : > { %10586 = vst [vmem:[#allocation25_spill] sm:$0xff] %v8467_v12  ;;  %v4673_v56 = vsel %vm4163_vm2, %v4486_v0, 0.0  ;;  %v4285_v61 = vsel %vm4163_vm2, %v8467_v12, 0.0  ;;  %v4487_v58 = vmul.f32 %v8467_v12, %v8467_v12 }
 0x26a   : > { %v4286_v63 = vadd.f32 %v4285_v61, %v4284_v23  ;;  %v6378_v39 = vpop.f32.mrb[64].mxu1  ;;  %v4674_v13 = vadd.f32 %v4673_v56, %v4672_v36  ;;  %v4677_v56 = vsel %vm4163_vm2, %v4488_v47, 0.0 }
 0x26b   : > { %v4675_v9 = vsel %vm4163_vm2, %v4487_v58, 0.0  ;;  %v6638_v29 = vpop.f32.mrb[64].mxu0  ;;  %v1771_v46 = vpop.f32.mrb[65].mxu1 }
 0x26c   : > { %v4288_v3 = vadd.f32 %v4287_v40, %v4286_v63  ;;  %v8482_v27 = vadd.f32 %v6638_v29, %v6378_v39  ;;  %v3780_v20 = vpop.f32.mrb[65].mxu0  ;;  %v6379_v0 = vpop.f32.mrb[66].mxu1  ;;  %v4676_v23 = vadd.f32 %v4675_v9, %v4674_v13  ;;  %v4679_v13 = vsel %vm4163_vm2, %v4489_v2, 0.0 }
 0x26d   : > { %v8486_v61 = vadd.f32 %v3780_v20, %v1771_v46  ;;  %v6639_v19 = vpop.f32.mrb[66].mxu0  ;;  %v1774_v36 = vpop.f32.mrb[67].mxu1 }
 0x26e   : > { %10587 = vst [vmem:[#allocation26_spill] sm:$0xff] %v8482_v27  ;;  %v4290_v58 = vadd.f32 %v4289_v5, %v4288_v3  ;;  %v8489_v12 = vadd.f32 %v6639_v19, %v6379_v0  ;;  %v3783_v15 = vpop.f32.mrb[67].mxu0  ;;  %v4678_v41 = vadd.f32 %v4677_v56, %v4676_v23  ;;  %v4492_v3 = vmul.f32 %v8482_v27, %v8482_v27 }
 0x26f   : > { %10588 = vst [vmem:[#allocation27_spill] sm:$0xff] %v8486_v61  ;;  %v4291_v63 = vsel %vm4163_vm2, %v8486_v61, 0.0  ;;  %v4490_v39 = vmul.f32 %v8486_v61, %v8486_v61  ;;  %v8495_v40 = vadd.f32 %v3783_v15, %v1774_v36  ;;  %v4295_v15 = vsel %vm4163_vm2, %v8482_v27, 0.0 }
 0x270   : > { %10589 = vst [vmem:[#allocation28_spill] sm:$0xff] %v8489_v12  ;;  %v4292_v9 = vadd.f32 %v4291_v63, %v4290_v58  ;;  %v4680_v29 = vadd.f32 %v4679_v13, %v4678_v41  ;;  %v4493_v36 = vmul.f32 %v8489_v12, %v8489_v12  ;;  %v4297_v13 = vsel %vm4163_vm2, %v8489_v12, 0.0 }
 0x271   : > { %10590 = vst [vmem:[#allocation29_spill] sm:$0xff] %v8495_v40  ;;  %v4681_v46 = vsel %vm4163_vm2, %v4490_v39, 0.0  ;;  %v4293_v19 = vsel %vm4163_vm2, %v8495_v40, 0.0  ;;  %v4491_v47 = vmul.f32 %v8495_v40, %v8495_v40 }
 0x272   : > { %v4294_v20 = vadd.f32 %v4293_v19, %v4292_v9  ;;  %v6382_v0 = vpop.f32.mrb[68].mxu1  ;;  %v4682_v5 = vadd.f32 %v4681_v46, %v4680_v29  ;;  %v4685_v46 = vsel %vm4163_vm2, %v4492_v3, 0.0 }
 0x273   : > { %v4683_v2 = vsel %vm4163_vm2, %v4491_v47, 0.0  ;;  %v6642_v41 = vpop.f32.mrb[68].mxu0  ;;  %v1787_v23 = vpop.f32.mrb[69].mxu1 }
 0x274   : > { %v4296_v56 = vadd.f32 %v4295_v15, %v4294_v20  ;;  %v8510_v58 = vadd.f32 %v6642_v41, %v6382_v0  ;;  %v3796_v63 = vpop.f32.mrb[69].mxu0  ;;  %v6383_v39 = vpop.f32.mrb[70].mxu1  ;;  %v4684_v9 = vadd.f32 %v4683_v2, %v4682_v5  ;;  %v4687_v5 = vsel %vm4163_vm2, %v4493_v36, 0.0 }
 0x275   : > { %v8514_v19 = vadd.f32 %v3796_v63, %v1787_v23  ;;  %v6643_v27 = vpop.f32.mrb[70].mxu0  ;;  %v1790_v29 = vpop.f32.mrb[71].mxu1 }
 0x276   : > { %10591 = vst [vmem:[#allocation30_spill] sm:$0xff] %v8510_v58  ;;  %v4298_v47 = vadd.f32 %v4297_v13, %v4296_v56  ;;  %v8517_v40 = vadd.f32 %v6643_v27, %v6383_v39  ;;  %v3799_v61 = vpop.f32.mrb[71].mxu0  ;;  %v4686_v42 = vadd.f32 %v4685_v46, %v4684_v9  ;;  %v4496_v56 = vmul.f32 %v8510_v58, %v8510_v58 }
 0x277   : > { %10592 = vst [vmem:[#allocation31_spill] sm:$0xff] %v8514_v19  ;;  %v4299_v20 = vsel %vm4163_vm2, %v8514_v19, 0.0  ;;  %v4494_v0 = vmul.f32 %v8514_v19, %v8514_v19  ;;  %v8523_v15 = vadd.f32 %v3799_v61, %v1790_v29  ;;  %v4303_v61 = vsel %vm4163_vm2, %v8510_v58, 0.0 }
 0x278   : > { %10593 = vst [vmem:[#allocation32_spill] sm:$0xff] %v8517_v40  ;;  %v4300_v2 = vadd.f32 %v4299_v20, %v4298_v47  ;;  %v4688_v41 = vadd.f32 %v4687_v5, %v4686_v42  ;;  %v4497_v29 = vmul.f32 %v8517_v40, %v8517_v40  ;;  %v4305_v5 = vsel %vm4163_vm2, %v8517_v40, 0.0 }
 0x279   : > { %10594 = vst [vmem:[#allocation33_spill] sm:$0xff] %v8523_v15  ;;  %v4689_v23 = vsel %vm4163_vm2, %v4494_v0, 0.0  ;;  %v4301_v27 = vsel %vm4163_vm2, %v8523_v15, 0.0  ;;  %v4495_v3 = vmul.f32 %v8523_v15, %v8523_v15 }
 0x27a   : > { %v4302_v63 = vadd.f32 %v4301_v27, %v4300_v2  ;;  %v6386_v39 = vpop.f32.mrb[72].mxu1  ;;  %v4690_v13 = vadd.f32 %v4689_v23, %v4688_v41  ;;  %v4693_v23 = vsel %vm4163_vm2, %v4496_v56, 0.0 }
 0x27b   : > { %v4691_v36 = vsel %vm4163_vm2, %v4495_v3, 0.0  ;;  %v6646_v42 = vpop.f32.mrb[72].mxu0  ;;  %v1803_v9 = vpop.f32.mrb[73].mxu1 }
 0x27c   : > { %v4304_v46 = vadd.f32 %v4303_v61, %v4302_v63  ;;  %v8538_v47 = vadd.f32 %v6646_v42, %v6386_v39  ;;  %v3812_v20 = vpop.f32.mrb[73].mxu0  ;;  %v6387_v0 = vpop.f32.mrb[74].mxu1  ;;  %v4692_v2 = vadd.f32 %v4691_v36, %v4690_v13  ;;  %v4695_v13 = vsel %vm4163_vm2, %v4497_v29, 0.0 }
 0x27d   : > { %v8542_v27 = vadd.f32 %v3812_v20, %v1803_v9  ;;  %v6647_v58 = vpop.f32.mrb[74].mxu0  ;;  %v1806_v41 = vpop.f32.mrb[75].mxu1 }
 0x27e   : > { %10595 = vst [vmem:[#allocation34_spill] sm:$0xff] %v8538_v47  ;;  %v4306_v3 = vadd.f32 %v4305_v5, %v4304_v46  ;;  %v8545_v15 = vadd.f32 %v6647_v58, %v6387_v0  ;;  %v3815_v19 = vpop.f32.mrb[75].mxu0  ;;  %v4694_v12 = vadd.f32 %v4693_v23, %v4692_v2  ;;  %v4500_v46 = vmul.f32 %v8538_v47, %v8538_v47 }
 0x27f   : > { %10596 = vst [vmem:[#allocation35_spill] sm:$0xff] %v8542_v27  ;;  %v4307_v63 = vsel %vm4163_vm2, %v8542_v27, 0.0  ;;  %v4498_v39 = vmul.f32 %v8542_v27, %v8542_v27  ;;  %v8551_v61 = vadd.f32 %v3815_v19, %v1806_v41  ;;  %v4311_v19 = vsel %vm4163_vm2, %v8538_v47, 0.0 }
 0x280   : > { %10597 = vst [vmem:[#allocation36_spill] sm:$0xff] %v8545_v15  ;;  %v4308_v36 = vadd.f32 %v4307_v63, %v4306_v3  ;;  %v4696_v42 = vadd.f32 %v4695_v13, %v4694_v12  ;;  %v4501_v41 = vmul.f32 %v8545_v15, %v8545_v15  ;;  %v4313_v13 = vsel %vm4163_vm2, %v8545_v15, 0.0 }
 0x281   : > { %10598 = vst [vmem:[#allocation37_spill] sm:$0xff] %v8551_v61  ;;  %v4697_v9 = vsel %vm4163_vm2, %v4498_v39, 0.0  ;;  %v4309_v58 = vsel %vm4163_vm2, %v8551_v61, 0.0  ;;  %v4499_v56 = vmul.f32 %v8551_v61, %v8551_v61 }
 0x282   : > { %v4310_v20 = vadd.f32 %v4309_v58, %v4308_v36  ;;  %v6390_v0 = vpop.f32.mrb[76].mxu1  ;;  %v4698_v5 = vadd.f32 %v4697_v9, %v4696_v42  ;;  %v4701_v9 = vsel %vm4163_vm2, %v4500_v46, 0.0 }
 0x283   : > { %v4699_v29 = vsel %vm4163_vm2, %v4499_v56, 0.0  ;;  %v6650_v12 = vpop.f32.mrb[76].mxu0  ;;  %v1819_v2 = vpop.f32.mrb[77].mxu1 }
 0x284   : > { %v4312_v23 = vadd.f32 %v4311_v19, %v4310_v20  ;;  %v8566_v3 = vadd.f32 %v6650_v12, %v6390_v0  ;;  %v3828_v63 = vpop.f32.mrb[77].mxu0  ;;  %v6391_v39 = vpop.f32.mrb[78].mxu1  ;;  %v4700_v36 = vadd.f32 %v4699_v29, %v4698_v5  ;;  %v4703_v5 = vsel %vm4163_vm2, %v4501_v41, 0.0 }
 0x285   : > { %v8570_v58 = vadd.f32 %v3828_v63, %v1819_v2  ;;  %v6651_v47 = vpop.f32.mrb[78].mxu0  ;;  %v1822_v42 = vpop.f32.mrb[79].mxu1 }
 0x286   : > { %10599 = vst [vmem:[#allocation38_spill] sm:$0xff] %v8566_v3  ;;  %v4314_v56 = vadd.f32 %v4313_v13, %v4312_v23  ;;  %v8573_v61 = vadd.f32 %v6651_v47, %v6391_v39  ;;  %v3831_v27 = vpop.f32.mrb[79].mxu0  ;;  %v4702_v40 = vadd.f32 %v4701_v9, %v4700_v36  ;;  %v4504_v23 = vmul.f32 %v8566_v3, %v8566_v3 }
 0x287   : > { %10600 = vst [vmem:[#allocation39_spill] sm:$0xff] %v8570_v58  ;;  %v4315_v20 = vsel %vm4163_vm2, %v8570_v58, 0.0  ;;  %v4502_v0 = vmul.f32 %v8570_v58, %v8570_v58  ;;  %v8579_v19 = vadd.f32 %v3831_v27, %v1822_v42  ;;  %v4319_v27 = vsel %vm4163_vm2, %v8566_v3, 0.0 }
 0x288   : > { %10601 = vst [vmem:[#allocation40_spill] sm:$0xff] %v8573_v61  ;;  %v4316_v29 = vadd.f32 %v4315_v20, %v4314_v56  ;;  %v4704_v12 = vadd.f32 %v4703_v5, %v4702_v40  ;;  %v4505_v42 = vmul.f32 %v8573_v61, %v8573_v61  ;;  %v4321_v5 = vsel %vm4163_vm2, %v8573_v61, 0.0 }
 0x289   : > { %10602 = vst [vmem:[#allocation41_spill] sm:$0xff] %v8579_v19  ;;  %v4705_v2 = vsel %vm4163_vm2, %v4502_v0, 0.0  ;;  %v4317_v47 = vsel %vm4163_vm2, %v8579_v19, 0.0  ;;  %v4503_v46 = vmul.f32 %v8579_v19, %v8579_v19 }
 0x28a   : > { %v4318_v63 = vadd.f32 %v4317_v47, %v4316_v29  ;;  %v6394_v39 = vpop.f32.mrb[80].mxu1  ;;  %v4706_v13 = vadd.f32 %v4705_v2, %v4704_v12  ;;  %v4709_v2 = vsel %vm4163_vm2, %v4504_v23, 0.0 }
 0x28b   : > { %v4707_v41 = vsel %vm4163_vm2, %v4503_v46, 0.0  ;;  %v6654_v40 = vpop.f32.mrb[80].mxu0  ;;  %v1835_v36 = vpop.f32.mrb[81].mxu1 }
 0x28c   : > { %v4320_v9 = vadd.f32 %v4319_v27, %v4318_v63  ;;  %v8594_v56 = vadd.f32 %v6654_v40, %v6394_v39  ;;  %v3844_v20 = vpop.f32.mrb[81].mxu0  ;;  %v6395_v0 = vpop.f32.mrb[82].mxu1  ;;  %v4708_v29 = vadd.f32 %v4707_v41, %v4706_v13  ;;  %v4711_v13 = vsel %vm4163_vm2, %v4505_v42, 0.0 }
 0x28d   : > { %v8598_v47 = vadd.f32 %v3844_v20, %v1835_v36  ;;  %v6655_v3 = vpop.f32.mrb[82].mxu0  ;;  %v1838_v12 = vpop.f32.mrb[83].mxu1 }
 0x28e   : > { %10603 = vst [vmem:[#allocation42_spill] sm:$0xff] %v8594_v56  ;;  %v4322_v46 = vadd.f32 %v4321_v5, %v4320_v9  ;;  %v8601_v19 = vadd.f32 %v6655_v3, %v6395_v0  ;;  %v3847_v58 = vpop.f32.mrb[83].mxu0  ;;  %v4710_v15 = vadd.f32 %v4709_v2, %v4708_v29  ;;  %v4508_v9 = vmul.f32 %v8594_v56, %v8594_v56 }
 0x28f   : > { %10604 = vst [vmem:[#allocation43_spill] sm:$0xff] %v8598_v47  ;;  %v4323_v63 = vsel %vm4163_vm2, %v8598_v47, 0.0  ;;  %v4506_v39 = vmul.f32 %v8598_v47, %v8598_v47  ;;  %v8607_v27 = vadd.f32 %v3847_v58, %v1838_v12  ;;  %v4327_v58 = vsel %vm4163_vm2, %v8594_v56, 0.0 }
 0x290   : > { %10605 = vst [vmem:[#allocation44_spill] sm:$0xff] %v8601_v19  ;;  %v4324_v41 = vadd.f32 %v4323_v63, %v4322_v46  ;;  %v4712_v40 = vadd.f32 %v4711_v13, %v4710_v15  ;;  %v4509_v12 = vmul.f32 %v8601_v19, %v8601_v19  ;;  %v4329_v13 = vsel %vm4163_vm2, %v8601_v19, 0.0 }
 0x291   : > { %10606 = vst [vmem:[#allocation45_spill] sm:$0xff] %v8607_v27  ;;  %v4713_v36 = vsel %vm4163_vm2, %v4506_v39, 0.0  ;;  %v4325_v3 = vsel %vm4163_vm2, %v8607_v27, 0.0  ;;  %v4507_v23 = vmul.f32 %v8607_v27, %v8607_v27 }
 0x292   : > { %v4326_v20 = vadd.f32 %v4325_v3, %v4324_v41  ;;  %v6398_v0 = vpop.f32.mrb[84].mxu1  ;;  %v4714_v5 = vadd.f32 %v4713_v36, %v4712_v40  ;;  %v4717_v36 = vsel %vm4163_vm2, %v4508_v9, 0.0 }
 0x293   : > { %v4715_v42 = vsel %vm4163_vm2, %v4507_v23, 0.0  ;;  %v6658_v15 = vpop.f32.mrb[84].mxu0  ;;  %v1851_v29 = vpop.f32.mrb[85].mxu1 }
 0x294   : > { %v4328_v2 = vadd.f32 %v4327_v58, %v4326_v20  ;;  %v8622_v46 = vadd.f32 %v6658_v15, %v6398_v0  ;;  %v3860_v63 = vpop.f32.mrb[85].mxu0  ;;  %v6399_v39 = vpop.f32.mrb[86].mxu1  ;;  %v4716_v41 = vadd.f32 %v4715_v42, %v4714_v5  ;;  %v4719_v5 = vsel %vm4163_vm2, %v4509_v12, 0.0 }
 0x295   : > { %v8626_v3 = vadd.f32 %v3860_v63, %v1851_v29  ;;  %v6659_v56 = vpop.f32.mrb[86].mxu0  ;;  %v1854_v40 = vpop.f32.mrb[87].mxu1 }
 0x296   : > { %10607 = vst [vmem:[#allocation46_spill] sm:$0xff] %v8622_v46  ;;  %v4330_v23 = vadd.f32 %v4329_v13, %v4328_v2  ;;  %v8629_v27 = vadd.f32 %v6659_v56, %v6399_v39  ;;  %v3863_v47 = vpop.f32.mrb[87].mxu0  ;;  %v4718_v61 = vadd.f32 %v4717_v36, %v4716_v41  ;;  %v4512_v2 = vmul.f32 %v8622_v46, %v8622_v46 }
 0x297   : > { %10608 = vst [vmem:[#allocation47_spill] sm:$0xff] %v8626_v3  ;;  %v4331_v20 = vsel %vm4163_vm2, %v8626_v3, 0.0  ;;  %v4510_v0 = vmul.f32 %v8626_v3, %v8626_v3  ;;  %v8635_v58 = vadd.f32 %v3863_v47, %v1854_v40  ;;  %v4335_v47 = vsel %vm4163_vm2, %v8622_v46, 0.0 }
 0x298   : > { %10609 = vst [vmem:[#allocation48_spill] sm:$0xff] %v8629_v27  ;;  %v4332_v42 = vadd.f32 %v4331_v20, %v4330_v23  ;;  %v4720_v15 = vadd.f32 %v4719_v5, %v4718_v61  ;;  %v4513_v40 = vmul.f32 %v8629_v27, %v8629_v27  ;;  %v4337_v5 = vsel %vm4163_vm2, %v8629_v27, 0.0 }
 0x299   : > { %10610 = vst [vmem:[#allocation49_spill] sm:$0xff] %v8635_v58  ;;  %v4721_v29 = vsel %vm4163_vm2, %v4510_v0, 0.0  ;;  %v4333_v56 = vsel %vm4163_vm2, %v8635_v58, 0.0  ;;  %v4511_v9 = vmul.f32 %v8635_v58, %v8635_v58 }
 0x29a   : > { %v4334_v63 = vadd.f32 %v4333_v56, %v4332_v42  ;;  %v6402_v39 = vpop.f32.mrb[88].mxu1  ;;  %v4722_v13 = vadd.f32 %v4721_v29, %v4720_v15  ;;  %v4725_v29 = vsel %vm4163_vm2, %v4512_v2, 0.0 }
 0x29b   : > { %v4723_v12 = vsel %vm4163_vm2, %v4511_v9, 0.0  ;;  %v6662_v61 = vpop.f32.mrb[88].mxu0  ;;  %v1867_v41 = vpop.f32.mrb[89].mxu1 }
 0x29c   : > { %v4336_v36 = vadd.f32 %v4335_v47, %v4334_v63  ;;  %v8650_v23 = vadd.f32 %v6662_v61, %v6402_v39  ;;  %v3876_v20 = vpop.f32.mrb[89].mxu0  ;;  %v6403_v0 = vpop.f32.mrb[90].mxu1  ;;  %v4724_v42 = vadd.f32 %v4723_v12, %v4722_v13  ;;  %v4727_v13 = vsel %vm4163_vm2, %v4513_v40, 0.0 }
 0x29d   : > { %v8654_v56 = vadd.f32 %v3876_v20, %v1867_v41  ;;  %v6663_v46 = vpop.f32.mrb[90].mxu0  ;;  %v1870_v15 = vpop.f32.mrb[91].mxu1 }
 0x29e   : > { %10611 = vst [vmem:[#allocation50_spill] sm:$0xff] %v8650_v23  ;;  %v4338_v9 = vadd.f32 %v4337_v5, %v4336_v36  ;;  %v8657_v58 = vadd.f32 %v6663_v46, %v6403_v0  ;;  %v3879_v3 = vpop.f32.mrb[91].mxu0  ;;  %v4726_v19 = vadd.f32 %v4725_v29, %v4724_v42  ;;  %v4516_v36 = vmul.f32 %v8650_v23, %v8650_v23 }
 0x29f   : > { %10612 = vst [vmem:[#allocation51_spill] sm:$0xff] %v8654_v56  ;;  %v4339_v63 = vsel %vm4163_vm2, %v8654_v56, 0.0  ;;  %v4514_v39 = vmul.f32 %v8654_v56, %v8654_v56  ;;  %v8663_v47 = vadd.f32 %v3879_v3, %v1870_v15  ;;  %v4343_v3 = vsel %vm4163_vm2, %v8650_v23, 0.0 }
 0x2a0   : > { %10613 = vst [vmem:[#allocation52_spill] sm:$0xff] %v8657_v58  ;;  %v4340_v12 = vadd.f32 %v4339_v63, %v4338_v9  ;;  %v4728_v61 = vadd.f32 %v4727_v13, %v4726_v19  ;;  %v4517_v15 = vmul.f32 %v8657_v58, %v8657_v58  ;;  %v4345_v13 = vsel %vm4163_vm2, %v8657_v58, 0.0 }
 0x2a1   : > { %10614 = vst [vmem:[#allocation53_spill] sm:$0xff] %v8663_v47  ;;  %v4729_v41 = vsel %vm4163_vm2, %v4514_v39, 0.0  ;;  %v4341_v46 = vsel %vm4163_vm2, %v8663_v47, 0.0  ;;  %v4515_v2 = vmul.f32 %v8663_v47, %v8663_v47 }
 0x2a2   : > { %v4342_v20 = vadd.f32 %v4341_v46, %v4340_v12  ;;  %v6406_v0 = vpop.f32.mrb[92].mxu1  ;;  %v4730_v5 = vadd.f32 %v4729_v41, %v4728_v61  ;;  %v4733_v41 = vsel %vm4163_vm2, %v4516_v36, 0.0 }
 0x2a3   : > { %v4731_v40 = vsel %vm4163_vm2, %v4515_v2, 0.0  ;;  %v6666_v19 = vpop.f32.mrb[92].mxu0  ;;  %v1883_v42 = vpop.f32.mrb[93].mxu1 }
 0x2a4   : > { %v4344_v29 = vadd.f32 %v4343_v3, %v4342_v20  ;;  %v8678_v9 = vadd.f32 %v6666_v19, %v6406_v0  ;;  %v3892_v63 = vpop.f32.mrb[93].mxu0  ;;  %v6407_v39 = vpop.f32.mrb[94].mxu1  ;;  %v4732_v12 = vadd.f32 %v4731_v40, %v4730_v5  ;;  %v4735_v5 = vsel %vm4163_vm2, %v4517_v15, 0.0 }
 0x2a5   : > { %v8682_v46 = vadd.f32 %v3892_v63, %v1883_v42  ;;  %v6667_v23 = vpop.f32.mrb[94].mxu0  ;;  %v1886_v61 = vpop.f32.mrb[95].mxu1 }
 0x2a6   : > { %10615 = vst [vmem:[#allocation54_spill] sm:$0xff] %v8678_v9  ;;  %v4346_v2 = vadd.f32 %v4345_v13, %v4344_v29  ;;  %v8685_v47 = vadd.f32 %v6667_v23, %v6407_v39  ;;  %v3895_v56 = vpop.f32.mrb[95].mxu0  ;;  %v4734_v27 = vadd.f32 %v4733_v41, %v4732_v12  ;;  %v4520_v29 = vmul.f32 %v8678_v9, %v8678_v9 }
 0x2a7   : > { %10616 = vst [vmem:[#allocation55_spill] sm:$0xff] %v8682_v46  ;;  %v4347_v20 = vsel %vm4163_vm2, %v8682_v46, 0.0  ;;  %v4518_v0 = vmul.f32 %v8682_v46, %v8682_v46  ;;  %v8691_v3 = vadd.f32 %v3895_v56, %v1886_v61  ;;  %v4351_v56 = vsel %vm4163_vm2, %v8678_v9, 0.0 }
 0x2a8   : > { %10617 = vst [vmem:[#allocation56_spill] sm:$0xff] %v8685_v47  ;;  %v4348_v40 = vadd.f32 %v4347_v20, %v4346_v2  ;;  %v4736_v19 = vadd.f32 %v4735_v5, %v4734_v27  ;;  %v4521_v61 = vmul.f32 %v8685_v47, %v8685_v47  ;;  %v4353_v5 = vsel %vm4163_vm2, %v8685_v47, 0.0 }
 0x2a9   : > { %10618 = vst [vmem:[#allocation57_spill] sm:$0xff] %v8691_v3  ;;  %v4737_v42 = vsel %vm4163_vm2, %v4518_v0, 0.0  ;;  %v4349_v23 = vsel %vm4163_vm2, %v8691_v3, 0.0  ;;  %v4519_v36 = vmul.f32 %v8691_v3, %v8691_v3 }
 0x2aa   : > { %v4350_v63 = vadd.f32 %v4349_v23, %v4348_v40  ;;  %v6410_v39 = vpop.f32.mrb[96].mxu1  ;;  %v4738_v13 = vadd.f32 %v4737_v42, %v4736_v19  ;;  %v4741_v42 = vsel %vm4163_vm2, %v4520_v29, 0.0 }
 0x2ab   : > { %v4739_v15 = vsel %vm4163_vm2, %v4519_v36, 0.0  ;;  %v6670_v27 = vpop.f32.mrb[96].mxu0  ;;  %v1899_v12 = vpop.f32.mrb[97].mxu1 }
 0x2ac   : > { %v4352_v41 = vadd.f32 %v4351_v56, %v4350_v63  ;;  %v8706_v2 = vadd.f32 %v6670_v27, %v6410_v39  ;;  %v3908_v20 = vpop.f32.mrb[97].mxu0  ;;  %v6411_v0 = vpop.f32.mrb[98].mxu1  ;;  %v4740_v40 = vadd.f32 %v4739_v15, %v4738_v13  ;;  %v4743_v13 = vsel %vm4163_vm2, %v4521_v61, 0.0 }
 0x2ad   : > { %v8710_v23 = vadd.f32 %v3908_v20, %v1899_v12  ;;  %v6671_v9 = vpop.f32.mrb[98].mxu0  ;;  %v1902_v19 = vpop.f32.mrb[99].mxu1 }
 0x2ae   : > { %10619 = vst [vmem:[#allocation58_spill] sm:$0xff] %v8706_v2  ;;  %v4354_v36 = vadd.f32 %v4353_v5, %v4352_v41  ;;  %v8713_v3 = vadd.f32 %v6671_v9, %v6411_v0  ;;  %v3911_v46 = vpop.f32.mrb[99].mxu0  ;;  %v4742_v58 = vadd.f32 %v4741_v42, %v4740_v40  ;;  %v4524_v41 = vmul.f32 %v8706_v2, %v8706_v2 }
 0x2af   : > { %10620 = vst [vmem:[#allocation59_spill] sm:$0xff] %v8710_v23  ;;  %v4355_v63 = vsel %vm4163_vm2, %v8710_v23, 0.0  ;;  %v4522_v39 = vmul.f32 %v8710_v23, %v8710_v23  ;;  %v8719_v56 = vadd.f32 %v3911_v46, %v1902_v19  ;;  %v4359_v46 = vsel %vm4163_vm2, %v8706_v2, 0.0 }
 0x2b0   : > { %10621 = vst [vmem:[#allocation60_spill] sm:$0xff] %v8713_v3  ;;  %v4356_v15 = vadd.f32 %v4355_v63, %v4354_v36  ;;  %v4744_v27 = vadd.f32 %v4743_v13, %v4742_v58  ;;  %v4525_v19 = vmul.f32 %v8713_v3, %v8713_v3  ;;  %v4361_v13 = vsel %vm4163_vm2, %v8713_v3, 0.0 }
 0x2b1   : > { %10622 = vst [vmem:[#allocation61_spill] sm:$0xff] %v8719_v56  ;;  %v4745_v12 = vsel %vm4163_vm2, %v4522_v39, 0.0  ;;  %v4357_v9 = vsel %vm4163_vm2, %v8719_v56, 0.0  ;;  %v4523_v29 = vmul.f32 %v8719_v56, %v8719_v56 }
 0x2b2   : > { %v4358_v20 = vadd.f32 %v4357_v9, %v4356_v15  ;;  %v6414_v0 = vpop.f32.mrb[100].mxu1  ;;  %v4746_v5 = vadd.f32 %v4745_v12, %v4744_v27  ;;  %v4749_v12 = vsel %vm4163_vm2, %v4524_v41, 0.0 }
 0x2b3   : > { %v4747_v61 = vsel %vm4163_vm2, %v4523_v29, 0.0  ;;  %v6674_v58 = vpop.f32.mrb[100].mxu0  ;;  %v1915_v40 = vpop.f32.mrb[101].mxu1 }
 0x2b4   : > { %v4360_v42 = vadd.f32 %v4359_v46, %v4358_v20  ;;  %v8734_v36 = vadd.f32 %v6674_v58, %v6414_v0  ;;  %v3924_v63 = vpop.f32.mrb[101].mxu0  ;;  %v6415_v39 = vpop.f32.mrb[102].mxu1  ;;  %v4748_v15 = vadd.f32 %v4747_v61, %v4746_v5  ;;  %v4751_v5 = vsel %vm4163_vm2, %v4525_v19, 0.0 }
 0x2b5   : > { %v8738_v9 = vadd.f32 %v3924_v63, %v1915_v40  ;;  %v6675_v2 = vpop.f32.mrb[102].mxu0  ;;  %v1918_v27 = vpop.f32.mrb[103].mxu1 }
 0x2b6   : > { %10623 = vst [vmem:[#allocation62_spill] sm:$0xff] %v8734_v36  ;;  %v4362_v29 = vadd.f32 %v4361_v13, %v4360_v42  ;;  %v8741_v56 = vadd.f32 %v6675_v2, %v6415_v39  ;;  %v3927_v23 = vpop.f32.mrb[103].mxu0  ;;  %v4750_v47 = vadd.f32 %v4749_v12, %v4748_v15  ;;  %v4528_v42 = vmul.f32 %v8734_v36, %v8734_v36 }
 0x2b7   : > { %10624 = vst [vmem:[#allocation63_spill] sm:$0xff] %v8738_v9  ;;  %v4363_v20 = vsel %vm4163_vm2, %v8738_v9, 0.0  ;;  %v4526_v0 = vmul.f32 %v8738_v9, %v8738_v9  ;;  %v8747_v46 = vadd.f32 %v3927_v23, %v1918_v27  ;;  %v4367_v23 = vsel %vm4163_vm2, %v8734_v36, 0.0 }
 0x2b8   : > { %10625 = vst [vmem:[#allocation64_spill] sm:$0xff] %v8741_v56  ;;  %v4364_v61 = vadd.f32 %v4363_v20, %v4362_v29  ;;  %v4752_v58 = vadd.f32 %v4751_v5, %v4750_v47  ;;  %v4529_v27 = vmul.f32 %v8741_v56, %v8741_v56  ;;  %v4369_v5 = vsel %vm4163_vm2, %v8741_v56, 0.0 }
 0x2b9   : > { %10626 = vst [vmem:[#allocation65_spill] sm:$0xff] %v8747_v46  ;;  %v4753_v40 = vsel %vm4163_vm2, %v4526_v0, 0.0  ;;  %v4365_v2 = vsel %vm4163_vm2, %v8747_v46, 0.0  ;;  %v4527_v41 = vmul.f32 %v8747_v46, %v8747_v46 }
 0x2ba   : > { %v4366_v63 = vadd.f32 %v4365_v2, %v4364_v61  ;;  %v6418_v39 = vpop.f32.mrb[104].mxu1  ;;  %v4754_v13 = vadd.f32 %v4753_v40, %v4752_v58  ;;  %v4757_v40 = vsel %vm4163_vm2, %v4528_v42, 0.0 }
 0x2bb   : > { %v4755_v19 = vsel %vm4163_vm2, %v4527_v41, 0.0  ;;  %v6678_v47 = vpop.f32.mrb[104].mxu0  ;;  %v1931_v15 = vpop.f32.mrb[105].mxu1 }
 0x2bc   : > { %v4368_v12 = vadd.f32 %v4367_v23, %v4366_v63  ;;  %v8762_v29 = vadd.f32 %v6678_v47, %v6418_v39  ;;  %v3940_v20 = vpop.f32.mrb[105].mxu0  ;;  %v6419_v0 = vpop.f32.mrb[106].mxu1  ;;  %v4756_v61 = vadd.f32 %v4755_v19, %v4754_v13  ;;  %v4759_v13 = vsel %vm4163_vm2, %v4529_v27, 0.0 }
 0x2bd   : > { %v8766_v2 = vadd.f32 %v3940_v20, %v1931_v15  ;;  %v6679_v36 = vpop.f32.mrb[106].mxu0  ;;  %v1934_v58 = vpop.f32.mrb[107].mxu1 }
 0x2be   : > { %10627 = vst [vmem:[#allocation66_spill] sm:$0xff] %v8762_v29  ;;  %v4370_v41 = vadd.f32 %v4369_v5, %v4368_v12  ;;  %v8769_v46 = vadd.f32 %v6679_v36, %v6419_v0  ;;  %v3943_v9 = vpop.f32.mrb[107].mxu0  ;;  %v4758_v3 = vadd.f32 %v4757_v40, %v4756_v61  ;;  %v4532_v12 = vmul.f32 %v8762_v29, %v8762_v29 }
 0x2bf   : > { %10628 = vst [vmem:[#allocation67_spill] sm:$0xff] %v8766_v2  ;;  %v4371_v63 = vsel %vm4163_vm2, %v8766_v2, 0.0  ;;  %v4530_v39 = vmul.f32 %v8766_v2, %v8766_v2  ;;  %v8775_v23 = vadd.f32 %v3943_v9, %v1934_v58  ;;  %v4375_v9 = vsel %vm4163_vm2, %v8762_v29, 0.0 }
 0x2c0   : > { %10629 = vst [vmem:[#allocation68_spill] sm:$0xff] %v8769_v46  ;;  %v4372_v19 = vadd.f32 %v4371_v63, %v4370_v41  ;;  %v4760_v47 = vadd.f32 %v4759_v13, %v4758_v3  ;;  %v4533_v58 = vmul.f32 %v8769_v46, %v8769_v46  ;;  %v4377_v13 = vsel %vm4163_vm2, %v8769_v46, 0.0 }
 0x2c1   : > { %10630 = vst [vmem:[#allocation69_spill] sm:$0xff] %v8775_v23  ;;  %v4761_v15 = vsel %vm4163_vm2, %v4530_v39, 0.0  ;;  %v4373_v36 = vsel %vm4163_vm2, %v8775_v23, 0.0  ;;  %v4531_v42 = vmul.f32 %v8775_v23, %v8775_v23 }
 0x2c2   : > { %v4374_v20 = vadd.f32 %v4373_v36, %v4372_v19  ;;  %v6422_v0 = vpop.f32.mrb[108].mxu1  ;;  %v4762_v5 = vadd.f32 %v4761_v15, %v4760_v47  ;;  %v4765_v15 = vsel %vm4163_vm2, %v4532_v12, 0.0 }
 0x2c3   : > { %v4763_v27 = vsel %vm4163_vm2, %v4531_v42, 0.0  ;;  %v6682_v3 = vpop.f32.mrb[108].mxu0  ;;  %v1947_v61 = vpop.f32.mrb[109].mxu1 }
 0x2c4   : > { %v4376_v40 = vadd.f32 %v4375_v9, %v4374_v20  ;;  %v8790_v41 = vadd.f32 %v6682_v3, %v6422_v0  ;;  %v3956_v63 = vpop.f32.mrb[109].mxu0  ;;  %v6423_v39 = vpop.f32.mrb[110].mxu1  ;;  %v4764_v19 = vadd.f32 %v4763_v27, %v4762_v5  ;;  %v4767_v5 = vsel %vm4163_vm2, %v4533_v58, 0.0 }
 0x2c5   : > { %v8794_v36 = vadd.f32 %v3956_v63, %v1947_v61  ;;  %v6683_v29 = vpop.f32.mrb[110].mxu0  ;;  %v1950_v47 = vpop.f32.mrb[111].mxu1 }
 0x2c6   : > { %10631 = vst [vmem:[#allocation70_spill] sm:$0xff] %v8790_v41  ;;  %v4378_v42 = vadd.f32 %v4377_v13, %v4376_v40  ;;  %v8797_v23 = vadd.f32 %v6683_v29, %v6423_v39  ;;  %v3959_v2 = vpop.f32.mrb[111].mxu0  ;;  %v4766_v56 = vadd.f32 %v4765_v15, %v4764_v19  ;;  %v4536_v40 = vmul.f32 %v8790_v41, %v8790_v41 }
 0x2c7   : > { %10632 = vst [vmem:[#allocation71_spill] sm:$0xff] %v8794_v36  ;;  %v4379_v20 = vsel %vm4163_vm2, %v8794_v36, 0.0  ;;  %v4534_v0 = vmul.f32 %v8794_v36, %v8794_v36  ;;  %v8803_v9 = vadd.f32 %v3959_v2, %v1950_v47  ;;  %v4383_v2 = vsel %vm4163_vm2, %v8790_v41, 0.0 }
 0x2c8   : > { %10633 = vst [vmem:[#allocation72_spill] sm:$0xff] %v8797_v23  ;;  %v4380_v27 = vadd.f32 %v4379_v20, %v4378_v42  ;;  %v4768_v3 = vadd.f32 %v4767_v5, %v4766_v56  ;;  %v4537_v47 = vmul.f32 %v8797_v23, %v8797_v23  ;;  %v4385_v5 = vsel %vm4163_vm2, %v8797_v23, 0.0 }
 0x2c9   : > { %10634 = vst [vmem:[#allocation73_spill] sm:$0xff] %v8803_v9  ;;  %v4769_v61 = vsel %vm4163_vm2, %v4534_v0, 0.0  ;;  %v4381_v29 = vsel %vm4163_vm2, %v8803_v9, 0.0  ;;  %v4535_v12 = vmul.f32 %v8803_v9, %v8803_v9 }
 0x2ca   : > { %v4382_v63 = vadd.f32 %v4381_v29, %v4380_v27  ;;  %v6426_v39 = vpop.f32.mrb[112].mxu1  ;;  %v4770_v13 = vadd.f32 %v4769_v61, %v4768_v3  ;;  %v4773_v61 = vsel %vm4163_vm2, %v4536_v40, 0.0 }
 0x2cb   : > { %v4771_v58 = vsel %vm4163_vm2, %v4535_v12, 0.0  ;;  %v6686_v56 = vpop.f32.mrb[112].mxu0  ;;  %v1963_v19 = vpop.f32.mrb[113].mxu1 }
 0x2cc   : > { %v4384_v15 = vadd.f32 %v4383_v2, %v4382_v63  ;;  %v8818_v42 = vadd.f32 %v6686_v56, %v6426_v39  ;;  %v3972_v20 = vpop.f32.mrb[113].mxu0  ;;  %v6427_v0 = vpop.f32.mrb[114].mxu1  ;;  %v4772_v27 = vadd.f32 %v4771_v58, %v4770_v13  ;;  %v4775_v13 = vsel %vm4163_vm2, %v4537_v47, 0.0 }
 0x2cd   : > { %v8822_v29 = vadd.f32 %v3972_v20, %v1963_v19  ;;  %v6687_v41 = vpop.f32.mrb[114].mxu0  ;;  %v1966_v3 = vpop.f32.mrb[115].mxu1 }
 0x2ce   : > { %10635 = vst [vmem:[#allocation74_spill] sm:$0xff] %v8818_v42  ;;  %v4386_v12 = vadd.f32 %v4385_v5, %v4384_v15  ;;  %v8825_v9 = vadd.f32 %v6687_v41, %v6427_v0  ;;  %v3975_v36 = vpop.f32.mrb[115].mxu0  ;;  %v4774_v46 = vadd.f32 %v4773_v61, %v4772_v27  ;;  %v4540_v15 = vmul.f32 %v8818_v42, %v8818_v42 }
 0x2cf   : > { %10636 = vst [vmem:[#allocation75_spill] sm:$0xff] %v8822_v29  ;;  %v4387_v63 = vsel %vm4163_vm2, %v8822_v29, 0.0  ;;  %v4538_v39 = vmul.f32 %v8822_v29, %v8822_v29  ;;  %v8831_v2 = vadd.f32 %v3975_v36, %v1966_v3  ;;  %v4391_v36 = vsel %vm4163_vm2, %v8818_v42, 0.0 }
 0x2d0   : > { %10637 = vst [vmem:[#allocation76_spill] sm:$0xff] %v8825_v9  ;;  %v4388_v58 = vadd.f32 %v4387_v63, %v4386_v12  ;;  %v4776_v56 = vadd.f32 %v4775_v13, %v4774_v46  ;;  %v4541_v3 = vmul.f32 %v8825_v9, %v8825_v9  ;;  %v4393_v13 = vsel %vm4163_vm2, %v8825_v9, 0.0 }
 0x2d1   : > { %10638 = vst [vmem:[#allocation77_spill] sm:$0xff] %v8831_v2  ;;  %v4777_v19 = vsel %vm4163_vm2, %v4538_v39, 0.0  ;;  %v4389_v41 = vsel %vm4163_vm2, %v8831_v2, 0.0  ;;  %v4539_v40 = vmul.f32 %v8831_v2, %v8831_v2 }
 0x2d2   : > { %v4390_v20 = vadd.f32 %v4389_v41, %v4388_v58  ;;  %v6430_v0 = vpop.f32.mrb[116].mxu1  ;;  %v4778_v5 = vadd.f32 %v4777_v19, %v4776_v56  ;;  %v4781_v19 = vsel %vm4163_vm2, %v4540_v15, 0.0 }
 0x2d3   : > { %v4779_v47 = vsel %vm4163_vm2, %v4539_v40, 0.0  ;;  %v6690_v46 = vpop.f32.mrb[116].mxu0  ;;  %v1979_v27 = vpop.f32.mrb[117].mxu1 }
 0x2d4   : > { %v4392_v61 = vadd.f32 %v4391_v36, %v4390_v20  ;;  %v8846_v12 = vadd.f32 %v6690_v46, %v6430_v0  ;;  %v3988_v63 = vpop.f32.mrb[117].mxu0  ;;  %v6431_v39 = vpop.f32.mrb[118].mxu1  ;;  %v4780_v58 = vadd.f32 %v4779_v47, %v4778_v5  ;;  %v4783_v5 = vsel %vm4163_vm2, %v4541_v3, 0.0 }
 0x2d5   : > { %v8850_v41 = vadd.f32 %v3988_v63, %v1979_v27  ;;  %v6691_v42 = vpop.f32.mrb[118].mxu0  ;;  %v1982_v56 = vpop.f32.mrb[119].mxu1 }
 0x2d6   : > { %10639 = vst [vmem:[#allocation78_spill] sm:$0xff] %v8846_v12  ;;  %v4394_v40 = vadd.f32 %v4393_v13, %v4392_v61  ;;  %v8853_v2 = vadd.f32 %v6691_v42, %v6431_v39  ;;  %v3991_v29 = vpop.f32.mrb[119].mxu0  ;;  %v4782_v23 = vadd.f32 %v4781_v19, %v4780_v58  ;;  %v4544_v61 = vmul.f32 %v8846_v12, %v8846_v12 }
 0x2d7   : > { %10640 = vst [vmem:[#allocation79_spill] sm:$0xff] %v8850_v41  ;;  %v4395_v20 = vsel %vm4163_vm2, %v8850_v41, 0.0  ;;  %v4542_v0 = vmul.f32 %v8850_v41, %v8850_v41  ;;  %v8859_v36 = vadd.f32 %v3991_v29, %v1982_v56  ;;  %v4399_v29 = vsel %vm4163_vm2, %v8846_v12, 0.0 }
 0x2d8   : > { %10641 = vst [vmem:[#allocation80_spill] sm:$0xff] %v8853_v2  ;;  %v4396_v47 = vadd.f32 %v4395_v20, %v4394_v40  ;;  %v4784_v46 = vadd.f32 %v4783_v5, %v4782_v23  ;;  %v4545_v56 = vmul.f32 %v8853_v2, %v8853_v2  ;;  %v4401_v5 = vsel %vm4163_vm2, %v8853_v2, 0.0 }
 0x2d9   : > { %10642 = vst [vmem:[#allocation81_spill] sm:$0xff] %v8859_v36  ;;  %v4785_v27 = vsel %vm4163_vm2, %v4542_v0, 0.0  ;;  %v4397_v42 = vsel %vm4163_vm2, %v8859_v36, 0.0  ;;  %v4543_v15 = vmul.f32 %v8859_v36, %v8859_v36 }
 0x2da   : > { %v4398_v63 = vadd.f32 %v4397_v42, %v4396_v47  ;;  %v6434_v39 = vpop.f32.mrb[120].mxu1  ;;  %v4786_v13 = vadd.f32 %v4785_v27, %v4784_v46  ;;  %v4789_v27 = vsel %vm4163_vm2, %v4544_v61, 0.0 }
 0x2db   : > { %v4787_v3 = vsel %vm4163_vm2, %v4543_v15, 0.0  ;;  %v6694_v23 = vpop.f32.mrb[120].mxu0  ;;  %v1995_v58 = vpop.f32.mrb[121].mxu1 }
 0x2dc   : > { %v4400_v19 = vadd.f32 %v4399_v29, %v4398_v63  ;;  %v8874_v40 = vadd.f32 %v6694_v23, %v6434_v39  ;;  %v4004_v20 = vpop.f32.mrb[121].mxu0  ;;  %v6435_v0 = vpop.f32.mrb[122].mxu1  ;;  %v4788_v47 = vadd.f32 %v4787_v3, %v4786_v13  ;;  %v4791_v13 = vsel %vm4163_vm2, %v4545_v56, 0.0 }
 0x2dd   : > { %v8878_v42 = vadd.f32 %v4004_v20, %v1995_v58  ;;  %v6695_v12 = vpop.f32.mrb[122].mxu0  ;;  %v1998_v46 = vpop.f32.mrb[123].mxu1 }
 0x2de   : > { %10643 = vst [vmem:[#allocation82_spill] sm:$0xff] %v8874_v40  ;;  %v4402_v15 = vadd.f32 %v4401_v5, %v4400_v19  ;;  %v8881_v36 = vadd.f32 %v6695_v12, %v6435_v0  ;;  %v4007_v41 = vpop.f32.mrb[123].mxu0  ;;  %v4790_v9 = vadd.f32 %v4789_v27, %v4788_v47  ;;  %v4548_v19 = vmul.f32 %v8874_v40, %v8874_v40 }
 0x2df   : > { %10644 = vst [vmem:[#allocation83_spill] sm:$0xff] %v8878_v42  ;;  %v4403_v63 = vsel %vm4163_vm2, %v8878_v42, 0.0  ;;  %v4546_v39 = vmul.f32 %v8878_v42, %v8878_v42  ;;  %v8887_v29 = vadd.f32 %v4007_v41, %v1998_v46  ;;  %v4407_v41 = vsel %vm4163_vm2, %v8874_v40, 0.0 }
 0x2e0   : > { %10645 = vst [vmem:[#allocation84_spill] sm:$0xff] %v8881_v36  ;;  %v4404_v3 = vadd.f32 %v4403_v63, %v4402_v15  ;;  %v4792_v23 = vadd.f32 %v4791_v13, %v4790_v9  ;;  %v4549_v46 = vmul.f32 %v8881_v36, %v8881_v36  ;;  %v4409_v13 = vsel %vm4163_vm2, %v8881_v36, 0.0 }
 0x2e1   : > { %10646 = vst [vmem:[#allocation85_spill] sm:$0xff] %v8887_v29  ;;  %v4793_v58 = vsel %vm4163_vm2, %v4546_v39, 0.0  ;;  %v4405_v12 = vsel %vm4163_vm2, %v8887_v29, 0.0  ;;  %v4547_v61 = vmul.f32 %v8887_v29, %v8887_v29 }
 0x2e2   : > { %v4406_v20 = vadd.f32 %v4405_v12, %v4404_v3  ;;  %v6438_v0 = vpop.f32.mrb[124].mxu1  ;;  %v4794_v5 = vadd.f32 %v4793_v58, %v4792_v23  ;;  %v4797_v58 = vsel %vm4163_vm2, %v4548_v19, 0.0 }
 0x2e3   : > { %v4795_v56 = vsel %vm4163_vm2, %v4547_v61, 0.0  ;;  %v6698_v9 = vpop.f32.mrb[124].mxu0  ;;  %v2011_v47 = vpop.f32.mrb[125].mxu1 }
 0x2e4   : > { %v4408_v27 = vadd.f32 %v4407_v41, %v4406_v20  ;;  %v8902_v15 = vadd.f32 %v6698_v9, %v6438_v0  ;;  %v4020_v63 = vpop.f32.mrb[125].mxu0  ;;  %v6439_v39 = vpop.f32.mrb[126].mxu1  ;;  %v4796_v3 = vadd.f32 %v4795_v56, %v4794_v5  ;;  %v4799_v5 = vsel %vm4163_vm2, %v4549_v46, 0.0 }
 0x2e5   : > { %v8906_v12 = vadd.f32 %v4020_v63, %v2011_v47  ;;  %v6699_v2 = vpop.f32.mrb[126].mxu0  ;;  %v2014_v23 = vpop.f32.mrb[127].mxu1 }
 0x2e6   : > { %10647 = vst [vmem:[#allocation86_spill] sm:$0xff] %v8902_v15  ;;  %v4410_v61 = vadd.f32 %v4409_v13, %v4408_v27  ;;  %v8909_v40 = vadd.f32 %v6699_v2, %v6439_v39  ;;  %v4023_v29 = vpop.f32.mrb[127].mxu0  ;;  %v4798_v42 = vadd.f32 %v4797_v58, %v4796_v3  ;;  %v4552_v27 = vmul.f32 %v8902_v15, %v8902_v15 }
 0x2e7   : > { %10648 = vst [vmem:[#allocation87_spill] sm:$0xff] %v8906_v12  ;;  %v4411_v20 = vsel %vm4163_vm2, %v8906_v12, 0.0  ;;  %v4550_v0 = vmul.f32 %v8906_v12, %v8906_v12  ;;  %v8915_v41 = vadd.f32 %v4023_v29, %v2014_v23  ;;  %v4415_v29 = vsel %vm4163_vm2, %v8902_v15, 0.0 }
 0x2e8   : > { %10649 = vst [vmem:[#allocation88_spill] sm:$0xff] %v8909_v40  ;;  %v4412_v56 = vadd.f32 %v4411_v20, %v4410_v61  ;;  %v4800_v9 = vadd.f32 %v4799_v5, %v4798_v42  ;;  %v4553_v42 = vmul.f32 %v8909_v40, %v8909_v40  ;;  %v4417_v3 = vsel %vm4163_vm2, %v8909_v40, 0.0 }
 0x2e9   : > { %10650 = vst [vmem:[#allocation89_spill] sm:$0xff] %v8915_v41  ;;  %v4801_v47 = vsel %vm4163_vm2, %v4550_v0, 0.0  ;;  %v4413_v2 = vsel %vm4163_vm2, %v8915_v41, 0.0  ;;  %v4551_v19 = vmul.f32 %v8915_v41, %v8915_v41  ;;  %v4805_v58 = vsel %vm4163_vm2, %v4552_v27, 0.0 }
 0x2ea   : > { %v4414_v63 = vadd.f32 %v4413_v2, %v4412_v56  ;;  %v4802_v39 = vadd.f32 %v4801_v47, %v4800_v9  ;;  %v4807_v0 = vsel %vm4163_vm2, %v4553_v42, 0.0 }
 0x2eb   : > { %v4803_v46 = vsel %vm4163_vm2, %v4551_v19, 0.0 }
 0x2ec   : > { %v4416_v13 = vadd.f32 %v4415_v29, %v4414_v63  ;;  %v4804_v23 = vadd.f32 %v4803_v46, %v4802_v39 }
 0x2ee   : > { %v4418_v61 = vadd.f32 %v4417_v3, %v4416_v13  ;;  %v4806_v20 = vadd.f32 %v4805_v58, %v4804_v23  ;;  %v10693_v3 = vld [vmem:[#allocation37_spill] sm:$0xff] }
 0x2ef   : > { %v10733_v58 = vld [vmem:[#allocation77_spill] sm:$0xff] }
 0x2f0   : > { %v4419_v5 = vrot.slane %v4418_v61, 4  ;;  %v4808_v56 = vadd.f32 %v4807_v0, %v4806_v20  ;;  %v10737_v0 = vld [vmem:[#allocation81_spill] sm:$0xff]  ;;  %v10738_v20 = vld [vmem:[#allocation78_spill] sm:$0xff] }
 0x2f2   : > { %v4420_v2 = vadd.f32 %v4419_v5, %v4418_v61  ;;  %v4809_v9 = vrot.slane %v4808_v56, 4  ;;  %v10729_v5 = vld [vmem:[#allocation73_spill] sm:$0xff]  ;;  %v10739_v61 = vld [vmem:[#allocation80_spill] sm:$0xff] }
 0x2f4   : > { %v4421_v47 = vrot.slane %v4420_v2, 2  ;;  %v4810_v19 = vadd.f32 %v4809_v9, %v4808_v56  ;;  %v10653_v9 = vld [vmem:[#allocation2_spill] sm:$0xff]  ;;  %v10735_v56 = vld [vmem:[#allocation76_spill] sm:$0xff] }
 0x2f6   : > { %v4422_v15 = vadd.f32 %v4421_v47, %v4420_v2  ;;  %v4811_v41 = vrot.slane %v4810_v19, 2  ;;  %v10652_v2 = vld [vmem:[#allocation5_spill] sm:$0xff]  ;;  %v10654_v47 = vld [vmem:[#allocation4_spill] sm:$0xff] }
 0x2f8   : > { %v4423_v12 = vrot.slane %v4422_v15, 1  ;;  %v4812_v63 = vadd.f32 %v4811_v41, %v4810_v19  ;;  %v10655_v19 = vld [vmem:[#allocation7_spill] sm:$0xff] }
 0x2fa   : > { %v4424_v29 = vadd.f32 %v4423_v12, %v4422_v15  ;;  %v4813_v36 = vrot.slane %v4812_v63, 1  ;;  %v10736_v12 = vld [vmem:[#allocation79_spill] sm:$0xff] }
 0x2fc   : > { %v8934_v40 = vmul.f32 0.0009765625, %v4424_v29  ;;  %v4814_v39 = vadd.f32 %v4813_v36, %v4812_v63  ;;  %v10656_v63 = vld [vmem:[#allocation9_spill] sm:$0xff]  ;;  %v10657_v29 = vld [vmem:[#allocation6_spill] sm:$0xff] }
 0x2fe   : > { %v8938_v27 = vmul.f32 %v8934_v40, %v8934_v40  ;;  %v8940_v46 = vmul.f32 0.0009765625, %v4814_v39  ;;  %v10651_v39 = vld [vmem:[#allocation3_spill] sm:$0xff]  ;;  %v10742_v15 = vsub.f32 %v7992_v26, %v8934_v40  ;;  %v10743_v13 = vsub.f32 %v7996_v51, %v8934_v40 }
 0x300   : > { %v10692_v23 = vsub.f32 %v8940_v46, %v8938_v27  ;;  %v10740_v46 = vsub.f32 %v7994_v8, %v8934_v40 }
 0x302   : > { %v4946_v42 = vadd.f32 1e-05, %v10692_v23  ;;  %v10741_v23 = vsub.f32 %v8000_v44, %v8934_v40 }
 0x304   : > { %7101 = vrsqrt.f32 %v4946_v42 }
 0x30e   : > { %v9195_v27 = vpop.eup %7101 }
 0x30f   : > { %v9209_v42 = vmul.f32 %v9195_v27, %v10740_v46  ;;  %v9215_v36 = vmul.f32 %v9195_v27, %v10741_v23  ;;  %v9221_v41 = vmul.f32 %v9195_v27, %v10742_v15  ;;  %v9227_v8 = vmul.f32 %v9195_v27, %v10743_v13 }
 0x310   : > { %v10744_v46 = vsub.f32 %v8033_v55, %v8934_v40  ;;  %v10745_v23 = vsub.f32 %v8042_v60, %v8934_v40  ;;  %v10746_v15 = vsub.f32 %v8028_v37, %v8934_v40  ;;  %v10747_v13 = vsub.f32 %v8040_v30, %v8934_v40 }
 0x312   : > { %v9233_v44 = vmul.f32 %v9195_v27, %v10744_v46  ;;  %v9239_v26 = vmul.f32 %v9195_v27, %v10745_v23  ;;  %v9245_v51 = vmul.f32 %v9195_v27, %v10746_v15  ;;  %v9251_v55 = vmul.f32 %v9195_v27, %v10747_v13 }
 0x313   : > { %v10748_v46 = vsub.f32 %v8072_v31, %v8934_v40  ;;  %v10749_v23 = vsub.f32 %v8081_v45, %v8934_v40  ;;  %v10750_v15 = vsub.f32 %v8068_v52, %v8934_v40  ;;  %v10751_v13 = vsub.f32 %v8075_v7, %v8934_v40 }
 0x315   : > { %v9257_v60 = vmul.f32 %v9195_v27, %v10748_v46  ;;  %v9263_v37 = vmul.f32 %v9195_v27, %v10749_v23  ;;  %v9269_v30 = vmul.f32 %v9195_v27, %v10750_v15  ;;  %v9275_v31 = vmul.f32 %v9195_v27, %v10751_v13 }
 0x316   : > { %v10752_v46 = vsub.f32 %v8112_v18, %v8934_v40  ;;  %v10753_v23 = vsub.f32 %v8121_v14, %v8934_v40  ;;  %v10754_v15 = vsub.f32 %v8108_v24, %v8934_v40  ;;  %v10755_v13 = vsub.f32 %v8115_v34, %v8934_v40 }
 0x318   : > { %v9281_v45 = vmul.f32 %v9195_v27, %v10752_v46  ;;  %v9287_v52 = vmul.f32 %v9195_v27, %v10753_v23  ;;  %v9293_v7 = vmul.f32 %v9195_v27, %v10754_v15  ;;  %v9299_v18 = vmul.f32 %v9195_v27, %v10755_v13 }
 0x319   : > { %v10756_v46 = vsub.f32 %v8148_v62, %v8934_v40  ;;  %v10757_v23 = vsub.f32 %v8157_v57, %v8934_v40  ;;  %v10758_v15 = vsub.f32 %v8144_v38, %v8934_v40  ;;  %v10759_v13 = vsub.f32 %v8151_v22, %v8934_v40 }
 0x31b   : > { %v9305_v14 = vmul.f32 %v9195_v27, %v10756_v46  ;;  %v9311_v24 = vmul.f32 %v9195_v27, %v10757_v23  ;;  %v9317_v34 = vmul.f32 %v9195_v27, %v10758_v15  ;;  %v9323_v62 = vmul.f32 %v9195_v27, %v10759_v13 }
 0x31c   : > { %v10760_v46 = vsub.f32 %v8178_v48, %v8934_v40  ;;  %v10761_v23 = vsub.f32 %v8187_v11, %v8934_v40  ;;  %v10762_v15 = vsub.f32 %v8174_v32, %v8934_v40  ;;  %v10763_v13 = vsub.f32 %v8181_v35, %v8934_v40 }
 0x31e   : > { %v9329_v57 = vmul.f32 %v9195_v27, %v10760_v46  ;;  %v9335_v38 = vmul.f32 %v9195_v27, %v10761_v23  ;;  %v9341_v22 = vmul.f32 %v9195_v27, %v10762_v15  ;;  %v9347_v48 = vmul.f32 %v9195_v27, %v10763_v13 }
 0x31f   : > { %v10764_v46 = vsub.f32 %v8206_v21, %v8934_v40  ;;  %v10765_v23 = vsub.f32 %v8215_v53, %v8934_v40  ;;  %v10766_v15 = vsub.f32 %v8202_v59, %v8934_v40  ;;  %v10767_v13 = vsub.f32 %v8209_v1, %v8934_v40 }
 0x321   : > { %v9353_v11 = vmul.f32 %v9195_v27, %v10764_v46  ;;  %v9359_v32 = vmul.f32 %v9195_v27, %v10765_v23  ;;  %v9365_v35 = vmul.f32 %v9195_v27, %v10766_v15  ;;  %v9371_v21 = vmul.f32 %v9195_v27, %v10767_v13 }
 0x322   : > { %v10768_v46 = vsub.f32 %v8234_v17, %v8934_v40  ;;  %v10769_v23 = vsub.f32 %v8243_v33, %v8934_v40  ;;  %v10770_v15 = vsub.f32 %v8230_v28, %v8934_v40  ;;  %v10771_v13 = vsub.f32 %v8237_v4, %v8934_v40 }
 0x324   : > { %v9377_v53 = vmul.f32 %v9195_v27, %v10768_v46  ;;  %v9383_v59 = vmul.f32 %v9195_v27, %v10769_v23  ;;  %v9389_v1 = vmul.f32 %v9195_v27, %v10770_v15  ;;  %v9395_v17 = vmul.f32 %v9195_v27, %v10771_v13 }
 0x325   : > { %v10772_v46 = vsub.f32 %v8262_v54, %v8934_v40  ;;  %v10773_v23 = vsub.f32 %v8271_v16, %v8934_v40  ;;  %v10774_v15 = vsub.f32 %v8258_v50, %v8934_v40  ;;  %v10775_v13 = vsub.f32 %v8265_v43, %v8934_v40 }
 0x327   : > { %v9401_v33 = vmul.f32 %v9195_v27, %v10772_v46  ;;  %v9407_v28 = vmul.f32 %v9195_v27, %v10773_v23  ;;  %v9413_v4 = vmul.f32 %v9195_v27, %v10774_v15  ;;  %v9419_v54 = vmul.f32 %v9195_v27, %v10775_v13 }
 0x328   : > { %v10776_v46 = vsub.f32 %v8290_v10, %v8934_v40  ;;  %v10777_v23 = vsub.f32 %v8299_v49, %v8934_v40  ;;  %v10778_v15 = vsub.f32 %v8286_v6, %v8934_v40  ;;  %v10779_v13 = vsub.f32 %v8293_v25, %v8934_v40 }
 0x32a   : > { %v9425_v16 = vmul.f32 %v9195_v27, %v10776_v46  ;;  %v9431_v50 = vmul.f32 %v9195_v27, %v10777_v23  ;;  %v9437_v43 = vmul.f32 %v9195_v27, %v10778_v15  ;;  %v9443_v10 = vmul.f32 %v9195_v27, %v10779_v13 }
 0x32b   : > { %v10780_v46 = vsub.f32 %v10651_v39, %v8934_v40  ;;  %v10781_v23 = vsub.f32 %v10652_v2, %v8934_v40  ;;  %v10782_v15 = vsub.f32 %v10653_v9, %v8934_v40  ;;  %v10783_v13 = vsub.f32 %v10654_v47, %v8934_v40 }
 0x32d   : > { %v9449_v49 = vmul.f32 %v9195_v27, %v10780_v46  ;;  %v9455_v6 = vmul.f32 %v9195_v27, %v10781_v23  ;;  %v9461_v25 = vmul.f32 %v9195_v27, %v10782_v15  ;;  %v9467_v39 = vmul.f32 %v9195_v27, %v10783_v13  ;;  %v10791_v13 = vld [vmem:[#allocation8_spill] sm:$0xff] }
 0x32e   : > { %v10785_v46 = vsub.f32 %v10655_v19, %v8934_v40  ;;  %v10787_v23 = vsub.f32 %v10656_v63, %v8934_v40  ;;  %v10789_v15 = vsub.f32 %v10657_v29, %v8934_v40 }
 0x32f   : > { %10784 = vst [vmem:[#allocation3_spill] sm:$0xff] %v9467_v39  ;;  %v10792_v39 = vsub.f32 %v10791_v13, %v8934_v40 }
 0x330   : > { %v9473_v2 = vmul.f32 %v9195_v27, %v10785_v46  ;;  %v9479_v9 = vmul.f32 %v9195_v27, %v10787_v23  ;;  %v9485_v47 = vmul.f32 %v9195_v27, %v10789_v15  ;;  %v10794_v46 = vld [vmem:[#allocation11_spill] sm:$0xff]  ;;  %v10797_v23 = vld [vmem:[#allocation13_spill] sm:$0xff]  ;;  %v10800_v15 = vld [vmem:[#allocation10_spill] sm:$0xff] }
 0x331   : > { %v9491_v19 = vmul.f32 %v9195_v27, %v10792_v39  ;;  %v10803_v39 = vld [vmem:[#allocation12_spill] sm:$0xff] }
 0x332   : > { %10786 = vst [vmem:[#allocation5_spill] sm:$0xff] %v9473_v2  ;;  %10788 = vst [vmem:[#allocation2_spill] sm:$0xff] %v9479_v9  ;;  %v10795_v2 = vsub.f32 %v10794_v46, %v8934_v40  ;;  %v10798_v9 = vsub.f32 %v10797_v23, %v8934_v40 }
 0x333   : > { %10790 = vst [vmem:[#allocation4_spill] sm:$0xff] %v9485_v47  ;;  %10793 = vst [vmem:[#allocation7_spill] sm:$0xff] %v9491_v19  ;;  %v10801_v47 = vsub.f32 %v10800_v15, %v8934_v40  ;;  %v10804_v19 = vsub.f32 %v10803_v39, %v8934_v40 }
 0x334   : > { %v9497_v63 = vmul.f32 %v9195_v27, %v10795_v2  ;;  %v9503_v29 = vmul.f32 %v9195_v27, %v10798_v9  ;;  %v10806_v2 = vld [vmem:[#allocation15_spill] sm:$0xff]  ;;  %v10809_v9 = vld [vmem:[#allocation17_spill] sm:$0xff] }
 0x335   : > { %v9509_v13 = vmul.f32 %v9195_v27, %v10801_v47  ;;  %v9515_v46 = vmul.f32 %v9195_v27, %v10804_v19  ;;  %v10812_v47 = vld [vmem:[#allocation14_spill] sm:$0xff]  ;;  %v10815_v19 = vld [vmem:[#allocation16_spill] sm:$0xff] }
 0x336   : > { %10796 = vst [vmem:[#allocation9_spill] sm:$0xff] %v9497_v63  ;;  %10799 = vst [vmem:[#allocation6_spill] sm:$0xff] %v9503_v29  ;;  %v10807_v63 = vsub.f32 %v10806_v2, %v8934_v40  ;;  %v10810_v29 = vsub.f32 %v10809_v9, %v8934_v40 }
 0x337   : > { %10802 = vst [vmem:[#allocation37_spill] sm:$0xff] %v9509_v13  ;;  %10805 = vst [vmem:[#allocation73_spill] sm:$0xff] %v9515_v46  ;;  %v10813_v13 = vsub.f32 %v10812_v47, %v8934_v40  ;;  %v10816_v46 = vsub.f32 %v10815_v19, %v8934_v40 }
 0x338   : > { %v9521_v23 = vmul.f32 %v9195_v27, %v10807_v63  ;;  %v9527_v15 = vmul.f32 %v9195_v27, %v10810_v29  ;;  %v10818_v63 = vld [vmem:[#allocation19_spill] sm:$0xff]  ;;  %v10821_v29 = vld [vmem:[#allocation21_spill] sm:$0xff] }
 0x339   : > { %v9533_v39 = vmul.f32 %v9195_v27, %v10813_v13  ;;  %v9539_v2 = vmul.f32 %v9195_v27, %v10816_v46  ;;  %v10824_v13 = vld [vmem:[#allocation18_spill] sm:$0xff]  ;;  %v10827_v46 = vld [vmem:[#allocation20_spill] sm:$0xff] }
 0x33a   : > { %10808 = vst [vmem:[#allocation77_spill] sm:$0xff] %v9521_v23  ;;  %10811 = vst [vmem:[#allocation76_spill] sm:$0xff] %v9527_v15  ;;  %v10819_v23 = vsub.f32 %v10818_v63, %v8934_v40  ;;  %v10822_v15 = vsub.f32 %v10821_v29, %v8934_v40 }
 0x33b   : > { %10814 = vst [vmem:[#allocation79_spill] sm:$0xff] %v9533_v39  ;;  %10817 = vst [vmem:[#allocation81_spill] sm:$0xff] %v9539_v2  ;;  %v10825_v39 = vsub.f32 %v10824_v13, %v8934_v40  ;;  %v10828_v2 = vsub.f32 %v10827_v46, %v8934_v40 }
 0x33c   : > { %v9545_v9 = vmul.f32 %v9195_v27, %v10819_v23  ;;  %v9551_v47 = vmul.f32 %v9195_v27, %v10822_v15  ;;  %v10830_v23 = vld [vmem:[#allocation23_spill] sm:$0xff]  ;;  %v10833_v15 = vld [vmem:[#allocation25_spill] sm:$0xff] }
 0x33d   : > { %v9557_v19 = vmul.f32 %v9195_v27, %v10825_v39  ;;  %v9563_v63 = vmul.f32 %v9195_v27, %v10828_v2  ;;  %v10836_v39 = vld [vmem:[#allocation22_spill] sm:$0xff]  ;;  %v10839_v2 = vld [vmem:[#allocation24_spill] sm:$0xff] }
 0x33e   : > { %10820 = vst [vmem:[#allocation78_spill] sm:$0xff] %v9545_v9  ;;  %10823 = vst [vmem:[#allocation80_spill] sm:$0xff] %v9551_v47  ;;  %v10831_v9 = vsub.f32 %v10830_v23, %v8934_v40  ;;  %v10834_v47 = vsub.f32 %v10833_v15, %v8934_v40 }
 0x33f   : > { %10826 = vst [vmem:[#allocation8_spill] sm:$0xff] %v9557_v19  ;;  %10829 = vst [vmem:[#allocation11_spill] sm:$0xff] %v9563_v63  ;;  %v10837_v19 = vsub.f32 %v10836_v39, %v8934_v40  ;;  %v10840_v63 = vsub.f32 %v10839_v2, %v8934_v40 }
 0x340   : > { %v9569_v29 = vmul.f32 %v9195_v27, %v10831_v9  ;;  %v9575_v13 = vmul.f32 %v9195_v27, %v10834_v47  ;;  %v10842_v9 = vld [vmem:[#allocation27_spill] sm:$0xff]  ;;  %v10845_v47 = vld [vmem:[#allocation29_spill] sm:$0xff] }
 0x341   : > { %v9581_v46 = vmul.f32 %v9195_v27, %v10837_v19  ;;  %v9587_v23 = vmul.f32 %v9195_v27, %v10840_v63  ;;  %v10848_v19 = vld [vmem:[#allocation26_spill] sm:$0xff]  ;;  %v10851_v63 = vld [vmem:[#allocation28_spill] sm:$0xff] }
 0x342   : > { %10832 = vst [vmem:[#allocation13_spill] sm:$0xff] %v9569_v29  ;;  %10835 = vst [vmem:[#allocation10_spill] sm:$0xff] %v9575_v13  ;;  %v10843_v29 = vsub.f32 %v10842_v9, %v8934_v40  ;;  %v10846_v13 = vsub.f32 %v10845_v47, %v8934_v40 }
 0x343   : > { %10838 = vst [vmem:[#allocation12_spill] sm:$0xff] %v9581_v46  ;;  %10841 = vst [vmem:[#allocation15_spill] sm:$0xff] %v9587_v23  ;;  %v10849_v46 = vsub.f32 %v10848_v19, %v8934_v40  ;;  %v10852_v23 = vsub.f32 %v10851_v63, %v8934_v40 }
 0x344   : > { %v9593_v15 = vmul.f32 %v9195_v27, %v10843_v29  ;;  %v9599_v39 = vmul.f32 %v9195_v27, %v10846_v13  ;;  %v10854_v29 = vld [vmem:[#allocation31_spill] sm:$0xff]  ;;  %v10857_v13 = vld [vmem:[#allocation33_spill] sm:$0xff] }
 0x345   : > { %v9605_v2 = vmul.f32 %v9195_v27, %v10849_v46  ;;  %v9611_v9 = vmul.f32 %v9195_v27, %v10852_v23  ;;  %v10859_v46 = vld [vmem:[#allocation30_spill] sm:$0xff]  ;;  %v10862_v23 = vld [vmem:[#allocation32_spill] sm:$0xff] }
 0x346   : > { %10844 = vst [vmem:[#allocation17_spill] sm:$0xff] %v9593_v15  ;;  %10847 = vst [vmem:[#allocation14_spill] sm:$0xff] %v9599_v39  ;;  %v10855_v15 = vsub.f32 %v10854_v29, %v8934_v40  ;;  %v10858_v39 = vsub.f32 %v10857_v13, %v8934_v40 }
 0x347   : > { %10850 = vst [vmem:[#allocation16_spill] sm:$0xff] %v9605_v2  ;;  %10853 = vst [vmem:[#allocation19_spill] sm:$0xff] %v9611_v9  ;;  %v10860_v2 = vsub.f32 %v10859_v46, %v8934_v40  ;;  %v10863_v9 = vsub.f32 %v10862_v23, %v8934_v40 }
 0x348   : > { %v9617_v47 = vmul.f32 %v9195_v27, %v10855_v15  ;;  %v9623_v19 = vmul.f32 %v9195_v27, %v10858_v39  ;;  %v10865_v15 = vld [vmem:[#allocation35_spill] sm:$0xff]  ;;  %v10868_v39 = vsub.f32 %v10693_v3, %v8934_v40 }
 0x349   : > { %v9629_v63 = vmul.f32 %v9195_v27, %v10860_v2  ;;  %v9635_v29 = vmul.f32 %v9195_v27, %v10863_v9  ;;  %v10870_v2 = vld [vmem:[#allocation34_spill] sm:$0xff]  ;;  %v10873_v9 = vld [vmem:[#allocation36_spill] sm:$0xff] }
 0x34a   : > { %10856 = vst [vmem:[#allocation21_spill] sm:$0xff] %v9617_v47  ;;  %v10866_v47 = vsub.f32 %v10865_v15, %v8934_v40  ;;  %v9647_v46 = vmul.f32 %v9195_v27, %v10868_v39  ;;  %v10879_v39 = vld [vmem:[#allocation41_spill] sm:$0xff] }
 0x34b   : > { %10861 = vst [vmem:[#allocation18_spill] sm:$0xff] %v9629_v63  ;;  %10864 = vst [vmem:[#allocation20_spill] sm:$0xff] %v9635_v29  ;;  %v10871_v63 = vsub.f32 %v10870_v2, %v8934_v40  ;;  %v10874_v29 = vsub.f32 %v10873_v9, %v8934_v40 }
 0x34c   : > { %v9641_v13 = vmul.f32 %v9195_v27, %v10866_v47  ;;  %10869 = vst [vmem:[#allocation25_spill] sm:$0xff] %v9647_v46  ;;  %v10876_v47 = vld [vmem:[#allocation39_spill] sm:$0xff]  ;;  %v10880_v46 = vsub.f32 %v10879_v39, %v8934_v40 }
 0x34d   : > { %v9653_v23 = vmul.f32 %v9195_v27, %v10871_v63  ;;  %v9659_v15 = vmul.f32 %v9195_v27, %v10874_v29  ;;  %v10882_v63 = vld [vmem:[#allocation38_spill] sm:$0xff]  ;;  %v10885_v29 = vld [vmem:[#allocation40_spill] sm:$0xff] }
 0x34e   : > { %10867 = vst [vmem:[#allocation23_spill] sm:$0xff] %v9641_v13  ;;  %v10877_v13 = vsub.f32 %v10876_v47, %v8934_v40  ;;  %v9671_v2 = vmul.f32 %v9195_v27, %v10880_v46  ;;  %v10891_v46 = vld [vmem:[#allocation45_spill] sm:$0xff] }
 0x34f   : > { %10872 = vst [vmem:[#allocation22_spill] sm:$0xff] %v9653_v23  ;;  %10875 = vst [vmem:[#allocation24_spill] sm:$0xff] %v9659_v15  ;;  %v10883_v23 = vsub.f32 %v10882_v63, %v8934_v40  ;;  %v10886_v15 = vsub.f32 %v10885_v29, %v8934_v40 }
 0x350   : > { %v9665_v3 = vmul.f32 %v9195_v27, %v10877_v13  ;;  %10881 = vst [vmem:[#allocation29_spill] sm:$0xff] %v9671_v2  ;;  %v10888_v13 = vld [vmem:[#allocation43_spill] sm:$0xff]  ;;  %v10892_v2 = vsub.f32 %v10891_v46, %v8934_v40 }
 0x351   : > { %v9677_v9 = vmul.f32 %v9195_v27, %v10883_v23  ;;  %v9683_v47 = vmul.f32 %v9195_v27, %v10886_v15  ;;  %v10894_v23 = vld [vmem:[#allocation42_spill] sm:$0xff]  ;;  %v10897_v15 = vld [vmem:[#allocation44_spill] sm:$0xff] }
 0x352   : > { %10878 = vst [vmem:[#allocation27_spill] sm:$0xff] %v9665_v3  ;;  %v10889_v3 = vsub.f32 %v10888_v13, %v8934_v40  ;;  %v9695_v63 = vmul.f32 %v9195_v27, %v10892_v2  ;;  %v10903_v2 = vld [vmem:[#allocation49_spill] sm:$0xff] }
 0x353   : > { %10884 = vst [vmem:[#allocation26_spill] sm:$0xff] %v9677_v9  ;;  %10887 = vst [vmem:[#allocation28_spill] sm:$0xff] %v9683_v47  ;;  %v10895_v9 = vsub.f32 %v10894_v23, %v8934_v40  ;;  %v10898_v47 = vsub.f32 %v10897_v15, %v8934_v40 }
 0x354   : > { %v9689_v39 = vmul.f32 %v9195_v27, %v10889_v3  ;;  %10893 = vst [vmem:[#allocation33_spill] sm:$0xff] %v9695_v63  ;;  %v10900_v3 = vld [vmem:[#allocation47_spill] sm:$0xff]  ;;  %v10904_v63 = vsub.f32 %v10903_v2, %v8934_v40 }
 0x355   : > { %v9701_v29 = vmul.f32 %v9195_v27, %v10895_v9  ;;  %v9707_v13 = vmul.f32 %v9195_v27, %v10898_v47  ;;  %v10906_v9 = vld [vmem:[#allocation46_spill] sm:$0xff]  ;;  %v10909_v47 = vld [vmem:[#allocation48_spill] sm:$0xff] }
 0x356   : > { %10890 = vst [vmem:[#allocation31_spill] sm:$0xff] %v9689_v39  ;;  %v10901_v39 = vsub.f32 %v10900_v3, %v8934_v40  ;;  %v9719_v23 = vmul.f32 %v9195_v27, %v10904_v63  ;;  %v10915_v63 = vld [vmem:[#allocation53_spill] sm:$0xff] }
 0x357   : > { %10896 = vst [vmem:[#allocation30_spill] sm:$0xff] %v9701_v29  ;;  %10899 = vst [vmem:[#allocation32_spill] sm:$0xff] %v9707_v13  ;;  %v10907_v29 = vsub.f32 %v10906_v9, %v8934_v40  ;;  %v10910_v13 = vsub.f32 %v10909_v47, %v8934_v40 }
 0x358   : > { %v9713_v46 = vmul.f32 %v9195_v27, %v10901_v39  ;;  %10905 = vst [vmem:[#allocation34_spill] sm:$0xff] %v9719_v23  ;;  %v10912_v39 = vld [vmem:[#allocation51_spill] sm:$0xff]  ;;  %v10916_v23 = vsub.f32 %v10915_v63, %v8934_v40 }
 0x359   : > { %v9725_v15 = vmul.f32 %v9195_v27, %v10907_v29  ;;  %v9731_v3 = vmul.f32 %v9195_v27, %v10910_v13  ;;  %v10918_v29 = vld [vmem:[#allocation50_spill] sm:$0xff]  ;;  %v10921_v13 = vld [vmem:[#allocation52_spill] sm:$0xff] }
 0x35a   : > { %10902 = vst [vmem:[#allocation35_spill] sm:$0xff] %v9713_v46  ;;  %v10913_v46 = vsub.f32 %v10912_v39, %v8934_v40  ;;  %v9743_v9 = vmul.f32 %v9195_v27, %v10916_v23  ;;  %v10927_v23 = vld [vmem:[#allocation57_spill] sm:$0xff] }
 0x35b   : > { %10908 = vst [vmem:[#allocation36_spill] sm:$0xff] %v9725_v15  ;;  %10911 = vst [vmem:[#allocation39_spill] sm:$0xff] %v9731_v3  ;;  %v10919_v15 = vsub.f32 %v10918_v29, %v8934_v40  ;;  %v10922_v3 = vsub.f32 %v10921_v13, %v8934_v40 }
 0x35c   : > { %v9737_v2 = vmul.f32 %v9195_v27, %v10913_v46  ;;  %10917 = vst [vmem:[#allocation38_spill] sm:$0xff] %v9743_v9  ;;  %v10924_v46 = vld [vmem:[#allocation55_spill] sm:$0xff]  ;;  %v10928_v9 = vsub.f32 %v10927_v23, %v8934_v40 }
 0x35d   : > { %v9749_v47 = vmul.f32 %v9195_v27, %v10919_v15  ;;  %v9755_v39 = vmul.f32 %v9195_v27, %v10922_v3  ;;  %v10930_v15 = vld [vmem:[#allocation54_spill] sm:$0xff]  ;;  %v10933_v3 = vld [vmem:[#allocation56_spill] sm:$0xff] }
 0x35e   : > { %10914 = vst [vmem:[#allocation41_spill] sm:$0xff] %v9737_v2  ;;  %v10925_v2 = vsub.f32 %v10924_v46, %v8934_v40  ;;  %v9767_v29 = vmul.f32 %v9195_v27, %v10928_v9  ;;  %v10939_v9 = vld [vmem:[#allocation61_spill] sm:$0xff] }
 0x35f   : > { %10920 = vst [vmem:[#allocation40_spill] sm:$0xff] %v9749_v47  ;;  %10923 = vst [vmem:[#allocation43_spill] sm:$0xff] %v9755_v39  ;;  %v10931_v47 = vsub.f32 %v10930_v15, %v8934_v40  ;;  %v10934_v39 = vsub.f32 %v10933_v3, %v8934_v40 }
 0x360   : > { %v9761_v63 = vmul.f32 %v9195_v27, %v10925_v2  ;;  %10929 = vst [vmem:[#allocation42_spill] sm:$0xff] %v9767_v29  ;;  %v10936_v2 = vld [vmem:[#allocation59_spill] sm:$0xff]  ;;  %v10940_v29 = vsub.f32 %v10939_v9, %v8934_v40 }
 0x361   : > { %v9773_v13 = vmul.f32 %v9195_v27, %v10931_v47  ;;  %v9779_v46 = vmul.f32 %v9195_v27, %v10934_v39  ;;  %v10942_v47 = vld [vmem:[#allocation58_spill] sm:$0xff]  ;;  %v10945_v39 = vld [vmem:[#allocation60_spill] sm:$0xff] }
 0x362   : > { %10926 = vst [vmem:[#allocation45_spill] sm:$0xff] %v9761_v63  ;;  %v10937_v63 = vsub.f32 %v10936_v2, %v8934_v40  ;;  %v9791_v15 = vmul.f32 %v9195_v27, %v10940_v29  ;;  %v10951_v29 = vld [vmem:[#allocation65_spill] sm:$0xff] }
 0x363   : > { %10932 = vst [vmem:[#allocation44_spill] sm:$0xff] %v9773_v13  ;;  %10935 = vst [vmem:[#allocation47_spill] sm:$0xff] %v9779_v46  ;;  %v10943_v13 = vsub.f32 %v10942_v47, %v8934_v40  ;;  %v10946_v46 = vsub.f32 %v10945_v39, %v8934_v40 }
 0x364   : > { %v9785_v23 = vmul.f32 %v9195_v27, %v10937_v63  ;;  %10941 = vst [vmem:[#allocation46_spill] sm:$0xff] %v9791_v15  ;;  %v10948_v63 = vld [vmem:[#allocation63_spill] sm:$0xff]  ;;  %v10952_v15 = vsub.f32 %v10951_v29, %v8934_v40 }
 0x365   : > { %v9797_v3 = vmul.f32 %v9195_v27, %v10943_v13  ;;  %v9803_v2 = vmul.f32 %v9195_v27, %v10946_v46  ;;  %v10954_v13 = vld [vmem:[#allocation62_spill] sm:$0xff]  ;;  %v10957_v46 = vld [vmem:[#allocation64_spill] sm:$0xff] }
 0x366   : > { %10938 = vst [vmem:[#allocation49_spill] sm:$0xff] %v9785_v23  ;;  %v10949_v23 = vsub.f32 %v10948_v63, %v8934_v40  ;;  %v9815_v47 = vmul.f32 %v9195_v27, %v10952_v15  ;;  %v10963_v15 = vld [vmem:[#allocation69_spill] sm:$0xff] }
 0x367   : > { %10944 = vst [vmem:[#allocation48_spill] sm:$0xff] %v9797_v3  ;;  %10947 = vst [vmem:[#allocation51_spill] sm:$0xff] %v9803_v2  ;;  %v10955_v3 = vsub.f32 %v10954_v13, %v8934_v40  ;;  %v10958_v2 = vsub.f32 %v10957_v46, %v8934_v40 }
 0x368   : > { %v9809_v9 = vmul.f32 %v9195_v27, %v10949_v23  ;;  %10953 = vst [vmem:[#allocation50_spill] sm:$0xff] %v9815_v47  ;;  %v10960_v23 = vld [vmem:[#allocation67_spill] sm:$0xff]  ;;  %v10964_v47 = vsub.f32 %v10963_v15, %v8934_v40 }
 0x369   : > { %v9821_v39 = vmul.f32 %v9195_v27, %v10955_v3  ;;  %v9827_v63 = vmul.f32 %v9195_v27, %v10958_v2  ;;  %v10965_v3 = vld [vmem:[#allocation66_spill] sm:$0xff]  ;;  %v10968_v2 = vld [vmem:[#allocation68_spill] sm:$0xff] }
 0x36a   : > { %10950 = vst [vmem:[#allocation53_spill] sm:$0xff] %v9809_v9  ;;  %v10961_v9 = vsub.f32 %v10960_v23, %v8934_v40  ;;  %v9839_v13 = vmul.f32 %v9195_v27, %v10964_v47  ;;  %v10974_v47 = vsub.f32 %v10729_v5, %v8934_v40 }
 0x36b   : > { %10956 = vst [vmem:[#allocation52_spill] sm:$0xff] %v9821_v39  ;;  %10959 = vst [vmem:[#allocation55_spill] sm:$0xff] %v9827_v63  ;;  %v10966_v39 = vsub.f32 %v10965_v3, %v8934_v40  ;;  %v10969_v63 = vsub.f32 %v10968_v2, %v8934_v40 }
 0x36c   : > { %v9833_v29 = vmul.f32 %v9195_v27, %v10961_v9  ;;  %v10971_v9 = vld [vmem:[#allocation71_spill] sm:$0xff]  ;;  %v9863_v3 = vmul.f32 %v9195_v27, %v10974_v47  ;;  %v10982_v47 = vsub.f32 %v10733_v58, %v8934_v40 }
 0x36d   : > { %v9845_v46 = vmul.f32 %v9195_v27, %v10966_v39  ;;  %v9851_v23 = vmul.f32 %v9195_v27, %v10969_v63  ;;  %v10975_v39 = vld [vmem:[#allocation70_spill] sm:$0xff]  ;;  %v10978_v63 = vld [vmem:[#allocation72_spill] sm:$0xff] }
 0x36e   : > { %10962 = vst [vmem:[#allocation57_spill] sm:$0xff] %v9833_v29  ;;  %v10972_v29 = vsub.f32 %v10971_v9, %v8934_v40 }
 0x36f   : > { %10967 = vst [vmem:[#allocation54_spill] sm:$0xff] %v9845_v46  ;;  %10970 = vst [vmem:[#allocation56_spill] sm:$0xff] %v9851_v23  ;;  %v10976_v46 = vsub.f32 %v10975_v39, %v8934_v40  ;;  %v10979_v23 = vsub.f32 %v10978_v63, %v8934_v40  ;;  %v9888_v39 = vmul.f32 %v9195_v27, %v10982_v47 }
 0x370   : > { %v9857_v15 = vmul.f32 %v9195_v27, %v10972_v29  ;;  %v10980_v29 = vld [vmem:[#allocation75_spill] sm:$0xff]  ;;  %v10988_v47 = vsub.f32 %v10737_v0, %v8934_v40 }
 0x371   : > { %v9869_v2 = vmul.f32 %v9195_v27, %v10976_v46  ;;  %v9875_v9 = vmul.f32 %v9195_v27, %v10979_v23  ;;  %v10983_v46 = vld [vmem:[#allocation74_spill] sm:$0xff]  ;;  %v10985_v23 = vsub.f32 %v10735_v56, %v8934_v40 }
 0x372   : > { %10973 = vst [vmem:[#allocation59_spill] sm:$0xff] %v9857_v15  ;;  %v10981_v15 = vsub.f32 %v10980_v29, %v8934_v40 }
 0x373   : > { %10977 = vst [vmem:[#allocation61_spill] sm:$0xff] %v9869_v2  ;;  %v10984_v2 = vsub.f32 %v10983_v46, %v8934_v40  ;;  %v9900_v29 = vmul.f32 %v9195_v27, %v10985_v23  ;;  %v9912_v46 = vmul.f32 %v9195_v27, %v10988_v47  ;;  %v10992_v23 = vsub.f32 %v10739_v61, %v8934_v40  ;;  %v10996_v47 = vld [vmem:[#allocation85_spill] sm:$0xff] }
 0x374   : > { %v9882_v5 = vmul.f32 %v9195_v27, %v10981_v15  ;;  %v10986_v15 = vsub.f32 %v10736_v12, %v8934_v40 }
 0x375   : > { %v9894_v63 = vmul.f32 %v9195_v27, %v10984_v2  ;;  %10989 = vst [vmem:[#allocation60_spill] sm:$0xff] %v9912_v46  ;;  %v10990_v2 = vsub.f32 %v10738_v20, %v8934_v40  ;;  %v9924_v12 = vmul.f32 %v9195_v27, %v10992_v23  ;;  %v10997_v46 = vsub.f32 %v10996_v47, %v8934_v40  ;;  %v11002_v23 = vld [vmem:[#allocation84_spill] sm:$0xff] }
 0x376   : > { %v9906_v58 = vmul.f32 %v9195_v27, %v10986_v15  ;;  %v10994_v15 = vld [vmem:[#allocation83_spill] sm:$0xff] }
 0x377   : > { %v9918_v56 = vmul.f32 %v9195_v27, %v10990_v2  ;;  %10993 = vst [vmem:[#allocation65_spill] sm:$0xff] %v9924_v12  ;;  %v9936_v20 = vmul.f32 %v9195_v27, %v10997_v46  ;;  %v10999_v2 = vld [vmem:[#allocation82_spill] sm:$0xff]  ;;  %v11003_v12 = vsub.f32 %v11002_v23, %v8934_v40 }
 0x378   : > { %10987 = vst [vmem:[#allocation58_spill] sm:$0xff] %v9906_v58  ;;  %v10995_v58 = vsub.f32 %v10994_v15, %v8934_v40 }
 0x379   : > { %10991 = vst [vmem:[#allocation63_spill] sm:$0xff] %v9918_v56  ;;  %10998 = vst [vmem:[#allocation62_spill] sm:$0xff] %v9936_v20  ;;  %v11000_v56 = vsub.f32 %v10999_v2, %v8934_v40  ;;  %v9948_v15 = vmul.f32 %v9195_v27, %v11003_v12  ;;  %v11008_v2 = vld [vmem:[#allocation89_spill] sm:$0xff]  ;;  %v11011_v12 = vld [vmem:[#allocation86_spill] sm:$0xff] }
 0x37a   : > { %v9930_v0 = vmul.f32 %v9195_v27, %v10995_v58  ;;  %v11005_v58 = vld [vmem:[#allocation87_spill] sm:$0xff]  ;;  %v11013_v20 = vld [vmem:[#allocation88_spill] sm:$0xff] }
 0x37b   : > { %v9942_v61 = vmul.f32 %v9195_v27, %v11000_v56  ;;  %11004 = vst [vmem:[#allocation67_spill] sm:$0xff] %v9948_v15  ;;  %v11006_v46 = vsub.f32 %v11005_v58, %v8934_v40  ;;  %v11009_v56 = vsub.f32 %v11008_v2, %v8934_v40  ;;  %v11012_v15 = vsub.f32 %v11011_v12, %v8934_v40 }
 0x37c   : > { %v11014_v58 = vsub.f32 %v11013_v20, %v8934_v40  ;;  %v5076_v2 = vmax.f32 %v9209_v42, 0.0  ;;  %v5079_v12 = vmax.f32 %v9227_v8, 0.0  ;;  %v5082_v40 = vmax.f32 %v9245_v51, 0.0  ;;  %v11019_v20 = vld [vmem:[#allocation7_spill] sm:$0xff] }
 0x37d   : > { %11001 = vst [vmem:[#allocation64_spill] sm:$0xff] %v9942_v61  ;;  %v9959_v47 = vmul.f32 %v9195_v27, %v11006_v46  ;;  %v9965_v23 = vmul.f32 %v9195_v27, %v11009_v56  ;;  %v9971_v61 = vmul.f32 %v9195_v27, %v11012_v15  ;;  %v5077_v56 = vmax.f32 %v9215_v36, 0.0 }
 0x37e   : > { %v9977_v46 = vmul.f32 %v9195_v27, %v11014_v58  ;;  %v5081_v15 = vmax.f32 %v9239_v26, 0.0  ;;  %v5083_v27 = vmax.f32 %v9251_v55, 0.0  ;;  %v5084_v42 = vmax.f32 %v9257_v60, 0.0  ;;  %5204 = vst.msk [vmem:[%s9953_s26] sm:$0xff] %vm4163_vm2, %v5076_v2  ;;  %5207 = vst.msk [vmem:[%s9953_s26 + $0x18] sm:$0xff] %vm4163_vm2, %v5079_v12  ;;  %v11021_v2 = vld [vmem:[#allocation6_spill] sm:$0xff] }
 0x37f   : > { %11007 = vst [vmem:[#allocation69_spill] sm:$0xff] %v9959_v47  ;;  %11010 = vst [vmem:[#allocation66_spill] sm:$0xff] %v9965_v23  ;;  %v5078_v23 = vmax.f32 %v9221_v41, 0.0  ;;  %v5080_v47 = vmax.f32 %v9233_v44, 0.0  ;;  %v5085_v36 = vmax.f32 %v9263_v37, 0.0  ;;  %v5086_v41 = vmax.f32 %v9269_v30, 0.0 }
 0x380   : > { %v5087_v8 = vmax.f32 %v9275_v31, 0.0  ;;  %5205 = vst.msk [vmem:[%s9953_s26 + $0x8] sm:$0xff] %vm4163_vm2, %v5077_v56  ;;  %v5088_v44 = vmax.f32 %v9281_v45, 0.0  ;;  %v5089_v26 = vmax.f32 %v9287_v52, 0.0  ;;  %v5090_v51 = vmax.f32 %v9293_v7, 0.0  ;;  %5209 = vst.msk [vmem:[%s9953_s26 + $0x28] sm:$0xff] %vm4163_vm2, %v5081_v15 }
 0x381   : > { %5206 = vst.msk [vmem:[%s9953_s26 + $0x10] sm:$0xff] %vm4163_vm2, %v5078_v23  ;;  %v5091_v55 = vmax.f32 %v9299_v18, 0.0  ;;  %5208 = vst.msk [vmem:[%s9953_s26 + $0x20] sm:$0xff] %vm4163_vm2, %v5080_v47  ;;  %v5092_v60 = vmax.f32 %v9305_v14, 0.0  ;;  %v5093_v37 = vmax.f32 %v9311_v24, 0.0  ;;  %v5094_v30 = vmax.f32 %v9317_v34, 0.0 }
 0x382   : > { %5210 = vst.msk [vmem:[%s9953_s26 + $0x30] sm:$0xff] %vm4163_vm2, %v5082_v40  ;;  %5211 = vst.msk [vmem:[%s9953_s26 + $0x38] sm:$0xff] %vm4163_vm2, %v5083_v27  ;;  %v5095_v31 = vmax.f32 %v9323_v62, 0.0  ;;  %v5096_v45 = vmax.f32 %v9329_v57, 0.0  ;;  %v5097_v52 = vmax.f32 %v9335_v38, 0.0  ;;  %v5098_v7 = vmax.f32 %v9341_v22, 0.0 }
 0x383   : > { %5212 = vst.msk [vmem:[%s9953_s26 + $0x40] sm:$0xff] %vm4163_vm2, %v5084_v42  ;;  %5213 = vst.msk [vmem:[%s9953_s26 + $0x48] sm:$0xff] %vm4163_vm2, %v5085_v36  ;;  %v5099_v18 = vmax.f32 %v9347_v48, 0.0  ;;  %v5100_v14 = vmax.f32 %v9353_v11, 0.0  ;;  %v5101_v24 = vmax.f32 %v9359_v32, 0.0  ;;  %v5102_v34 = vmax.f32 %v9365_v35, 0.0 }
 0x384   : > { %5214 = vst.msk [vmem:[%s9953_s26 + $0x50] sm:$0xff] %vm4163_vm2, %v5086_v41  ;;  %5215 = vst.msk [vmem:[%s9953_s26 + $0x58] sm:$0xff] %vm4163_vm2, %v5087_v8  ;;  %v5103_v62 = vmax.f32 %v9371_v21, 0.0  ;;  %v5104_v57 = vmax.f32 %v9377_v53, 0.0  ;;  %v5105_v38 = vmax.f32 %v9383_v59, 0.0  ;;  %v5106_v22 = vmax.f32 %v9389_v1, 0.0 }
 0x385   : > { %5216 = vst.msk [vmem:[%s9953_s26 + $0x60] sm:$0xff] %vm4163_vm2, %v5088_v44  ;;  %5217 = vst.msk [vmem:[%s9953_s26 + $0x68] sm:$0xff] %vm4163_vm2, %v5089_v26  ;;  %v5107_v48 = vmax.f32 %v9395_v17, 0.0  ;;  %v5108_v11 = vmax.f32 %v9401_v33, 0.0  ;;  %v5109_v32 = vmax.f32 %v9407_v28, 0.0  ;;  %v5110_v35 = vmax.f32 %v9413_v4, 0.0 }
 0x386   : > { %5218 = vst.msk [vmem:[%s9953_s26 + $0x70] sm:$0xff] %vm4163_vm2, %v5090_v51  ;;  %5219 = vst.msk [vmem:[%s9953_s26 + $0x78] sm:$0xff] %vm4163_vm2, %v5091_v55  ;;  %v5111_v21 = vmax.f32 %v9419_v54, 0.0  ;;  %v5112_v53 = vmax.f32 %v9425_v16, 0.0  ;;  %v5113_v59 = vmax.f32 %v9431_v50, 0.0  ;;  %v5114_v1 = vmax.f32 %v9437_v43, 0.0 }
 0x387   : > { %5220 = vst.msk [vmem:[%s9953_s26 + $0x80] sm:$0xff] %vm4163_vm2, %v5092_v60  ;;  %5221 = vst.msk [vmem:[%s9953_s26 + $0x88] sm:$0xff] %vm4163_vm2, %v5093_v37  ;;  %v5115_v17 = vmax.f32 %v9443_v10, 0.0  ;;  %v5116_v33 = vmax.f32 %v9449_v49, 0.0  ;;  %v5117_v28 = vmax.f32 %v9455_v6, 0.0  ;;  %v5118_v4 = vmax.f32 %v9461_v25, 0.0 }
 0x388   : > { %5222 = vst.msk [vmem:[%s9953_s26 + $0x90] sm:$0xff] %vm4163_vm2, %v5094_v30  ;;  %5223 = vst.msk [vmem:[%s9953_s26 + $0x98] sm:$0xff] %vm4163_vm2, %v5095_v31  ;;  %v11015_v54 = vld [vmem:[#allocation3_spill] sm:$0xff]  ;;  %v11016_v50 = vld [vmem:[#allocation5_spill] sm:$0xff]  ;;  %v5123_v47 = vmax.f32 %v11019_v20, 0.0  ;;  %v5125_v56 = vmax.f32 %v11021_v2, 0.0 }
 0x389   : > { %5224 = vst.msk [vmem:[%s9953_s26 + $0xa0] sm:$0xff] %vm4163_vm2, %v5096_v45  ;;  %5225 = vst.msk [vmem:[%s9953_s26 + $0xa8] sm:$0xff] %vm4163_vm2, %v5097_v52  ;;  %v5119_v16 = vmax.f32 %v11015_v54, 0.0  ;;  %v5120_v43 = vmax.f32 %v11016_v50, 0.0  ;;  %v11017_v10 = vld [vmem:[#allocation2_spill] sm:$0xff]  ;;  %v11018_v6 = vld [vmem:[#allocation4_spill] sm:$0xff] }
 0x38a   : > { %5226 = vst.msk [vmem:[%s9953_s26 + $0xb0] sm:$0xff] %vm4163_vm2, %v5098_v7  ;;  %5227 = vst.msk [vmem:[%s9953_s26 + $0xb8] sm:$0xff] %vm4163_vm2, %v5099_v18  ;;  %v5121_v49 = vmax.f32 %v11017_v10, 0.0  ;;  %v5122_v25 = vmax.f32 %v11018_v6, 0.0  ;;  %v11020_v23 = vld [vmem:[#allocation9_spill] sm:$0xff]  ;;  %v11025_v41 = vld [vmem:[#allocation76_spill] sm:$0xff] }
 0x38b   : > { %5228 = vst.msk [vmem:[%s9953_s26 + $0xc0] sm:$0xff] %vm4163_vm2, %v5100_v14  ;;  %5229 = vst.msk [vmem:[%s9953_s26 + $0xc8] sm:$0xff] %vm4163_vm2, %v5101_v24  ;;  %v5124_v58 = vmax.f32 %v11020_v23, 0.0  ;;  %v11022_v12 = vld [vmem:[#allocation37_spill] sm:$0xff]  ;;  %v5129_v8 = vmax.f32 %v11025_v41, 0.0  ;;  %v11026_v44 = vld [vmem:[#allocation79_spill] sm:$0xff] }
 0x38c   : > { %5230 = vst.msk [vmem:[%s9953_s26 + $0xd0] sm:$0xff] %vm4163_vm2, %v5102_v34  ;;  %5231 = vst.msk [vmem:[%s9953_s26 + $0xd8] sm:$0xff] %vm4163_vm2, %v5103_v62  ;;  %v5126_v15 = vmax.f32 %v11022_v12, 0.0  ;;  %v11023_v40 = vld [vmem:[#allocation73_spill] sm:$0xff]  ;;  %v5130_v26 = vmax.f32 %v11026_v44, 0.0  ;;  %v11028_v60 = vld [vmem:[#allocation78_spill] sm:$0xff] }
 0x38d   : > { %5232 = vst.msk [vmem:[%s9953_s26 + $0xe0] sm:$0xff] %vm4163_vm2, %v5104_v57  ;;  %5233 = vst.msk [vmem:[%s9953_s26 + $0xe8] sm:$0xff] %vm4163_vm2, %v5105_v38  ;;  %v5127_v27 = vmax.f32 %v11023_v40, 0.0  ;;  %v11024_v42 = vld [vmem:[#allocation77_spill] sm:$0xff]  ;;  %v5132_v37 = vmax.f32 %v11028_v60, 0.0  ;;  %v11029_v30 = vld [vmem:[#allocation80_spill] sm:$0xff] }
 0x38e   : > { %5234 = vst.msk [vmem:[%s9953_s26 + $0xf0] sm:$0xff] %vm4163_vm2, %v5106_v22  ;;  %5235 = vst.msk [vmem:[%s9953_s26 + $0xf8] sm:$0xff] %vm4163_vm2, %v5107_v48  ;;  %v5128_v36 = vmax.f32 %v11024_v42, 0.0  ;;  %v11027_v51 = vld [vmem:[#allocation81_spill] sm:$0xff]  ;;  %v5133_v31 = vmax.f32 %v11029_v30, 0.0  ;;  %v11030_v45 = vld [vmem:[#allocation8_spill] sm:$0xff] }
 0x38f   : > { %5236 = vst.msk [vmem:[%s9953_s26 + $0x100] sm:$0xff] %vm4163_vm2, %v5108_v11  ;;  %5237 = vst.msk [vmem:[%s9953_s26 + $0x108] sm:$0xff] %vm4163_vm2, %v5109_v32  ;;  %v5131_v55 = vmax.f32 %v11027_v51, 0.0  ;;  %v5134_v52 = vmax.f32 %v11030_v45, 0.0  ;;  %v11031_v7 = vld [vmem:[#allocation11_spill] sm:$0xff]  ;;  %v11032_v14 = vld [vmem:[#allocation13_spill] sm:$0xff] }
 0x390   : > { %5238 = vst.msk [vmem:[%s9953_s26 + $0x110] sm:$0xff] %vm4163_vm2, %v5110_v35  ;;  %5239 = vst.msk [vmem:[%s9953_s26 + $0x118] sm:$0xff] %vm4163_vm2, %v5111_v21  ;;  %v5135_v18 = vmax.f32 %v11031_v7, 0.0  ;;  %v5136_v24 = vmax.f32 %v11032_v14, 0.0  ;;  %v11033_v34 = vld [vmem:[#allocation10_spill] sm:$0xff]  ;;  %v11034_v57 = vld [vmem:[#allocation12_spill] sm:$0xff] }
 0x391   : > { %5240 = vst.msk [vmem:[%s9953_s26 + $0x120] sm:$0xff] %vm4163_vm2, %v5112_v53  ;;  %5241 = vst.msk [vmem:[%s9953_s26 + $0x128] sm:$0xff] %vm4163_vm2, %v5113_v59  ;;  %v5137_v62 = vmax.f32 %v11033_v34, 0.0  ;;  %v5138_v38 = vmax.f32 %v11034_v57, 0.0  ;;  %v11035_v22 = vld [vmem:[#allocation15_spill] sm:$0xff]  ;;  %v11036_v11 = vld [vmem:[#allocation17_spill] sm:$0xff] }
 0x392   : > { %5242 = vst.msk [vmem:[%s9953_s26 + $0x130] sm:$0xff] %vm4163_vm2, %v5114_v1  ;;  %5243 = vst.msk [vmem:[%s9953_s26 + $0x138] sm:$0xff] %vm4163_vm2, %v5115_v17  ;;  %v5139_v48 = vmax.f32 %v11035_v22, 0.0  ;;  %v5140_v32 = vmax.f32 %v11036_v11, 0.0  ;;  %v11037_v35 = vld [vmem:[#allocation14_spill] sm:$0xff]  ;;  %v11038_v53 = vld [vmem:[#allocation16_spill] sm:$0xff] }
 0x393   : > { %5244 = vst.msk [vmem:[%s9953_s26 + $0x140] sm:$0xff] %vm4163_vm2, %v5116_v33  ;;  %5245 = vst.msk [vmem:[%s9953_s26 + $0x148] sm:$0xff] %vm4163_vm2, %v5117_v28  ;;  %v5141_v21 = vmax.f32 %v11037_v35, 0.0  ;;  %v5142_v59 = vmax.f32 %v11038_v53, 0.0  ;;  %v11039_v1 = vld [vmem:[#allocation19_spill] sm:$0xff]  ;;  %v11040_v33 = vld [vmem:[#allocation21_spill] sm:$0xff] }
 0x394   : > { %5246 = vst.msk [vmem:[%s9953_s26 + $0x150] sm:$0xff] %vm4163_vm2, %v5118_v4  ;;  %5247 = vst.msk [vmem:[%s9953_s26 + $0x158] sm:$0xff] %vm4163_vm2, %v5119_v16  ;;  %v5143_v17 = vmax.f32 %v11039_v1, 0.0  ;;  %v5144_v28 = vmax.f32 %v11040_v33, 0.0  ;;  %v5145_v4 = vmax.f32 %v9623_v19, 0.0  ;;  %v11041_v54 = vld [vmem:[#allocation18_spill] sm:$0xff] }
 0x395   : > { %5248 = vst.msk [vmem:[%s9953_s26 + $0x160] sm:$0xff] %vm4163_vm2, %v5120_v43  ;;  %5249 = vst.msk [vmem:[%s9953_s26 + $0x168] sm:$0xff] %vm4163_vm2, %v5121_v49  ;;  %v5146_v16 = vmax.f32 %v11041_v54, 0.0  ;;  %v11042_v50 = vld [vmem:[#allocation20_spill] sm:$0xff]  ;;  %v11043_v10 = vld [vmem:[#allocation23_spill] sm:$0xff] }
 0x396   : > { %5250 = vst.msk [vmem:[%s9953_s26 + $0x170] sm:$0xff] %vm4163_vm2, %v5122_v25  ;;  %5251 = vst.msk [vmem:[%s9953_s26 + $0x178] sm:$0xff] %vm4163_vm2, %v5123_v47  ;;  %v5147_v43 = vmax.f32 %v11042_v50, 0.0  ;;  %v5148_v49 = vmax.f32 %v11043_v10, 0.0  ;;  %v11044_v6 = vld [vmem:[#allocation25_spill] sm:$0xff]  ;;  %v11045_v25 = vld [vmem:[#allocation22_spill] sm:$0xff] }
 0x397   : > { %5252 = vst.msk [vmem:[%s9953_s26 + $0x180] sm:$0xff] %vm4163_vm2, %v5124_v58  ;;  %5253 = vst.msk [vmem:[%s9953_s26 + $0x188] sm:$0xff] %vm4163_vm2, %v5125_v56  ;;  %v5149_v19 = vmax.f32 %v11044_v6, 0.0  ;;  %v5150_v20 = vmax.f32 %v11045_v25, 0.0  ;;  %v11046_v47 = vld [vmem:[#allocation24_spill] sm:$0xff]  ;;  %v11047_v58 = vld [vmem:[#allocation27_spill] sm:$0xff] }
 0x398   : > { %5254 = vst.msk [vmem:[%s9953_s26 + $0x190] sm:$0xff] %vm4163_vm2, %v5126_v15  ;;  %5255 = vst.msk [vmem:[%s9953_s26 + $0x198] sm:$0xff] %vm4163_vm2, %v5127_v27  ;;  %v5151_v23 = vmax.f32 %v11046_v47, 0.0  ;;  %v5152_v2 = vmax.f32 %v11047_v58, 0.0  ;;  %v11048_v56 = vld [vmem:[#allocation29_spill] sm:$0xff]  ;;  %v11049_v15 = vld [vmem:[#allocation26_spill] sm:$0xff] }
 0x399   : > { %5256 = vst.msk [vmem:[%s9953_s26 + $0x1a0] sm:$0xff] %vm4163_vm2, %v5128_v36  ;;  %5257 = vst.msk [vmem:[%s9953_s26 + $0x1a8] sm:$0xff] %vm4163_vm2, %v5129_v8  ;;  %v5153_v12 = vmax.f32 %v11048_v56, 0.0  ;;  %v5154_v40 = vmax.f32 %v11049_v15, 0.0  ;;  %v11050_v27 = vld [vmem:[#allocation28_spill] sm:$0xff]  ;;  %v11051_v36 = vld [vmem:[#allocation31_spill] sm:$0xff] }
 0x39a   : > { %5258 = vst.msk [vmem:[%s9953_s26 + $0x1b0] sm:$0xff] %vm4163_vm2, %v5130_v26  ;;  %5259 = vst.msk [vmem:[%s9953_s26 + $0x1b8] sm:$0xff] %vm4163_vm2, %v5131_v55  ;;  %v5155_v42 = vmax.f32 %v11050_v27, 0.0  ;;  %v5156_v41 = vmax.f32 %v11051_v36, 0.0  ;;  %v11052_v8 = vld [vmem:[#allocation33_spill] sm:$0xff]  ;;  %v11053_v26 = vld [vmem:[#allocation30_spill] sm:$0xff] }
 0x39b   : > { %5260 = vst.msk [vmem:[%s9953_s26 + $0x1c0] sm:$0xff] %vm4163_vm2, %v5132_v37  ;;  %5261 = vst.msk [vmem:[%s9953_s26 + $0x1c8] sm:$0xff] %vm4163_vm2, %v5133_v31  ;;  %v5157_v44 = vmax.f32 %v11052_v8, 0.0  ;;  %v5158_v51 = vmax.f32 %v11053_v26, 0.0  ;;  %v11054_v55 = vld [vmem:[#allocation32_spill] sm:$0xff]  ;;  %v11055_v37 = vld [vmem:[#allocation35_spill] sm:$0xff] }
 0x39c   : > { %5262 = vst.msk [vmem:[%s9953_s26 + $0x1d0] sm:$0xff] %vm4163_vm2, %v5134_v52  ;;  %5263 = vst.msk [vmem:[%s9953_s26 + $0x1d8] sm:$0xff] %vm4163_vm2, %v5135_v18  ;;  %v5159_v60 = vmax.f32 %v11054_v55, 0.0  ;;  %v5160_v30 = vmax.f32 %v11055_v37, 0.0  ;;  %v11056_v31 = vld [vmem:[#allocation34_spill] sm:$0xff]  ;;  %v11057_v52 = vld [vmem:[#allocation36_spill] sm:$0xff] }
 0x39d   : > { %5264 = vst.msk [vmem:[%s9953_s26 + $0x1e0] sm:$0xff] %vm4163_vm2, %v5136_v24  ;;  %5265 = vst.msk [vmem:[%s9953_s26 + $0x1e8] sm:$0xff] %vm4163_vm2, %v5137_v62  ;;  %v5161_v45 = vmax.f32 %v11056_v31, 0.0  ;;  %v5162_v7 = vmax.f32 %v11057_v52, 0.0  ;;  %v11058_v18 = vld [vmem:[#allocation39_spill] sm:$0xff]  ;;  %v11059_v24 = vld [vmem:[#allocation41_spill] sm:$0xff] }
 0x39e   : > { %5266 = vst.msk [vmem:[%s9953_s26 + $0x1f0] sm:$0xff] %vm4163_vm2, %v5138_v38  ;;  %5267 = vst.msk [vmem:[%s9953_s26 + $0x1f8] sm:$0xff] %vm4163_vm2, %v5139_v48  ;;  %v5163_v14 = vmax.f32 %v11058_v18, 0.0  ;;  %v5164_v34 = vmax.f32 %v11059_v24, 0.0  ;;  %v11060_v62 = vld [vmem:[#allocation38_spill] sm:$0xff]  ;;  %v11061_v38 = vld [vmem:[#allocation40_spill] sm:$0xff] }
 0x39f   : > { %5268 = vst.msk [vmem:[%s9953_s26 + $0x200] sm:$0xff] %vm4163_vm2, %v5140_v32  ;;  %5269 = vst.msk [vmem:[%s9953_s26 + $0x208] sm:$0xff] %vm4163_vm2, %v5141_v21  ;;  %v5165_v57 = vmax.f32 %v11060_v62, 0.0  ;;  %v5166_v22 = vmax.f32 %v11061_v38, 0.0  ;;  %v11062_v48 = vld [vmem:[#allocation43_spill] sm:$0xff]  ;;  %v11063_v32 = vld [vmem:[#allocation45_spill] sm:$0xff] }
 0x3a0   : > { %5270 = vst.msk [vmem:[%s9953_s26 + $0x210] sm:$0xff] %vm4163_vm2, %v5142_v59  ;;  %5271 = vst.msk [vmem:[%s9953_s26 + $0x218] sm:$0xff] %vm4163_vm2, %v5143_v17  ;;  %v5167_v11 = vmax.f32 %v11062_v48, 0.0  ;;  %v5168_v35 = vmax.f32 %v11063_v32, 0.0  ;;  %v11064_v21 = vld [vmem:[#allocation42_spill] sm:$0xff]  ;;  %v11065_v59 = vld [vmem:[#allocation44_spill] sm:$0xff] }
 0x3a1   : > { %5272 = vst.msk [vmem:[%s9953_s26 + $0x220] sm:$0xff] %vm4163_vm2, %v5144_v28  ;;  %5273 = vst.msk [vmem:[%s9953_s26 + $0x228] sm:$0xff] %vm4163_vm2, %v5145_v4  ;;  %v5169_v53 = vmax.f32 %v11064_v21, 0.0  ;;  %v5170_v1 = vmax.f32 %v11065_v59, 0.0  ;;  %v11066_v17 = vld [vmem:[#allocation47_spill] sm:$0xff]  ;;  %v11067_v28 = vld [vmem:[#allocation49_spill] sm:$0xff] }
 0x3a2   : > { %5274 = vst.msk [vmem:[%s9953_s26 + $0x230] sm:$0xff] %vm4163_vm2, %v5146_v16  ;;  %5275 = vst.msk [vmem:[%s9953_s26 + $0x238] sm:$0xff] %vm4163_vm2, %v5147_v43  ;;  %v5171_v33 = vmax.f32 %v11066_v17, 0.0  ;;  %v5172_v4 = vmax.f32 %v11067_v28, 0.0  ;;  %v11068_v54 = vld [vmem:[#allocation46_spill] sm:$0xff]  ;;  %v11069_v50 = vld [vmem:[#allocation48_spill] sm:$0xff] }
 0x3a3   : > { %5276 = vst.msk [vmem:[%s9953_s26 + $0x240] sm:$0xff] %vm4163_vm2, %v5148_v49  ;;  %5277 = vst.msk [vmem:[%s9953_s26 + $0x248] sm:$0xff] %vm4163_vm2, %v5149_v19  ;;  %v5173_v16 = vmax.f32 %v11068_v54, 0.0  ;;  %v5174_v43 = vmax.f32 %v11069_v50, 0.0  ;;  %v11070_v10 = vld [vmem:[#allocation51_spill] sm:$0xff]  ;;  %v11071_v6 = vld [vmem:[#allocation53_spill] sm:$0xff] }
 0x3a4   : > { %5278 = vst.msk [vmem:[%s9953_s26 + $0x250] sm:$0xff] %vm4163_vm2, %v5150_v20  ;;  %5279 = vst.msk [vmem:[%s9953_s26 + $0x258] sm:$0xff] %vm4163_vm2, %v5151_v23  ;;  %v5175_v49 = vmax.f32 %v11070_v10, 0.0  ;;  %v5176_v19 = vmax.f32 %v11071_v6, 0.0  ;;  %v11072_v25 = vld [vmem:[#allocation50_spill] sm:$0xff]  ;;  %v11073_v47 = vld [vmem:[#allocation52_spill] sm:$0xff] }
 0x3a5   : > { %5280 = vst.msk [vmem:[%s9953_s26 + $0x260] sm:$0xff] %vm4163_vm2, %v5152_v2  ;;  %5281 = vst.msk [vmem:[%s9953_s26 + $0x268] sm:$0xff] %vm4163_vm2, %v5153_v12  ;;  %v5177_v20 = vmax.f32 %v11072_v25, 0.0  ;;  %v5178_v23 = vmax.f32 %v11073_v47, 0.0  ;;  %v11074_v58 = vld [vmem:[#allocation55_spill] sm:$0xff]  ;;  %v11075_v56 = vld [vmem:[#allocation57_spill] sm:$0xff] }
 0x3a6   : > { %5282 = vst.msk [vmem:[%s9953_s26 + $0x270] sm:$0xff] %vm4163_vm2, %v5154_v40  ;;  %5283 = vst.msk [vmem:[%s9953_s26 + $0x278] sm:$0xff] %vm4163_vm2, %v5155_v42  ;;  %v5179_v2 = vmax.f32 %v11074_v58, 0.0  ;;  %v5180_v12 = vmax.f32 %v11075_v56, 0.0  ;;  %v5181_v15 = vmax.f32 %v9839_v13, 0.0  ;;  %v11076_v40 = vld [vmem:[#allocation54_spill] sm:$0xff] }
 0x3a7   : > { %5284 = vst.msk [vmem:[%s9953_s26 + $0x280] sm:$0xff] %vm4163_vm2, %v5156_v41  ;;  %5285 = vst.msk [vmem:[%s9953_s26 + $0x288] sm:$0xff] %vm4163_vm2, %v5157_v44  ;;  %v5182_v27 = vmax.f32 %v11076_v40, 0.0  ;;  %v11077_v42 = vld [vmem:[#allocation56_spill] sm:$0xff]  ;;  %v11078_v41 = vld [vmem:[#allocation59_spill] sm:$0xff]  ;;  %v5185_v13 = vmax.f32 %v9863_v3, 0.0 }
 0x3a8   : > { %5286 = vst.msk [vmem:[%s9953_s26 + $0x290] sm:$0xff] %vm4163_vm2, %v5158_v51  ;;  %5287 = vst.msk [vmem:[%s9953_s26 + $0x298] sm:$0xff] %vm4163_vm2, %v5159_v60  ;;  %v5183_v36 = vmax.f32 %v11077_v42, 0.0  ;;  %v5184_v8 = vmax.f32 %v11078_v41, 0.0  ;;  %v11079_v44 = vld [vmem:[#allocation61_spill] sm:$0xff]  ;;  %v5187_v51 = vmax.f32 %v9875_v9, 0.0 }
 0x3a9   : > { %5288 = vst.msk [vmem:[%s9953_s26 + $0x2a0] sm:$0xff] %vm4163_vm2, %v5160_v30  ;;  %5289 = vst.msk [vmem:[%s9953_s26 + $0x2a8] sm:$0xff] %vm4163_vm2, %v5161_v45  ;;  %v5186_v26 = vmax.f32 %v11079_v44, 0.0  ;;  %v5188_v55 = vmax.f32 %v9882_v5, 0.0  ;;  %v5189_v3 = vmax.f32 %v9888_v39, 0.0  ;;  %v5190_v60 = vmax.f32 %v9894_v63, 0.0 }
 0x3aa   : > { %5290 = vst.msk [vmem:[%s9953_s26 + $0x2b0] sm:$0xff] %vm4163_vm2, %v5162_v7  ;;  %5291 = vst.msk [vmem:[%s9953_s26 + $0x2b8] sm:$0xff] %vm4163_vm2, %v5163_v14  ;;  %v5191_v9 = vmax.f32 %v9900_v29, 0.0  ;;  %v11080_v37 = vld [vmem:[#allocation58_spill] sm:$0xff]  ;;  %v11081_v30 = vld [vmem:[#allocation60_spill] sm:$0xff]  ;;  %v5196_v52 = vmax.f32 %v9930_v0, 0.0 }
 0x3ab   : > { %5292 = vst.msk [vmem:[%s9953_s26 + $0x2c0] sm:$0xff] %vm4163_vm2, %v5164_v34  ;;  %5293 = vst.msk [vmem:[%s9953_s26 + $0x2c8] sm:$0xff] %vm4163_vm2, %v5165_v57  ;;  %v5192_v5 = vmax.f32 %v11080_v37, 0.0  ;;  %v5193_v39 = vmax.f32 %v11081_v30, 0.0  ;;  %v11082_v31 = vld [vmem:[#allocation63_spill] sm:$0xff]  ;;  %v11083_v45 = vld [vmem:[#allocation65_spill] sm:$0xff] }
 0x3ac   : > { %5294 = vst.msk [vmem:[%s9953_s26 + $0x2d0] sm:$0xff] %vm4163_vm2, %v5166_v22  ;;  %5295 = vst.msk [vmem:[%s9953_s26 + $0x2d8] sm:$0xff] %vm4163_vm2, %v5167_v11  ;;  %v5194_v63 = vmax.f32 %v11082_v31, 0.0  ;;  %v5195_v29 = vmax.f32 %v11083_v45, 0.0  ;;  %v11084_v7 = vld [vmem:[#allocation62_spill] sm:$0xff]  ;;  %v11085_v14 = vld [vmem:[#allocation64_spill] sm:$0xff] }
 0x3ad   : > { %5296 = vst.msk [vmem:[%s9953_s26 + $0x2e0] sm:$0xff] %vm4163_vm2, %v5168_v35  ;;  %5297 = vst.msk [vmem:[%s9953_s26 + $0x2e8] sm:$0xff] %vm4163_vm2, %v5169_v53  ;;  %v5197_v18 = vmax.f32 %v11084_v7, 0.0  ;;  %v5198_v24 = vmax.f32 %v11085_v14, 0.0  ;;  %v11086_v34 = vld [vmem:[#allocation67_spill] sm:$0xff]  ;;  %v11087_v0 = vld [vmem:[#allocation69_spill] sm:$0xff] }
 0x3ae   : > { %5298 = vst.msk [vmem:[%s9953_s26 + $0x2f0] sm:$0xff] %vm4163_vm2, %v5170_v1  ;;  %5299 = vst.msk [vmem:[%s9953_s26 + $0x2f8] sm:$0xff] %vm4163_vm2, %v5171_v33  ;;  %v5199_v62 = vmax.f32 %v11086_v34, 0.0  ;;  %v5200_v57 = vmax.f32 %v11087_v0, 0.0  ;;  %v11088_v38 = vld [vmem:[#allocation66_spill] sm:$0xff]  ;;  %v5202_v48 = vmax.f32 %v9971_v61, 0.0 }
 0x3af   : > { %5300 = vst.msk [vmem:[%s9953_s26 + $0x300] sm:$0xff] %vm4163_vm2, %v5172_v4  ;;  %5301 = vst.msk [vmem:[%s9953_s26 + $0x308] sm:$0xff] %vm4163_vm2, %v5173_v16  ;;  %v5201_v22 = vmax.f32 %v11088_v38, 0.0  ;;  %v5203_v11 = vmax.f32 %v9977_v46, 0.0 }
 0x3b0   : > { %5302 = vst.msk [vmem:[%s9953_s26 + $0x310] sm:$0xff] %vm4163_vm2, %v5174_v43  ;;  %5303 = vst.msk [vmem:[%s9953_s26 + $0x318] sm:$0xff] %vm4163_vm2, %v5175_v49 }
 0x3b1   : > { %5304 = vst.msk [vmem:[%s9953_s26 + $0x320] sm:$0xff] %vm4163_vm2, %v5176_v19  ;;  %5305 = vst.msk [vmem:[%s9953_s26 + $0x328] sm:$0xff] %vm4163_vm2, %v5177_v20 }
 0x3b2   : > { %5306 = vst.msk [vmem:[%s9953_s26 + $0x330] sm:$0xff] %vm4163_vm2, %v5178_v23  ;;  %5307 = vst.msk [vmem:[%s9953_s26 + $0x338] sm:$0xff] %vm4163_vm2, %v5179_v2 }
 0x3b3   : > { %5308 = vst.msk [vmem:[%s9953_s26 + $0x340] sm:$0xff] %vm4163_vm2, %v5180_v12  ;;  %5309 = vst.msk [vmem:[%s9953_s26 + $0x348] sm:$0xff] %vm4163_vm2, %v5181_v15 }
 0x3b4   : > { %5310 = vst.msk [vmem:[%s9953_s26 + $0x350] sm:$0xff] %vm4163_vm2, %v5182_v27  ;;  %5311 = vst.msk [vmem:[%s9953_s26 + $0x358] sm:$0xff] %vm4163_vm2, %v5183_v36 }
 0x3b5   : > { %5312 = vst.msk [vmem:[%s9953_s26 + $0x360] sm:$0xff] %vm4163_vm2, %v5184_v8  ;;  %5313 = vst.msk [vmem:[%s9953_s26 + $0x368] sm:$0xff] %vm4163_vm2, %v5185_v13 }
 0x3b6   : > { %5314 = vst.msk [vmem:[%s9953_s26 + $0x370] sm:$0xff] %vm4163_vm2, %v5186_v26  ;;  %5315 = vst.msk [vmem:[%s9953_s26 + $0x378] sm:$0xff] %vm4163_vm2, %v5187_v51 }
 0x3b7   : > { %5316 = vst.msk [vmem:[%s9953_s26 + $0x380] sm:$0xff] %vm4163_vm2, %v5188_v55  ;;  %5317 = vst.msk [vmem:[%s9953_s26 + $0x388] sm:$0xff] %vm4163_vm2, %v5189_v3 }
 0x3b8   : > { %5318 = vst.msk [vmem:[%s9953_s26 + $0x390] sm:$0xff] %vm4163_vm2, %v5190_v60  ;;  %5319 = vst.msk [vmem:[%s9953_s26 + $0x398] sm:$0xff] %vm4163_vm2, %v5191_v9 }
 0x3b9   : > { %5320 = vst.msk [vmem:[%s9953_s26 + $0x3a0] sm:$0xff] %vm4163_vm2, %v5192_v5  ;;  %5321 = vst.msk [vmem:[%s9953_s26 + $0x3a8] sm:$0xff] %vm4163_vm2, %v5193_v39 }
 0x3ba   : > { %5322 = vst.msk [vmem:[%s9953_s26 + $0x3b0] sm:$0xff] %vm4163_vm2, %v5194_v63  ;;  %5323 = vst.msk [vmem:[%s9953_s26 + $0x3b8] sm:$0xff] %vm4163_vm2, %v5195_v29 }
 0x3bb   : > { %5324 = vst.msk [vmem:[%s9953_s26 + $0x3c0] sm:$0xff] %vm4163_vm2, %v5196_v52  ;;  %5325 = vst.msk [vmem:[%s9953_s26 + $0x3c8] sm:$0xff] %vm4163_vm2, %v5197_v18 }
 0x3bc   : > { %5326 = vst.msk [vmem:[%s9953_s26 + $0x3d0] sm:$0xff] %vm4163_vm2, %v5198_v24  ;;  %5327 = vst.msk [vmem:[%s9953_s26 + $0x3d8] sm:$0xff] %vm4163_vm2, %v5199_v62 }
 0x3bd   : > { %5328 = vst.msk [vmem:[%s9953_s26 + $0x3e0] sm:$0xff] %vm4163_vm2, %v5200_v57  ;;  %5329 = vst.msk [vmem:[%s9953_s26 + $0x3e8] sm:$0xff] %vm4163_vm2, %v5201_v22 }
 0x3be   : > { %5330 = vst.msk [vmem:[%s9953_s26 + $0x3f0] sm:$0xff] %vm4163_vm2, %v5202_v48  ;;  %5331 = vst.msk [vmem:[%s9953_s26 + $0x3f8] sm:$0xff] %vm4163_vm2, %v5203_v11 }
 0x3bf PF: > { %s12_s9 = sadd.s32 1, %s7109_s9  }
 0x3c0   : > { %p9_p4 = scmp.ge.s32.totalorder %s12_s9, 4  }
 0x3c2   :  { %11 = sbr.rel (!%p9_p4) target bundleno = 1 (0x1), region = 62 }

// kernel: dc_discriminator_forward.5
= control target key start
LH: loop header
LB: loop body
LE: loop exit
PB: predicated region body
PF: predicated region fallthrough
CT: control target
= control target key end

     0   :  { %s2270_s9 = smov 0   ;;  %s2935_s0 = inlined_call_operand.vmem [shape: f32[2,17,17,128], index: 0, kind: input, shape index: {}]   ;;  %s2936_s1 = inlined_call_operand.vmem [shape: bf16[4,128,64], index: 1, kind: input, shape index: {}]   ;;  %s2937_s2 = inlined_call_operand.vmem [shape: f32[2,16,16,64], index: 2, kind: output, shape index: {}]  }
   0x1 LB: > { %s1665_s10 = sadd.s32 4294967295, %s2253_s9   ;;  %p1669_p0 = scmp.ge.s32.totalorder %s2253_s9, 1  ;;  %s2253_s9 = sphi %s2270_s9, %s12_s9  }
   0x2   : > { %p112_p1 = scmp.lt.s32.totalorder %s2253_s9, 3 }
   0x4   : > { %p113_p2 = pnand %p1669_p0, %p112_p1 }
   0x5   : > { %v2213_v0 = vld [vmem:[%s2936_s1 + $0x40] sm:$0xff] (!%p113_p2)   ;;  %p134_p3 = scmp.lt.s32.totalorder (!%p113_p2), %s1665_s10, 1  ;;  %v2215_v2 = vld [vmem:[%s2936_s1 + $0x48] sm:$0xff] (!%p113_p2)   ;;  %v2217_v4 = vld [vmem:[%s2936_s1 + $0x50] sm:$0xff] (!%p113_p2)   ;;  %vm1305_vm0 = vcmask (!%p113_p2), 523264  }
   0x6   : > { %116 = sbr.rel (%p113_p2) target bundleno = 442 (0x1ba), region = 28  ;;  %v2214_v1 = vld [vmem:[%s2936_s1 + $0x80] sm:$0xff] (!%p113_p2)   ;;  %1916 = vmatprep.subr.bf16.mxu1 (!%p113_p2), %v2213_v0  ;;  %v2216_v3 = vld [vmem:[%s2936_s1 + $0x88] sm:$0xff] (!%p113_p2)   ;;  %v2218_v5 = vld [vmem:[%s2936_s1 + $0x90] sm:$0xff] (!%p113_p2)  }
   0x7   : > { %2012 = vmatprep.subr.bf16.mxu0 (!%p113_p2), %v2214_v1  ;;  %1917 = vmatpush3.bf16.msra.mxu1 (!%p113_p2), %v2213_v0  ;;  %v2219_v6 = vld [vmem:[%s2936_s1 + $0x58] sm:$0xff] (!%p113_p2)   ;;  %v2221_v8 = vld [vmem:[%s2936_s1 + $0x60] sm:$0xff] (!%p113_p2)   ;;  %v2223_v10 = vld [vmem:[%s2936_s1 + $0x68] sm:$0xff] (!%p113_p2)  }
   0x8   : > { %2013 = vmatpush3.bf16.msra.mxu0 (!%p113_p2), %v2214_v1  ;;  %1918 = vmatprep.subr.bf16.mxu1 (!%p113_p2), %v2215_v2  ;;  %v2220_v7 = vld [vmem:[%s2936_s1 + $0x98] sm:$0xff] (!%p113_p2)   ;;  %v2222_v9 = vld [vmem:[%s2936_s1 + $0xa0] sm:$0xff] (!%p113_p2)   ;;  %v2224_v14 = vld [vmem:[%s2936_s1 + $0xa8] sm:$0xff] (!%p113_p2)  }
   0x9   : > { %2014 = vmatprep.subr.bf16.mxu0 (!%p113_p2), %v2216_v3  ;;  %v2225_v18 = vld [vmem:[%s2936_s1 + $0x70] sm:$0xff] (!%p113_p2)   ;;  %v2227_v20 = vld [vmem:[%s2936_s1 + $0x78] sm:$0xff] (!%p113_p2)   ;;  %v2229_v24 = vld [vmem:[%s2936_s1] sm:$0xff] (!%p113_p2)  }
   0xa   : > { %v2226_v19 = vld [vmem:[%s2936_s1 + $0xb0] sm:$0xff] (!%p113_p2)   ;;  %v2228_v21 = vld [vmem:[%s2936_s1 + $0xb8] sm:$0xff] (!%p113_p2)   ;;  %v2230_v27 = vld [vmem:[%s2936_s1 + $0xc0] sm:$0xff] (!%p113_p2)  }
   0xb   : > { %1919 = vmatpush3.bf16.msra.mxu1 (!%p113_p2), %v2215_v2  ;;  %v2231_v38 = vld [vmem:[%s2936_s1 + $0x8] sm:$0xff] (!%p113_p2)   ;;  %v2233_v45 = vld [vmem:[%s2936_s1 + $0x10] sm:$0xff] (!%p113_p2)   ;;  %v2235_v52 = vld [vmem:[%s2936_s1 + $0x18] sm:$0xff] (!%p113_p2)  }
   0xc   : > { %2015 = vmatpush3.bf16.msra.mxu0 (!%p113_p2), %v2216_v3  ;;  %1920 = vmatprep.subr.bf16.mxu1 (!%p113_p2), %v2217_v4  ;;  %v2232_v40 = vld [vmem:[%s2936_s1 + $0xc8] sm:$0xff] (!%p113_p2)   ;;  %v2234_v47 = vld [vmem:[%s2936_s1 + $0xd0] sm:$0xff] (!%p113_p2)   ;;  %v2236_v55 = vld [vmem:[%s2936_s1 + $0xd8] sm:$0xff] (!%p113_p2)  }
   0xd   : > { %s2939_s10 = smov (!%p134_p3, %s1665_s10), 1  ;;  %2016 = vmatprep.subr.bf16.mxu0 %v2218_v5  ;;  %v2237_v62 = vld [vmem:[%s2936_s1 + $0x20] sm:$0xff]  }
   0xe   : > { %s2204_s27 = smul.u32 408, %s2939_s10  ;;  %v2238_v0 = vld [vmem:[%s2936_s1 + $0xe0] sm:$0xff]  }
   0xf   : > { %1921 = vmatpush3.bf16.msra.mxu1 %v2217_v4 }
  0x10   : > { %2017 = vmatpush3.bf16.msra.mxu0 %v2218_v5  ;;  %1922 = vmatprep.subr.bf16.mxu1 %v2219_v6  ;;  %s2314_s6 = scalar_lea.vmem %s2935_s0, %s2204_s27 }
  0x11   : > { %2018 = vmatprep.subr.bf16.mxu0 %v2220_v7  ;;  %v209_v11 = vld [vmem:[%s2314_s6 + $0x1] sm:$0xff]  ;;  %v210_v12 = vld [vmem:[%s2314_s6 + $0x9] sm:$0xff]  ;;  %v1705_v13 = vld [vmem:[%s2314_s6 + $0x18] sm:$0xff] }
  0x12   : > { %v241_v15 = vpack.c.bf16 %v210_v12, %v209_v11  ;;  %v1706_v16 = vld [vmem:[%s2314_s6 + $0x20] sm:$0xff]  ;;  %v1707_v25 = vld [vmem:[%s2314_s6 + $0x30] sm:$0xff]  ;;  %v1708_v26 = vld [vmem:[%s2314_s6 + $0x38] sm:$0xff] }
  0x13   : > { %1923 = vmatpush3.bf16.msra.mxu1 %v2219_v6  ;;  %v2326_v17 = vpack.c.bf16 %v1706_v16, %v1705_v13  ;;  %v211_v22 = vld [vmem:[%s2314_s6 + $0x19] sm:$0xff]  ;;  %v212_v23 = vld [vmem:[%s2314_s6 + $0x21] sm:$0xff]  ;;  %v213_v28 = vld [vmem:[%s2314_s6 + $0x31] sm:$0xff]  ;;  %v2357_v33 = vpack.c.bf16 %v1708_v26, %v1707_v25 }
  0x14   : > { %2019 = vmatpush3.bf16.msra.mxu0 %v2220_v7  ;;  %1924 = vmatprep.subr.bf16.mxu1 %v2221_v8  ;;  %v214_v29 = vld [vmem:[%s2314_s6 + $0x39] sm:$0xff]  ;;  %v2353_v30 = vpack.c.bf16 %v212_v23, %v211_v22  ;;  %v1709_v31 = vld [vmem:[%s2314_s6 + $0x48] sm:$0xff]  ;;  %v1710_v32 = vld [vmem:[%s2314_s6 + $0x50] sm:$0xff] }
  0x15   : > { %2020 = vmatprep.subr.bf16.mxu0 %v2222_v9  ;;  %1932 = vmatprep.mubr.bf16.mxu1 %v241_v15  ;;  %v2359_v34 = vpack.c.bf16 %v214_v29, %v213_v28  ;;  %v2361_v35 = vpack.c.bf16 %v1710_v32, %v1709_v31  ;;  %v215_v36 = vld [vmem:[%s2314_s6 + $0x49] sm:$0xff]  ;;  %v216_v37 = vld [vmem:[%s2314_s6 + $0x51] sm:$0xff]  ;;  %v1711_v39 = vld [vmem:[%s2314_s6 + $0x60] sm:$0xff] }
  0x16   : > { %2028 = vmatprep.mubr.bf16.mxu0 %v2326_v17  ;;  %v1712_v41 = vld [vmem:[%s2314_s6 + $0x68] sm:$0xff]  ;;  %v1713_v44 = vld [vmem:[%s2314_s6 + $0x78] sm:$0xff]  ;;  %v1714_v46 = vld [vmem:[%s2314_s6 + $0x80] sm:$0xff]  ;;  %v2387_v48 = vpack.c.bf16 %v216_v37, %v215_v36 }
  0x17   : > { %1925 = vmatpush3.bf16.msra.mxu1 %v2221_v8  ;;  %v217_v42 = vld [vmem:[%s2314_s6 + $0x61] sm:$0xff]  ;;  %v218_v43 = vld [vmem:[%s2314_s6 + $0x69] sm:$0xff]  ;;  %v2389_v49 = vpack.c.bf16 %v1712_v41, %v1711_v39  ;;  %v2393_v51 = vpack.c.bf16 %v1714_v46, %v1713_v44  ;;  %v219_v53 = vld [vmem:[%s2314_s6 + $0x79] sm:$0xff] }
  0x18   : > { %2021 = vmatpush3.bf16.msra.mxu0 %v2222_v9  ;;  %1926 = vmatprep.subr.bf16.mxu1 %v2223_v10  ;;  %v2391_v50 = vpack.c.bf16 %v218_v43, %v217_v42  ;;  %v220_v54 = vld [vmem:[%s2314_s6 + $0x81] sm:$0xff]  ;;  %v1715_v56 = vld [vmem:[%s2314_s6 + $0x90] sm:$0xff]  ;;  %v1716_v57 = vld [vmem:[%s2314_s6 + $0x98] sm:$0xff] }
  0x19   : > { %2022 = vmatprep.subr.bf16.mxu0 %v2224_v14  ;;  %v221_v58 = vld [vmem:[%s2314_s6 + $0x91] sm:$0xff]  ;;  %v222_v59 = vld [vmem:[%s2314_s6 + $0x99] sm:$0xff]  ;;  %v1717_v60 = vld [vmem:[%s2314_s6 + $0xa8] sm:$0xff]  ;;  %v2416_v63 = vpack.c.bf16 %v220_v54, %v219_v53  ;;  %v2421_v1 = vpack.c.bf16 %v1716_v57, %v1715_v56 }
  0x1a   : > { %v1718_v61 = vld [vmem:[%s2314_s6 + $0xb0] sm:$0xff]  ;;  %v2423_v2 = vpack.c.bf16 %v222_v59, %v221_v58  ;;  %v2239_v6 = vld [vmem:[%s2936_s1 + $0x28] sm:$0xff]   ;;  %v1719_v7 = vld [vmem:[%s2314_s6 + $0xc0] sm:$0xff] }
  0x1b   : > { %1927 = vmatpush3.bf16.msra.mxu1 %v2223_v10  ;;  %v2425_v3 = vpack.c.bf16 %v1718_v61, %v1717_v60  ;;  %v223_v4 = vld [vmem:[%s2314_s6 + $0xa9] sm:$0xff]  ;;  %v224_v5 = vld [vmem:[%s2314_s6 + $0xb1] sm:$0xff]  ;;  %v225_v10 = vld [vmem:[%s2314_s6 + $0xc1] sm:$0xff] }
  0x1c   : > { %2023 = vmatpush3.bf16.msra.mxu0 %v2224_v14  ;;  %1928 = vmatprep.subr.bf16.mxu1 %v2225_v18  ;;  %v2240_v8 = vld [vmem:[%s2936_s1 + $0xe8] sm:$0xff]   ;;  %v1721_v12 = vld [vmem:[%s2314_s6 + $0xd8] sm:$0xff]  ;;  %v1722_v13 = vld [vmem:[%s2314_s6 + $0xe0] sm:$0xff]  ;;  %v2448_v15 = vpack.c.bf16 %v224_v5, %v223_v4 }
  0x1d   : > { %2024 = vmatprep.subr.bf16.mxu0 %v2226_v19  ;;  %v1720_v9 = vld [vmem:[%s2314_s6 + $0xc8] sm:$0xff]  ;;  %v2241_v14 = vld [vmem:[%s2936_s1 + $0x30] sm:$0xff]   ;;  %v2244_v22 = vld [vmem:[%s2936_s1 + $0xf8] sm:$0xff]  }
  0x1e   : > { %v226_v11 = vld [vmem:[%s2314_s6 + $0xc9] sm:$0xff]  ;;  %v227_v23 = vld [vmem:[%s2314_s6 + $0xd9] sm:$0xff]  ;;  %v233_v43 = vld [vmem:[%s2314_s6 + $0x121] sm:$0xff] }
  0x1f   : > { %1929 = vmatpush3.bf16.msra.mxu1 %v2225_v18  ;;  %v2242_v16 = vld [vmem:[%s2936_s1 + $0xf0] sm:$0xff]   ;;  %v2453_v18 = vpack.c.bf16 %v1720_v9, %v1719_v7  ;;  %v1724_v26 = vld [vmem:[%s2314_s6 + $0xf8] sm:$0xff]  ;;  %v1725_v29 = vld [vmem:[%s2314_s6 + $0x108] sm:$0xff] }
  0x20   : > { %2025 = vmatpush3.bf16.msra.mxu0 %v2226_v19  ;;  %1930 = vmatprep.subr.bf16.mxu1 %v2227_v20  ;;  %v2455_v19 = vpack.c.bf16 %v226_v11, %v225_v10  ;;  %v1723_v25 = vld [vmem:[%s2314_s6 + $0xf0] sm:$0xff]  ;;  %v230_v28 = vld [vmem:[%s2314_s6 + $0xf9] sm:$0xff]  ;;  %v1728_v42 = vld [vmem:[%s2314_s6 + $0x128] sm:$0xff] }
  0x21   : > { %2026 = vmatprep.subr.bf16.mxu0 %v2228_v21  ;;  %v1726_v31 = vld [vmem:[%s2314_s6 + $0x110] sm:$0xff]  ;;  %v2479_v36 = vpack.c.bf16 %v1724_v26, %v1723_v25  ;;  %v1727_v41 = vld [vmem:[%s2314_s6 + $0x120] sm:$0xff]  ;;  %v1732_v58 = vld [vmem:[%s2314_s6 + $0x158] sm:$0xff] }
  0x22   : > { %v231_v39 = vld [vmem:[%s2314_s6 + $0x109] sm:$0xff]  ;;  %v1730_v46 = vld [vmem:[%s2314_s6 + $0x140] sm:$0xff]  ;;  %v237_v59 = vld [vmem:[%s2314_s6 + $0x151] sm:$0xff] }
  0x23   : > { %1931 = vmatpush3.bf16.msra.mxu1 %v2227_v20  ;;  %v2457_v20 = vpack.c.bf16 %v1722_v13, %v1721_v12  ;;  %v234_v44 = vld [vmem:[%s2314_s6 + $0x129] sm:$0xff]  ;;  %v236_v56 = vld [vmem:[%s2314_s6 + $0x141] sm:$0xff]  ;;  %v238_v60 = vld [vmem:[%s2314_s6 + $0x159] sm:$0xff] }
  0x24   : > { %2027 = vmatpush3.bf16.msra.mxu0 %v2228_v21  ;;  %1964 = vmatprep.subr.bf16.mxu1 %v2229_v24  ;;  %v2243_v21 = vld [vmem:[%s2936_s1 + $0x38] sm:$0xff]   ;;  %v253_v53 = vpack.c.bf16 %v234_v44, %v233_v43  ;;  %v1731_v57 = vld [vmem:[%s2314_s6 + $0x150] sm:$0xff]  ;;  %v1733_v61 = vld [vmem:[%s2314_s6 + $0x168] sm:$0xff]  ;;  %v255_v5 = vpack.c.bf16 %v238_v60, %v237_v59 }
  0x25   : > { %2060 = vmatprep.subr.bf16.mxu0 %v2230_v27  ;;  %v738_v4 = vpack.c.bf16 %v1732_v58, %v1731_v57  ;;  %v239_v7 = vld [vmem:[%s2314_s6 + $0x169] sm:$0xff]  ;;  %v1735_v9 = vld [vmem:[%s2314_s6 + $0x180] sm:$0xff] }
  0x26   : > { %1933 = vmatmul.mubr.bf16.vlgmr.msra.gmra.mrb[0].mxu1 %v2353_v30  ;;  %v1736_v10 = vld [vmem:[%s2314_s6 + $0x188] sm:$0xff]  ;;  %v145_v11 = vld [vmem:[%s2314_s6] sm:$0xff] }
  0x27   : > { %2029 = vmatmul.mubr.bf16.vlgmr.msra.gmra.mrb[0].mxu0 %v2357_v33  ;;  %1965 = vmatpush3.bf16.msra.mxu1 %v2229_v24  ;;  %v228_v24 = vld [vmem:[%s2314_s6 + $0xe1] sm:$0xff] }
  0x28   : > { %2061 = vmatpush3.bf16.msra.mxu0 %v2230_v27  ;;  %1936 = vmatprep.mubr.bf16.mxu1 %v2359_v34  ;;  %v229_v27 = vld [vmem:[%s2314_s6 + $0xf1] sm:$0xff]  ;;  %v2477_v32 = vpack.c.bf16 %v228_v24, %v227_v23  ;;  %v146_v12 = vld [vmem:[%s2314_s6 + $0x8] sm:$0xff] }
  0x29   : > { %2032 = vmatprep.mubr.bf16.mxu0 %v2361_v35  ;;  %1966 = vmatprep.subr.bf16.mxu1 %v2231_v38  ;;  %v2481_v37 = vpack.c.bf16 %v230_v28, %v229_v27 }
  0x2a   : > { %2062 = vmatprep.subr.bf16.mxu0 %v2232_v40 }
  0x2b   : > { %1967 = vmatpush3.bf16.msra.mxu1 %v2231_v38  ;;  %v2483_v38 = vpack.c.bf16 %v1726_v31, %v1725_v29 }
  0x2c   : > { %2063 = vmatpush3.bf16.msra.mxu0 %v2232_v40  ;;  %1968 = vmatprep.subr.bf16.mxu1 %v2233_v45  ;;  %v232_v40 = vld [vmem:[%s2314_s6 + $0x111] sm:$0xff] }
  0x2d   : > { %2064 = vmatprep.subr.bf16.mxu0 %v2234_v47 }
  0x2e   : > { %1937 = vmatmul.mubr.bf16.gmra.mrb[4].mxu1 %v2387_v48 }
  0x2f   : > { %2033 = vmatmul.mubr.bf16.gmra.mrb[4].mxu0 %v2389_v49  ;;  %1940 = vmatprep.mubr.bf16.mxu1 %v2391_v50 }
  0x30   : > { %2036 = vmatprep.mubr.bf16.mxu0 %v2393_v51  ;;  %1969 = vmatpush3.bf16.msra.mxu1 %v2233_v45  ;;  %v1729_v45 = vld [vmem:[%s2314_s6 + $0x138] sm:$0xff] }
  0x31   : > { %2065 = vmatpush3.bf16.msra.mxu0 %v2234_v47  ;;  %1970 = vmatprep.subr.bf16.mxu1 %v2235_v52  ;;  %v252_v47 = vpack.c.bf16 %v232_v40, %v231_v39  ;;  %v737_v54 = vpack.c.bf16 %v1730_v46, %v1729_v45 }
  0x32   : > { %2066 = vmatprep.subr.bf16.mxu0 %v2236_v55 }
  0x34   : > { %1971 = vmatpush3.bf16.msra.mxu1 %v2235_v52  ;;  %v736_v52 = vpack.c.bf16 %v1728_v42, %v1727_v41 }
  0x35   : > { %2067 = vmatpush3.bf16.msra.mxu0 %v2236_v55  ;;  %1972 = vmatprep.subr.bf16.mxu1 %v2237_v62  ;;  %v235_v55 = vld [vmem:[%s2314_s6 + $0x139] sm:$0xff] }
  0x36   : > { %1941 = vmatmul.mubr.bf16.gmra.mrb[8].mxu1 %v2416_v63  ;;  %2068 = vmatprep.subr.bf16.mxu0 %v2238_v0 }
  0x37   : > { %2037 = vmatmul.mubr.bf16.gmra.mrb[8].mxu0 %v2421_v1  ;;  %1944 = vmatprep.mubr.bf16.mxu1 %v2423_v2 }
  0x38   : > { %2040 = vmatprep.mubr.bf16.mxu0 %v2425_v3  ;;  %1973 = vmatpush3.bf16.msra.mxu1 %v2237_v62  ;;  %v1734_v62 = vld [vmem:[%s2314_s6 + $0x170] sm:$0xff] }
  0x39   : > { %2069 = vmatpush3.bf16.msra.mxu0 %v2238_v0  ;;  %1974 = vmatprep.subr.bf16.mxu1 %v2239_v6  ;;  %v254_v0 = vpack.c.bf16 %v236_v56, %v235_v55 }
  0x3a   : > { %2070 = vmatprep.subr.bf16.mxu0 %v2240_v8 }
  0x3c   : > { %1975 = vmatpush3.bf16.msra.mxu1 %v2239_v6  ;;  %v739_v6 = vpack.c.bf16 %v1734_v62, %v1733_v61 }
  0x3d   : > { %2071 = vmatpush3.bf16.msra.mxu0 %v2240_v8  ;;  %1976 = vmatprep.subr.bf16.mxu1 %v2241_v14  ;;  %v240_v8 = vld [vmem:[%s2314_s6 + $0x171] sm:$0xff] }
  0x3e   : > { %1945 = vmatmul.mubr.bf16.gmra.mrb[12].mxu1 %v2448_v15  ;;  %2072 = vmatprep.subr.bf16.mxu0 %v2242_v16  ;;  %v256_v13 = vpack.c.bf16 %v240_v8, %v239_v7 }
  0x3f   : > { %2041 = vmatmul.mubr.bf16.gmra.mrb[12].mxu0 %v2453_v18  ;;  %1948 = vmatprep.mubr.bf16.mxu1 %v2455_v19 }
  0x40   : > { %2044 = vmatprep.mubr.bf16.mxu0 %v2457_v20  ;;  %1977 = vmatpush3.bf16.msra.mxu1 %v2241_v14  ;;  %v740_v14 = vpack.c.bf16 %v1736_v10, %v1735_v9 }
  0x41   : > { %2073 = vmatpush3.bf16.msra.mxu0 %v2242_v16  ;;  %1978 = vmatprep.subr.bf16.mxu1 %v2243_v21  ;;  %v177_v16 = vpack.c.bf16 %v146_v12, %v145_v11 }
  0x42   : > { %2074 = vmatprep.subr.bf16.mxu0 %v2244_v22 }
  0x44   : > { %1979 = vmatpush3.bf16.msra.mxu1 %v2243_v21 }
  0x45   : > { %2075 = vmatpush3.bf16.msra.mxu0 %v2244_v22 }
  0x46   : > { %1949 = vmatmul.mubr.bf16.gmra.mrb[16].mxu1 %v2477_v32 }
  0x47   : > { %2045 = vmatmul.mubr.bf16.gmra.mrb[16].mxu0 %v2479_v36  ;;  %1952 = vmatprep.mubr.bf16.mxu1 %v2481_v37 }
  0x48   : > { %2048 = vmatprep.mubr.bf16.mxu0 %v2483_v38 }
  0x4e   : > { %1953 = vmatmul.mubr.bf16.gmra.mrb[20].mxu1 %v252_v47 }
  0x4f   : > { %2049 = vmatmul.mubr.bf16.gmra.mrb[20].mxu0 %v736_v52  ;;  %1956 = vmatprep.mubr.bf16.mxu1 %v253_v53 }
  0x50   : > { %2052 = vmatprep.mubr.bf16.mxu0 %v737_v54 }
  0x56   : > { %1957 = vmatmul.mubr.bf16.gmra.mrb[24].mxu1 %v254_v0 }
  0x57   : > { %2053 = vmatmul.mubr.bf16.gmra.mrb[24].mxu0 %v738_v4  ;;  %1960 = vmatprep.mubr.bf16.mxu1 %v255_v5 }
  0x58   : > { %2056 = vmatprep.mubr.bf16.mxu0 %v739_v6 }
  0x5e   : > { %1961 = vmatmul.mubr.bf16.gmra.mrb[28].mxu1 %v256_v13 }
  0x5f   : > { %2057 = vmatmul.mubr.bf16.gmra.mrb[28].mxu0 %v740_v14  ;;  %1980 = vmatprep.mubr.bf16.mxu1 %v177_v16 }
  0x60   : > { %2076 = vmatprep.mubr.bf16.mxu0 %v2353_v30  ;;  %v1792_v30 = vld [vmem:[%s2314_s6 + $0x189] sm:$0xff] }
  0x66   : > { %1981 = vmatmul.mubr.bf16.vlgmr.msra.gmra.mrb[0].mxu1 %v2326_v17  ;;  %v1791_v17 = vld [vmem:[%s2314_s6 + $0x181] sm:$0xff]  ;;  %s1819_s6 = sshll.u32 %s2939_s10, 8 }
  0x67   : > { %2077 = vmatmul.mubr.bf16.vlgmr.msra.gmra.mrb[0].mxu0 %v2359_v34  ;;  %1984 = vmatprep.mubr.bf16.mxu1 %v2357_v33  ;;  %v1046_v33 = vpack.c.bf16 %v1792_v30, %v1791_v17  ;;  %s2846_s29 = scalar_lea.vmem %s2937_s2, %s1819_s6 }
  0x68   : > { %2080 = vmatprep.mubr.bf16.mxu0 %v2387_v48 }
  0x6e   : > { %1985 = vmatmul.mubr.bf16.gmra.mrb[4].mxu1 %v2361_v35 }
  0x6f   : > { %2081 = vmatmul.mubr.bf16.gmra.mrb[4].mxu0 %v2391_v50  ;;  %1988 = vmatprep.mubr.bf16.mxu1 %v2389_v49 }
  0x70   : > { %2084 = vmatprep.mubr.bf16.mxu0 %v2416_v63 }
  0x76   : > { %1989 = vmatmul.mubr.bf16.gmra.mrb[8].mxu1 %v2393_v51 }
  0x77   : > { %2085 = vmatmul.mubr.bf16.gmra.mrb[8].mxu0 %v2423_v2  ;;  %1992 = vmatprep.mubr.bf16.mxu1 %v2421_v1 }
  0x78   : > { %2088 = vmatprep.mubr.bf16.mxu0 %v2448_v15 }
  0x7e   : > { %1993 = vmatmul.mubr.bf16.gmra.mrb[12].mxu1 %v2425_v3 }
  0x7f   : > { %2089 = vmatmul.mubr.bf16.gmra.mrb[12].mxu0 %v2455_v19  ;;  %1996 = vmatprep.mubr.bf16.mxu1 %v2453_v18 }
  0x80   : > { %2092 = vmatprep.mubr.bf16.mxu0 %v2477_v32 }
  0x86   : > { %1997 = vmatmul.mubr.bf16.gmra.mrb[16].mxu1 %v2457_v20 }
  0x87   : > { %2093 = vmatmul.mubr.bf16.gmra.mrb[16].mxu0 %v2481_v37  ;;  %2000 = vmatprep.mubr.bf16.mxu1 %v2479_v36 }
  0x88   : > { %2096 = vmatprep.mubr.bf16.mxu0 %v252_v47 }
  0x8e   : > { %2001 = vmatmul.mubr.bf16.gmra.mrb[20].mxu1 %v2483_v38 }
  0x8f   : > { %2097 = vmatmul.mubr.bf16.gmra.mrb[20].mxu0 %v253_v53  ;;  %2004 = vmatprep.mubr.bf16.mxu1 %v736_v52 }
  0x90   : > { %2100 = vmatprep.mubr.bf16.mxu0 %v254_v0 }
  0x96   : > { %2005 = vmatmul.mubr.bf16.gmra.mrb[24].mxu1 %v737_v54 }
  0x97   : > { %2101 = vmatmul.mubr.bf16.gmra.mrb[24].mxu0 %v255_v5  ;;  %2008 = vmatprep.mubr.bf16.mxu1 %v738_v4 }
  0x98   : > { %2104 = vmatprep.mubr.bf16.mxu0 %v256_v13 }
  0x9e   : > { %2009 = vmatmul.mubr.bf16.gmra.mrb[28].mxu1 %v739_v6 }
  0x9f   : > { %2105 = vmatmul.mubr.bf16.gmra.mrb[28].mxu0 %v1046_v33 }
 0x139   : > { %v1982_v34 = vpop.f32.mrb[0].mxu1 }
 0x13a   : > { %v2078_v35 = vpop.f32.mrb[0].mxu0  ;;  %v565_v48 = vpop.f32.mrb[1].mxu1 }
 0x13b   : > { %v2534_v49 = vadd.f32 %v2078_v35, %v1982_v34  ;;  %v1146_v50 = vpop.f32.mrb[1].mxu0  ;;  %v1983_v51 = vpop.f32.mrb[2].mxu1 }
 0x13c   : > { %v2536_v63 = vadd.f32 %v1146_v50, %v565_v48  ;;  %v2079_v1 = vpop.f32.mrb[2].mxu0  ;;  %v568_v2 = vpop.f32.mrb[3].mxu1 }
 0x13d   : > { %v2538_v3 = vadd.f32 %v2079_v1, %v1983_v51  ;;  %v1149_v15 = vpop.f32.mrb[3].mxu0  ;;  %v1378_v20 = vmul.f32 %v2534_v49, %v2534_v49  ;;  %v1309_v27 = vsel %vm1305_vm0, %v2534_v49, 0.0 }
 0x13e   : > { %v1376_v18 = vmul.f32 %v2536_v63, %v2536_v63  ;;  %v2542_v19 = vadd.f32 %v1149_v15, %v568_v2  ;;  %v1306_v21 = vsel %vm1305_vm0, %v2536_v63, 0.0 }
 0x13f   : > { %v1379_v24 = vmul.f32 %v2538_v3, %v2538_v3  ;;  %v1411_v41 = vsel %vm1305_vm0, %v1378_v20, 0.0  ;;  %v1311_v42 = vsel %vm1305_vm0, %v2538_v3, 0.0 }
 0x140   : > { %v1307_v22 = vsel %vm1305_vm0, %v2542_v19, 0.0  ;;  %v1377_v23 = vmul.f32 %v2542_v19, %v2542_v19  ;;  %v1408_v28 = vsel %vm1305_vm0, %v1376_v18, 0.0 }
 0x141   : > { %v1308_v25 = vadd.f32 %v1307_v22, %v1306_v21  ;;  %v1986_v26 = vpop.f32.mrb[4].mxu1  ;;  %v1413_v46 = vsel %vm1305_vm0, %v1379_v24, 0.0 }
 0x142   : > { %v1409_v29 = vsel %vm1305_vm0, %v1377_v23, 0.0  ;;  %v2082_v31 = vpop.f32.mrb[4].mxu0  ;;  %v581_v32 = vpop.f32.mrb[5].mxu1 }
 0x143   : > { %v1310_v36 = vadd.f32 %v1309_v27, %v1308_v25  ;;  %v1410_v37 = vadd.f32 %v1409_v29, %v1408_v28  ;;  %v2558_v38 = vadd.f32 %v2082_v31, %v1986_v26  ;;  %v1162_v39 = vpop.f32.mrb[5].mxu0  ;;  %v1987_v40 = vpop.f32.mrb[6].mxu1 }
 0x144   : > { %v2563_v43 = vadd.f32 %v1162_v39, %v581_v32  ;;  %v2083_v44 = vpop.f32.mrb[6].mxu0  ;;  %v584_v45 = vpop.f32.mrb[7].mxu1 }
 0x145   : > { %v1412_v47 = vadd.f32 %v1411_v41, %v1410_v37  ;;  %v1312_v52 = vadd.f32 %v1311_v42, %v1310_v36  ;;  %v1165_v53 = vpop.f32.mrb[7].mxu0  ;;  %v2570_v56 = vadd.f32 %v2083_v44, %v1987_v40  ;;  %v1382_v62 = vmul.f32 %v2558_v38, %v2558_v38 }
 0x146   : > { %v1313_v54 = vsel %vm1305_vm0, %v2563_v43, 0.0  ;;  %v1380_v55 = vmul.f32 %v2563_v43, %v2563_v43  ;;  %v2572_v57 = vadd.f32 %v1165_v53, %v584_v45  ;;  %v1317_v7 = vsel %vm1305_vm0, %v2558_v38, 0.0 }
 0x147   : > { %v1314_v58 = vadd.f32 %v1313_v54, %v1312_v52  ;;  %v1414_v59 = vadd.f32 %v1413_v46, %v1412_v47  ;;  %v1383_v10 = vmul.f32 %v2570_v56, %v2570_v56  ;;  %v1319_v17 = vsel %vm1305_vm0, %v2570_v56, 0.0 }
 0x148   : > { %v1415_v60 = vsel %vm1305_vm0, %v1380_v55, 0.0  ;;  %v1315_v61 = vsel %vm1305_vm0, %v2572_v57, 0.0  ;;  %v1381_v5 = vmul.f32 %v2572_v57, %v2572_v57  ;;  %v1419_v48 = vsel %vm1305_vm0, %v1382_v62, 0.0 }
 0x149   : > { %v1416_v0 = vadd.f32 %v1415_v60, %v1414_v59  ;;  %v1316_v4 = vadd.f32 %v1315_v61, %v1314_v58  ;;  %v1990_v6 = vpop.f32.mrb[8].mxu1  ;;  %v1421_v21 = vsel %vm1305_vm0, %v1383_v10, 0.0 }
 0x14a   : > { %v2086_v8 = vpop.f32.mrb[8].mxu0  ;;  %v597_v9 = vpop.f32.mrb[9].mxu1  ;;  %v1417_v12 = vsel %vm1305_vm0, %v1381_v5, 0.0 }
 0x14b   : > { %v1318_v11 = vadd.f32 %v1317_v7, %v1316_v4  ;;  %v2586_v13 = vadd.f32 %v2086_v8, %v1990_v6  ;;  %v1178_v14 = vpop.f32.mrb[9].mxu0  ;;  %v1991_v16 = vpop.f32.mrb[10].mxu1  ;;  %v1418_v30 = vadd.f32 %v1417_v12, %v1416_v0 }
 0x14c   : > { %v2590_v33 = vadd.f32 %v1178_v14, %v597_v9  ;;  %v2087_v34 = vpop.f32.mrb[10].mxu0  ;;  %v600_v35 = vpop.f32.mrb[11].mxu1 }
 0x14d   : > { %v1320_v50 = vadd.f32 %v1319_v17, %v1318_v11  ;;  %v2593_v51 = vadd.f32 %v2087_v34, %v1991_v16  ;;  %v1181_v1 = vpop.f32.mrb[11].mxu0  ;;  %v1420_v2 = vadd.f32 %v1419_v48, %v1418_v30  ;;  %v1386_v27 = vmul.f32 %v2586_v13, %v2586_v13 }
 0x14e   : > { %v1321_v15 = vsel %vm1305_vm0, %v2590_v33, 0.0  ;;  %v1384_v18 = vmul.f32 %v2590_v33, %v2590_v33  ;;  %v2599_v20 = vadd.f32 %v1181_v1, %v600_v35  ;;  %v1325_v31 = vsel %vm1305_vm0, %v2586_v13, 0.0 }
 0x14f   : > { %v1322_v22 = vadd.f32 %v1321_v15, %v1320_v50  ;;  %v1422_v23 = vadd.f32 %v1421_v21, %v1420_v2  ;;  %v1387_v40 = vmul.f32 %v2593_v51, %v2593_v51  ;;  %v1327_v46 = vsel %vm1305_vm0, %v2593_v51, 0.0 }
 0x150   : > { %v1423_v24 = vsel %vm1305_vm0, %v1384_v18, 0.0  ;;  %v1323_v25 = vsel %vm1305_vm0, %v2599_v20, 0.0  ;;  %v1385_v26 = vmul.f32 %v2599_v20, %v2599_v20  ;;  %v1427_v55 = vsel %vm1305_vm0, %v1386_v27, 0.0 }
 0x151   : > { %v1324_v28 = vadd.f32 %v1323_v25, %v1322_v22  ;;  %v1994_v29 = vpop.f32.mrb[12].mxu1  ;;  %v1424_v32 = vadd.f32 %v1423_v24, %v1422_v23  ;;  %v1429_v5 = vsel %vm1305_vm0, %v1387_v40, 0.0 }
 0x152   : > { %v1425_v36 = vsel %vm1305_vm0, %v1385_v26, 0.0  ;;  %v2090_v37 = vpop.f32.mrb[12].mxu0  ;;  %v613_v39 = vpop.f32.mrb[13].mxu1 }
 0x153   : > { %v1326_v41 = vadd.f32 %v1325_v31, %v1324_v28  ;;  %v2614_v42 = vadd.f32 %v2090_v37, %v1994_v29  ;;  %v1194_v44 = vpop.f32.mrb[13].mxu0  ;;  %v1995_v45 = vpop.f32.mrb[14].mxu1  ;;  %v1426_v47 = vadd.f32 %v1425_v36, %v1424_v32 }
 0x154   : > { %v2618_v52 = vadd.f32 %v1194_v44, %v613_v39  ;;  %v2091_v53 = vpop.f32.mrb[14].mxu0  ;;  %v616_v54 = vpop.f32.mrb[15].mxu1 }
 0x155   : > { %v1328_v58 = vadd.f32 %v1327_v46, %v1326_v41  ;;  %v2621_v59 = vadd.f32 %v2091_v53, %v1995_v45  ;;  %v1197_v60 = vpop.f32.mrb[15].mxu0  ;;  %v1428_v61 = vadd.f32 %v1427_v55, %v1426_v47  ;;  %v1390_v11 = vmul.f32 %v2614_v42, %v2614_v42 }
 0x156   : > { %v1329_v62 = vsel %vm1305_vm0, %v2618_v52, 0.0  ;;  %v1388_v0 = vmul.f32 %v2618_v52, %v2618_v52  ;;  %v2627_v4 = vadd.f32 %v1197_v60, %v616_v54  ;;  %v1333_v16 = vsel %vm1305_vm0, %v2614_v42, 0.0 }
 0x157   : > { %v1330_v6 = vadd.f32 %v1329_v62, %v1328_v58  ;;  %v1430_v7 = vadd.f32 %v1429_v5, %v1428_v61  ;;  %v1391_v48 = vmul.f32 %v2621_v59, %v2621_v59  ;;  %v1335_v18 = vsel %vm1305_vm0, %v2621_v59, 0.0 }
 0x158   : > { %v1431_v8 = vsel %vm1305_vm0, %v1388_v0, 0.0  ;;  %v1331_v9 = vsel %vm1305_vm0, %v2627_v4, 0.0  ;;  %v1389_v10 = vmul.f32 %v2627_v4, %v2627_v4  ;;  %v1435_v25 = vsel %vm1305_vm0, %v1390_v11, 0.0 }
 0x159   : > { %v1332_v12 = vadd.f32 %v1331_v9, %v1330_v6  ;;  %v1998_v14 = vpop.f32.mrb[16].mxu1  ;;  %v1432_v17 = vadd.f32 %v1431_v8, %v1430_v7  ;;  %v1437_v37 = vsel %vm1305_vm0, %v1391_v48, 0.0 }
 0x15a   : > { %v1433_v30 = vsel %vm1305_vm0, %v1389_v10, 0.0  ;;  %v2094_v34 = vpop.f32.mrb[16].mxu0  ;;  %v629_v35 = vpop.f32.mrb[17].mxu1 }
 0x15b   : > { %v1334_v50 = vadd.f32 %v1333_v16, %v1332_v12  ;;  %v2642_v1 = vadd.f32 %v2094_v34, %v1998_v14  ;;  %v1210_v2 = vpop.f32.mrb[17].mxu0  ;;  %v1999_v15 = vpop.f32.mrb[18].mxu1  ;;  %v1434_v21 = vadd.f32 %v1433_v30, %v1432_v17 }
 0x15c   : > { %v2646_v22 = vadd.f32 %v1210_v2, %v629_v35  ;;  %v2095_v23 = vpop.f32.mrb[18].mxu0  ;;  %v632_v24 = vpop.f32.mrb[19].mxu1 }
 0x15d   : > { %v1336_v26 = vadd.f32 %v1335_v18, %v1334_v50  ;;  %v2649_v27 = vadd.f32 %v2095_v23, %v1999_v15  ;;  %v1213_v28 = vpop.f32.mrb[19].mxu0  ;;  %v1436_v29 = vadd.f32 %v1435_v25, %v1434_v21  ;;  %v1394_v46 = vmul.f32 %v2642_v1, %v2642_v1 }
 0x15e   : > { %v1337_v31 = vsel %vm1305_vm0, %v2646_v22, 0.0  ;;  %v1392_v32 = vmul.f32 %v2646_v22, %v2646_v22  ;;  %v2655_v36 = vadd.f32 %v1213_v28, %v632_v24  ;;  %v1341_v54 = vsel %vm1305_vm0, %v2642_v1, 0.0 }
 0x15f   : > { %v1338_v39 = vadd.f32 %v1337_v31, %v1336_v26  ;;  %v1438_v40 = vadd.f32 %v1437_v37, %v1436_v29  ;;  %v1395_v62 = vmul.f32 %v2649_v27, %v2649_v27  ;;  %v1343_v8 = vsel %vm1305_vm0, %v2649_v27, 0.0 }
 0x160   : > { %v1439_v41 = vsel %vm1305_vm0, %v1392_v32, 0.0  ;;  %v1339_v44 = vsel %vm1305_vm0, %v2655_v36, 0.0  ;;  %v1393_v45 = vmul.f32 %v2655_v36, %v2655_v36  ;;  %v1443_v14 = vsel %vm1305_vm0, %v1394_v46, 0.0 }
 0x161   : > { %v1340_v47 = vadd.f32 %v1339_v44, %v1338_v39  ;;  %v2002_v53 = vpop.f32.mrb[20].mxu1  ;;  %v1440_v55 = vadd.f32 %v1439_v41, %v1438_v40  ;;  %v1445_v2 = vsel %vm1305_vm0, %v1395_v62, 0.0 }
 0x162   : > { %v1441_v58 = vsel %vm1305_vm0, %v1393_v45, 0.0  ;;  %v2098_v60 = vpop.f32.mrb[20].mxu0  ;;  %v645_v61 = vpop.f32.mrb[21].mxu1 }
 0x163   : > { %v1342_v0 = vadd.f32 %v1341_v54, %v1340_v47  ;;  %v2670_v5 = vadd.f32 %v2098_v60, %v2002_v53  ;;  %v1226_v6 = vpop.f32.mrb[21].mxu0  ;;  %v2003_v7 = vpop.f32.mrb[22].mxu1  ;;  %v1442_v9 = vadd.f32 %v1441_v58, %v1440_v55 }
 0x164   : > { %v2674_v10 = vadd.f32 %v1226_v6, %v645_v61  ;;  %v2099_v11 = vpop.f32.mrb[22].mxu0  ;;  %v648_v12 = vpop.f32.mrb[23].mxu1 }
 0x165   : > { %v1344_v16 = vadd.f32 %v1343_v8, %v1342_v0  ;;  %v2677_v17 = vadd.f32 %v2099_v11, %v2003_v7  ;;  %v1229_v30 = vpop.f32.mrb[23].mxu0  ;;  %v1444_v34 = vadd.f32 %v1443_v14, %v1442_v9  ;;  %v1398_v25 = vmul.f32 %v2670_v5, %v2670_v5 }
 0x166   : > { %v1345_v35 = vsel %vm1305_vm0, %v2674_v10, 0.0  ;;  %v1396_v48 = vmul.f32 %v2674_v10, %v2674_v10  ;;  %v2683_v50 = vadd.f32 %v1229_v30, %v648_v12  ;;  %v1349_v29 = vsel %vm1305_vm0, %v2670_v5, 0.0 }
 0x167   : > { %v1346_v15 = vadd.f32 %v1345_v35, %v1344_v16  ;;  %v1446_v18 = vadd.f32 %v1445_v2, %v1444_v34  ;;  %v1399_v40 = vmul.f32 %v2677_v17, %v2677_v17  ;;  %v1351_v47 = vsel %vm1305_vm0, %v2677_v17, 0.0 }
 0x168   : > { %v1447_v21 = vsel %vm1305_vm0, %v1396_v48, 0.0  ;;  %v1347_v23 = vsel %vm1305_vm0, %v2683_v50, 0.0  ;;  %v1397_v24 = vmul.f32 %v2683_v50, %v2683_v50  ;;  %v1451_v60 = vsel %vm1305_vm0, %v1398_v25, 0.0 }
 0x169   : > { %v1348_v26 = vadd.f32 %v1347_v23, %v1346_v15  ;;  %v2006_v28 = vpop.f32.mrb[24].mxu1  ;;  %v1448_v31 = vadd.f32 %v1447_v21, %v1446_v18  ;;  %v1453_v11 = vsel %vm1305_vm0, %v1399_v40, 0.0 }
 0x16a   : > { %v1449_v32 = vsel %vm1305_vm0, %v1397_v24, 0.0  ;;  %v2102_v37 = vpop.f32.mrb[24].mxu0  ;;  %v661_v39 = vpop.f32.mrb[25].mxu1 }
 0x16b   : > { %v1350_v41 = vadd.f32 %v1349_v29, %v1348_v26  ;;  %v2698_v44 = vadd.f32 %v2102_v37, %v2006_v28  ;;  %v1242_v45 = vpop.f32.mrb[25].mxu0  ;;  %v2007_v46 = vpop.f32.mrb[26].mxu1  ;;  %v1450_v53 = vadd.f32 %v1449_v32, %v1448_v31 }
 0x16c   : > { %v2702_v54 = vadd.f32 %v1242_v45, %v661_v39  ;;  %v2103_v55 = vpop.f32.mrb[26].mxu0  ;;  %v664_v58 = vpop.f32.mrb[27].mxu1 }
 0x16d   : > { %v1352_v61 = vadd.f32 %v1351_v47, %v1350_v41  ;;  %v2705_v62 = vadd.f32 %v2103_v55, %v2007_v46  ;;  %v1245_v0 = vpop.f32.mrb[27].mxu0  ;;  %v1452_v6 = vadd.f32 %v1451_v60, %v1450_v53  ;;  %v1402_v35 = vmul.f32 %v2698_v44, %v2698_v44 }
 0x16e   : > { %v1353_v7 = vsel %vm1305_vm0, %v2702_v54, 0.0  ;;  %v1400_v8 = vmul.f32 %v2702_v54, %v2702_v54  ;;  %v2711_v9 = vadd.f32 %v1245_v0, %v664_v58  ;;  %v1357_v15 = vsel %vm1305_vm0, %v2698_v44, 0.0 }
 0x16f   : > { %v1354_v12 = vadd.f32 %v1353_v7, %v1352_v61  ;;  %v1454_v14 = vadd.f32 %v1453_v11, %v1452_v6  ;;  %v1403_v25 = vmul.f32 %v2705_v62, %v2705_v62  ;;  %v1359_v32 = vsel %vm1305_vm0, %v2705_v62, 0.0 }
 0x170   : > { %v1455_v16 = vsel %vm1305_vm0, %v1400_v8, 0.0  ;;  %v1355_v30 = vsel %vm1305_vm0, %v2711_v9, 0.0  ;;  %v1401_v34 = vmul.f32 %v2711_v9, %v2711_v9  ;;  %v1459_v45 = vsel %vm1305_vm0, %v1402_v35, 0.0 }
 0x171   : > { %v1356_v48 = vadd.f32 %v1355_v30, %v1354_v12  ;;  %v2010_v2 = vpop.f32.mrb[28].mxu1  ;;  %v1456_v18 = vadd.f32 %v1455_v16, %v1454_v14  ;;  %v1461_v0 = vsel %vm1305_vm0, %v1403_v25, 0.0 }
 0x172   : > { %v1457_v21 = vsel %vm1305_vm0, %v1401_v34, 0.0  ;;  %v2106_v23 = vpop.f32.mrb[28].mxu0  ;;  %v677_v24 = vpop.f32.mrb[29].mxu1 }
 0x173   : > { %v1358_v26 = vadd.f32 %v1357_v15, %v1356_v48  ;;  %v2726_v28 = vadd.f32 %v2106_v23, %v2010_v2  ;;  %v1258_v29 = vpop.f32.mrb[29].mxu0  ;;  %v2011_v31 = vpop.f32.mrb[30].mxu1  ;;  %v1458_v37 = vadd.f32 %v1457_v21, %v1456_v18 }
 0x174   : > { %v2730_v39 = vadd.f32 %v1258_v29, %v677_v24  ;;  %v2107_v40 = vpop.f32.mrb[30].mxu0  ;;  %v680_v41 = vpop.f32.mrb[31].mxu1 }
 0x175   : > { %v1360_v46 = vadd.f32 %v1359_v32, %v1358_v26  ;;  %v2733_v47 = vadd.f32 %v2107_v40, %v2011_v31  ;;  %v1261_v53 = vpop.f32.mrb[31].mxu0  ;;  %v1460_v55 = vadd.f32 %v1459_v45, %v1458_v37  ;;  %v1406_v14 = vmul.f32 %v2726_v28, %v2726_v28 }
 0x176   : > { %v1361_v58 = vsel %vm1305_vm0, %v2730_v39, 0.0  ;;  %v1404_v60 = vmul.f32 %v2730_v39, %v2730_v39  ;;  %v2739_v61 = vadd.f32 %v1261_v53, %v680_v41  ;;  %v1365_v30 = vsel %vm1305_vm0, %v2726_v28, 0.0 }
 0x177   : > { %v1362_v6 = vadd.f32 %v1361_v58, %v1360_v46  ;;  %v1462_v7 = vadd.f32 %v1461_v0, %v1460_v55  ;;  %v1407_v48 = vmul.f32 %v2733_v47, %v2733_v47  ;;  %v1367_v15 = vsel %vm1305_vm0, %v2733_v47, 0.0 }
 0x178   : > { %v1463_v8 = vsel %vm1305_vm0, %v1404_v60, 0.0  ;;  %v1363_v11 = vsel %vm1305_vm0, %v2739_v61, 0.0  ;;  %v1405_v12 = vmul.f32 %v2739_v61, %v2739_v61  ;;  %v1467_v21 = vsel %vm1305_vm0, %v1406_v14, 0.0 }
 0x179   : > { %v1364_v16 = vadd.f32 %v1363_v11, %v1362_v6  ;;  %v1464_v34 = vadd.f32 %v1463_v8, %v1462_v7  ;;  %v1469_v25 = vsel %vm1305_vm0, %v1407_v48, 0.0 }
 0x17a   : > { %v1465_v35 = vsel %vm1305_vm0, %v1405_v12, 0.0 }
 0x17b   : > { %v1366_v2 = vadd.f32 %v1365_v30, %v1364_v16  ;;  %v1466_v18 = vadd.f32 %v1465_v35, %v1464_v34 }
 0x17d   : > { %v1368_v23 = vadd.f32 %v1367_v15, %v1366_v2  ;;  %v1468_v24 = vadd.f32 %v1467_v21, %v1466_v18 }
 0x17f   : > { %v1369_v26 = vrot.slane %v1368_v23, 4  ;;  %v1470_v29 = vadd.f32 %v1469_v25, %v1468_v24 }
 0x181   : > { %v1370_v31 = vadd.f32 %v1369_v26, %v1368_v23  ;;  %v1471_v32 = vrot.slane %v1470_v29, 4 }
 0x183   : > { %v1371_v37 = vrot.slane %v1370_v31, 2  ;;  %v1472_v40 = vadd.f32 %v1471_v32, %v1470_v29 }
 0x185   : > { %v1372_v41 = vadd.f32 %v1371_v37, %v1370_v31  ;;  %v1473_v45 = vrot.slane %v1472_v40, 2 }
 0x187   : > { %v1373_v46 = vrot.slane %v1372_v41, 1  ;;  %v1474_v53 = vadd.f32 %v1473_v45, %v1472_v40 }
 0x189   : > { %v1374_v55 = vadd.f32 %v1373_v46, %v1372_v41  ;;  %v1475_v58 = vrot.slane %v1474_v53, 1 }
 0x18b   : > { %v2758_v60 = vmul.f32 0.00390625, %v1374_v55  ;;  %v1476_v0 = vadd.f32 %v1475_v58, %v1474_v53 }
 0x18d   : > { %v1478_v6 = vmul.f32 %v2758_v60, %v2758_v60  ;;  %v1477_v7 = vmul.f32 0.00390625, %v1476_v0  ;;  %v1489_v8 = vsub.f32 %v2599_v20, %v2758_v60  ;;  %v1492_v12 = vsub.f32 %v2618_v52, %v2758_v60 }
 0x18e   : > { %v1493_v14 = vsub.f32 %v2627_v4, %v2758_v60  ;;  %v1494_v16 = vsub.f32 %v2614_v42, %v2758_v60  ;;  %v1495_v30 = vsub.f32 %v2621_v59, %v2758_v60  ;;  %v1496_v34 = vsub.f32 %v2646_v22, %v2758_v60 }
 0x18f   : > { %v1479_v11 = vsub.f32 %v1477_v7, %v1478_v6  ;;  %v1497_v35 = vsub.f32 %v2655_v36, %v2758_v60  ;;  %v1498_v20 = vsub.f32 %v2642_v1, %v2758_v60  ;;  %v1499_v52 = vsub.f32 %v2649_v27, %v2758_v60 }
 0x190   : > { %v1500_v4 = vsub.f32 %v2674_v10, %v2758_v60  ;;  %v1501_v42 = vsub.f32 %v2683_v50, %v2758_v60  ;;  %v1502_v59 = vsub.f32 %v2670_v5, %v2758_v60  ;;  %v1503_v22 = vsub.f32 %v2677_v17, %v2758_v60 }
 0x191   : > { %v1504_v36 = vsub.f32 %v2702_v54, %v2758_v60  ;;  %v1505_v1 = vsub.f32 %v2711_v9, %v2758_v60  ;;  %v1506_v27 = vsub.f32 %v2698_v44, %v2758_v60  ;;  %v1507_v10 = vsub.f32 %v2705_v62, %v2758_v60 }
 0x192   : > { %v1508_v50 = vsub.f32 %v2730_v39, %v2758_v60  ;;  %v1509_v5 = vsub.f32 %v2739_v61, %v2758_v60  ;;  %v1510_v17 = vsub.f32 %v2726_v28, %v2758_v60  ;;  %v1511_v54 = vsub.f32 %v2733_v47, %v2758_v60 }
 0x193   : > { %v1512_v48 = vadd.f32 1e-05, %v1479_v11  ;;  %v1480_v44 = vsub.f32 %v2536_v63, %v2758_v60  ;;  %v1481_v62 = vsub.f32 %v2542_v19, %v2758_v60  ;;  %v1482_v9 = vsub.f32 %v2534_v49, %v2758_v60 }
 0x194   : > { %v1483_v39 = vsub.f32 %v2538_v3, %v2758_v60  ;;  %v1484_v28 = vsub.f32 %v2563_v43, %v2758_v60  ;;  %v1485_v47 = vsub.f32 %v2572_v57, %v2758_v60  ;;  %v1486_v61 = vsub.f32 %v2558_v38, %v2758_v60 }
 0x195   : > { %2245 = vrsqrt.f32 %v1512_v48  ;;  %v1487_v63 = vsub.f32 %v2570_v56, %v2758_v60  ;;  %v1488_v19 = vsub.f32 %v2590_v33, %v2758_v60  ;;  %v1490_v49 = vsub.f32 %v2586_v13, %v2758_v60 }
 0x196   : > { %v1491_v3 = vsub.f32 %v2593_v51, %v2758_v60 }
 0x19f   : > { %v2246_v2 = vpop.eup %2245 }
 0x1a0   : > { %v1514_v43 = vmul.f32 %v2246_v2, %v1480_v44  ;;  %v1515_v15 = vmul.f32 %v2246_v2, %v1481_v62  ;;  %v1516_v57 = vmul.f32 %v2246_v2, %v1482_v9  ;;  %v1517_v18 = vmul.f32 %v2246_v2, %v1483_v39 }
 0x1a1   : > { %v1518_v21 = vmul.f32 %v2246_v2, %v1484_v28  ;;  %v1519_v38 = vmul.f32 %v2246_v2, %v1485_v47  ;;  %v1520_v23 = vmul.f32 %v2246_v2, %v1486_v61  ;;  %v1521_v24 = vmul.f32 %v2246_v2, %v1487_v63 }
 0x1a2   : > { %v1522_v25 = vmul.f32 %v2246_v2, %v1488_v19  ;;  %v1523_v56 = vmul.f32 %v2246_v2, %v1489_v8  ;;  %v1524_v26 = vmul.f32 %v2246_v2, %v1490_v49  ;;  %v1525_v29 = vmul.f32 %v2246_v2, %v1491_v3 }
 0x1a3   : > { %v1526_v33 = vmul.f32 %v2246_v2, %v1492_v12  ;;  %v1527_v31 = vmul.f32 %v2246_v2, %v1493_v14  ;;  %v1528_v32 = vmul.f32 %v2246_v2, %v1494_v16  ;;  %v1529_v13 = vmul.f32 %v2246_v2, %v1495_v30 }
 0x1a4   : > { %v1530_v37 = vmul.f32 %v2246_v2, %v1496_v34  ;;  %v1531_v51 = vmul.f32 %v2246_v2, %v1497_v35  ;;  %v1532_v40 = vmul.f32 %v2246_v2, %v1498_v20  ;;  %v1533_v41 = vmul.f32 %v2246_v2, %v1499_v52 }
 0x1a5   : > { %v2827_v45 = vmul.f32 %v2246_v2, %v1500_v4  ;;  %v2829_v46 = vmul.f32 %v2246_v2, %v1501_v42  ;;  %v2831_v53 = vmul.f32 %v2246_v2, %v1502_v59  ;;  %v2833_v55 = vmul.f32 %v2246_v2, %v1503_v22 }
 0x1a6   : > { %v2835_v58 = vmul.f32 %v2246_v2, %v1504_v36  ;;  %v2837_v60 = vmul.f32 %v2246_v2, %v1505_v1  ;;  %v2839_v0 = vmul.f32 %v2246_v2, %v1506_v27  ;;  %v2841_v6 = vmul.f32 %v2246_v2, %v1507_v10 }
 0x1a7   : > { %v2848_v7 = vmul.f32 %v2246_v2, %v1508_v50  ;;  %v2850_v8 = vmul.f32 %v2246_v2, %v1509_v5  ;;  %v2852_v11 = vmul.f32 %v2246_v2, %v1510_v17  ;;  %v2854_v12 = vmul.f32 %v2246_v2, %v1511_v54 }
 0x1a8   : > { %v1546_v14 = vmax.f32 %v1514_v43, 0.0  ;;  %v1547_v16 = vmax.f32 %v1515_v15, 0.0  ;;  %v1548_v30 = vmax.f32 %v1516_v57, 0.0  ;;  %v1549_v34 = vmax.f32 %v1517_v18, 0.0 }
 0x1a9   : > { %v1550_v35 = vmax.f32 %v1518_v21, 0.0  ;;  %v1551_v20 = vmax.f32 %v1519_v38, 0.0  ;;  %v1552_v52 = vmax.f32 %v1520_v23, 0.0  ;;  %v1553_v4 = vmax.f32 %v1521_v24, 0.0 }
 0x1aa   : > { %v1554_v42 = vmax.f32 %v1522_v25, 0.0  ;;  %v1555_v59 = vmax.f32 %v1523_v56, 0.0  ;;  %v1556_v22 = vmax.f32 %v1524_v26, 0.0  ;;  %v1557_v36 = vmax.f32 %v1525_v29, 0.0  ;;  %1578 = vst.msk [vmem:[%s2846_s29] sm:$0xff] %vm1305_vm0, %v1546_v14  ;;  %1579 = vst.msk [vmem:[%s2846_s29 + $0x8] sm:$0xff] %vm1305_vm0, %v1547_v16 }
 0x1ab   : > { %1580 = vst.msk [vmem:[%s2846_s29 + $0x10] sm:$0xff] %vm1305_vm0, %v1548_v30  ;;  %1581 = vst.msk [vmem:[%s2846_s29 + $0x18] sm:$0xff] %vm1305_vm0, %v1549_v34  ;;  %v1558_v1 = vmax.f32 %v1526_v33, 0.0  ;;  %v1559_v27 = vmax.f32 %v1527_v31, 0.0  ;;  %v1560_v10 = vmax.f32 %v1528_v32, 0.0  ;;  %v1561_v50 = vmax.f32 %v1529_v13, 0.0 }
 0x1ac   : > { %1582 = vst.msk [vmem:[%s2846_s29 + $0x20] sm:$0xff] %vm1305_vm0, %v1550_v35  ;;  %1583 = vst.msk [vmem:[%s2846_s29 + $0x28] sm:$0xff] %vm1305_vm0, %v1551_v20  ;;  %v1562_v5 = vmax.f32 %v1530_v37, 0.0  ;;  %v1563_v17 = vmax.f32 %v1531_v51, 0.0  ;;  %v1564_v54 = vmax.f32 %v1532_v40, 0.0  ;;  %v1565_v48 = vmax.f32 %v1533_v41, 0.0 }
 0x1ad   : > { %1584 = vst.msk [vmem:[%s2846_s29 + $0x30] sm:$0xff] %vm1305_vm0, %v1552_v52  ;;  %1585 = vst.msk [vmem:[%s2846_s29 + $0x38] sm:$0xff] %vm1305_vm0, %v1553_v4  ;;  %v1566_v44 = vmax.f32 %v2827_v45, 0.0  ;;  %v1567_v62 = vmax.f32 %v2829_v46, 0.0  ;;  %v1568_v9 = vmax.f32 %v2831_v53, 0.0  ;;  %v1569_v39 = vmax.f32 %v2833_v55, 0.0 }
 0x1ae   : > { %1586 = vst.msk [vmem:[%s2846_s29 + $0x40] sm:$0xff] %vm1305_vm0, %v1554_v42  ;;  %1587 = vst.msk [vmem:[%s2846_s29 + $0x48] sm:$0xff] %vm1305_vm0, %v1555_v59  ;;  %v1570_v28 = vmax.f32 %v2835_v58, 0.0  ;;  %v1571_v47 = vmax.f32 %v2837_v60, 0.0  ;;  %v1572_v61 = vmax.f32 %v2839_v0, 0.0  ;;  %v1573_v2 = vmax.f32 %v2841_v6, 0.0 }
 0x1af   : > { %1588 = vst.msk [vmem:[%s2846_s29 + $0x50] sm:$0xff] %vm1305_vm0, %v1556_v22  ;;  %1589 = vst.msk [vmem:[%s2846_s29 + $0x58] sm:$0xff] %vm1305_vm0, %v1557_v36  ;;  %v1574_v63 = vmax.f32 %v2848_v7, 0.0  ;;  %v1575_v19 = vmax.f32 %v2850_v8, 0.0  ;;  %v1576_v49 = vmax.f32 %v2852_v11, 0.0  ;;  %v1577_v3 = vmax.f32 %v2854_v12, 0.0 }
 0x1b0   : > { %1590 = vst.msk [vmem:[%s2846_s29 + $0x60] sm:$0xff] %vm1305_vm0, %v1558_v1  ;;  %1591 = vst.msk [vmem:[%s2846_s29 + $0x68] sm:$0xff] %vm1305_vm0, %v1559_v27 }
 0x1b1   : > { %1592 = vst.msk [vmem:[%s2846_s29 + $0x70] sm:$0xff] %vm1305_vm0, %v1560_v10  ;;  %1593 = vst.msk [vmem:[%s2846_s29 + $0x78] sm:$0xff] %vm1305_vm0, %v1561_v50 }
 0x1b2   : > { %1594 = vst.msk [vmem:[%s2846_s29 + $0x80] sm:$0xff] %vm1305_vm0, %v1562_v5  ;;  %1595 = vst.msk [vmem:[%s2846_s29 + $0x88] sm:$0xff] %vm1305_vm0, %v1563_v17 }
 0x1b3   : > { %1596 = vst.msk [vmem:[%s2846_s29 + $0x90] sm:$0xff] %vm1305_vm0, %v1564_v54  ;;  %1597 = vst.msk [vmem:[%s2846_s29 + $0x98] sm:$0xff] %vm1305_vm0, %v1565_v48 }
 0x1b4   : > { %1598 = vst.msk [vmem:[%s2846_s29 + $0xa0] sm:$0xff] %vm1305_vm0, %v1566_v44  ;;  %1599 = vst.msk [vmem:[%s2846_s29 + $0xa8] sm:$0xff] %vm1305_vm0, %v1567_v62 }
 0x1b5   : > { %1600 = vst.msk [vmem:[%s2846_s29 + $0xb0] sm:$0xff] %vm1305_vm0, %v1568_v9  ;;  %1601 = vst.msk [vmem:[%s2846_s29 + $0xb8] sm:$0xff] %vm1305_vm0, %v1569_v39 }
 0x1b6   : > { %1602 = vst.msk [vmem:[%s2846_s29 + $0xc0] sm:$0xff] %vm1305_vm0, %v1570_v28  ;;  %1603 = vst.msk [vmem:[%s2846_s29 + $0xc8] sm:$0xff] %vm1305_vm0, %v1571_v47 }
 0x1b7   : > { %1604 = vst.msk [vmem:[%s2846_s29 + $0xd0] sm:$0xff] %vm1305_vm0, %v1572_v61  ;;  %1605 = vst.msk [vmem:[%s2846_s29 + $0xd8] sm:$0xff] %vm1305_vm0, %v1573_v2 }
 0x1b8   : > { %1606 = vst.msk [vmem:[%s2846_s29 + $0xe0] sm:$0xff] %vm1305_vm0, %v1574_v63  ;;  %1607 = vst.msk [vmem:[%s2846_s29 + $0xe8] sm:$0xff] %vm1305_vm0, %v1575_v19 }
 0x1b9   : > { %1608 = vst.msk [vmem:[%s2846_s29 + $0xf0] sm:$0xff] %vm1305_vm0, %v1576_v49  ;;  %1609 = vst.msk [vmem:[%s2846_s29 + $0xf8] sm:$0xff] %vm1305_vm0, %v1577_v3 }
 0x1ba PF: > { %s12_s9 = sadd.s32 1, %s2253_s9  }
 0x1bb   : > { %p9_p4 = scmp.ge.s32.totalorder %s12_s9, 4  }
 0x1bd   :  { %11 = sbr.rel (!%p9_p4) target bundleno = 1 (0x1), region = 62 }

// kernel: dc_discriminator_forward.6
= control target key start
LH: loop header
LB: loop body
LE: loop exit
PB: predicated region body
PF: predicated region fallthrough
CT: control target
= control target key end

     0   :  { %s1862_s9 = smov 0   ;;  %s2293_s0 = inlined_call_operand.vmem [shape: f32[2,9,9,256], index: 0, kind: input, shape index: {}]   ;;  %s2294_s1 = inlined_call_operand.vmem [shape: bf16[4,256,128], index: 1, kind: input, shape index: {}]   ;;  %s2295_s2 = inlined_call_operand.vmem [shape: f32[2,8,8,128], index: 2, kind: output, shape index: {}]  }
   0x1 LB: > { %s1385_s10 = sadd.s32 4294967295, %s1845_s9   ;;  %p1389_p0 = scmp.ge.s32.totalorder %s1845_s9, 1  ;;  %s1845_s9 = sphi %s1862_s9, %s12_s9  }
   0x2   : > { %p112_p1 = scmp.lt.s32.totalorder %s1845_s9, 3 }
   0x4   : > { %p113_p2 = pnand %p1389_p0, %p112_p1 }
   0x5   : > { %v1773_v0 = vld [vmem:[%s2294_s1 + $0xc0] sm:$0xff] (!%p113_p2)   ;;  %v1777_v4 = vld [vmem:[%s2294_s1 + $0xc8] sm:$0xff] (!%p113_p2)   ;;  %v1781_v8 = vld [vmem:[%s2294_s1 + $0xd0] sm:$0xff] (!%p113_p2)   ;;  %p134_p3 = scmp.lt.s32.totalorder (!%p113_p2), %s1385_s10, 1  ;;  %vm265_vm0 = vcmask (!%p113_p2), 1046528  }
   0x6   : > { %116 = sbr.rel (%p113_p2) target bundleno = 357 (0x165), region = 28  ;;  %v1774_v1 = vld [vmem:[%s2294_s1 + $0x40] sm:$0xff] (!%p113_p2)   ;;  %1604 = vmatprep.subr.bf16.mxu0 (!%p113_p2), %v1773_v0  ;;  %v1778_v5 = vld [vmem:[%s2294_s1 + $0x48] sm:$0xff] (!%p113_p2)   ;;  %v1782_v9 = vld [vmem:[%s2294_s1 + $0x50] sm:$0xff] (!%p113_p2)  }
   0x7   : > { %v1775_v2 = vld [vmem:[%s2294_s1 + $0x80] sm:$0xff] (!%p113_p2)   ;;  %1644 = vmatprep.subr.bf16.mxu1 (!%p113_p2), %v1774_v1  ;;  %v1779_v6 = vld [vmem:[%s2294_s1 + $0x88] sm:$0xff] (!%p113_p2)   ;;  %v1783_v10 = vld [vmem:[%s2294_s1 + $0x90] sm:$0xff] (!%p113_p2)  }
   0x8   : > { %v1776_v3 = vld [vmem:[%s2294_s1] sm:$0xff] (!%p113_p2)   ;;  %1605 = vmatpush3.bf16.msra.mxu0 (!%p113_p2), %v1775_v2  ;;  %v1780_v7 = vld [vmem:[%s2294_s1 + $0x8] sm:$0xff] (!%p113_p2)   ;;  %v1784_v11 = vld [vmem:[%s2294_s1 + $0x10] sm:$0xff] (!%p113_p2)  }
   0x9   : > { %1645 = vmatpush3.bf16.msra.mxu1 (!%p113_p2), %v1776_v3  ;;  %1606 = vmatprep.subr.bf16.mxu0 (!%p113_p2), %v1777_v4  ;;  %v1785_v12 = vld [vmem:[%s2294_s1 + $0xd8] sm:$0xff] (!%p113_p2)   ;;  %v1789_v16 = vld [vmem:[%s2294_s1 + $0xe0] sm:$0xff] (!%p113_p2)   ;;  %v1793_v20 = vld [vmem:[%s2294_s1 + $0xe8] sm:$0xff] (!%p113_p2)  }
   0xa   : > { %1646 = vmatprep.subr.bf16.mxu1 (!%p113_p2), %v1778_v5  ;;  %v1786_v13 = vld [vmem:[%s2294_s1 + $0x58] sm:$0xff] (!%p113_p2)   ;;  %v1790_v17 = vld [vmem:[%s2294_s1 + $0x60] sm:$0xff] (!%p113_p2)   ;;  %v1794_v21 = vld [vmem:[%s2294_s1 + $0x68] sm:$0xff] (!%p113_p2)  }
   0xb   : > { %v1787_v14 = vld [vmem:[%s2294_s1 + $0x98] sm:$0xff] (!%p113_p2)   ;;  %v1791_v18 = vld [vmem:[%s2294_s1 + $0xa0] sm:$0xff] (!%p113_p2)   ;;  %v1795_v22 = vld [vmem:[%s2294_s1 + $0xa8] sm:$0xff] (!%p113_p2)  }
   0xc   : > { %1607 = vmatpush3.bf16.msra.mxu0 (!%p113_p2), %v1779_v6  ;;  %v1788_v15 = vld [vmem:[%s2294_s1 + $0x18] sm:$0xff] (!%p113_p2)   ;;  %v1792_v19 = vld [vmem:[%s2294_s1 + $0x20] sm:$0xff] (!%p113_p2)   ;;  %v1796_v23 = vld [vmem:[%s2294_s1 + $0x28] sm:$0xff] (!%p113_p2)  }
   0xd   : > { %1647 = vmatpush3.bf16.msra.mxu1 %v1780_v7  ;;  %1608 = vmatprep.subr.bf16.mxu0 %v1781_v8  ;;  %s2297_s10 = smov (!%p134_p3, %s1385_s10), 1  ;;  %v1797_v24 = vld [vmem:[%s2294_s1 + $0xf0] sm:$0xff]   ;;  %v1801_v28 = vld [vmem:[%s2294_s1 + $0xf8] sm:$0xff]   ;;  %v1805_v58 = vld [vmem:[%s2294_s1 + $0x140] sm:$0xff]  }
   0xe   : > { %1648 = vmatprep.subr.bf16.mxu1 %v1782_v9  ;;  %v1798_v25 = vld [vmem:[%s2294_s1 + $0x70] sm:$0xff]   ;;  %s1764_s11 = smul.u32 288, %s2297_s10  ;;  %v1802_v29 = vld [vmem:[%s2294_s1 + $0x78] sm:$0xff]   ;;  %v1806_v60 = vld [vmem:[%s2294_s1 + $0x1c0] sm:$0xff]  }
   0xf   : > { %v1799_v26 = vld [vmem:[%s2294_s1 + $0xb0] sm:$0xff]   ;;  %v1803_v30 = vld [vmem:[%s2294_s1 + $0xb8] sm:$0xff]   ;;  %v1807_v62 = vld [vmem:[%s2294_s1 + $0x100] sm:$0xff]  }
  0x10   : > { %1609 = vmatpush3.bf16.msra.mxu0 %v1783_v10  ;;  %v1800_v27 = vld [vmem:[%s2294_s1 + $0x30] sm:$0xff]   ;;  %s1970_s22 = scalar_lea.vmem %s2293_s0, %s1764_s11  ;;  %v1804_v31 = vld [vmem:[%s2294_s1 + $0x38] sm:$0xff]   ;;  %v1808_v63 = vld [vmem:[%s2294_s1 + $0x180] sm:$0xff]  }
  0x11   : > { %1649 = vmatpush3.bf16.msra.mxu1 %v1784_v11  ;;  %1610 = vmatprep.subr.bf16.mxu0 %v1785_v12  ;;  %v202_v32 = vld [vmem:[%s1970_s22 + $0x8] sm:$0xfe]  ;;  %v204_v33 = vld [vmem:[%s1970_s22 + $0x18] sm:$0x1]  ;;  %v201_v42 = vld [vmem:[%s1970_s22] sm:$0xfe] }
  0x12   : > { %1650 = vmatprep.subr.bf16.mxu1 %v1786_v13  ;;  %v206_v34 = vld [vmem:[%s1970_s22 + $0x28] sm:$0xfe]  ;;  %v208_v35 = vld [vmem:[%s1970_s22 + $0x38] sm:$0x1]  ;;  %v269_v36 = vrot.slane %v202_v32, 1  ;;  %v270_v37 = vrot.slane %v204_v33, 1 }
  0x13   : > { %v275_v38 = vrot.slane %v206_v34, 1  ;;  %v146_v39 = vld [vmem:[%s1970_s22 + $0x8] sm:$0xff]  ;;  %v276_v40 = vrot.slane %v208_v35, 1  ;;  %v203_v43 = vld [vmem:[%s1970_s22 + $0x10] sm:$0x1]  ;;  %v266_v48 = vrot.slane %v201_v42, 1 }
  0x14   : > { %1611 = vmatpush3.bf16.msra.mxu0 %v1787_v14  ;;  %v1984_v41 = vld [vmem:[%s1970_s22 + $0x28] sm:$0xff]  ;;  %v271_v44 = vsel %vm265_vm0, %v269_v36, %v270_v37  ;;  %v205_v46 = vld [vmem:[%s1970_s22 + $0x20] sm:$0xfe]  ;;  %v207_v47 = vld [vmem:[%s1970_s22 + $0x30] sm:$0x1]  ;;  %v267_v49 = vrot.slane %v203_v43, 1 }
  0x15   : > { %1651 = vmatpush3.bf16.msra.mxu1 %v1788_v15  ;;  %1612 = vmatprep.subr.bf16.mxu0 %v1789_v16  ;;  %v162_v45 = vpack.c.bf16 %v1984_v41, %v146_v39  ;;  %v277_v50 = vsel %vm265_vm0, %v275_v38, %v276_v40  ;;  %v272_v51 = vrot.slane %v205_v46, 1  ;;  %v273_v52 = vrot.slane %v207_v47, 1  ;;  %v145_v53 = vld [vmem:[%s1970_s22] sm:$0xff]  ;;  %v1809_v0 = vld [vmem:[%s2294_s1 + $0x148] sm:$0xff]   ;;  %v212_v5 = vld [vmem:[%s1970_s22 + $0x58] sm:$0x1] }
  0x16   : > { %1652 = vmatprep.subr.bf16.mxu1 %v1790_v17  ;;  %v1995_v54 = vld [vmem:[%s1970_s22 + $0x20] sm:$0xff]  ;;  %v331_v55 = vpack.c.bf16 %v277_v50, %v271_v44  ;;  %v268_v56 = vsel %vm265_vm0, %v266_v48, %v267_v49  ;;  %v1810_v1 = vld [vmem:[%s2294_s1 + $0x1c8] sm:$0xff]   ;;  %v216_v7 = vld [vmem:[%s1970_s22 + $0x78] sm:$0x1]  ;;  %v282_v9 = vrot.slane %v212_v5, 1 }
  0x17   : > { %660 = vmatprep.mubr.bf16.mxu1 %v162_v45  ;;  %v161_v57 = vpack.c.bf16 %v1995_v54, %v145_v53  ;;  %v274_v59 = vsel %vm265_vm0, %v272_v51, %v273_v52  ;;  %v1811_v2 = vld [vmem:[%s2294_s1 + $0x108] sm:$0xff]   ;;  %v288_v11 = vrot.slane %v216_v7, 1  ;;  %v209_v15 = vld [vmem:[%s1970_s22 + $0x40] sm:$0xfe]  ;;  %v211_v16 = vld [vmem:[%s1970_s22 + $0x50] sm:$0x1] }
  0x18   : > { %1613 = vmatpush3.bf16.msra.mxu0 %v1791_v18  ;;  %499 = vmatprep.mubr.bf16.mxu0 %v331_v55  ;;  %v330_v61 = vpack.c.bf16 %v274_v59, %v268_v56  ;;  %v1812_v3 = vld [vmem:[%s2294_s1 + $0x188] sm:$0xff]   ;;  %v213_v17 = vld [vmem:[%s1970_s22 + $0x60] sm:$0xfe]  ;;  %v1814_v32 = vld [vmem:[%s2294_s1 + $0x1d0] sm:$0xff]  }
  0x19   : > { %1653 = vmatpush3.bf16.msra.mxu1 %v1792_v19  ;;  %1614 = vmatprep.subr.bf16.mxu0 %v1793_v20  ;;  %v210_v4 = vld [vmem:[%s1970_s22 + $0x48] sm:$0xfe]  ;;  %v215_v20 = vld [vmem:[%s1970_s22 + $0x70] sm:$0x1]  ;;  %v1817_v36 = vld [vmem:[%s2294_s1 + $0x158] sm:$0xff]  }
  0x1a   : > { %1654 = vmatprep.subr.bf16.mxu1 %v1794_v21  ;;  %v214_v6 = vld [vmem:[%s1970_s22 + $0x68] sm:$0xfe]  ;;  %v281_v8 = vrot.slane %v210_v4, 1  ;;  %v278_v21 = vrot.slane %v209_v15, 1  ;;  %v1815_v34 = vld [vmem:[%s2294_s1 + $0x110] sm:$0xff]   ;;  %v1818_v37 = vld [vmem:[%s2294_s1 + $0x1d8] sm:$0xff]  }
  0x1b   : > { %v287_v10 = vrot.slane %v214_v6, 1  ;;  %v2029_v12 = vld [vmem:[%s1970_s22 + $0x48] sm:$0xff]  ;;  %v1816_v35 = vld [vmem:[%s2294_s1 + $0x190] sm:$0xff]   ;;  %v1819_v38 = vld [vmem:[%s2294_s1 + $0x118] sm:$0xff]  }
  0x1c   : > { %1615 = vmatpush3.bf16.msra.mxu0 %v1795_v22  ;;  %v2032_v13 = vld [vmem:[%s1970_s22 + $0x68] sm:$0xff]  ;;  %v283_v18 = vsel %vm265_vm0, %v281_v8, %v282_v9  ;;  %v279_v22 = vrot.slane %v211_v16, 1  ;;  %v1820_v39 = vld [vmem:[%s2294_s1 + $0x198] sm:$0xff]   ;;  %v217_v51 = vld [vmem:[%s1970_s22 + $0x80] sm:$0xfe] }
  0x1d   : > { %1655 = vmatpush3.bf16.msra.mxu1 %v1796_v23  ;;  %1616 = vmatprep.subr.bf16.mxu0 %v1797_v24  ;;  %v164_v14 = vpack.c.bf16 %v2032_v13, %v2029_v12  ;;  %v289_v19 = vsel %vm265_vm0, %v287_v10, %v288_v11  ;;  %v2043_v23 = vld [vmem:[%s1970_s22 + $0x40] sm:$0xff]  ;;  %v218_v40 = vld [vmem:[%s1970_s22 + $0x88] sm:$0xfe]  ;;  %v220_v42 = vld [vmem:[%s1970_s22 + $0x98] sm:$0x1]  ;;  %v290_v59 = vrot.slane %v217_v51, 1 }
  0x1e   : > { %1656 = vmatprep.subr.bf16.mxu1 %v1798_v25  ;;  %v2046_v24 = vld [vmem:[%s1970_s22 + $0x60] sm:$0xff]  ;;  %v333_v25 = vpack.c.bf16 %v289_v19, %v283_v18  ;;  %v222_v43 = vld [vmem:[%s1970_s22 + $0xa8] sm:$0xfe]  ;;  %v224_v44 = vld [vmem:[%s1970_s22 + $0xb8] sm:$0x1]  ;;  %v293_v45 = vrot.slane %v218_v40, 1 }
  0x1f   : > { %v294_v46 = vrot.slane %v220_v42, 1  ;;  %v299_v47 = vrot.slane %v222_v43, 1  ;;  %v300_v48 = vrot.slane %v224_v44, 1  ;;  %v2081_v49 = vld [vmem:[%s1970_s22 + $0x88] sm:$0xff]  ;;  %v219_v55 = vld [vmem:[%s1970_s22 + $0x90] sm:$0x1] }
  0x20   : > { %1617 = vmatpush3.bf16.msra.mxu0 %v1799_v26  ;;  %v284_v26 = vrot.slane %v213_v17, 1  ;;  %v2084_v50 = vld [vmem:[%s1970_s22 + $0xa8] sm:$0xff]  ;;  %v221_v56 = vld [vmem:[%s1970_s22 + $0xa0] sm:$0xfe]  ;;  %v228_v17 = vld [vmem:[%s1970_s22 + $0xd8] sm:$0x1] }
  0x21   : > { %1657 = vmatpush3.bf16.msra.mxu1 %v1800_v27  ;;  %1618 = vmatprep.subr.bf16.mxu0 %v1801_v28  ;;  %v285_v27 = vrot.slane %v215_v20, 1  ;;  %v163_v28 = vpack.c.bf16 %v2046_v24, %v2043_v23  ;;  %v295_v52 = vsel %vm265_vm0, %v293_v45, %v294_v46  ;;  %v166_v53 = vpack.c.bf16 %v2084_v50, %v2081_v49  ;;  %v1822_v4 = vld [vmem:[%s2294_s1 + $0x1e0] sm:$0xff]   ;;  %v1825_v10 = vld [vmem:[%s2294_s1 + $0x168] sm:$0xff]   ;;  %v232_v19 = vld [vmem:[%s1970_s22 + $0xf8] sm:$0x1] }
  0x22   : > { %1658 = vmatprep.subr.bf16.mxu1 %v1802_v29  ;;  %v280_v29 = vsel %vm265_vm0, %v278_v21, %v279_v22  ;;  %v1823_v7 = vld [vmem:[%s2294_s1 + $0x120] sm:$0xff]   ;;  %v1826_v11 = vld [vmem:[%s2294_s1 + $0x1e8] sm:$0xff]   ;;  %v306_v21 = vrot.slane %v228_v17, 1  ;;  %v1829_v45 = vld [vmem:[%s2294_s1 + $0x170] sm:$0xff]  }
  0x23   : > { %v1824_v9 = vld [vmem:[%s2294_s1 + $0x1a0] sm:$0xff]   ;;  %v1828_v15 = vld [vmem:[%s2294_s1 + $0x1a8] sm:$0xff]   ;;  %v1831_v51 = vld [vmem:[%s2294_s1 + $0x130] sm:$0xff]  }
  0x24   : > { %1619 = vmatpush3.bf16.msra.mxu0 %v1803_v30  ;;  %v1813_v30 = vld [vmem:[%s2294_s1 + $0x150] sm:$0xff]   ;;  %v226_v16 = vld [vmem:[%s1970_s22 + $0xc8] sm:$0xfe] }
  0x25   : > { %1659 = vmatpush3.bf16.msra.mxu1 %v1804_v31  ;;  %1684 = vmatprep.subr.bf16.mxu0 %v1805_v58  ;;  %v286_v31 = vsel %vm265_vm0, %v284_v26, %v285_v27  ;;  %v301_v58 = vsel %vm265_vm0, %v299_v47, %v300_v48  ;;  %v230_v18 = vld [vmem:[%s1970_s22 + $0xe8] sm:$0xfe]  ;;  %v305_v20 = vrot.slane %v226_v16, 1  ;;  %v1830_v47 = vld [vmem:[%s2294_s1 + $0x1f0] sm:$0xff]   ;;  %v1532_v16 = vld [vmem:[%s1970_s22 + $0x78] sm:$0x1] }
  0x26   : > { %1724 = vmatprep.subr.bf16.mxu1 %v1806_v60  ;;  %v332_v33 = vpack.c.bf16 %v286_v31, %v280_v29  ;;  %v291_v60 = vrot.slane %v219_v55, 1  ;;  %v311_v22 = vrot.slane %v230_v18, 1  ;;  %v2133_v26 = vld [vmem:[%s1970_s22 + $0xc8] sm:$0xff]  ;;  %v225_v29 = vld [vmem:[%s1970_s22 + $0xc0] sm:$0xfe]  ;;  %v1833_v55 = vld [vmem:[%s2294_s1 + $0x178] sm:$0xff]  }
  0x27   : > { %500 = vmatmul.mubr.bf16.vlgmr.msra.gmra.mrb[0].mxu0 %v330_v61  ;;  %v296_v61 = vrot.slane %v221_v56, 1  ;;  %v2136_v27 = vld [vmem:[%s1970_s22 + $0xe8] sm:$0xff]  ;;  %v229_v31 = vld [vmem:[%s1970_s22 + $0xe0] sm:$0xfe]  ;;  %v1834_v56 = vld [vmem:[%s2294_s1 + $0x1f8] sm:$0xff]  }
  0x28   : > { %661 = vmatmul.mubr.bf16.vlgmr.msra.gmra.mrb[0].mxu1 %v161_v57  ;;  %1685 = vmatpush3.bf16.msra.mxu0 %v1807_v62  ;;  %v223_v57 = vld [vmem:[%s1970_s22 + $0xb0] sm:$0x1]  ;;  %v2095_v62 = vld [vmem:[%s1970_s22 + $0x80] sm:$0xff]  ;;  %v292_v5 = vsel %vm265_vm0, %v290_v59, %v291_v60  ;;  %v308_v40 = vrot.slane %v229_v31, 1  ;;  %v1526_v59 = vld [vmem:[%s1970_s22 + $0x48] sm:$0xfe] }
  0x29   : > { %1725 = vmatpush3.bf16.msra.mxu1 %v1808_v63  ;;  %1686 = vmatprep.subr.bf16.mxu0 %v1809_v0  ;;  %v2098_v63 = vld [vmem:[%s1970_s22 + $0xa0] sm:$0xff]  ;;  %v1528_v60 = vld [vmem:[%s1970_s22 + $0x58] sm:$0x1] }
  0x2a   : > { %1726 = vmatprep.subr.bf16.mxu1 %v1810_v1  ;;  %668 = vmatprep.mubr.bf16.mxu1 %v164_v14  ;;  %v1821_v0 = vld [vmem:[%s2294_s1 + $0x160] sm:$0xff]   ;;  %v335_v1 = vpack.c.bf16 %v301_v58, %v295_v52  ;;  %v1827_v14 = vld [vmem:[%s2294_s1 + $0x128] sm:$0xff]   ;;  %v711_v52 = vpack.c.bf16 %v2029_v12, %v1984_v41  ;;  %v1835_v41 = vld [vmem:[%s2294_s1 + $0x138] sm:$0xff]  }
  0x2b   : > { %507 = vmatprep.mubr.bf16.mxu0 %v333_v25  ;;  %v312_v25 = vrot.slane %v232_v19, 1  ;;  %v1836_v12 = vld [vmem:[%s2294_s1 + $0x1b8] sm:$0xff]  }
  0x2c   : > { %1687 = vmatpush3.bf16.msra.mxu0 %v1811_v2  ;;  %v297_v2 = vrot.slane %v223_v57, 1  ;;  %v1522_v57 = vld [vmem:[%s1970_s22 + $0x28] sm:$0xfe]  ;;  %v1524_v58 = vld [vmem:[%s1970_s22 + $0x38] sm:$0x1] }
  0x2d   : > { %1727 = vmatpush3.bf16.msra.mxu1 %v1812_v3  ;;  %1688 = vmatprep.subr.bf16.mxu0 %v1813_v30  ;;  %v165_v3 = vpack.c.bf16 %v2098_v63, %v2095_v62  ;;  %v227_v30 = vld [vmem:[%s1970_s22 + $0xd0] sm:$0x1]  ;;  %v1536_v18 = vld [vmem:[%s1970_s22 + $0x98] sm:$0x1] }
  0x2e   : > { %1728 = vmatprep.subr.bf16.mxu1 %v1814_v32  ;;  %v298_v6 = vsel %vm265_vm0, %v296_v61, %v297_v2  ;;  %v307_v32 = vsel %vm265_vm0, %v305_v20, %v306_v21  ;;  %v987_v61 = vrot.slane %v1522_v57, 1  ;;  %v993_v2 = vrot.slane %v1526_v59, 1  ;;  %v1546_v59 = vld [vmem:[%s1970_s22 + $0xe8] sm:$0xfe] }
  0x2f   : > { %508 = vmatmul.mubr.bf16.gmra.mrb[4].mxu0 %v332_v33  ;;  %v334_v8 = vpack.c.bf16 %v298_v6, %v292_v5  ;;  %v313_v33 = vsel %vm265_vm0, %v311_v22, %v312_v25  ;;  %v1523_v5 = vld [vmem:[%s1970_s22 + $0x30] sm:$0x1]  ;;  %v713_v6 = vpack.c.bf16 %v2081_v49, %v2032_v13  ;;  %v1534_v49 = vld [vmem:[%s1970_s22 + $0x88] sm:$0xfe]  ;;  %v1000_v20 = vrot.slane %v1532_v16, 1 }
  0x30   : > { %669 = vmatmul.mubr.bf16.gmra.mrb[4].mxu1 %v163_v28  ;;  %1689 = vmatpush3.bf16.msra.mxu0 %v1815_v34  ;;  %v168_v28 = vpack.c.bf16 %v2136_v27, %v2133_v26  ;;  %v231_v34 = vld [vmem:[%s1970_s22 + $0xf0] sm:$0x1]  ;;  %v1005_v22 = vrot.slane %v1534_v49, 1  ;;  %v1006_v25 = vrot.slane %v1536_v18, 1  ;;  %v1549_v49 = vld [vmem:[%s1970_s22 + $0x100] sm:$0xfe] }
  0x31   : > { %1729 = vmatpush3.bf16.msra.mxu1 %v1816_v35  ;;  %1690 = vmatprep.subr.bf16.mxu0 %v1817_v36  ;;  %v302_v35 = vrot.slane %v225_v29, 1  ;;  %v303_v36 = vrot.slane %v227_v30, 1  ;;  %v309_v42 = vrot.slane %v231_v34, 1  ;;  %v1531_v29 = vld [vmem:[%s1970_s22 + $0x70] sm:$0x1] }
  0x32   : > { %1730 = vmatprep.subr.bf16.mxu1 %v1818_v37  ;;  %676 = vmatprep.mubr.bf16.mxu1 %v166_v53  ;;  %v2147_v37 = vld [vmem:[%s1970_s22 + $0xc0] sm:$0xff]  ;;  %v1832_v53 = vld [vmem:[%s2294_s1 + $0x1b0] sm:$0xff]  }
  0x33   : > { %515 = vmatprep.mubr.bf16.mxu0 %v335_v1  ;;  %v304_v44 = vsel %vm265_vm0, %v302_v35, %v303_v36  ;;  %v310_v46 = vsel %vm265_vm0, %v308_v40, %v309_v42  ;;  %v710_v1 = vpack.c.bf16 %v2043_v23, %v1995_v54  ;;  %v997_v35 = vrot.slane %v1531_v29, 1  ;;  %v1551_v18 = vld [vmem:[%s1970_s22 + $0x110] sm:$0x1] }
  0x34   : > { %1691 = vmatpush3.bf16.msra.mxu0 %v1819_v38  ;;  %v2150_v38 = vld [vmem:[%s1970_s22 + $0xe0] sm:$0xff]  ;;  %v336_v48 = vpack.c.bf16 %v310_v46, %v304_v44  ;;  %v1007_v36 = vsel %vm265_vm0, %v1005_v22, %v1006_v25  ;;  %v1540_v44 = vld [vmem:[%s1970_s22 + $0xb8] sm:$0x1]  ;;  %v715_v46 = vpack.c.bf16 %v2133_v26, %v2084_v50  ;;  %v1543_v26 = vld [vmem:[%s1970_s22 + $0xd0] sm:$0x1]  ;;  %v1026_v22 = vrot.slane %v1549_v49, 1 }
  0x35   : > { %1731 = vmatpush3.bf16.msra.mxu1 %v1820_v39  ;;  %1692 = vmatprep.subr.bf16.mxu0 %v1821_v0  ;;  %v337_v39 = vpack.c.bf16 %v313_v33, %v307_v32  ;;  %v167_v43 = vpack.c.bf16 %v2150_v38, %v2147_v37  ;;  %v988_v0 = vrot.slane %v1524_v58, 1  ;;  %v1533_v32 = vld [vmem:[%s1970_s22 + $0x80] sm:$0xfe]  ;;  %v1535_v33 = vld [vmem:[%s1970_s22 + $0x90] sm:$0x1]  ;;  %v1027_v25 = vrot.slane %v1551_v18, 1 }
  0x36   : > { %1732 = vmatprep.subr.bf16.mxu1 %v1822_v4  ;;  %v1521_v4 = vld [vmem:[%s1970_s22 + $0x20] sm:$0xfe]  ;;  %v1002_v40 = vrot.slane %v1533_v32, 1  ;;  %v1003_v42 = vrot.slane %v1535_v33, 1 }
  0x37   : > { %516 = vmatmul.mubr.bf16.gmra.mrb[8].mxu0 %v334_v8  ;;  %v1525_v8 = vld [vmem:[%s1970_s22 + $0x40] sm:$0xfe]  ;;  %v1028_v29 = vsel %vm265_vm0, %v1026_v22, %v1027_v25 }
  0x38   : > { %677 = vmatmul.mubr.bf16.gmra.mrb[8].mxu1 %v165_v3  ;;  %1693 = vmatpush3.bf16.msra.mxu0 %v1823_v7  ;;  %v994_v3 = vrot.slane %v1528_v60, 1  ;;  %v989_v7 = vsel %vm265_vm0, %v987_v61, %v988_v0  ;;  %v990_v23 = vrot.slane %v1525_v8, 1  ;;  %v1541_v50 = vld [vmem:[%s1970_s22 + $0xc0] sm:$0xfe]  ;;  %v1548_v61 = vld [vmem:[%s1970_s22 + $0xf8] sm:$0x1] }
  0x39   : > { %1733 = vmatpush3.bf16.msra.mxu1 %v1824_v9  ;;  %1694 = vmatprep.subr.bf16.mxu0 %v1825_v10  ;;  %v1527_v9 = vld [vmem:[%s1970_s22 + $0x50] sm:$0x1]  ;;  %v984_v10 = vrot.slane %v1521_v4, 1  ;;  %v1550_v0 = vld [vmem:[%s1970_s22 + $0x108] sm:$0xfe]  ;;  %v1014_v4 = vrot.slane %v1541_v50, 1 }
  0x3a   : > { %1734 = vmatprep.subr.bf16.mxu1 %v1826_v11  ;;  %684 = vmatprep.mubr.bf16.mxu1 %v168_v28  ;;  %v985_v11 = vrot.slane %v1523_v5, 1  ;;  %v995_v54 = vsel %vm265_vm0, %v993_v2, %v994_v3  ;;  %v1529_v28 = vld [vmem:[%s1970_s22 + $0x60] sm:$0xfe]  ;;  %v1015_v5 = vrot.slane %v1543_v26, 1  ;;  %v1024_v8 = vrot.slane %v1548_v61, 1 }
  0x3b   : > { %523 = vmatprep.mubr.bf16.mxu0 %v337_v39  ;;  %v1049_v17 = vpack.c.bf16 %v995_v54, %v989_v7  ;;  %v996_v34 = vrot.slane %v1529_v28, 1  ;;  %v712_v39 = vpack.c.bf16 %v2095_v62, %v2046_v24  ;;  %v1004_v62 = vsel %vm265_vm0, %v1002_v40, %v1003_v42 }
  0x3c   : > { %1695 = vmatpush3.bf16.msra.mxu0 %v1827_v14  ;;  %v991_v14 = vrot.slane %v1527_v9, 1  ;;  %v986_v13 = vsel %vm265_vm0, %v984_v10, %v985_v11  ;;  %v1023_v7 = vrot.slane %v1546_v59, 1  ;;  %v1029_v9 = vrot.slane %v1550_v0, 1 }
  0x3d   : > { %1735 = vmatpush3.bf16.msra.mxu1 %v1828_v15  ;;  %1696 = vmatprep.subr.bf16.mxu0 %v1829_v45  ;;  %v1530_v15 = vld [vmem:[%s1970_s22 + $0x68] sm:$0xfe]  ;;  %v998_v24 = vsel %vm265_vm0, %v996_v34, %v997_v35  ;;  %v714_v11 = vpack.c.bf16 %v2147_v37, %v2098_v63  ;;  %v1471_v37 = vld [vmem:[%s1970_s22 + $0x100] sm:$0xff] }
  0x3e   : > { %1736 = vmatprep.subr.bf16.mxu1 %v1830_v47  ;;  %v999_v19 = vrot.slane %v1530_v15, 1  ;;  %v992_v21 = vsel %vm265_vm0, %v990_v23, %v991_v14  ;;  %v1542_v47 = vld [vmem:[%s1970_s22 + $0xc8] sm:$0xfe]  ;;  %v1050_v60 = vpack.c.bf16 %v1004_v62, %v998_v24  ;;  %v1016_v23 = vsel %vm265_vm0, %v1014_v4, %v1015_v5  ;;  %v1545_v15 = vld [vmem:[%s1970_s22 + $0xe0] sm:$0xfe] }
  0x3f   : > { %524 = vmatmul.mubr.bf16.gmra.mrb[12].mxu0 %v336_v48  ;;  %v1048_v30 = vpack.c.bf16 %v992_v21, %v986_v13  ;;  %v1544_v48 = vld [vmem:[%s1970_s22 + $0xd8] sm:$0x1]  ;;  %v1025_v16 = vsel %vm265_vm0, %v1023_v7, %v1024_v8  ;;  %v1547_v13 = vld [vmem:[%s1970_s22 + $0xf0] sm:$0x1] }
  0x40   : > { %685 = vmatmul.mubr.bf16.gmra.mrb[12].mxu1 %v167_v43  ;;  %1697 = vmatpush3.bf16.msra.mxu0 %v1831_v51  ;;  %v1001_v31 = vsel %vm265_vm0, %v999_v19, %v1000_v20  ;;  %v1538_v43 = vld [vmem:[%s1970_s22 + $0xa8] sm:$0xfe]  ;;  %v1020_v20 = vrot.slane %v1545_v15, 1  ;;  %v1021_v21 = vrot.slane %v1547_v13, 1 }
  0x41   : > { %1737 = vmatpush3.bf16.msra.mxu1 %v1832_v53  ;;  %1698 = vmatprep.subr.bf16.mxu0 %v1833_v55  ;;  %v1051_v45 = vpack.c.bf16 %v1007_v36, %v1001_v31  ;;  %v1011_v51 = vrot.slane %v1538_v43, 1  ;;  %v1017_v53 = vrot.slane %v1542_v47, 1  ;;  %v1018_v55 = vrot.slane %v1544_v48, 1 }
  0x42   : > { %879 = vmatprep.mubr.bf16.mxu0 %v711_v52  ;;  %1738 = vmatprep.subr.bf16.mxu1 %v1834_v56  ;;  %v1012_v52 = vrot.slane %v1540_v44, 1  ;;  %v1537_v56 = vld [vmem:[%s1970_s22 + $0xa0] sm:$0xfe]  ;;  %v1022_v28 = vsel %vm265_vm0, %v1020_v20, %v1021_v21 }
  0x43   : > { %1217 = vmatprep.mubr.bf16.mxu1 %v1049_v17  ;;  %v1019_v57 = vsel %vm265_vm0, %v1017_v53, %v1018_v55  ;;  %v1008_v58 = vrot.slane %v1537_v56, 1 }
  0x44   : > { %1699 = vmatpush3.bf16.msra.mxu0 %v1835_v41  ;;  %v1013_v41 = vsel %vm265_vm0, %v1011_v51, %v1012_v52 }
  0x45   : > { %1739 = vmatpush3.bf16.msra.mxu1 %v1836_v12  ;;  %v1539_v12 = vld [vmem:[%s1970_s22 + $0xb0] sm:$0x1]  ;;  %v1053_v2 = vpack.c.bf16 %v1019_v57, %v1013_v41 }
  0x46   : > { %v1009_v3 = vrot.slane %v1539_v12, 1 }
  0x47   : > { %880 = vmatmul.mubr.bf16.vlgmr.msra.gmra.mrb[16].mxu0 %v710_v1  ;;  %v1552_v1 = vld [vmem:[%s1970_s22 + $0x118] sm:$0x1] }
  0x48   : > { %887 = vmatprep.mubr.bf16.mxu0 %v713_v6  ;;  %1218 = vmatmul.mubr.bf16.vlgmr.msra.gmra.mrb[16].mxu1 %v1048_v30  ;;  %v1472_v6 = vld [vmem:[%s1970_s22 + $0x108] sm:$0xff]  ;;  %v1030_v10 = vrot.slane %v1552_v1, 1  ;;  %v1010_v54 = vsel %vm265_vm0, %v1008_v58, %v1009_v3  ;;  %v1054_v30 = vpack.c.bf16 %v1028_v29, %v1022_v28  ;;  %s1603_s22 = sshll.u32 %s2297_s10, 6 }
  0x49   : > { %1225 = vmatprep.mubr.bf16.mxu1 %v1051_v45  ;;  %v717_v14 = vpack.c.bf16 %v1472_v6, %v2136_v27  ;;  %v1052_v19 = vpack.c.bf16 %v1016_v23, %v1010_v54  ;;  %v716_v27 = vpack.c.bf16 %v1471_v37, %v2150_v38  ;;  %s143_s17 = scalar_lea.vmem %s2295_s2, %s1603_s22 }
  0x4a   : > { %v1031_v17 = vsel %vm265_vm0, %v1029_v9, %v1030_v10 }
  0x4b   : > { %v1055_v63 = vpack.c.bf16 %v1031_v17, %v1025_v16 }
  0x4f   : > { %888 = vmatmul.mubr.bf16.gmra.mrb[20].mxu0 %v712_v39 }
  0x50   : > { %895 = vmatprep.mubr.bf16.mxu0 %v715_v46  ;;  %1226 = vmatmul.mubr.bf16.gmra.mrb[20].mxu1 %v1050_v60 }
  0x51   : > { %1233 = vmatprep.mubr.bf16.mxu1 %v1053_v2 }
  0x57   : > { %896 = vmatmul.mubr.bf16.gmra.mrb[24].mxu0 %v714_v11 }
  0x58   : > { %903 = vmatprep.mubr.bf16.mxu0 %v717_v14  ;;  %1234 = vmatmul.mubr.bf16.gmra.mrb[24].mxu1 %v1052_v19 }
  0x59   : > { %1241 = vmatprep.mubr.bf16.mxu1 %v1055_v63 }
  0x5f   : > { %904 = vmatmul.mubr.bf16.gmra.mrb[28].mxu0 %v716_v27 }
  0x60   : > { %1242 = vmatmul.mubr.bf16.gmra.mrb[28].mxu1 %v1054_v30 }
  0xfa   : > { %v1620_v33 = vpop.f32.mrb[0].mxu0 }
  0xfb   : > { %v1660_v31 = vpop.f32.mrb[0].mxu1  ;;  %v1621_v36 = vpop.f32.mrb[1].mxu0 }
  0xfc   : > { %v1661_v32 = vpop.f32.mrb[1].mxu1  ;;  %v1622_v40 = vadd.f32 %v1621_v36, %v1620_v33  ;;  %v1623_v42 = vpop.f32.mrb[2].mxu0 }
  0xfd   : > { %v1662_v34 = vadd.f32 %v1661_v32, %v1660_v31  ;;  %v1663_v35 = vpop.f32.mrb[2].mxu1  ;;  %v1624_v44 = vpop.f32.mrb[3].mxu0 }
  0xfe   : > { %v1664_v39 = vpop.f32.mrb[3].mxu1  ;;  %v1625_v45 = vadd.f32 %v1624_v44, %v1623_v42 }
  0xff   : > { %v1665_v43 = vadd.f32 %v1664_v39, %v1663_v35  ;;  %v663_v38 = vadd.f32 %v1662_v34, %v1622_v40 }
 0x101   : > { %v666_v46 = vadd.f32 %v1665_v43, %v1625_v45 }
 0x102   : > { %v1626_v24 = vpop.f32.mrb[4].mxu0 }
 0x103   : > { %v1666_v47 = vpop.f32.mrb[4].mxu1  ;;  %v1627_v53 = vpop.f32.mrb[5].mxu0 }
 0x104   : > { %v1667_v48 = vpop.f32.mrb[5].mxu1  ;;  %v1628_v56 = vadd.f32 %v1627_v53, %v1626_v24  ;;  %v1629_v41 = vpop.f32.mrb[6].mxu0 }
 0x105   : > { %v1668_v51 = vadd.f32 %v1667_v48, %v1666_v47  ;;  %v1669_v52 = vpop.f32.mrb[6].mxu1  ;;  %v1630_v12 = vpop.f32.mrb[7].mxu0 }
 0x106   : > { %v1670_v62 = vpop.f32.mrb[7].mxu1  ;;  %v1631_v26 = vadd.f32 %v1630_v12, %v1629_v41 }
 0x107   : > { %v1671_v55 = vadd.f32 %v1670_v62, %v1669_v52  ;;  %v671_v50 = vadd.f32 %v1668_v51, %v1628_v56 }
 0x109   : > { %v674_v57 = vadd.f32 %v1671_v55, %v1631_v26 }
 0x10a   : > { %v1632_v0 = vpop.f32.mrb[8].mxu0 }
 0x10b   : > { %v1672_v58 = vpop.f32.mrb[8].mxu1  ;;  %v1633_v2 = vpop.f32.mrb[9].mxu0 }
 0x10c   : > { %v1673_v59 = vpop.f32.mrb[9].mxu1  ;;  %v1634_v4 = vadd.f32 %v1633_v2, %v1632_v0  ;;  %v1635_v5 = vpop.f32.mrb[10].mxu0 }
 0x10d   : > { %v1674_v60 = vadd.f32 %v1673_v59, %v1672_v58  ;;  %v1675_v61 = vpop.f32.mrb[10].mxu1  ;;  %v1636_v6 = vpop.f32.mrb[11].mxu0 }
 0x10e   : > { %v1676_v1 = vpop.f32.mrb[11].mxu1  ;;  %v1637_v8 = vadd.f32 %v1636_v6, %v1635_v5 }
 0x10f   : > { %v1677_v3 = vadd.f32 %v1676_v1, %v1675_v61  ;;  %v2244_v7 = vadd.f32 %v1674_v60, %v1634_v4 }
 0x111   : > { %v2246_v9 = vadd.f32 %v1677_v3, %v1637_v8 }
 0x112   : > { %v1638_v14 = vpop.f32.mrb[12].mxu0 }
 0x113   : > { %v1678_v10 = vpop.f32.mrb[12].mxu1  ;;  %v1639_v16 = vpop.f32.mrb[13].mxu0 }
 0x114   : > { %v1679_v11 = vpop.f32.mrb[13].mxu1  ;;  %v1640_v13 = vadd.f32 %v1639_v16, %v1638_v14  ;;  %v1641_v49 = vpop.f32.mrb[14].mxu0 }
 0x115   : > { %v1680_v54 = vadd.f32 %v1679_v11, %v1678_v10  ;;  %v1681_v23 = vpop.f32.mrb[14].mxu1  ;;  %v1642_v18 = vpop.f32.mrb[15].mxu0 }
 0x116   : > { %v1682_v15 = vpop.f32.mrb[15].mxu1  ;;  %v1643_v20 = vadd.f32 %v1642_v18, %v1641_v49 }
 0x117   : > { %v1683_v17 = vadd.f32 %v1682_v15, %v1681_v23  ;;  %v2248_v19 = vadd.f32 %v1680_v54, %v1640_v13 }
 0x119   : > { %v2250_v63 = vadd.f32 %v1683_v17, %v1643_v20 }
 0x11a   : > { %v1700_v37 = vpop.f32.mrb[16].mxu0 }
 0x11b   : > { %v1701_v21 = vpop.f32.mrb[17].mxu0  ;;  %v1740_v28 = vpop.f32.mrb[16].mxu1 }
 0x11c   : > { %v1702_v22 = vadd.f32 %v1701_v21, %v1700_v37  ;;  %v1703_v25 = vpop.f32.mrb[18].mxu0  ;;  %v1741_v31 = vpop.f32.mrb[17].mxu1 }
 0x11d   : > { %v1704_v27 = vpop.f32.mrb[19].mxu0  ;;  %v1742_v32 = vadd.f32 %v1741_v31, %v1740_v28  ;;  %v1743_v33 = vpop.f32.mrb[18].mxu1 }
 0x11e   : > { %v912_v29 = vadd.f32 %v1702_v22, %v663_v38  ;;  %v1705_v30 = vadd.f32 %v1704_v27, %v1703_v25  ;;  %v1744_v35 = vpop.f32.mrb[19].mxu1 }
 0x11f   : > { %v1745_v39 = vadd.f32 %v1744_v35, %v1743_v33 }
 0x120   : > { %v913_v34 = vadd.f32 %v1705_v30, %v666_v46  ;;  %v2252_v36 = vadd.f32 %v1742_v32, %v912_v29 }
 0x122   : > { %v1706_v40 = vpop.f32.mrb[20].mxu0  ;;  %v2254_v43 = vadd.f32 %v1745_v39, %v913_v34  ;;  %v1272_v47 = vmul.f32 %v2252_v36, %v2252_v36 }
 0x123   : > { %v1707_v42 = vpop.f32.mrb[21].mxu0  ;;  %v1746_v51 = vpop.f32.mrb[20].mxu1 }
 0x124   : > { %v1708_v44 = vadd.f32 %v1707_v42, %v1706_v40  ;;  %v1709_v45 = vpop.f32.mrb[22].mxu0  ;;  %v1258_v38 = vadd.f32 %v2254_v43, %v2252_v36  ;;  %v1273_v46 = vmul.f32 %v2254_v43, %v2254_v43  ;;  %v1747_v62 = vpop.f32.mrb[21].mxu1 }
 0x125   : > { %v1710_v48 = vpop.f32.mrb[23].mxu0  ;;  %v1748_v55 = vadd.f32 %v1747_v62, %v1746_v51  ;;  %v1749_v56 = vpop.f32.mrb[22].mxu1 }
 0x126   : > { %v914_v52 = vadd.f32 %v1708_v44, %v671_v50  ;;  %v1711_v24 = vadd.f32 %v1710_v48, %v1709_v45  ;;  %v1280_v53 = vadd.f32 %v1273_v46, %v1272_v47  ;;  %v1750_v12 = vpop.f32.mrb[23].mxu1 }
 0x127   : > { %v1751_v58 = vadd.f32 %v1750_v12, %v1749_v56 }
 0x128   : > { %v915_v41 = vadd.f32 %v1711_v24, %v674_v57  ;;  %v2262_v26 = vadd.f32 %v1748_v55, %v914_v52 }
 0x12a   : > { %v1712_v59 = vpop.f32.mrb[24].mxu0  ;;  %v1259_v61 = vadd.f32 %v1258_v38, %v2262_v26  ;;  %v1274_v0 = vmul.f32 %v2262_v26, %v2262_v26  ;;  %v2267_v1 = vadd.f32 %v1751_v58, %v915_v41 }
 0x12b   : > { %v1713_v60 = vpop.f32.mrb[25].mxu0  ;;  %v1752_v6 = vpop.f32.mrb[24].mxu1 }
 0x12c   : > { %v1714_v50 = vadd.f32 %v1713_v60, %v1712_v59  ;;  %v1715_v2 = vpop.f32.mrb[26].mxu0  ;;  %v1281_v4 = vadd.f32 %v1280_v53, %v1274_v0  ;;  %v1260_v5 = vadd.f32 %v1259_v61, %v2267_v1  ;;  %v1275_v57 = vmul.f32 %v2267_v1, %v2267_v1  ;;  %v1753_v10 = vpop.f32.mrb[25].mxu1 }
 0x12d   : > { %v1716_v3 = vpop.f32.mrb[27].mxu0  ;;  %v1754_v23 = vadd.f32 %v1753_v10, %v1752_v6  ;;  %v1755_v14 = vpop.f32.mrb[26].mxu1 }
 0x12e   : > { %v916_v8 = vadd.f32 %v1714_v50, %v2244_v7  ;;  %v1717_v11 = vadd.f32 %v1716_v3, %v1715_v2  ;;  %v1282_v54 = vadd.f32 %v1281_v4, %v1275_v57  ;;  %v1756_v16 = vpop.f32.mrb[27].mxu1 }
 0x12f   : > { %v1757_v13 = vadd.f32 %v1756_v16, %v1755_v14 }
 0x130   : > { %v917_v15 = vadd.f32 %v1717_v11, %v2246_v9  ;;  %v2274_v17 = vadd.f32 %v1754_v23, %v916_v8 }
 0x132   : > { %v1718_v49 = vpop.f32.mrb[28].mxu0  ;;  %v1261_v20 = vadd.f32 %v1260_v5, %v2274_v17  ;;  %v1276_v37 = vmul.f32 %v2274_v17, %v2274_v17  ;;  %v1255_v21 = vadd.f32 %v1757_v13, %v917_v15 }
 0x133   : > { %v1719_v18 = vpop.f32.mrb[29].mxu0  ;;  %v1758_v30 = vpop.f32.mrb[28].mxu1 }
 0x134   : > { %v1720_v7 = vadd.f32 %v1719_v18, %v1718_v49  ;;  %v1721_v22 = vpop.f32.mrb[30].mxu0  ;;  %v1283_v27 = vadd.f32 %v1282_v54, %v1276_v37  ;;  %v1262_v28 = vadd.f32 %v1261_v20, %v1255_v21  ;;  %v1277_v29 = vmul.f32 %v1255_v21, %v1255_v21  ;;  %v1759_v31 = vpop.f32.mrb[29].mxu1 }
 0x135   : > { %v1722_v25 = vpop.f32.mrb[31].mxu0  ;;  %v1760_v34 = vadd.f32 %v1759_v31, %v1758_v30  ;;  %v1761_v35 = vpop.f32.mrb[30].mxu1 }
 0x136   : > { %v918_v9 = vadd.f32 %v1720_v7, %v2248_v19  ;;  %v1723_v32 = vadd.f32 %v1722_v25, %v1721_v22  ;;  %v1284_v33 = vadd.f32 %v1283_v27, %v1277_v29  ;;  %v1762_v40 = vpop.f32.mrb[31].mxu1 }
 0x137   : > { %v1763_v44 = vadd.f32 %v1762_v40, %v1761_v35 }
 0x138   : > { %v919_v39 = vadd.f32 %v1723_v32, %v2250_v63  ;;  %v1256_v42 = vadd.f32 %v1760_v34, %v918_v9 }
 0x13a   : > { %v1263_v45 = vadd.f32 %v1262_v28, %v1256_v42  ;;  %v1278_v47 = vmul.f32 %v1256_v42, %v1256_v42  ;;  %v1257_v48 = vadd.f32 %v1763_v44, %v919_v39 }
 0x13c   : > { %v1285_v38 = vadd.f32 %v1284_v33, %v1278_v47  ;;  %v1264_v46 = vadd.f32 %v1263_v45, %v1257_v48  ;;  %v1279_v51 = vmul.f32 %v1257_v48, %v1257_v48 }
 0x13e   : > { %v1265_v52 = vrot.slane %v1264_v46, 4  ;;  %v1286_v24 = vadd.f32 %v1285_v38, %v1279_v51 }
 0x140   : > { %v1266_v62 = vadd.f32 %v1265_v52, %v1264_v46  ;;  %v1287_v19 = vrot.slane %v1286_v24, 4 }
 0x142   : > { %v1267_v53 = vrot.slane %v1266_v62, 2  ;;  %v1288_v55 = vadd.f32 %v1287_v19, %v1286_v24 }
 0x144   : > { %v1268_v56 = vadd.f32 %v1267_v53, %v1266_v62  ;;  %v1289_v41 = vrot.slane %v1288_v55, 2 }
 0x146   : > { %v1269_v12 = vrot.slane %v1268_v56, 1  ;;  %v1290_v58 = vadd.f32 %v1289_v41, %v1288_v55 }
 0x148   : > { %v1270_v63 = vadd.f32 %v1269_v12, %v1268_v56  ;;  %v1291_v59 = vrot.slane %v1290_v58, 1 }
 0x14a   : > { %v1271_v60 = vmul.f32 0.015625, %v1270_v63  ;;  %v1292_v61 = vadd.f32 %v1291_v59, %v1290_v58 }
 0x14c   : > { %v1293_v0 = vmul.f32 0.015625, %v1292_v61  ;;  %v1294_v50 = vmul.f32 %v1271_v60, %v1271_v60  ;;  %v1296_v2 = vsub.f32 %v2252_v36, %v1271_v60  ;;  %v1297_v3 = vsub.f32 %v2254_v43, %v1271_v60 }
 0x14d   : > { %v1298_v4 = vsub.f32 %v2262_v26, %v1271_v60  ;;  %v1299_v5 = vsub.f32 %v2267_v1, %v1271_v60  ;;  %v1300_v57 = vsub.f32 %v2274_v17, %v1271_v60  ;;  %v1301_v6 = vsub.f32 %v1255_v21, %v1271_v60 }
 0x14e   : > { %v1295_v8 = vsub.f32 %v1293_v0, %v1294_v50  ;;  %v1302_v10 = vsub.f32 %v1256_v42, %v1271_v60  ;;  %v1303_v11 = vsub.f32 %v1257_v48, %v1271_v60 }
 0x150   : > { %v1304_v54 = vadd.f32 1e-05, %v1295_v8 }
 0x152   : > { %1837 = vrsqrt.f32 %v1304_v54 }
 0x15c   : > { %v1838_v23 = vpop.eup %1837 }
 0x15d   : > { %v1306_v14 = vmul.f32 %v1838_v23, %v1296_v2  ;;  %v1307_v15 = vmul.f32 %v1838_v23, %v1297_v3  ;;  %v1308_v16 = vmul.f32 %v1838_v23, %v1298_v4  ;;  %v1309_v36 = vmul.f32 %v1838_v23, %v1299_v5 }
 0x15e   : > { %v1310_v43 = vmul.f32 %v1838_v23, %v1300_v57  ;;  %v1311_v26 = vmul.f32 %v1838_v23, %v1301_v6  ;;  %v1312_v1 = vmul.f32 %v1838_v23, %v1302_v10  ;;  %v1313_v17 = vmul.f32 %v1838_v23, %v1303_v11 }
 0x15f   : > { %v1314_v13 = vmax.f32 %v1306_v14, 0.0  ;;  %v1315_v49 = vmax.f32 %v1307_v15, 0.0  ;;  %v1316_v18 = vmax.f32 %v1308_v16, 0.0  ;;  %v1317_v20 = vmax.f32 %v1309_v36, 0.0 }
 0x160   : > { %v1318_v37 = vmax.f32 %v1310_v43, 0.0  ;;  %v1319_v21 = vmax.f32 %v1311_v26, 0.0  ;;  %v1320_v7 = vmax.f32 %v1312_v1, 0.0  ;;  %v1321_v22 = vmax.f32 %v1313_v17, 0.0 }
 0x161   : > { %1322 = vst [vmem:[%s143_s17] sm:$0xff] %v1314_v13  ;;  %1323 = vst [vmem:[%s143_s17 + $0x8] sm:$0xff] %v1315_v49 }
 0x162   : > { %1324 = vst [vmem:[%s143_s17 + $0x10] sm:$0xff] %v1316_v18  ;;  %1325 = vst [vmem:[%s143_s17 + $0x18] sm:$0xff] %v1317_v20 }
 0x163   : > { %1326 = vst [vmem:[%s143_s17 + $0x20] sm:$0xff] %v1318_v37  ;;  %1327 = vst [vmem:[%s143_s17 + $0x28] sm:$0xff] %v1319_v21 }
 0x164   : > { %1328 = vst [vmem:[%s143_s17 + $0x30] sm:$0xff] %v1320_v7  ;;  %1329 = vst [vmem:[%s143_s17 + $0x38] sm:$0xff] %v1321_v22 }
 0x165 PF: > { %s12_s9 = sadd.s32 1, %s1845_s9  }
 0x166   : > { %p9_p4 = scmp.ge.s32.totalorder %s12_s9, 4  }
 0x168   :  { %11 = sbr.rel (!%p9_p4) target bundleno = 1 (0x1), region = 62 }

// kernel: dc_discriminator_forward.7
= control target key start
LH: loop header
LB: loop body
LE: loop exit
PB: predicated region body
PF: predicated region fallthrough
CT: control target
= control target key end

     0   :  { %s4870_s12 = smov 0   ;;  %s6673_s0 = inlined_call_operand.vmem [shape: f32[2,5,5,512], index: 0, kind: input, shape index: {}]   ;;  %s6674_s1 = inlined_call_operand.vmem [shape: bf16[4,512,256], index: 1, kind: input, shape index: {}]   ;;  %s6675_s2 = inlined_call_operand.vmem [shape: f32[16,256], index: 2, kind: input, shape index: {}]   ;;  %s6676_s3 = inlined_call_operand.vmem [shape: f32[2,1,1], index: 3, kind: output, shape index: {}]  }
   0x1 LB: > { %s3589_s13 = sadd.s32 4294967295, %s4848_s12   ;;  %p3593_p0 = scmp.ge.s32.totalorder %s4848_s12, 1  ;;  %s4848_s12 = sphi %s4870_s12, %s13_s12  }
   0x2   : > { %p137_p1 = scmp.lt.s32.totalorder %s4848_s12, 3 }
   0x4   : > { %p138_p2 = pnand %p3593_p0, %p137_p1 }
   0x5   : > { %v4198_v0 = vld [vmem:[%s6674_s1 + $0x204] ss:$8 sps:$4 sm:$0xff] (!%p138_p2)   ;;  %v4200_v1 = vld [vmem:[%s6674_s1 + $0x200] ss:$8 sps:$4 sm:$0xff] (!%p138_p2)   ;;  %v4201_v2 = vld [vmem:[%s6674_s1 + $0x214] ss:$8 sps:$4 sm:$0xff] (!%p138_p2)  }
   0x6   : > { %141 = sbr.rel (%p138_p2) target bundleno = 1452 (0x5ac), region = 32  ;;  %664 = vmatprep.subr.bf16.mxu0 (!%p138_p2), %v4198_v0  ;;  %2135 = vmatprep.subr.bf16.mxu1 (!%p138_p2), %v4198_v0  ;;  %v4203_v3 = vld [vmem:[%s6674_s1 + $0x210] ss:$8 sps:$4 sm:$0xff] (!%p138_p2)   ;;  %v4204_v4 = vld [vmem:[%s6674_s1 + $0x224] ss:$8 sps:$4 sm:$0xff] (!%p138_p2)   ;;  %p159_p3 = scmp.lt.s32.totalorder (!%p138_p2), %s3589_s13, 1 }
   0x7   : > { %665 = vmatpush1.bf16.msra.mxu0 (!%p138_p2), %v4200_v1  ;;  %2136 = vmatpush1.bf16.msra.mxu1 (!%p138_p2), %v4200_v1  ;;  %v4206_v5 = vld [vmem:[%s6674_s1 + $0x220] ss:$8 sps:$4 sm:$0xff] (!%p138_p2)   ;;  %v4207_v6 = vld [vmem:[%s6674_s1 + $0x234] ss:$8 sps:$4 sm:$0xff] (!%p138_p2)   ;;  %v4209_v7 = vld [vmem:[%s6674_s1 + $0x230] ss:$8 sps:$4 sm:$0xff] (!%p138_p2)  }
   0x8   : > { %666 = vmatprep.subr.bf16.mxu0 (!%p138_p2), %v4201_v2  ;;  %2137 = vmatprep.subr.bf16.mxu1 (!%p138_p2), %v4201_v2  ;;  %v4210_v8 = vld [vmem:[%s6674_s1 + $0x244] ss:$8 sps:$4 sm:$0xff] (!%p138_p2)   ;;  %v4212_v9 = vld [vmem:[%s6674_s1 + $0x240] ss:$8 sps:$4 sm:$0xff] (!%p138_p2)   ;;  %v4213_v10 = vld [vmem:[%s6674_s1 + $0x254] ss:$8 sps:$4 sm:$0xff] (!%p138_p2)  }
   0x9   : > { %v4215_v11 = vld [vmem:[%s6674_s1 + $0x250] ss:$8 sps:$4 sm:$0xff] (!%p138_p2)   ;;  %v4216_v12 = vld [vmem:[%s6674_s1 + $0x264] ss:$8 sps:$4 sm:$0xff] (!%p138_p2)   ;;  %v4218_v16 = vld [vmem:[%s6674_s1 + $0x260] ss:$8 sps:$4 sm:$0xff] (!%p138_p2)  }
   0xa   : > { %v4219_v18 = vld [vmem:[%s6674_s1 + $0x274] ss:$8 sps:$4 sm:$0xff] (!%p138_p2)   ;;  %v4221_v24 = vld [vmem:[%s6674_s1 + $0x270] ss:$8 sps:$4 sm:$0xff] (!%p138_p2)   ;;  %v4222_v26 = vld [vmem:[%s6674_s1 + $0x284] ss:$8 sps:$4 sm:$0xff] (!%p138_p2)  }
   0xb   : > { %667 = vmatpush1.bf16.msra.mxu0 (!%p138_p2), %v4203_v3  ;;  %2138 = vmatpush1.bf16.msra.mxu1 (!%p138_p2), %v4203_v3  ;;  %v4224_v29 = vld [vmem:[%s6674_s1 + $0x280] ss:$8 sps:$4 sm:$0xff] (!%p138_p2)   ;;  %v4225_v30 = vld [vmem:[%s6674_s1 + $0x294] ss:$8 sps:$4 sm:$0xff] (!%p138_p2)   ;;  %v4227_v31 = vld [vmem:[%s6674_s1 + $0x290] ss:$8 sps:$4 sm:$0xff] (!%p138_p2)  }
   0xc   : > { %668 = vmatprep.subr.bf16.mxu0 (!%p138_p2), %v4204_v4  ;;  %2139 = vmatprep.subr.bf16.mxu1 (!%p138_p2), %v4204_v4  ;;  %v4228_v32 = vld [vmem:[%s6674_s1 + $0x2a4] ss:$8 sps:$4 sm:$0xff] (!%p138_p2)   ;;  %v4230_v33 = vld [vmem:[%s6674_s1 + $0x2a0] ss:$8 sps:$4 sm:$0xff] (!%p138_p2)   ;;  %v4231_v34 = vld [vmem:[%s6674_s1 + $0x2b4] ss:$8 sps:$4 sm:$0xff] (!%p138_p2)  }
   0xd   : > { %s6678_s13 = smov (!%p159_p3, %s3589_s13), 1  ;;  %v4233_v35 = vld [vmem:[%s6674_s1 + $0x2b0] ss:$8 sps:$4 sm:$0xff]   ;;  %v4234_v36 = vld [vmem:[%s6674_s1 + $0x2c4] ss:$8 sps:$4 sm:$0xff]   ;;  %vm3278_vm0 = vcmask 1043456  }
   0xe   : > { %s4189_s5 = smul.u32 160, %s6678_s13  ;;  %v4236_v37 = vld [vmem:[%s6674_s1 + $0x2c0] ss:$8 sps:$4 sm:$0xff]   ;;  %v4237_v40 = vld [vmem:[%s6674_s1 + $0x2d4] ss:$8 sps:$4 sm:$0xff]   ;;  %s166_s25 = scalar_lea.vmem %s6676_s3, %s6678_s13  ;;  %vm3540_vm1 = vcmask 0  }
   0xf   : > { %669 = vmatpush1.bf16.msra.mxu0 %v4206_v5  ;;  %2140 = vmatpush1.bf16.msra.mxu1 %v4206_v5  ;;  %v4239_v45 = vld [vmem:[%s6674_s1 + $0x2d0] ss:$8 sps:$4 sm:$0xff]   ;;  %v4240_v46 = vld [vmem:[%s6674_s1 + $0x2e4] ss:$8 sps:$4 sm:$0xff]   ;;  %v4242_v51 = vld [vmem:[%s6674_s1 + $0x2e0] ss:$8 sps:$4 sm:$0xff]  }
  0x10   : > { %670 = vmatprep.subr.bf16.mxu0 %v4207_v6  ;;  %2141 = vmatprep.subr.bf16.mxu1 %v4207_v6  ;;  %s4917_s14 = scalar_lea.vmem %s6673_s0, %s4189_s5  ;;  %v4243_v52 = vld [vmem:[%s6674_s1 + $0x2f4] ss:$8 sps:$4 sm:$0xff]   ;;  %v4245_v59 = vld [vmem:[%s6674_s1 + $0x2f0] ss:$8 sps:$4 sm:$0xff]   ;;  %v4246_v60 = vld [vmem:[%s6674_s1 + $0x304] ss:$8 sps:$4 sm:$0xff]  }
  0x11   : > { %v240_v13 = vld [vmem:[%s4917_s14 + $0x8] sm:$0x1e]  ;;  %v239_v38 = vld [vmem:[%s4917_s14] sm:$0x1e]  ;;  %v242_v43 = vld [vmem:[%s4917_s14 + $0x18] sm:$0x1e] }
  0x12   : > { %v244_v14 = vpack.c.bf16 %v240_v13, %v240_v13  ;;  %v3920_v15 = vld [vmem:[%s4917_s14 + $0x28] sm:$0x1e]  ;;  %v3919_v39 = vld [vmem:[%s4917_s14 + $0x20] sm:$0x1e]  ;;  %v243_v41 = vpack.c.bf16 %v239_v38, %v239_v38  ;;  %v3922_v44 = vld [vmem:[%s4917_s14 + $0x38] sm:$0x1e]  ;;  %v246_v47 = vpack.c.bf16 %v242_v43, %v242_v43 }
  0x13   : > { %671 = vmatpush1.bf16.msra.mxu0 %v4209_v7  ;;  %2142 = vmatpush1.bf16.msra.mxu1 %v4209_v7  ;;  %v1631_v17 = vpack.c.bf16 %v3920_v15, %v3920_v15  ;;  %v1630_v42 = vpack.c.bf16 %v3919_v39, %v3919_v39  ;;  %v1633_v48 = vpack.c.bf16 %v3922_v44, %v3922_v44  ;;  %v4248_v3 = vld [vmem:[%s6674_s1 + $0x300] ss:$8 sps:$4 sm:$0xff]   ;;  %v4249_v4 = vld [vmem:[%s6674_s1 + $0x314] ss:$8 sps:$4 sm:$0xff]   ;;  %v4251_v7 = vld [vmem:[%s6674_s1 + $0x310] ss:$8 sps:$4 sm:$0xff]  }
  0x14   : > { %672 = vmatprep.subr.bf16.mxu0 %v4210_v8  ;;  %2143 = vmatprep.subr.bf16.mxu1 %v4210_v8  ;;  %v320_v19 = vshrl.u32 %v244_v14, 16  ;;  %v322_v20 = vshll.u32 %v244_v14, 16  ;;  %v315_v49 = vshll.u32 %v243_v41, 16  ;;  %v336_v53 = vshll.u32 %v246_v47, 16  ;;  %v4252_v8 = vld [vmem:[%s6674_s1 + $0x324] ss:$8 sps:$4 sm:$0xff]  }
  0x15   : > { %v1707_v21 = vshrl.u32 %v1631_v17, 16  ;;  %v1709_v22 = vshll.u32 %v1631_v17, 16  ;;  %v1702_v50 = vshll.u32 %v1630_v42, 16  ;;  %v1723_v54 = vshll.u32 %v1633_v48, 16  ;;  %v4260_v13 = vld [vmem:[%s6674_s1 + $0x340] ss:$8 sps:$4 sm:$0xff]  }
  0x16   : > { %v324_v23 = vrot.slane %v322_v20, 1  ;;  %v313_v55 = vshrl.u32 %v243_v41, 16  ;;  %v317_v56 = vrot.slane %v315_v49, 1  ;;  %v1700_v57 = vshrl.u32 %v1630_v42, 16  ;;  %v4261_v14 = vld [vmem:[%s6674_s1 + $0x354] ss:$8 sps:$4 sm:$0xff]  }
  0x17   : > { %673 = vmatpush1.bf16.msra.mxu0 %v4212_v9  ;;  %2144 = vmatpush1.bf16.msra.mxu1 %v4212_v9  ;;  %v1711_v25 = vrot.slane %v1709_v22, 1  ;;  %v1704_v58 = vrot.slane %v1702_v50, 1  ;;  %v334_v61 = vshrl.u32 %v246_v47, 16  ;;  %v338_v62 = vrot.slane %v336_v53, 1  ;;  %v4254_v9 = vld [vmem:[%s6674_s1 + $0x320] ss:$8 sps:$4 sm:$0xff]  }
  0x18   : > { %674 = vmatprep.subr.bf16.mxu0 %v4213_v10  ;;  %2145 = vmatprep.subr.bf16.mxu1 %v4213_v10  ;;  %v325_v27 = vor.u32 %v324_v23, %v320_v19  ;;  %v1721_v63 = vshrl.u32 %v1633_v48, 16  ;;  %v1725_v0 = vrot.slane %v1723_v54, 1  ;;  %v318_v1 = vor.u32 %v317_v56, %v313_v55  ;;  %v4255_v10 = vld [vmem:[%s6674_s1 + $0x334] ss:$8 sps:$4 sm:$0xff]   ;;  %v4263_v15 = vld [vmem:[%s6674_s1 + $0x350] ss:$8 sps:$4 sm:$0xff]  }
  0x19   : > { %v4939_v28 = vor.u32 %v1711_v25, %v1707_v21  ;;  %v4994_v2 = vor.u32 %v1704_v58, %v1700_v57  ;;  %v339_v5 = vor.u32 %v338_v62, %v334_v61  ;;  %v4266_v17 = vld [vmem:[%s6674_s1 + $0x360] ss:$8 sps:$4 sm:$0xff]   ;;  %v4269_v19 = vld [vmem:[%s6674_s1 + $0x370] ss:$8 sps:$4 sm:$0xff]   ;;  %v4270_v20 = vld [vmem:[%s6674_s1 + $0x384] ss:$8 sps:$4 sm:$0xff]  }
  0x1a   : > { %696 = vmatprep.mubr.bf16.mxu0 %v325_v27  ;;  %v5002_v6 = vor.u32 %v1725_v0, %v1721_v63  ;;  %v4272_v21 = vld [vmem:[%s6674_s1 + $0x380] ss:$8 sps:$4 sm:$0xff]   ;;  %v4273_v22 = vld [vmem:[%s6674_s1 + $0x394] ss:$8 sps:$4 sm:$0xff]   ;;  %v4275_v23 = vld [vmem:[%s6674_s1 + $0x390] ss:$8 sps:$4 sm:$0xff]  }
  0x1b   : > { %675 = vmatpush1.bf16.msra.mxu0 %v4215_v11  ;;  %2146 = vmatpush1.bf16.msra.mxu1 %v4215_v11  ;;  %v4257_v11 = vld [vmem:[%s6674_s1 + $0x330] ss:$8 sps:$4 sm:$0xff]   ;;  %v4278_v25 = vld [vmem:[%s6674_s1 + $0x3a0] ss:$8 sps:$4 sm:$0xff]   ;;  %v4291_v41 = vld [vmem:[%s6674_s1 + $0x3f4] ss:$8 sps:$4 sm:$0xff]  }
  0x1c   : > { %676 = vmatprep.subr.bf16.mxu0 %v4216_v12  ;;  %2147 = vmatprep.subr.bf16.mxu1 %v4216_v12  ;;  %v4258_v12 = vld [vmem:[%s6674_s1 + $0x344] ss:$8 sps:$4 sm:$0xff]   ;;  %v4281_v27 = vld [vmem:[%s6674_s1 + $0x3b0] ss:$8 sps:$4 sm:$0xff]   ;;  %v168_v48 = vld [vmem:[%s4917_s14 + $0x8] sm:$0xf] }
  0x1d   : > { %2167 = vmatprep.mubr.bf16.mxu1 %v4939_v28  ;;  %v4293_v42 = vld [vmem:[%s6674_s1 + $0x3f0] ss:$8 sps:$4 sm:$0xff]   ;;  %v4294_v47 = vld [vmem:[%s6674_s1 + $0x4] ss:$8 sps:$4 sm:$0xff]   ;;  %v3788_v49 = vld [vmem:[%s4917_s14 + $0x28] sm:$0xf]  ;;  %v172_v54 = vpack.c.bf16 %v168_v48, %v168_v48 }
  0x1e   : > { %v4297_v53 = vld [vmem:[%s6674_s1 + $0x14] ss:$8 sps:$4 sm:$0xff]   ;;  %v5108_v55 = vpack.c.bf16 %v3788_v49, %v3788_v49  ;;  %v4299_v56 = vld [vmem:[%s6674_s1 + $0x10] ss:$8 sps:$4 sm:$0xff]   ;;  %v4300_v57 = vld [vmem:[%s6674_s1 + $0x24] ss:$8 sps:$4 sm:$0xff]  }
  0x1f   : > { %677 = vmatpush1.bf16.msra.mxu0 %v4218_v16  ;;  %2148 = vmatpush1.bf16.msra.mxu1 %v4218_v16  ;;  %v4264_v16 = vld [vmem:[%s6674_s1 + $0x364] ss:$8 sps:$4 sm:$0xff]   ;;  %v4302_v58 = vld [vmem:[%s6674_s1 + $0x20] ss:$8 sps:$4 sm:$0xff]   ;;  %v4309_v63 = vld [vmem:[%s6674_s1 + $0x54] ss:$8 sps:$4 sm:$0xff]  }
  0x20   : > { %678 = vmatprep.subr.bf16.mxu0 %v4219_v18  ;;  %2149 = vmatprep.subr.bf16.mxu1 %v4219_v18  ;;  %v4267_v18 = vld [vmem:[%s6674_s1 + $0x374] ss:$8 sps:$4 sm:$0xff]   ;;  %v4306_v61 = vld [vmem:[%s6674_s1 + $0x44] ss:$8 sps:$4 sm:$0xff]   ;;  %v4308_v62 = vld [vmem:[%s6674_s1 + $0x40] ss:$8 sps:$4 sm:$0xff]  }
  0x21   : > { %v4311_v0 = vld [vmem:[%s6674_s1 + $0x50] ss:$8 sps:$4 sm:$0xff]   ;;  %v4366_v48 = vld [vmem:[%s6674_s1 + $0x184] ss:$8 sps:$4 sm:$0xff]   ;;  %v4368_v49 = vld [vmem:[%s6674_s1 + $0x180] ss:$8 sps:$4 sm:$0xff]  }
  0x23   : > { %679 = vmatpush1.bf16.msra.mxu0 %v4221_v24  ;;  %2150 = vmatpush1.bf16.msra.mxu1 %v4221_v24  ;;  %v4276_v24 = vld [vmem:[%s6674_s1 + $0x3a4] ss:$8 sps:$4 sm:$0xff]  }
  0x24   : > { %680 = vmatprep.subr.bf16.mxu0 %v4222_v26  ;;  %2151 = vmatprep.subr.bf16.mxu1 %v4222_v26  ;;  %v4279_v26 = vld [vmem:[%s6674_s1 + $0x3b4] ss:$8 sps:$4 sm:$0xff]  }
  0x27   : > { %681 = vmatpush1.bf16.msra.mxu0 %v4224_v29  ;;  %2152 = vmatpush1.bf16.msra.mxu1 %v4224_v29  ;;  %v4282_v29 = vld [vmem:[%s6674_s1 + $0x3c4] ss:$8 sps:$4 sm:$0xff]  }
  0x28   : > { %682 = vmatprep.subr.bf16.mxu0 %v4225_v30  ;;  %2153 = vmatprep.subr.bf16.mxu1 %v4225_v30  ;;  %v4284_v30 = vld [vmem:[%s6674_s1 + $0x3c0] ss:$8 sps:$4 sm:$0xff]  }
  0x2b   : > { %683 = vmatpush1.bf16.msra.mxu0 %v4227_v31  ;;  %2154 = vmatpush1.bf16.msra.mxu1 %v4227_v31  ;;  %v241_v31 = vld [vmem:[%s4917_s14 + $0x10] sm:$0x1e] }
  0x2c   : > { %684 = vmatprep.subr.bf16.mxu0 %v4228_v32  ;;  %2155 = vmatprep.subr.bf16.mxu1 %v4228_v32  ;;  %v3921_v32 = vld [vmem:[%s4917_s14 + $0x30] sm:$0x1e] }
  0x2f   : > { %685 = vmatpush1.bf16.msra.mxu0 %v4230_v33  ;;  %2156 = vmatpush1.bf16.msra.mxu1 %v4230_v33  ;;  %v4285_v33 = vld [vmem:[%s6674_s1 + $0x3d4] ss:$8 sps:$4 sm:$0xff]  }
  0x30   : > { %686 = vmatprep.subr.bf16.mxu0 %v4231_v34  ;;  %2157 = vmatprep.subr.bf16.mxu1 %v4231_v34  ;;  %v245_v34 = vpack.c.bf16 %v241_v31, %v241_v31  ;;  %v4344_v31 = vld [vmem:[%s6674_s1 + $0x100] ss:$8 sps:$4 sm:$0xff]  }
  0x32   : > { %v329_v38 = vshll.u32 %v245_v34, 16  ;;  %v327_v43 = vshrl.u32 %v245_v34, 16 }
  0x33   : > { %687 = vmatpush1.bf16.msra.mxu0 %v4233_v35  ;;  %2158 = vmatpush1.bf16.msra.mxu1 %v4233_v35  ;;  %v1632_v35 = vpack.c.bf16 %v3921_v32, %v3921_v32  ;;  %v4345_v32 = vld [vmem:[%s6674_s1 + $0x114] ss:$8 sps:$4 sm:$0xff]  }
  0x34   : > { %688 = vmatprep.subr.bf16.mxu0 %v4234_v36  ;;  %2159 = vmatprep.subr.bf16.mxu1 %v4234_v36  ;;  %v4287_v36 = vld [vmem:[%s6674_s1 + $0x3d0] ss:$8 sps:$4 sm:$0xff]   ;;  %v331_v44 = vrot.slane %v329_v38, 1  ;;  %v4351_v38 = vld [vmem:[%s6674_s1 + $0x134] ss:$8 sps:$4 sm:$0xff]  }
  0x35   : > { %v1716_v39 = vshll.u32 %v1632_v35, 16 }
  0x36   : > { %v332_v50 = vor.u32 %v331_v44, %v327_v43  ;;  %v4359_v43 = vld [vmem:[%s6674_s1 + $0x150] ss:$8 sps:$4 sm:$0xff]   ;;  %v4360_v44 = vld [vmem:[%s6674_s1 + $0x164] ss:$8 sps:$4 sm:$0xff]  }
  0x37   : > { %689 = vmatpush1.bf16.msra.mxu0 %v4236_v37  ;;  %2160 = vmatpush1.bf16.msra.mxu1 %v4236_v37  ;;  %v4288_v37 = vld [vmem:[%s6674_s1 + $0x3e4] ss:$8 sps:$4 sm:$0xff]  }
  0x38   : > { %690 = vmatprep.subr.bf16.mxu0 %v4237_v40  ;;  %2161 = vmatprep.subr.bf16.mxu1 %v4237_v40  ;;  %v4290_v40 = vld [vmem:[%s6674_s1 + $0x3e0] ss:$8 sps:$4 sm:$0xff]  }
  0x3b   : > { %691 = vmatpush1.bf16.msra.mxu0 %v4239_v45  ;;  %2162 = vmatpush1.bf16.msra.mxu1 %v4239_v45  ;;  %v1714_v45 = vshrl.u32 %v1632_v35, 16  ;;  %v4347_v35 = vld [vmem:[%s6674_s1 + $0x110] ss:$8 sps:$4 sm:$0xff]  }
  0x3c   : > { %692 = vmatprep.subr.bf16.mxu0 %v4240_v46  ;;  %2163 = vmatprep.subr.bf16.mxu1 %v4240_v46  ;;  %v1718_v46 = vrot.slane %v1716_v39, 1  ;;  %v4353_v39 = vld [vmem:[%s6674_s1 + $0x130] ss:$8 sps:$4 sm:$0xff]  }
  0x3f   : > { %693 = vmatpush1.bf16.msra.mxu0 %v4242_v51  ;;  %2164 = vmatpush1.bf16.msra.mxu1 %v4242_v51  ;;  %v5100_v51 = vor.u32 %v1718_v46, %v1714_v45  ;;  %v4362_v45 = vld [vmem:[%s6674_s1 + $0x160] ss:$8 sps:$4 sm:$0xff]   ;;  %v4363_v46 = vld [vmem:[%s6674_s1 + $0x174] ss:$8 sps:$4 sm:$0xff]  }
  0x40   : > { %694 = vmatprep.subr.bf16.mxu0 %v4243_v52  ;;  %2165 = vmatprep.subr.bf16.mxu1 %v4243_v52  ;;  %v4296_v52 = vld [vmem:[%s6674_s1] ss:$8 sps:$4 sm:$0xff]  }
  0x43   : > { %695 = vmatpush1.bf16.msra.mxu0 %v4245_v59  ;;  %2166 = vmatpush1.bf16.msra.mxu1 %v4245_v59  ;;  %v4303_v59 = vld [vmem:[%s6674_s1 + $0x34] ss:$8 sps:$4 sm:$0xff]  }
  0x44   : > { %705 = vmatprep.subr.bf16.mxu0 %v4246_v60  ;;  %2176 = vmatprep.subr.bf16.mxu1 %v4246_v60  ;;  %v4305_v60 = vld [vmem:[%s6674_s1 + $0x30] ss:$8 sps:$4 sm:$0xff]  }
  0x46   : > { %697 = vmatmul.mubr.bf16.vlgmr.msra.gmra.mrb[0].mxu0 %v318_v1  ;;  %2168 = vmatmul.mubr.bf16.vlgmr.msra.gmra.mrb[0].mxu1 %v4994_v2  ;;  %v4312_v1 = vld [vmem:[%s6674_s1 + $0x64] ss:$8 sps:$4 sm:$0xff]  }
  0x47   : > { %706 = vmatpush1.bf16.msra.mxu0 %v4248_v3  ;;  %2177 = vmatpush1.bf16.msra.mxu1 %v4248_v3  ;;  %v4314_v3 = vld [vmem:[%s6674_s1 + $0x60] ss:$8 sps:$4 sm:$0xff]  }
  0x48   : > { %707 = vmatprep.subr.bf16.mxu0 %v4249_v4  ;;  %2178 = vmatprep.subr.bf16.mxu1 %v4249_v4  ;;  %v4315_v4 = vld [vmem:[%s6674_s1 + $0x74] ss:$8 sps:$4 sm:$0xff]  }
  0x49   : > { %737 = vmatprep.mubr.bf16.mxu0 %v339_v5  ;;  %2208 = vmatprep.mubr.bf16.mxu1 %v5002_v6  ;;  %v4317_v5 = vld [vmem:[%s6674_s1 + $0x70] ss:$8 sps:$4 sm:$0xff]  }
  0x4b   : > { %708 = vmatpush1.bf16.msra.mxu0 %v4251_v7  ;;  %2179 = vmatpush1.bf16.msra.mxu1 %v4251_v7  ;;  %v4318_v7 = vld [vmem:[%s6674_s1 + $0x84] ss:$8 sps:$4 sm:$0xff]  }
  0x4c   : > { %709 = vmatprep.subr.bf16.mxu0 %v4252_v8  ;;  %2180 = vmatprep.subr.bf16.mxu1 %v4252_v8  ;;  %v4320_v8 = vld [vmem:[%s6674_s1 + $0x80] ss:$8 sps:$4 sm:$0xff]  }
  0x4f   : > { %710 = vmatpush1.bf16.msra.mxu0 %v4254_v9  ;;  %2181 = vmatpush1.bf16.msra.mxu1 %v4254_v9  ;;  %v4321_v9 = vld [vmem:[%s6674_s1 + $0x94] ss:$8 sps:$4 sm:$0xff]  }
  0x50   : > { %711 = vmatprep.subr.bf16.mxu0 %v4255_v10  ;;  %2182 = vmatprep.subr.bf16.mxu1 %v4255_v10  ;;  %v4323_v10 = vld [vmem:[%s6674_s1 + $0x90] ss:$8 sps:$4 sm:$0xff]  }
  0x53   : > { %712 = vmatpush1.bf16.msra.mxu0 %v4257_v11  ;;  %2183 = vmatpush1.bf16.msra.mxu1 %v4257_v11  ;;  %v4324_v11 = vld [vmem:[%s6674_s1 + $0xa4] ss:$8 sps:$4 sm:$0xff]  }
  0x54   : > { %713 = vmatprep.subr.bf16.mxu0 %v4258_v12  ;;  %2184 = vmatprep.subr.bf16.mxu1 %v4258_v12  ;;  %v4326_v12 = vld [vmem:[%s6674_s1 + $0xa0] ss:$8 sps:$4 sm:$0xff]  }
  0x57   : > { %714 = vmatpush1.bf16.msra.mxu0 %v4260_v13  ;;  %2185 = vmatpush1.bf16.msra.mxu1 %v4260_v13  ;;  %v4327_v13 = vld [vmem:[%s6674_s1 + $0xb4] ss:$8 sps:$4 sm:$0xff]  }
  0x58   : > { %715 = vmatprep.subr.bf16.mxu0 %v4261_v14  ;;  %2186 = vmatprep.subr.bf16.mxu1 %v4261_v14  ;;  %v4329_v14 = vld [vmem:[%s6674_s1 + $0xb0] ss:$8 sps:$4 sm:$0xff]  }
  0x5b   : > { %716 = vmatpush1.bf16.msra.mxu0 %v4263_v15  ;;  %2187 = vmatpush1.bf16.msra.mxu1 %v4263_v15  ;;  %v4330_v15 = vld [vmem:[%s6674_s1 + $0xc4] ss:$8 sps:$4 sm:$0xff]  }
  0x5c   : > { %717 = vmatprep.subr.bf16.mxu0 %v4264_v16  ;;  %2188 = vmatprep.subr.bf16.mxu1 %v4264_v16  ;;  %v4332_v16 = vld [vmem:[%s6674_s1 + $0xc0] ss:$8 sps:$4 sm:$0xff]  }
  0x5f   : > { %718 = vmatpush1.bf16.msra.mxu0 %v4266_v17  ;;  %2189 = vmatpush1.bf16.msra.mxu1 %v4266_v17  ;;  %v4333_v17 = vld [vmem:[%s6674_s1 + $0xd4] ss:$8 sps:$4 sm:$0xff]  }
  0x60   : > { %719 = vmatprep.subr.bf16.mxu0 %v4267_v18  ;;  %2190 = vmatprep.subr.bf16.mxu1 %v4267_v18  ;;  %v4335_v18 = vld [vmem:[%s6674_s1 + $0xd0] ss:$8 sps:$4 sm:$0xff]  }
  0x63   : > { %720 = vmatpush1.bf16.msra.mxu0 %v4269_v19  ;;  %2191 = vmatpush1.bf16.msra.mxu1 %v4269_v19  ;;  %v4336_v19 = vld [vmem:[%s6674_s1 + $0xe4] ss:$8 sps:$4 sm:$0xff]  }
  0x64   : > { %721 = vmatprep.subr.bf16.mxu0 %v4270_v20  ;;  %2192 = vmatprep.subr.bf16.mxu1 %v4270_v20  ;;  %v4338_v20 = vld [vmem:[%s6674_s1 + $0xe0] ss:$8 sps:$4 sm:$0xff]  }
  0x67   : > { %722 = vmatpush1.bf16.msra.mxu0 %v4272_v21  ;;  %2193 = vmatpush1.bf16.msra.mxu1 %v4272_v21  ;;  %v4339_v21 = vld [vmem:[%s6674_s1 + $0xf4] ss:$8 sps:$4 sm:$0xff]  }
  0x68   : > { %723 = vmatprep.subr.bf16.mxu0 %v4273_v22  ;;  %2194 = vmatprep.subr.bf16.mxu1 %v4273_v22  ;;  %v4341_v22 = vld [vmem:[%s6674_s1 + $0xf0] ss:$8 sps:$4 sm:$0xff]  }
  0x6b   : > { %724 = vmatpush1.bf16.msra.mxu0 %v4275_v23  ;;  %2195 = vmatpush1.bf16.msra.mxu1 %v4275_v23  ;;  %v167_v23 = vld [vmem:[%s4917_s14] sm:$0xf] }
  0x6c   : > { %725 = vmatprep.subr.bf16.mxu0 %v4276_v24  ;;  %2196 = vmatprep.subr.bf16.mxu1 %v4276_v24  ;;  %v3787_v24 = vld [vmem:[%s4917_s14 + $0x20] sm:$0xf] }
  0x6f   : > { %726 = vmatpush1.bf16.msra.mxu0 %v4278_v25  ;;  %2197 = vmatpush1.bf16.msra.mxu1 %v4278_v25  ;;  %v4342_v25 = vld [vmem:[%s6674_s1 + $0x104] ss:$8 sps:$4 sm:$0xff]  }
  0x70   : > { %727 = vmatprep.subr.bf16.mxu0 %v4279_v26  ;;  %2198 = vmatprep.subr.bf16.mxu1 %v4279_v26  ;;  %v171_v26 = vpack.c.bf16 %v167_v23, %v167_v23  ;;  %v4411_v23 = vld [vmem:[%s6674_s1 + $0x474] ss:$8 sps:$4 sm:$0xff]  }
  0x73   : > { %728 = vmatpush1.bf16.msra.mxu0 %v4281_v27  ;;  %2199 = vmatpush1.bf16.msra.mxu1 %v4281_v27  ;;  %v5204_v27 = vpack.c.bf16 %v3787_v24, %v3787_v24  ;;  %v4413_v24 = vld [vmem:[%s6674_s1 + $0x470] ss:$8 sps:$4 sm:$0xff]  }
  0x74   : > { %729 = vmatprep.subr.bf16.mxu0 %v4282_v29  ;;  %2200 = vmatprep.subr.bf16.mxu1 %v4282_v29  ;;  %v170_v29 = vld [vmem:[%s4917_s14 + $0x18] sm:$0xf] }
  0x77   : > { %730 = vmatpush1.bf16.msra.mxu0 %v4284_v30  ;;  %2201 = vmatpush1.bf16.msra.mxu1 %v4284_v30  ;;  %v3790_v30 = vld [vmem:[%s4917_s14 + $0x38] sm:$0xf] }
  0x78   : > { %731 = vmatprep.subr.bf16.mxu0 %v4285_v33  ;;  %2202 = vmatprep.subr.bf16.mxu1 %v4285_v33  ;;  %v174_v33 = vpack.c.bf16 %v170_v29, %v170_v29  ;;  %v5214_v34 = vpack.c.bf16 %v3790_v30, %v3790_v30  ;;  %v4417_v29 = vld [vmem:[%s6674_s1 + $0x494] ss:$8 sps:$4 sm:$0xff]   ;;  %v4419_v30 = vld [vmem:[%s6674_s1 + $0x490] ss:$8 sps:$4 sm:$0xff]  }
  0x7b   : > { %732 = vmatpush1.bf16.msra.mxu0 %v4287_v36  ;;  %2203 = vmatpush1.bf16.msra.mxu1 %v4287_v36  ;;  %v4348_v36 = vld [vmem:[%s6674_s1 + $0x124] ss:$8 sps:$4 sm:$0xff]  }
  0x7c   : > { %733 = vmatprep.subr.bf16.mxu0 %v4288_v37  ;;  %2204 = vmatprep.subr.bf16.mxu1 %v4288_v37  ;;  %v4350_v37 = vld [vmem:[%s6674_s1 + $0x120] ss:$8 sps:$4 sm:$0xff]  }
  0x7f   : > { %734 = vmatpush1.bf16.msra.mxu0 %v4290_v40  ;;  %2205 = vmatpush1.bf16.msra.mxu1 %v4290_v40  ;;  %v4354_v40 = vld [vmem:[%s6674_s1 + $0x144] ss:$8 sps:$4 sm:$0xff]  }
  0x80   : > { %735 = vmatprep.subr.bf16.mxu0 %v4291_v41  ;;  %2206 = vmatprep.subr.bf16.mxu1 %v4291_v41  ;;  %v4356_v41 = vld [vmem:[%s6674_s1 + $0x140] ss:$8 sps:$4 sm:$0xff]  }
  0x83   : > { %736 = vmatpush1.bf16.msra.mxu0 %v4293_v42  ;;  %2207 = vmatpush1.bf16.msra.mxu1 %v4293_v42  ;;  %v4357_v42 = vld [vmem:[%s6674_s1 + $0x154] ss:$8 sps:$4 sm:$0xff]  }
  0x84   : > { %1066 = vmatprep.subr.bf16.mxu0 %v4294_v47  ;;  %2217 = vmatprep.subr.bf16.mxu1 %v4294_v47  ;;  %v4365_v47 = vld [vmem:[%s6674_s1 + $0x170] ss:$8 sps:$4 sm:$0xff]  }
  0x86   : > { %738 = vmatmul.mubr.bf16.vlgmr.msra.gmra.mrb[0].mxu0 %v332_v50  ;;  %2209 = vmatmul.mubr.bf16.vlgmr.msra.gmra.mrb[0].mxu1 %v5100_v51  ;;  %v4369_v50 = vld [vmem:[%s6674_s1 + $0x194] ss:$8 sps:$4 sm:$0xff]  }
  0x87   : > { %1067 = vmatpush1.bf16.msra.mxu0 %v4296_v52  ;;  %2218 = vmatpush1.bf16.msra.mxu1 %v4296_v52  ;;  %v4371_v52 = vld [vmem:[%s6674_s1 + $0x190] ss:$8 sps:$4 sm:$0xff]  }
  0x88   : > { %1068 = vmatprep.subr.bf16.mxu0 %v4297_v53  ;;  %2219 = vmatprep.subr.bf16.mxu1 %v4297_v53  ;;  %v4372_v53 = vld [vmem:[%s6674_s1 + $0x1a4] ss:$8 sps:$4 sm:$0xff]  }
  0x89   : > { %1098 = vmatprep.mubr.bf16.mxu0 %v172_v54  ;;  %2249 = vmatprep.mubr.bf16.mxu1 %v5108_v55  ;;  %v4374_v54 = vld [vmem:[%s6674_s1 + $0x1a0] ss:$8 sps:$4 sm:$0xff]  }
  0x8b   : > { %1069 = vmatpush1.bf16.msra.mxu0 %v4299_v56  ;;  %2220 = vmatpush1.bf16.msra.mxu1 %v4299_v56  ;;  %v4375_v56 = vld [vmem:[%s6674_s1 + $0x1b4] ss:$8 sps:$4 sm:$0xff]  }
  0x8c   : > { %1070 = vmatprep.subr.bf16.mxu0 %v4300_v57  ;;  %2221 = vmatprep.subr.bf16.mxu1 %v4300_v57  ;;  %v4377_v57 = vld [vmem:[%s6674_s1 + $0x1b0] ss:$8 sps:$4 sm:$0xff]  }
  0x8f   : > { %1071 = vmatpush1.bf16.msra.mxu0 %v4302_v58  ;;  %2222 = vmatpush1.bf16.msra.mxu1 %v4302_v58  ;;  %v4378_v58 = vld [vmem:[%s6674_s1 + $0x1c4] ss:$8 sps:$4 sm:$0xff]  }
  0x90   : > { %1072 = vmatprep.subr.bf16.mxu0 %v4303_v59  ;;  %2223 = vmatprep.subr.bf16.mxu1 %v4303_v59  ;;  %v4380_v59 = vld [vmem:[%s6674_s1 + $0x1c0] ss:$8 sps:$4 sm:$0xff]  }
  0x93   : > { %1073 = vmatpush1.bf16.msra.mxu0 %v4305_v60  ;;  %2224 = vmatpush1.bf16.msra.mxu1 %v4305_v60  ;;  %v4381_v60 = vld [vmem:[%s6674_s1 + $0x1d4] ss:$8 sps:$4 sm:$0xff]  }
  0x94   : > { %1074 = vmatprep.subr.bf16.mxu0 %v4306_v61  ;;  %2225 = vmatprep.subr.bf16.mxu1 %v4306_v61  ;;  %v4383_v61 = vld [vmem:[%s6674_s1 + $0x1d0] ss:$8 sps:$4 sm:$0xff]  }
  0x97   : > { %1075 = vmatpush1.bf16.msra.mxu0 %v4308_v62  ;;  %2226 = vmatpush1.bf16.msra.mxu1 %v4308_v62  ;;  %v4384_v62 = vld [vmem:[%s6674_s1 + $0x1e4] ss:$8 sps:$4 sm:$0xff]  }
  0x98   : > { %1076 = vmatprep.subr.bf16.mxu0 %v4309_v63  ;;  %2227 = vmatprep.subr.bf16.mxu1 %v4309_v63  ;;  %v4386_v63 = vld [vmem:[%s6674_s1 + $0x1e0] ss:$8 sps:$4 sm:$0xff]  }
  0x9b   : > { %1077 = vmatpush1.bf16.msra.mxu0 %v4311_v0  ;;  %2228 = vmatpush1.bf16.msra.mxu1 %v4311_v0  ;;  %v4387_v0 = vld [vmem:[%s6674_s1 + $0x1f4] ss:$8 sps:$4 sm:$0xff]  }
  0x9c   : > { %1078 = vmatprep.subr.bf16.mxu0 %v4312_v1  ;;  %2229 = vmatprep.subr.bf16.mxu1 %v4312_v1  ;;  %v4389_v1 = vld [vmem:[%s6674_s1 + $0x1f0] ss:$8 sps:$4 sm:$0xff]  }
  0x9f   : > { %1079 = vmatpush1.bf16.msra.mxu0 %v4314_v3  ;;  %2230 = vmatpush1.bf16.msra.mxu1 %v4314_v3  ;;  %v169_v3 = vld [vmem:[%s4917_s14 + $0x10] sm:$0xf] }
  0xa0   : > { %1080 = vmatprep.subr.bf16.mxu0 %v4315_v4  ;;  %2231 = vmatprep.subr.bf16.mxu1 %v4315_v4  ;;  %v3789_v4 = vld [vmem:[%s4917_s14 + $0x30] sm:$0xf] }
  0xa3   : > { %1081 = vmatpush1.bf16.msra.mxu0 %v4317_v5  ;;  %2232 = vmatpush1.bf16.msra.mxu1 %v4317_v5  ;;  %v4390_v5 = vld [vmem:[%s6674_s1 + $0x404] ss:$8 sps:$4 sm:$0xff]  }
  0xa4   : > { %1082 = vmatprep.subr.bf16.mxu0 %v4318_v7  ;;  %2233 = vmatprep.subr.bf16.mxu1 %v4318_v7  ;;  %v173_v7 = vpack.c.bf16 %v169_v3, %v169_v3  ;;  %v4465_v3 = vld [vmem:[%s6674_s1 + $0x594] ss:$8 sps:$4 sm:$0xff]  }
  0xa7   : > { %1083 = vmatpush1.bf16.msra.mxu0 %v4320_v8  ;;  %2234 = vmatpush1.bf16.msra.mxu1 %v4320_v8  ;;  %v5310_v8 = vpack.c.bf16 %v3789_v4, %v3789_v4  ;;  %v4467_v4 = vld [vmem:[%s6674_s1 + $0x590] ss:$8 sps:$4 sm:$0xff]  }
  0xa8   : > { %1084 = vmatprep.subr.bf16.mxu0 %v4321_v9  ;;  %2235 = vmatprep.subr.bf16.mxu1 %v4321_v9  ;;  %v4052_v9 = vld [vmem:[%s4917_s14 + $0x48] sm:$0xf] }
  0xab   : > { %1085 = vmatpush1.bf16.msra.mxu0 %v4323_v10  ;;  %2236 = vmatpush1.bf16.msra.mxu1 %v4323_v10  ;;  %v4392_v10 = vld [vmem:[%s6674_s1 + $0x400] ss:$8 sps:$4 sm:$0xff]  }
  0xac   : > { %1086 = vmatprep.subr.bf16.mxu0 %v4324_v11  ;;  %2237 = vmatprep.subr.bf16.mxu1 %v4324_v11  ;;  %v4393_v11 = vld [vmem:[%s6674_s1 + $0x414] ss:$8 sps:$4 sm:$0xff]  }
  0xaf   : > { %1087 = vmatpush1.bf16.msra.mxu0 %v4326_v12  ;;  %2238 = vmatpush1.bf16.msra.mxu1 %v4326_v12  ;;  %v5319_v12 = vpack.c.bf16 %v4052_v9, %v4052_v9  ;;  %v4471_v9 = vld [vmem:[%s6674_s1 + $0x5b4] ss:$8 sps:$4 sm:$0xff]  }
  0xb0   : > { %1088 = vmatprep.subr.bf16.mxu0 %v4327_v13  ;;  %2239 = vmatprep.subr.bf16.mxu1 %v4327_v13  ;;  %v4395_v13 = vld [vmem:[%s6674_s1 + $0x410] ss:$8 sps:$4 sm:$0xff]  }
  0xb3   : > { %1089 = vmatpush1.bf16.msra.mxu0 %v4329_v14  ;;  %2240 = vmatpush1.bf16.msra.mxu1 %v4329_v14  ;;  %v4396_v14 = vld [vmem:[%s6674_s1 + $0x424] ss:$8 sps:$4 sm:$0xff]  }
  0xb4   : > { %1090 = vmatprep.subr.bf16.mxu0 %v4330_v15  ;;  %2241 = vmatprep.subr.bf16.mxu1 %v4330_v15  ;;  %v4398_v15 = vld [vmem:[%s6674_s1 + $0x420] ss:$8 sps:$4 sm:$0xff]  }
  0xb7   : > { %1091 = vmatpush1.bf16.msra.mxu0 %v4332_v16  ;;  %2242 = vmatpush1.bf16.msra.mxu1 %v4332_v16  ;;  %v4399_v16 = vld [vmem:[%s6674_s1 + $0x434] ss:$8 sps:$4 sm:$0xff]  }
  0xb8   : > { %1092 = vmatprep.subr.bf16.mxu0 %v4333_v17  ;;  %2243 = vmatprep.subr.bf16.mxu1 %v4333_v17  ;;  %v4402_v17 = vld [vmem:[%s6674_s1 + $0x444] ss:$8 sps:$4 sm:$0xff]  }
  0xbb   : > { %1093 = vmatpush1.bf16.msra.mxu0 %v4335_v18  ;;  %2244 = vmatpush1.bf16.msra.mxu1 %v4335_v18  ;;  %v4404_v18 = vld [vmem:[%s6674_s1 + $0x440] ss:$8 sps:$4 sm:$0xff]  }
  0xbc   : > { %1094 = vmatprep.subr.bf16.mxu0 %v4336_v19  ;;  %2245 = vmatprep.subr.bf16.mxu1 %v4336_v19  ;;  %v4405_v19 = vld [vmem:[%s6674_s1 + $0x454] ss:$8 sps:$4 sm:$0xff]  }
  0xbf   : > { %1095 = vmatpush1.bf16.msra.mxu0 %v4338_v20  ;;  %2246 = vmatpush1.bf16.msra.mxu1 %v4338_v20  ;;  %v4407_v20 = vld [vmem:[%s6674_s1 + $0x450] ss:$8 sps:$4 sm:$0xff]  }
  0xc0   : > { %1096 = vmatprep.subr.bf16.mxu0 %v4339_v21  ;;  %2247 = vmatprep.subr.bf16.mxu1 %v4339_v21  ;;  %v4408_v21 = vld [vmem:[%s6674_s1 + $0x464] ss:$8 sps:$4 sm:$0xff]  }
  0xc3   : > { %1097 = vmatpush1.bf16.msra.mxu0 %v4341_v22  ;;  %2248 = vmatpush1.bf16.msra.mxu1 %v4341_v22  ;;  %v4410_v22 = vld [vmem:[%s6674_s1 + $0x460] ss:$8 sps:$4 sm:$0xff]  }
  0xc4   : > { %1107 = vmatprep.subr.bf16.mxu0 %v4342_v25  ;;  %2258 = vmatprep.subr.bf16.mxu1 %v4342_v25  ;;  %v4414_v25 = vld [vmem:[%s6674_s1 + $0x484] ss:$8 sps:$4 sm:$0xff]  }
  0xc6   : > { %1099 = vmatmul.mubr.bf16.vlgmr.msra.gmra.mrb[0].mxu0 %v171_v26  ;;  %2250 = vmatmul.mubr.bf16.vlgmr.msra.gmra.mrb[0].mxu1 %v5204_v27  ;;  %v4416_v26 = vld [vmem:[%s6674_s1 + $0x480] ss:$8 sps:$4 sm:$0xff]  }
  0xc7   : > { %1108 = vmatpush1.bf16.msra.mxu0 %v4344_v31  ;;  %2259 = vmatpush1.bf16.msra.mxu1 %v4344_v31  ;;  %v4420_v31 = vld [vmem:[%s6674_s1 + $0x4a4] ss:$8 sps:$4 sm:$0xff]  }
  0xc8   : > { %1109 = vmatprep.subr.bf16.mxu0 %v4345_v32  ;;  %2260 = vmatprep.subr.bf16.mxu1 %v4345_v32  ;;  %v4422_v32 = vld [vmem:[%s6674_s1 + $0x4a0] ss:$8 sps:$4 sm:$0xff]  }
  0xc9   : > { %1139 = vmatprep.mubr.bf16.mxu0 %v174_v33  ;;  %2290 = vmatprep.mubr.bf16.mxu1 %v5214_v34  ;;  %v4423_v33 = vld [vmem:[%s6674_s1 + $0x4b4] ss:$8 sps:$4 sm:$0xff]  }
  0xcb   : > { %1110 = vmatpush1.bf16.msra.mxu0 %v4347_v35  ;;  %2261 = vmatpush1.bf16.msra.mxu1 %v4347_v35  ;;  %v4425_v35 = vld [vmem:[%s6674_s1 + $0x4b0] ss:$8 sps:$4 sm:$0xff]  }
  0xcc   : > { %1111 = vmatprep.subr.bf16.mxu0 %v4348_v36  ;;  %2262 = vmatprep.subr.bf16.mxu1 %v4348_v36  ;;  %v4426_v36 = vld [vmem:[%s6674_s1 + $0x4c4] ss:$8 sps:$4 sm:$0xff]  }
  0xcf   : > { %1112 = vmatpush1.bf16.msra.mxu0 %v4350_v37  ;;  %2263 = vmatpush1.bf16.msra.mxu1 %v4350_v37  ;;  %v4428_v37 = vld [vmem:[%s6674_s1 + $0x4c0] ss:$8 sps:$4 sm:$0xff]  }
  0xd0   : > { %1113 = vmatprep.subr.bf16.mxu0 %v4351_v38  ;;  %2264 = vmatprep.subr.bf16.mxu1 %v4351_v38  ;;  %v4429_v38 = vld [vmem:[%s6674_s1 + $0x4d4] ss:$8 sps:$4 sm:$0xff]  }
  0xd3   : > { %1114 = vmatpush1.bf16.msra.mxu0 %v4353_v39  ;;  %2265 = vmatpush1.bf16.msra.mxu1 %v4353_v39  ;;  %v4431_v39 = vld [vmem:[%s6674_s1 + $0x4d0] ss:$8 sps:$4 sm:$0xff]  }
  0xd4   : > { %1115 = vmatprep.subr.bf16.mxu0 %v4354_v40  ;;  %2266 = vmatprep.subr.bf16.mxu1 %v4354_v40  ;;  %v4432_v40 = vld [vmem:[%s6674_s1 + $0x4e4] ss:$8 sps:$4 sm:$0xff]  }
  0xd7   : > { %1116 = vmatpush1.bf16.msra.mxu0 %v4356_v41  ;;  %2267 = vmatpush1.bf16.msra.mxu1 %v4356_v41  ;;  %v4434_v41 = vld [vmem:[%s6674_s1 + $0x4e0] ss:$8 sps:$4 sm:$0xff]  }
  0xd8   : > { %1117 = vmatprep.subr.bf16.mxu0 %v4357_v42  ;;  %2268 = vmatprep.subr.bf16.mxu1 %v4357_v42  ;;  %v4435_v42 = vld [vmem:[%s6674_s1 + $0x4f4] ss:$8 sps:$4 sm:$0xff]  }
  0xdb   : > { %1118 = vmatpush1.bf16.msra.mxu0 %v4359_v43  ;;  %2269 = vmatpush1.bf16.msra.mxu1 %v4359_v43  ;;  %v4437_v43 = vld [vmem:[%s6674_s1 + $0x4f0] ss:$8 sps:$4 sm:$0xff]  }
  0xdc   : > { %1119 = vmatprep.subr.bf16.mxu0 %v4360_v44  ;;  %2270 = vmatprep.subr.bf16.mxu1 %v4360_v44  ;;  %v4051_v44 = vld [vmem:[%s4917_s14 + $0x40] sm:$0xf] }
  0xdf   : > { %1120 = vmatpush1.bf16.msra.mxu0 %v4362_v45  ;;  %2271 = vmatpush1.bf16.msra.mxu1 %v4362_v45  ;;  %v4438_v45 = vld [vmem:[%s6674_s1 + $0x504] ss:$8 sps:$4 sm:$0xff]  }
  0xe0   : > { %1121 = vmatprep.subr.bf16.mxu0 %v4363_v46  ;;  %2272 = vmatprep.subr.bf16.mxu1 %v4363_v46  ;;  %v5415_v46 = vpack.c.bf16 %v4051_v44, %v4051_v44  ;;  %v4510_v44 = vld [vmem:[%s6674_s1 + $0x684] ss:$8 sps:$4 sm:$0xff]  }
  0xe3   : > { %1122 = vmatpush1.bf16.msra.mxu0 %v4365_v47  ;;  %2273 = vmatpush1.bf16.msra.mxu1 %v4365_v47  ;;  %v4054_v47 = vld [vmem:[%s4917_s14 + $0x58] sm:$0xf] }
  0xe4   : > { %1123 = vmatprep.subr.bf16.mxu0 %v4366_v48  ;;  %2274 = vmatprep.subr.bf16.mxu1 %v4366_v48  ;;  %v4440_v48 = vld [vmem:[%s6674_s1 + $0x500] ss:$8 sps:$4 sm:$0xff]  }
  0xe7   : > { %1124 = vmatpush1.bf16.msra.mxu0 %v4368_v49  ;;  %2275 = vmatpush1.bf16.msra.mxu1 %v4368_v49  ;;  %v4441_v49 = vld [vmem:[%s6674_s1 + $0x514] ss:$8 sps:$4 sm:$0xff]  }
  0xe8   : > { %1125 = vmatprep.subr.bf16.mxu0 %v4369_v50  ;;  %2276 = vmatprep.subr.bf16.mxu1 %v4369_v50  ;;  %v5424_v50 = vpack.c.bf16 %v4054_v47, %v4054_v47  ;;  %v4513_v47 = vld [vmem:[%s6674_s1 + $0x694] ss:$8 sps:$4 sm:$0xff]  }
  0xeb   : > { %1126 = vmatpush1.bf16.msra.mxu0 %v4371_v52  ;;  %2277 = vmatpush1.bf16.msra.mxu1 %v4371_v52  ;;  %v4443_v52 = vld [vmem:[%s6674_s1 + $0x510] ss:$8 sps:$4 sm:$0xff]  }
  0xec   : > { %1127 = vmatprep.subr.bf16.mxu0 %v4372_v53  ;;  %2278 = vmatprep.subr.bf16.mxu1 %v4372_v53  ;;  %v4444_v53 = vld [vmem:[%s6674_s1 + $0x524] ss:$8 sps:$4 sm:$0xff]  }
  0xef   : > { %1128 = vmatpush1.bf16.msra.mxu0 %v4374_v54  ;;  %2279 = vmatpush1.bf16.msra.mxu1 %v4374_v54  ;;  %v4447_v54 = vld [vmem:[%s6674_s1 + $0x534] ss:$8 sps:$4 sm:$0xff]  }
  0xf0   : > { %1129 = vmatprep.subr.bf16.mxu0 %v4375_v56  ;;  %2280 = vmatprep.subr.bf16.mxu1 %v4375_v56  ;;  %v4450_v56 = vld [vmem:[%s6674_s1 + $0x544] ss:$8 sps:$4 sm:$0xff]  }
  0xf3   : > { %1130 = vmatpush1.bf16.msra.mxu0 %v4377_v57  ;;  %2281 = vmatpush1.bf16.msra.mxu1 %v4377_v57  ;;  %v4452_v57 = vld [vmem:[%s6674_s1 + $0x540] ss:$8 sps:$4 sm:$0xff]  }
  0xf4   : > { %1131 = vmatprep.subr.bf16.mxu0 %v4378_v58  ;;  %2282 = vmatprep.subr.bf16.mxu1 %v4378_v58  ;;  %v4453_v58 = vld [vmem:[%s6674_s1 + $0x554] ss:$8 sps:$4 sm:$0xff]  }
  0xf7   : > { %1132 = vmatpush1.bf16.msra.mxu0 %v4380_v59  ;;  %2283 = vmatpush1.bf16.msra.mxu1 %v4380_v59  ;;  %v4455_v59 = vld [vmem:[%s6674_s1 + $0x550] ss:$8 sps:$4 sm:$0xff]  }
  0xf8   : > { %1133 = vmatprep.subr.bf16.mxu0 %v4381_v60  ;;  %2284 = vmatprep.subr.bf16.mxu1 %v4381_v60  ;;  %v4456_v60 = vld [vmem:[%s6674_s1 + $0x564] ss:$8 sps:$4 sm:$0xff]  }
  0xfb   : > { %1134 = vmatpush1.bf16.msra.mxu0 %v4383_v61  ;;  %2285 = vmatpush1.bf16.msra.mxu1 %v4383_v61  ;;  %v4458_v61 = vld [vmem:[%s6674_s1 + $0x560] ss:$8 sps:$4 sm:$0xff]  }
  0xfc   : > { %1135 = vmatprep.subr.bf16.mxu0 %v4384_v62  ;;  %2286 = vmatprep.subr.bf16.mxu1 %v4384_v62  ;;  %v4459_v62 = vld [vmem:[%s6674_s1 + $0x574] ss:$8 sps:$4 sm:$0xff]  }
  0xff   : > { %1136 = vmatpush1.bf16.msra.mxu0 %v4386_v63  ;;  %2287 = vmatpush1.bf16.msra.mxu1 %v4386_v63  ;;  %v4461_v63 = vld [vmem:[%s6674_s1 + $0x570] ss:$8 sps:$4 sm:$0xff]  }
 0x100   : > { %1137 = vmatprep.subr.bf16.mxu0 %v4387_v0  ;;  %2288 = vmatprep.subr.bf16.mxu1 %v4387_v0  ;;  %v4462_v0 = vld [vmem:[%s6674_s1 + $0x584] ss:$8 sps:$4 sm:$0xff]  }
 0x103   : > { %1138 = vmatpush1.bf16.msra.mxu0 %v4389_v1  ;;  %2289 = vmatpush1.bf16.msra.mxu1 %v4389_v1  ;;  %v4464_v1 = vld [vmem:[%s6674_s1 + $0x580] ss:$8 sps:$4 sm:$0xff]  }
 0x104   : > { %1542 = vmatprep.subr.bf16.mxu0 %v4390_v5  ;;  %2308 = vmatprep.subr.bf16.mxu1 %v4390_v5  ;;  %v4468_v5 = vld [vmem:[%s6674_s1 + $0x5a4] ss:$8 sps:$4 sm:$0xff]  }
 0x106   : > { %1140 = vmatmul.mubr.bf16.vlgmr.msra.gmra.mrb[0].mxu0 %v173_v7  ;;  %2291 = vmatmul.mubr.bf16.vlgmr.msra.gmra.mrb[0].mxu1 %v5310_v8  ;;  %v4470_v7 = vld [vmem:[%s6674_s1 + $0x5a0] ss:$8 sps:$4 sm:$0xff]  }
 0x107   : > { %1543 = vmatpush1.bf16.msra.mxu0 %v4392_v10  ;;  %2309 = vmatpush1.bf16.msra.mxu1 %v4392_v10  ;;  %v4473_v10 = vld [vmem:[%s6674_s1 + $0x5b0] ss:$8 sps:$4 sm:$0xff]  }
 0x108   : > { %1544 = vmatprep.subr.bf16.mxu0 %v4393_v11  ;;  %2310 = vmatprep.subr.bf16.mxu1 %v4393_v11  ;;  %v4474_v11 = vld [vmem:[%s6674_s1 + $0x5c4] ss:$8 sps:$4 sm:$0xff]  }
 0x109   : > { %1574 = vmatprep.mubr.bf16.mxu0 %v5108_v55  ;;  %2340 = vmatprep.mubr.bf16.mxu1 %v5319_v12  ;;  %v4401_v55 = vld [vmem:[%s6674_s1 + $0x430] ss:$8 sps:$4 sm:$0xff]  }
 0x10b   : > { %1545 = vmatpush1.bf16.msra.mxu0 %v4395_v13  ;;  %2311 = vmatpush1.bf16.msra.mxu1 %v4395_v13  ;;  %v4476_v13 = vld [vmem:[%s6674_s1 + $0x5c0] ss:$8 sps:$4 sm:$0xff]  }
 0x10c   : > { %1546 = vmatprep.subr.bf16.mxu0 %v4396_v14  ;;  %2312 = vmatprep.subr.bf16.mxu1 %v4396_v14  ;;  %v4477_v14 = vld [vmem:[%s6674_s1 + $0x5d4] ss:$8 sps:$4 sm:$0xff]  }
 0x10f   : > { %1547 = vmatpush1.bf16.msra.mxu0 %v4398_v15  ;;  %2313 = vmatpush1.bf16.msra.mxu1 %v4398_v15  ;;  %v4056_v15 = vld [vmem:[%s4917_s14 + $0x48] sm:$0x1e] }
 0x110   : > { %1548 = vmatprep.subr.bf16.mxu0 %v4399_v16  ;;  %2314 = vmatprep.subr.bf16.mxu1 %v4399_v16  ;;  %v4479_v16 = vld [vmem:[%s6674_s1 + $0x5d0] ss:$8 sps:$4 sm:$0xff]  }
 0x113   : > { %1549 = vmatpush1.bf16.msra.mxu0 %v4401_v55  ;;  %2315 = vmatpush1.bf16.msra.mxu1 %v4401_v55  ;;  %v4480_v55 = vld [vmem:[%s6674_s1 + $0x5e4] ss:$8 sps:$4 sm:$0xff]  }
 0x114   : > { %1550 = vmatprep.subr.bf16.mxu0 %v4402_v17  ;;  %2316 = vmatprep.subr.bf16.mxu1 %v4402_v17  ;;  %v2397_v17 = vpack.c.bf16 %v4056_v15, %v4056_v15  ;;  %v4537_v15 = vld [vmem:[%s6674_s1 + $0x714] ss:$8 sps:$4 sm:$0xff]  }
 0x117   : > { %1551 = vmatpush1.bf16.msra.mxu0 %v4404_v18  ;;  %2317 = vmatpush1.bf16.msra.mxu1 %v4404_v18  ;;  %v4482_v18 = vld [vmem:[%s6674_s1 + $0x5e0] ss:$8 sps:$4 sm:$0xff]  }
 0x118   : > { %1552 = vmatprep.subr.bf16.mxu0 %v4405_v19  ;;  %2318 = vmatprep.subr.bf16.mxu1 %v4405_v19  ;;  %v4483_v19 = vld [vmem:[%s6674_s1 + $0x5f4] ss:$8 sps:$4 sm:$0xff]  }
 0x11b   : > { %1553 = vmatpush1.bf16.msra.mxu0 %v4407_v20  ;;  %2319 = vmatpush1.bf16.msra.mxu1 %v4407_v20  ;;  %v2410_v20 = vshll.u32 %v2397_v17, 16 }
 0x11c   : > { %1554 = vmatprep.subr.bf16.mxu0 %v4408_v21  ;;  %2320 = vmatprep.subr.bf16.mxu1 %v4408_v21  ;;  %v4485_v21 = vld [vmem:[%s6674_s1 + $0x5f0] ss:$8 sps:$4 sm:$0xff]  }
 0x11f   : > { %1555 = vmatpush1.bf16.msra.mxu0 %v4410_v22  ;;  %2321 = vmatpush1.bf16.msra.mxu1 %v4410_v22  ;;  %v4053_v22 = vld [vmem:[%s4917_s14 + $0x50] sm:$0xf] }
 0x120   : > { %1556 = vmatprep.subr.bf16.mxu0 %v4411_v23  ;;  %2322 = vmatprep.subr.bf16.mxu1 %v4411_v23  ;;  %v4486_v23 = vld [vmem:[%s6674_s1 + $0x604] ss:$8 sps:$4 sm:$0xff]  }
 0x123   : > { %1557 = vmatpush1.bf16.msra.mxu0 %v4413_v24  ;;  %2323 = vmatpush1.bf16.msra.mxu1 %v4413_v24  ;;  %v2408_v24 = vshrl.u32 %v2397_v17, 16  ;;  %v4540_v17 = vld [vmem:[%s6674_s1 + $0x724] ss:$8 sps:$4 sm:$0xff]  }
 0x124   : > { %1558 = vmatprep.subr.bf16.mxu0 %v4414_v25  ;;  %2324 = vmatprep.subr.bf16.mxu1 %v4414_v25  ;;  %v2412_v25 = vrot.slane %v2410_v20, 1  ;;  %v4548_v20 = vld [vmem:[%s6674_s1 + $0x740] ss:$8 sps:$4 sm:$0xff]  }
 0x127   : > { %1559 = vmatpush1.bf16.msra.mxu0 %v4416_v26  ;;  %2325 = vmatpush1.bf16.msra.mxu1 %v4416_v26  ;;  %v5522_v26 = vpack.c.bf16 %v4053_v22, %v4053_v22  ;;  %v4551_v22 = vld [vmem:[%s6674_s1 + $0x750] ss:$8 sps:$4 sm:$0xff]  }
 0x128   : > { %1560 = vmatprep.subr.bf16.mxu0 %v4417_v29  ;;  %2326 = vmatprep.subr.bf16.mxu1 %v4417_v29  ;;  %v4488_v29 = vld [vmem:[%s6674_s1 + $0x600] ss:$8 sps:$4 sm:$0xff]  }
 0x12b   : > { %1561 = vmatpush1.bf16.msra.mxu0 %v4419_v30  ;;  %2327 = vmatpush1.bf16.msra.mxu1 %v4419_v30  ;;  %v4489_v30 = vld [vmem:[%s6674_s1 + $0x614] ss:$8 sps:$4 sm:$0xff]  }
 0x12c   : > { %1562 = vmatprep.subr.bf16.mxu0 %v4420_v31  ;;  %2328 = vmatprep.subr.bf16.mxu1 %v4420_v31  ;;  %v5530_v31 = vor.u32 %v2412_v25, %v2408_v24  ;;  %v4554_v24 = vld [vmem:[%s6674_s1 + $0x760] ss:$8 sps:$4 sm:$0xff]   ;;  %v4555_v25 = vld [vmem:[%s6674_s1 + $0x774] ss:$8 sps:$4 sm:$0xff]  }
 0x12f   : > { %1563 = vmatpush1.bf16.msra.mxu0 %v4422_v32  ;;  %2329 = vmatpush1.bf16.msra.mxu1 %v4422_v32  ;;  %v4491_v32 = vld [vmem:[%s6674_s1 + $0x610] ss:$8 sps:$4 sm:$0xff]  }
 0x130   : > { %1564 = vmatprep.subr.bf16.mxu0 %v4423_v33  ;;  %2330 = vmatprep.subr.bf16.mxu1 %v4423_v33  ;;  %v4492_v33 = vld [vmem:[%s6674_s1 + $0x624] ss:$8 sps:$4 sm:$0xff]  }
 0x133   : > { %1565 = vmatpush1.bf16.msra.mxu0 %v4425_v35  ;;  %2331 = vmatpush1.bf16.msra.mxu1 %v4425_v35  ;;  %v4495_v35 = vld [vmem:[%s6674_s1 + $0x634] ss:$8 sps:$4 sm:$0xff]  }
 0x134   : > { %1566 = vmatprep.subr.bf16.mxu0 %v4426_v36  ;;  %2332 = vmatprep.subr.bf16.mxu1 %v4426_v36  ;;  %v4498_v36 = vld [vmem:[%s6674_s1 + $0x644] ss:$8 sps:$4 sm:$0xff]  }
 0x137   : > { %1567 = vmatpush1.bf16.msra.mxu0 %v4428_v37  ;;  %2333 = vmatpush1.bf16.msra.mxu1 %v4428_v37  ;;  %v4500_v37 = vld [vmem:[%s6674_s1 + $0x640] ss:$8 sps:$4 sm:$0xff]  }
 0x138   : > { %1568 = vmatprep.subr.bf16.mxu0 %v4429_v38  ;;  %2334 = vmatprep.subr.bf16.mxu1 %v4429_v38  ;;  %v4501_v38 = vld [vmem:[%s6674_s1 + $0x654] ss:$8 sps:$4 sm:$0xff]  }
 0x13b   : > { %1569 = vmatpush1.bf16.msra.mxu0 %v4431_v39  ;;  %2335 = vmatpush1.bf16.msra.mxu1 %v4431_v39  ;;  %v4503_v39 = vld [vmem:[%s6674_s1 + $0x650] ss:$8 sps:$4 sm:$0xff]  }
 0x13c   : > { %1570 = vmatprep.subr.bf16.mxu0 %v4432_v40  ;;  %2336 = vmatprep.subr.bf16.mxu1 %v4432_v40  ;;  %v4504_v40 = vld [vmem:[%s6674_s1 + $0x664] ss:$8 sps:$4 sm:$0xff]  }
 0x13f   : > { %1571 = vmatpush1.bf16.msra.mxu0 %v4434_v41  ;;  %2337 = vmatpush1.bf16.msra.mxu1 %v4434_v41  ;;  %v4506_v41 = vld [vmem:[%s6674_s1 + $0x660] ss:$8 sps:$4 sm:$0xff]  }
 0x140   : > { %1572 = vmatprep.subr.bf16.mxu0 %v4435_v42  ;;  %2338 = vmatprep.subr.bf16.mxu1 %v4435_v42  ;;  %v4507_v42 = vld [vmem:[%s6674_s1 + $0x674] ss:$8 sps:$4 sm:$0xff]  }
 0x143   : > { %1573 = vmatpush1.bf16.msra.mxu0 %v4437_v43  ;;  %2339 = vmatpush1.bf16.msra.mxu1 %v4437_v43  ;;  %v4509_v43 = vld [vmem:[%s6674_s1 + $0x670] ss:$8 sps:$4 sm:$0xff]  }
 0x144   : > { %1583 = vmatprep.subr.bf16.mxu0 %v4438_v45  ;;  %2349 = vmatprep.subr.bf16.mxu1 %v4438_v45  ;;  %v4512_v45 = vld [vmem:[%s6674_s1 + $0x680] ss:$8 sps:$4 sm:$0xff]  }
 0x146   : > { %1575 = vmatmul.mubr.bf16.vlgmr.msra.gmra.mrb[0].mxu0 %v5204_v27  ;;  %2341 = vmatmul.mubr.bf16.vlgmr.msra.gmra.mrb[0].mxu1 %v5415_v46  ;;  %v4446_v27 = vld [vmem:[%s6674_s1 + $0x520] ss:$8 sps:$4 sm:$0xff]  }
 0x147   : > { %1584 = vmatpush1.bf16.msra.mxu0 %v4440_v48  ;;  %2350 = vmatpush1.bf16.msra.mxu1 %v4440_v48  ;;  %v4515_v48 = vld [vmem:[%s6674_s1 + $0x690] ss:$8 sps:$4 sm:$0xff]  }
 0x148   : > { %1585 = vmatprep.subr.bf16.mxu0 %v4441_v49  ;;  %2351 = vmatprep.subr.bf16.mxu1 %v4441_v49  ;;  %v4516_v49 = vld [vmem:[%s6674_s1 + $0x6a4] ss:$8 sps:$4 sm:$0xff]  }
 0x149   : > { %1615 = vmatprep.mubr.bf16.mxu0 %v5214_v34  ;;  %2381 = vmatprep.mubr.bf16.mxu1 %v5424_v50  ;;  %v4449_v34 = vld [vmem:[%s6674_s1 + $0x530] ss:$8 sps:$4 sm:$0xff]  }
 0x14b   : > { %1586 = vmatpush1.bf16.msra.mxu0 %v4443_v52  ;;  %2352 = vmatpush1.bf16.msra.mxu1 %v4443_v52  ;;  %v4518_v52 = vld [vmem:[%s6674_s1 + $0x6a0] ss:$8 sps:$4 sm:$0xff]  }
 0x14c   : > { %1587 = vmatprep.subr.bf16.mxu0 %v4444_v53  ;;  %2353 = vmatprep.subr.bf16.mxu1 %v4444_v53  ;;  %v4519_v53 = vld [vmem:[%s6674_s1 + $0x6b4] ss:$8 sps:$4 sm:$0xff]  }
 0x14f   : > { %1588 = vmatpush1.bf16.msra.mxu0 %v4446_v27  ;;  %2354 = vmatpush1.bf16.msra.mxu1 %v4446_v27  ;;  %v4521_v27 = vld [vmem:[%s6674_s1 + $0x6b0] ss:$8 sps:$4 sm:$0xff]  }
 0x150   : > { %1589 = vmatprep.subr.bf16.mxu0 %v4447_v54  ;;  %2355 = vmatprep.subr.bf16.mxu1 %v4447_v54  ;;  %v4522_v54 = vld [vmem:[%s6674_s1 + $0x6c4] ss:$8 sps:$4 sm:$0xff]  }
 0x153   : > { %1590 = vmatpush1.bf16.msra.mxu0 %v4449_v34  ;;  %2356 = vmatpush1.bf16.msra.mxu1 %v4449_v34  ;;  %v4524_v34 = vld [vmem:[%s6674_s1 + $0x6c0] ss:$8 sps:$4 sm:$0xff]  }
 0x154   : > { %1591 = vmatprep.subr.bf16.mxu0 %v4450_v56  ;;  %2357 = vmatprep.subr.bf16.mxu1 %v4450_v56  ;;  %v4055_v56 = vld [vmem:[%s4917_s14 + $0x40] sm:$0x1e] }
 0x157   : > { %1592 = vmatpush1.bf16.msra.mxu0 %v4452_v57  ;;  %2358 = vmatpush1.bf16.msra.mxu1 %v4452_v57  ;;  %v4525_v57 = vld [vmem:[%s6674_s1 + $0x6d4] ss:$8 sps:$4 sm:$0xff]  }
 0x158   : > { %1593 = vmatprep.subr.bf16.mxu0 %v4453_v58  ;;  %2359 = vmatprep.subr.bf16.mxu1 %v4453_v58  ;;  %v2396_v58 = vpack.c.bf16 %v4055_v56, %v4055_v56 }
 0x15b   : > { %1594 = vmatpush1.bf16.msra.mxu0 %v4455_v59  ;;  %2360 = vmatpush1.bf16.msra.mxu1 %v4455_v59  ;;  %v4058_v59 = vld [vmem:[%s4917_s14 + $0x58] sm:$0x1e] }
 0x15c   : > { %1595 = vmatprep.subr.bf16.mxu0 %v4456_v60  ;;  %2361 = vmatprep.subr.bf16.mxu1 %v4456_v60  ;;  %v4527_v60 = vld [vmem:[%s6674_s1 + $0x6d0] ss:$8 sps:$4 sm:$0xff]  }
 0x15f   : > { %1596 = vmatpush1.bf16.msra.mxu0 %v4458_v61  ;;  %2362 = vmatpush1.bf16.msra.mxu1 %v4458_v61  ;;  %v4528_v61 = vld [vmem:[%s6674_s1 + $0x6e4] ss:$8 sps:$4 sm:$0xff]  }
 0x160   : > { %1597 = vmatprep.subr.bf16.mxu0 %v4459_v62  ;;  %2363 = vmatprep.subr.bf16.mxu1 %v4459_v62  ;;  %v2399_v62 = vpack.c.bf16 %v4058_v59, %v4058_v59  ;;  %v4586_v59 = vld [vmem:[%s6674_s1 + $0x204] ss:$8 sps:$4 sm:$0xff]  }
 0x163   : > { %1598 = vmatpush1.bf16.msra.mxu0 %v4461_v63  ;;  %2364 = vmatpush1.bf16.msra.mxu1 %v4461_v63  ;;  %v2403_v63 = vshll.u32 %v2396_v58, 16 }
 0x164   : > { %1599 = vmatprep.subr.bf16.mxu0 %v4462_v0  ;;  %2365 = vmatprep.subr.bf16.mxu1 %v4462_v0  ;;  %v4530_v0 = vld [vmem:[%s6674_s1 + $0x6e0] ss:$8 sps:$4 sm:$0xff]  }
 0x167   : > { %1600 = vmatpush1.bf16.msra.mxu0 %v4464_v1  ;;  %2366 = vmatpush1.bf16.msra.mxu1 %v4464_v1  ;;  %v4531_v1 = vld [vmem:[%s6674_s1 + $0x6f4] ss:$8 sps:$4 sm:$0xff]  }
 0x168   : > { %1601 = vmatprep.subr.bf16.mxu0 %v4465_v3  ;;  %2367 = vmatprep.subr.bf16.mxu1 %v4465_v3  ;;  %v2424_v3 = vshll.u32 %v2399_v62, 16 }
 0x16b   : > { %1602 = vmatpush1.bf16.msra.mxu0 %v4467_v4  ;;  %2368 = vmatpush1.bf16.msra.mxu1 %v4467_v4  ;;  %v2401_v4 = vshrl.u32 %v2396_v58, 16 }
 0x16c   : > { %1603 = vmatprep.subr.bf16.mxu0 %v4468_v5  ;;  %2369 = vmatprep.subr.bf16.mxu1 %v4468_v5  ;;  %v2405_v5 = vrot.slane %v2403_v63, 1  ;;  %v4590_v63 = vld [vmem:[%s6674_s1 + $0x224] ss:$8 sps:$4 sm:$0xff]  }
 0x16f   : > { %1604 = vmatpush1.bf16.msra.mxu0 %v4470_v7  ;;  %2370 = vmatpush1.bf16.msra.mxu1 %v4470_v7  ;;  %v4533_v7 = vld [vmem:[%s6674_s1 + $0x6f0] ss:$8 sps:$4 sm:$0xff]  }
 0x170   : > { %1605 = vmatprep.subr.bf16.mxu0 %v4471_v9  ;;  %2371 = vmatprep.subr.bf16.mxu1 %v4471_v9  ;;  %v4534_v9 = vld [vmem:[%s6674_s1 + $0x704] ss:$8 sps:$4 sm:$0xff]  }
 0x173   : > { %1606 = vmatpush1.bf16.msra.mxu0 %v4473_v10  ;;  %2372 = vmatpush1.bf16.msra.mxu1 %v4473_v10  ;;  %v2422_v10 = vshrl.u32 %v2399_v62, 16  ;;  %v4588_v62 = vld [vmem:[%s6674_s1 + $0x214] ss:$8 sps:$4 sm:$0xff]  }
 0x174   : > { %1607 = vmatprep.subr.bf16.mxu0 %v4474_v11  ;;  %2373 = vmatprep.subr.bf16.mxu1 %v4474_v11  ;;  %v2426_v11 = vrot.slane %v2424_v3, 1  ;;  %v4594_v3 = vld [vmem:[%s6674_s1 + $0x244] ss:$8 sps:$4 sm:$0xff]  }
 0x177   : > { %1608 = vmatpush1.bf16.msra.mxu0 %v4476_v13  ;;  %2374 = vmatpush1.bf16.msra.mxu1 %v4476_v13  ;;  %v5628_v13 = vor.u32 %v2405_v5, %v2401_v4  ;;  %v4595_v4 = vld [vmem:[%s6674_s1 + $0x240] ss:$8 sps:$4 sm:$0xff]   ;;  %v4596_v5 = vld [vmem:[%s6674_s1 + $0x254] ss:$8 sps:$4 sm:$0xff]  }
 0x178   : > { %1609 = vmatprep.subr.bf16.mxu0 %v4477_v14  ;;  %2375 = vmatprep.subr.bf16.mxu1 %v4477_v14  ;;  %v4536_v14 = vld [vmem:[%s6674_s1 + $0x700] ss:$8 sps:$4 sm:$0xff]  }
 0x17b   : > { %1610 = vmatpush1.bf16.msra.mxu0 %v4479_v16  ;;  %2376 = vmatpush1.bf16.msra.mxu1 %v4479_v16  ;;  %v5636_v16 = vor.u32 %v2426_v11, %v2422_v10  ;;  %v4599_v10 = vld [vmem:[%s6674_s1 + $0x260] ss:$8 sps:$4 sm:$0xff]   ;;  %v4600_v11 = vld [vmem:[%s6674_s1 + $0x274] ss:$8 sps:$4 sm:$0xff]  }
 0x17c   : > { %1611 = vmatprep.subr.bf16.mxu0 %v4480_v55  ;;  %2377 = vmatprep.subr.bf16.mxu1 %v4480_v55  ;;  %v4539_v55 = vld [vmem:[%s6674_s1 + $0x710] ss:$8 sps:$4 sm:$0xff]  }
 0x17f   : > { %1612 = vmatpush1.bf16.msra.mxu0 %v4482_v18  ;;  %2378 = vmatpush1.bf16.msra.mxu1 %v4482_v18  ;;  %v4543_v18 = vld [vmem:[%s6674_s1 + $0x734] ss:$8 sps:$4 sm:$0xff]  }
 0x180   : > { %1613 = vmatprep.subr.bf16.mxu0 %v4483_v19  ;;  %2379 = vmatprep.subr.bf16.mxu1 %v4483_v19  ;;  %v4546_v19 = vld [vmem:[%s6674_s1 + $0x744] ss:$8 sps:$4 sm:$0xff]  }
 0x183   : > { %1614 = vmatpush1.bf16.msra.mxu0 %v4485_v21  ;;  %2380 = vmatpush1.bf16.msra.mxu1 %v4485_v21  ;;  %v4549_v21 = vld [vmem:[%s6674_s1 + $0x754] ss:$8 sps:$4 sm:$0xff]  }
 0x184   : > { %2051 = vmatprep.subr.bf16.mxu0 %v4486_v23  ;;  %2432 = vmatprep.subr.bf16.mxu1 %v4486_v23  ;;  %v4552_v23 = vld [vmem:[%s6674_s1 + $0x764] ss:$8 sps:$4 sm:$0xff]  }
 0x186   : > { %1616 = vmatmul.mubr.bf16.vlgmr.msra.gmra.mrb[0].mxu0 %v5310_v8  ;;  %2382 = vmatmul.mubr.bf16.vlgmr.msra.gmra.mrb[0].mxu1 %v5522_v26  ;;  %v4494_v8 = vld [vmem:[%s6674_s1 + $0x620] ss:$8 sps:$4 sm:$0xff]  }
 0x187   : > { %2052 = vmatpush1.bf16.msra.mxu0 %v4488_v29  ;;  %2433 = vmatpush1.bf16.msra.mxu1 %v4488_v29  ;;  %v4557_v29 = vld [vmem:[%s6674_s1 + $0x770] ss:$8 sps:$4 sm:$0xff]  }
 0x188   : > { %2053 = vmatprep.subr.bf16.mxu0 %v4489_v30  ;;  %2434 = vmatprep.subr.bf16.mxu1 %v4489_v30  ;;  %v4558_v30 = vld [vmem:[%s6674_s1 + $0x784] ss:$8 sps:$4 sm:$0xff]  }
 0x189   : > { %2083 = vmatprep.mubr.bf16.mxu0 %v4939_v28  ;;  %2464 = vmatprep.mubr.bf16.mxu1 %v5530_v31  ;;  %v4497_v28 = vld [vmem:[%s6674_s1 + $0x630] ss:$8 sps:$4 sm:$0xff]  }
 0x18b   : > { %2054 = vmatpush1.bf16.msra.mxu0 %v4491_v32  ;;  %2435 = vmatpush1.bf16.msra.mxu1 %v4491_v32  ;;  %v4560_v32 = vld [vmem:[%s6674_s1 + $0x780] ss:$8 sps:$4 sm:$0xff]  }
 0x18c   : > { %2055 = vmatprep.subr.bf16.mxu0 %v4492_v33  ;;  %2436 = vmatprep.subr.bf16.mxu1 %v4492_v33  ;;  %v4561_v33 = vld [vmem:[%s6674_s1 + $0x794] ss:$8 sps:$4 sm:$0xff]  }
 0x18f   : > { %2056 = vmatpush1.bf16.msra.mxu0 %v4494_v8  ;;  %2437 = vmatpush1.bf16.msra.mxu1 %v4494_v8  ;;  %v4563_v8 = vld [vmem:[%s6674_s1 + $0x790] ss:$8 sps:$4 sm:$0xff]  }
 0x190   : > { %2057 = vmatprep.subr.bf16.mxu0 %v4495_v35  ;;  %2438 = vmatprep.subr.bf16.mxu1 %v4495_v35  ;;  %v4564_v35 = vld [vmem:[%s6674_s1 + $0x7a4] ss:$8 sps:$4 sm:$0xff]  }
 0x193   : > { %2058 = vmatpush1.bf16.msra.mxu0 %v4497_v28  ;;  %2439 = vmatpush1.bf16.msra.mxu1 %v4497_v28  ;;  %v4566_v28 = vld [vmem:[%s6674_s1 + $0x7a0] ss:$8 sps:$4 sm:$0xff]  }
 0x194   : > { %2059 = vmatprep.subr.bf16.mxu0 %v4498_v36  ;;  %2440 = vmatprep.subr.bf16.mxu1 %v4498_v36  ;;  %v4567_v36 = vld [vmem:[%s6674_s1 + $0x7b4] ss:$8 sps:$4 sm:$0xff]  }
 0x197   : > { %2060 = vmatpush1.bf16.msra.mxu0 %v4500_v37  ;;  %2441 = vmatpush1.bf16.msra.mxu1 %v4500_v37  ;;  %v4569_v37 = vld [vmem:[%s6674_s1 + $0x7b0] ss:$8 sps:$4 sm:$0xff]  }
 0x198   : > { %2061 = vmatprep.subr.bf16.mxu0 %v4501_v38  ;;  %2442 = vmatprep.subr.bf16.mxu1 %v4501_v38  ;;  %v4570_v38 = vld [vmem:[%s6674_s1 + $0x7c4] ss:$8 sps:$4 sm:$0xff]  }
 0x19b   : > { %2062 = vmatpush1.bf16.msra.mxu0 %v4503_v39  ;;  %2443 = vmatpush1.bf16.msra.mxu1 %v4503_v39  ;;  %v4572_v39 = vld [vmem:[%s6674_s1 + $0x7c0] ss:$8 sps:$4 sm:$0xff]  }
 0x19c   : > { %2063 = vmatprep.subr.bf16.mxu0 %v4504_v40  ;;  %2444 = vmatprep.subr.bf16.mxu1 %v4504_v40  ;;  %v4057_v40 = vld [vmem:[%s4917_s14 + $0x50] sm:$0x1e] }
 0x19f   : > { %2064 = vmatpush1.bf16.msra.mxu0 %v4506_v41  ;;  %2445 = vmatpush1.bf16.msra.mxu1 %v4506_v41  ;;  %v4573_v41 = vld [vmem:[%s6674_s1 + $0x7d4] ss:$8 sps:$4 sm:$0xff]  }
 0x1a0   : > { %2065 = vmatprep.subr.bf16.mxu0 %v4507_v42  ;;  %2446 = vmatprep.subr.bf16.mxu1 %v4507_v42  ;;  %v2398_v42 = vpack.c.bf16 %v4057_v40, %v4057_v40 }
 0x1a3   : > { %2066 = vmatpush1.bf16.msra.mxu0 %v4509_v43  ;;  %2447 = vmatpush1.bf16.msra.mxu1 %v4509_v43  ;;  %v4064_v43 = vld [vmem:[%s4917_s14 + $0x68] sm:$0x1e] }
 0x1a4   : > { %2067 = vmatprep.subr.bf16.mxu0 %v4510_v44  ;;  %2448 = vmatprep.subr.bf16.mxu1 %v4510_v44  ;;  %v4575_v44 = vld [vmem:[%s6674_s1 + $0x7d0] ss:$8 sps:$4 sm:$0xff]  }
 0x1a7   : > { %2068 = vmatpush1.bf16.msra.mxu0 %v4512_v45  ;;  %2449 = vmatpush1.bf16.msra.mxu1 %v4512_v45  ;;  %v4576_v45 = vld [vmem:[%s6674_s1 + $0x7e4] ss:$8 sps:$4 sm:$0xff]  }
 0x1a8   : > { %2069 = vmatprep.subr.bf16.mxu0 %v4513_v47  ;;  %2450 = vmatprep.subr.bf16.mxu1 %v4513_v47  ;;  %v2778_v47 = vpack.c.bf16 %v4064_v43, %v4064_v43  ;;  %v4618_v43 = vld [vmem:[%s6674_s1 + $0x304] ss:$8 sps:$4 sm:$0xff]  }
 0x1aa   : > { %v2789_v56 = vshrl.u32 %v2778_v47, 16 }
 0x1ab   : > { %2070 = vmatpush1.bf16.msra.mxu0 %v4515_v48  ;;  %2451 = vmatpush1.bf16.msra.mxu1 %v4515_v48  ;;  %v2417_v48 = vshll.u32 %v2398_v42, 16 }
 0x1ac   : > { %2071 = vmatprep.subr.bf16.mxu0 %v4516_v49  ;;  %2452 = vmatprep.subr.bf16.mxu1 %v4516_v49  ;;  %v4578_v49 = vld [vmem:[%s6674_s1 + $0x7e0] ss:$8 sps:$4 sm:$0xff]  }
 0x1af   : > { %2072 = vmatpush1.bf16.msra.mxu0 %v4518_v52  ;;  %2453 = vmatpush1.bf16.msra.mxu1 %v4518_v52  ;;  %v4579_v52 = vld [vmem:[%s6674_s1 + $0x7f4] ss:$8 sps:$4 sm:$0xff]  }
 0x1b0   : > { %2073 = vmatprep.subr.bf16.mxu0 %v4519_v53  ;;  %2454 = vmatprep.subr.bf16.mxu1 %v4519_v53  ;;  %v2791_v53 = vshll.u32 %v2778_v47, 16  ;;  %v4620_v47 = vld [vmem:[%s6674_s1 + $0x314] ss:$8 sps:$4 sm:$0xff]  }
 0x1b3   : > { %2074 = vmatpush1.bf16.msra.mxu0 %v4521_v27  ;;  %2455 = vmatpush1.bf16.msra.mxu1 %v4521_v27  ;;  %v2415_v27 = vshrl.u32 %v2398_v42, 16  ;;  %v4617_v42 = vld [vmem:[%s6674_s1 + $0x2f0] ss:$8 sps:$4 sm:$0xff]  }
 0x1b4   : > { %2075 = vmatprep.subr.bf16.mxu0 %v4522_v54  ;;  %2456 = vmatprep.subr.bf16.mxu1 %v4522_v54  ;;  %v2419_v54 = vrot.slane %v2417_v48, 1  ;;  %v4622_v48 = vld [vmem:[%s6674_s1 + $0x324] ss:$8 sps:$4 sm:$0xff]  }
 0x1b6   : > { %v5731_v58 = vor.u32 %v2419_v54, %v2415_v27  ;;  %v4627_v27 = vld [vmem:[%s6674_s1 + $0x340] ss:$8 sps:$4 sm:$0xff]   ;;  %v4628_v54 = vld [vmem:[%s6674_s1 + $0x354] ss:$8 sps:$4 sm:$0xff]  }
 0x1b7   : > { %2076 = vmatpush1.bf16.msra.mxu0 %v4524_v34  ;;  %2457 = vmatpush1.bf16.msra.mxu1 %v4524_v34  ;;  %v4581_v34 = vld [vmem:[%s6674_s1 + $0x7f0] ss:$8 sps:$4 sm:$0xff]  }
 0x1b8   : > { %2077 = vmatprep.subr.bf16.mxu0 %v4525_v57  ;;  %2458 = vmatprep.subr.bf16.mxu1 %v4525_v57  ;;  %v2793_v57 = vrot.slane %v2791_v53, 1  ;;  %v4626_v53 = vld [vmem:[%s6674_s1 + $0x344] ss:$8 sps:$4 sm:$0xff]  }
 0x1bb   : > { %2078 = vmatpush1.bf16.msra.mxu0 %v4527_v60  ;;  %2459 = vmatpush1.bf16.msra.mxu1 %v4527_v60  ;;  %v5736_v60 = vor.u32 %v2793_v57, %v2789_v56  ;;  %v4630_v56 = vld [vmem:[%s6674_s1 + $0x364] ss:$8 sps:$4 sm:$0xff]   ;;  %v4631_v57 = vld [vmem:[%s6674_s1 + $0x360] ss:$8 sps:$4 sm:$0xff]  }
 0x1bc   : > { %2079 = vmatprep.subr.bf16.mxu0 %v4528_v61  ;;  %2460 = vmatprep.subr.bf16.mxu1 %v4528_v61  ;;  %v4587_v61 = vld [vmem:[%s6674_s1 + $0x200] ss:$8 sps:$4 sm:$0xff]  }
 0x1bf   : > { %2080 = vmatpush1.bf16.msra.mxu0 %v4530_v0  ;;  %2461 = vmatpush1.bf16.msra.mxu1 %v4530_v0  ;;  %v4591_v0 = vld [vmem:[%s6674_s1 + $0x220] ss:$8 sps:$4 sm:$0xff]  }
 0x1c0   : > { %2081 = vmatprep.subr.bf16.mxu0 %v4531_v1  ;;  %2462 = vmatprep.subr.bf16.mxu1 %v4531_v1  ;;  %v4593_v1 = vld [vmem:[%s6674_s1 + $0x230] ss:$8 sps:$4 sm:$0xff]  }
 0x1c3   : > { %2082 = vmatpush1.bf16.msra.mxu0 %v4533_v7  ;;  %2463 = vmatpush1.bf16.msra.mxu1 %v4533_v7  ;;  %v4597_v7 = vld [vmem:[%s6674_s1 + $0x250] ss:$8 sps:$4 sm:$0xff]  }
 0x1c4   : > { %2092 = vmatprep.subr.bf16.mxu0 %v4534_v9  ;;  %2473 = vmatprep.subr.bf16.mxu1 %v4534_v9  ;;  %v4598_v9 = vld [vmem:[%s6674_s1 + $0x264] ss:$8 sps:$4 sm:$0xff]  }
 0x1c6   : > { %2084 = vmatmul.mubr.bf16.vlgmr.msra.gmra.mrb[0].mxu0 %v4994_v2  ;;  %2465 = vmatmul.mubr.bf16.vlgmr.msra.gmra.mrb[0].mxu1 %v5628_v13  ;;  %v4542_v2 = vld [vmem:[%s6674_s1 + $0x720] ss:$8 sps:$4 sm:$0xff]  }
 0x1c7   : > { %2093 = vmatpush1.bf16.msra.mxu0 %v4536_v14  ;;  %2474 = vmatpush1.bf16.msra.mxu1 %v4536_v14  ;;  %v4601_v14 = vld [vmem:[%s6674_s1 + $0x270] ss:$8 sps:$4 sm:$0xff]  }
 0x1c8   : > { %2094 = vmatprep.subr.bf16.mxu0 %v4537_v15  ;;  %2475 = vmatprep.subr.bf16.mxu1 %v4537_v15  ;;  %v4602_v15 = vld [vmem:[%s6674_s1 + $0x284] ss:$8 sps:$4 sm:$0xff]  }
 0x1c9   : > { %2124 = vmatprep.mubr.bf16.mxu0 %v5002_v6  ;;  %2505 = vmatprep.mubr.bf16.mxu1 %v5636_v16  ;;  %v4545_v6 = vld [vmem:[%s6674_s1 + $0x730] ss:$8 sps:$4 sm:$0xff]  }
 0x1cb   : > { %2095 = vmatpush1.bf16.msra.mxu0 %v4539_v55  ;;  %2476 = vmatpush1.bf16.msra.mxu1 %v4539_v55  ;;  %v4603_v55 = vld [vmem:[%s6674_s1 + $0x280] ss:$8 sps:$4 sm:$0xff]  }
 0x1cc   : > { %2096 = vmatprep.subr.bf16.mxu0 %v4540_v17  ;;  %2477 = vmatprep.subr.bf16.mxu1 %v4540_v17  ;;  %v4604_v17 = vld [vmem:[%s6674_s1 + $0x294] ss:$8 sps:$4 sm:$0xff]  }
 0x1cf   : > { %2097 = vmatpush1.bf16.msra.mxu0 %v4542_v2  ;;  %2478 = vmatpush1.bf16.msra.mxu1 %v4542_v2  ;;  %v4605_v2 = vld [vmem:[%s6674_s1 + $0x290] ss:$8 sps:$4 sm:$0xff]  }
 0x1d0   : > { %2098 = vmatprep.subr.bf16.mxu0 %v4543_v18  ;;  %2479 = vmatprep.subr.bf16.mxu1 %v4543_v18  ;;  %v4606_v18 = vld [vmem:[%s6674_s1 + $0x2a4] ss:$8 sps:$4 sm:$0xff]  }
 0x1d3   : > { %2099 = vmatpush1.bf16.msra.mxu0 %v4545_v6  ;;  %2480 = vmatpush1.bf16.msra.mxu1 %v4545_v6  ;;  %v4607_v6 = vld [vmem:[%s6674_s1 + $0x2a0] ss:$8 sps:$4 sm:$0xff]  }
 0x1d4   : > { %2100 = vmatprep.subr.bf16.mxu0 %v4546_v19  ;;  %2481 = vmatprep.subr.bf16.mxu1 %v4546_v19  ;;  %v4608_v19 = vld [vmem:[%s6674_s1 + $0x2b4] ss:$8 sps:$4 sm:$0xff]  }
 0x1d7   : > { %2101 = vmatpush1.bf16.msra.mxu0 %v4548_v20  ;;  %2482 = vmatpush1.bf16.msra.mxu1 %v4548_v20  ;;  %v4609_v20 = vld [vmem:[%s6674_s1 + $0x2b0] ss:$8 sps:$4 sm:$0xff]  }
 0x1d8   : > { %2102 = vmatprep.subr.bf16.mxu0 %v4549_v21  ;;  %2483 = vmatprep.subr.bf16.mxu1 %v4549_v21  ;;  %v4063_v21 = vld [vmem:[%s4917_s14 + $0x60] sm:$0x1e] }
 0x1db   : > { %2103 = vmatpush1.bf16.msra.mxu0 %v4551_v22  ;;  %2484 = vmatpush1.bf16.msra.mxu1 %v4551_v22  ;;  %v4610_v22 = vld [vmem:[%s6674_s1 + $0x2c4] ss:$8 sps:$4 sm:$0xff]  }
 0x1dc   : > { %2104 = vmatprep.subr.bf16.mxu0 %v4552_v23  ;;  %2485 = vmatprep.subr.bf16.mxu1 %v4552_v23  ;;  %v2777_v23 = vpack.c.bf16 %v4063_v21, %v4063_v21  ;;  %v4649_v21 = vld [vmem:[%s6674_s1 + $0x3f0] ss:$8 sps:$4 sm:$0xff]  }
 0x1df   : > { %2105 = vmatpush1.bf16.msra.mxu0 %v4554_v24  ;;  %2486 = vmatpush1.bf16.msra.mxu1 %v4554_v24  ;;  %v4066_v24 = vld [vmem:[%s4917_s14 + $0x78] sm:$0x1e] }
 0x1e0   : > { %2106 = vmatprep.subr.bf16.mxu0 %v4555_v25  ;;  %2487 = vmatprep.subr.bf16.mxu1 %v4555_v25  ;;  %v4611_v25 = vld [vmem:[%s6674_s1 + $0x2c0] ss:$8 sps:$4 sm:$0xff]  }
 0x1e3   : > { %2107 = vmatpush1.bf16.msra.mxu0 %v4557_v29  ;;  %2488 = vmatpush1.bf16.msra.mxu1 %v4557_v29  ;;  %v4612_v29 = vld [vmem:[%s6674_s1 + $0x2d4] ss:$8 sps:$4 sm:$0xff]  }
 0x1e4   : > { %2108 = vmatprep.subr.bf16.mxu0 %v4558_v30  ;;  %2489 = vmatprep.subr.bf16.mxu1 %v4558_v30  ;;  %v2780_v30 = vpack.c.bf16 %v4066_v24, %v4066_v24  ;;  %v4651_v24 = vld [vmem:[%s6674_s1] ss:$8 sps:$4 sm:$0xff]  }
 0x1e7   : > { %2109 = vmatpush1.bf16.msra.mxu0 %v4560_v32  ;;  %2490 = vmatpush1.bf16.msra.mxu1 %v4560_v32  ;;  %v2784_v32 = vshll.u32 %v2777_v23, 16 }
 0x1e8   : > { %2110 = vmatprep.subr.bf16.mxu0 %v4561_v33  ;;  %2491 = vmatprep.subr.bf16.mxu1 %v4561_v33  ;;  %v4613_v33 = vld [vmem:[%s6674_s1 + $0x2d0] ss:$8 sps:$4 sm:$0xff]  }
 0x1eb   : > { %2111 = vmatpush1.bf16.msra.mxu0 %v4563_v8  ;;  %2492 = vmatpush1.bf16.msra.mxu1 %v4563_v8  ;;  %v4614_v8 = vld [vmem:[%s6674_s1 + $0x2e4] ss:$8 sps:$4 sm:$0xff]  }
 0x1ec   : > { %2112 = vmatprep.subr.bf16.mxu0 %v4564_v35  ;;  %2493 = vmatprep.subr.bf16.mxu1 %v4564_v35  ;;  %v2805_v35 = vshll.u32 %v2780_v30, 16 }
 0x1ee   : > { %v2807_v40 = vrot.slane %v2805_v35, 1  ;;  %v4660_v35 = vld [vmem:[%s6674_s1 + $0x54] ss:$8 sps:$4 sm:$0xff]  }
 0x1ef   : > { %2113 = vmatpush1.bf16.msra.mxu0 %v4566_v28  ;;  %2494 = vmatpush1.bf16.msra.mxu1 %v4566_v28  ;;  %v2782_v28 = vshrl.u32 %v2777_v23, 16 }
 0x1f0   : > { %2114 = vmatprep.subr.bf16.mxu0 %v4567_v36  ;;  %2495 = vmatprep.subr.bf16.mxu1 %v4567_v36  ;;  %v2786_v36 = vrot.slane %v2784_v32, 1  ;;  %v4657_v32 = vld [vmem:[%s6674_s1 + $0x30] ss:$8 sps:$4 sm:$0xff]  }
 0x1f3   : > { %2115 = vmatpush1.bf16.msra.mxu0 %v4569_v37  ;;  %2496 = vmatpush1.bf16.msra.mxu1 %v4569_v37  ;;  %v4615_v37 = vld [vmem:[%s6674_s1 + $0x2e0] ss:$8 sps:$4 sm:$0xff]  }
 0x1f4   : > { %2116 = vmatprep.subr.bf16.mxu0 %v4570_v38  ;;  %2497 = vmatprep.subr.bf16.mxu1 %v4570_v38  ;;  %v4616_v38 = vld [vmem:[%s6674_s1 + $0x2f4] ss:$8 sps:$4 sm:$0xff]  }
 0x1f7   : > { %2117 = vmatpush1.bf16.msra.mxu0 %v4572_v39  ;;  %2498 = vmatpush1.bf16.msra.mxu1 %v4572_v39  ;;  %v2803_v39 = vshrl.u32 %v2780_v30, 16  ;;  %v4655_v30 = vld [vmem:[%s6674_s1 + $0x20] ss:$8 sps:$4 sm:$0xff]  }
 0x1f8   : > { %2118 = vmatprep.subr.bf16.mxu0 %v4573_v41  ;;  %2499 = vmatprep.subr.bf16.mxu1 %v4573_v41  ;;  %v5834_v41 = vor.u32 %v2786_v36, %v2782_v28  ;;  %v4661_v28 = vld [vmem:[%s6674_s1 + $0x50] ss:$8 sps:$4 sm:$0xff]   ;;  %v4662_v36 = vld [vmem:[%s6674_s1 + $0x64] ss:$8 sps:$4 sm:$0xff]  }
 0x1fb   : > { %2119 = vmatpush1.bf16.msra.mxu0 %v4575_v44  ;;  %2500 = vmatpush1.bf16.msra.mxu1 %v4575_v44  ;;  %v5842_v44 = vor.u32 %v2807_v40, %v2803_v39  ;;  %v4665_v39 = vld [vmem:[%s6674_s1 + $0x70] ss:$8 sps:$4 sm:$0xff]   ;;  %v4666_v40 = vld [vmem:[%s6674_s1 + $0x84] ss:$8 sps:$4 sm:$0xff]  }
 0x1fc   : > { %2120 = vmatprep.subr.bf16.mxu0 %v4576_v45  ;;  %2501 = vmatprep.subr.bf16.mxu1 %v4576_v45  ;;  %v4619_v45 = vld [vmem:[%s6674_s1 + $0x300] ss:$8 sps:$4 sm:$0xff]  }
 0x1ff   : > { %2121 = vmatpush1.bf16.msra.mxu0 %v4578_v49  ;;  %2502 = vmatpush1.bf16.msra.mxu1 %v4578_v49  ;;  %v4623_v49 = vld [vmem:[%s6674_s1 + $0x320] ss:$8 sps:$4 sm:$0xff]  }
 0x200   : > { %2122 = vmatprep.subr.bf16.mxu0 %v4579_v52  ;;  %2503 = vmatprep.subr.bf16.mxu1 %v4579_v52  ;;  %v4625_v52 = vld [vmem:[%s6674_s1 + $0x330] ss:$8 sps:$4 sm:$0xff]  }
 0x203   : > { %2123 = vmatpush1.bf16.msra.mxu0 %v4581_v34  ;;  %2504 = vmatpush1.bf16.msra.mxu1 %v4581_v34  ;;  %v4629_v34 = vld [vmem:[%s6674_s1 + $0x350] ss:$8 sps:$4 sm:$0xff]  }
 0x204   : > { %2516 = vmatprep.subr.bf16.mxu0 %v4586_v59  ;;  %2897 = vmatprep.subr.bf16.mxu1 %v4586_v59  ;;  %v4632_v59 = vld [vmem:[%s6674_s1 + $0x374] ss:$8 sps:$4 sm:$0xff]  }
 0x206   : > { %2125 = vmatmul.mubr.bf16.vlgmr.msra.gmra.mrb[0].mxu0 %v5100_v51  ;;  %2506 = vmatmul.mubr.bf16.vlgmr.msra.gmra.mrb[0].mxu1 %v5731_v58  ;;  %v4589_v51 = vld [vmem:[%s6674_s1 + $0x210] ss:$8 sps:$4 sm:$0xff]  }
 0x207   : > { %2517 = vmatpush1.bf16.msra.mxu0 %v4587_v61  ;;  %2898 = vmatpush1.bf16.msra.mxu1 %v4587_v61  ;;  %v4633_v61 = vld [vmem:[%s6674_s1 + $0x370] ss:$8 sps:$4 sm:$0xff]  }
 0x208   : > { %2518 = vmatprep.subr.bf16.mxu0 %v4588_v62  ;;  %2899 = vmatprep.subr.bf16.mxu1 %v4588_v62  ;;  %v4634_v62 = vld [vmem:[%s6674_s1 + $0x384] ss:$8 sps:$4 sm:$0xff]  }
 0x209   : > { %2548 = vmatprep.mubr.bf16.mxu0 %v5530_v31  ;;  %2929 = vmatprep.mubr.bf16.mxu1 %v5736_v60  ;;  %v4592_v31 = vld [vmem:[%s6674_s1 + $0x234] ss:$8 sps:$4 sm:$0xff]  }
 0x20b   : > { %2519 = vmatpush1.bf16.msra.mxu0 %v4589_v51  ;;  %2900 = vmatpush1.bf16.msra.mxu1 %v4589_v51  ;;  %v4635_v51 = vld [vmem:[%s6674_s1 + $0x380] ss:$8 sps:$4 sm:$0xff]  }
 0x20c   : > { %2520 = vmatprep.subr.bf16.mxu0 %v4590_v63  ;;  %2901 = vmatprep.subr.bf16.mxu1 %v4590_v63  ;;  %v4636_v63 = vld [vmem:[%s6674_s1 + $0x394] ss:$8 sps:$4 sm:$0xff]  }
 0x20f   : > { %2521 = vmatpush1.bf16.msra.mxu0 %v4591_v0  ;;  %2902 = vmatpush1.bf16.msra.mxu1 %v4591_v0  ;;  %v4637_v0 = vld [vmem:[%s6674_s1 + $0x390] ss:$8 sps:$4 sm:$0xff]  }
 0x210   : > { %2522 = vmatprep.subr.bf16.mxu0 %v4592_v31  ;;  %2903 = vmatprep.subr.bf16.mxu1 %v4592_v31  ;;  %v4638_v31 = vld [vmem:[%s6674_s1 + $0x3a4] ss:$8 sps:$4 sm:$0xff]  }
 0x213   : > { %2523 = vmatpush1.bf16.msra.mxu0 %v4593_v1  ;;  %2904 = vmatpush1.bf16.msra.mxu1 %v4593_v1  ;;  %v4639_v1 = vld [vmem:[%s6674_s1 + $0x3a0] ss:$8 sps:$4 sm:$0xff]  }
 0x214   : > { %2524 = vmatprep.subr.bf16.mxu0 %v4594_v3  ;;  %2905 = vmatprep.subr.bf16.mxu1 %v4594_v3  ;;  %v4640_v3 = vld [vmem:[%s6674_s1 + $0x3b4] ss:$8 sps:$4 sm:$0xff]  }
 0x217   : > { %2525 = vmatpush1.bf16.msra.mxu0 %v4595_v4  ;;  %2906 = vmatpush1.bf16.msra.mxu1 %v4595_v4  ;;  %v4641_v4 = vld [vmem:[%s6674_s1 + $0x3b0] ss:$8 sps:$4 sm:$0xff]  }
 0x218   : > { %2526 = vmatprep.subr.bf16.mxu0 %v4596_v5  ;;  %2907 = vmatprep.subr.bf16.mxu1 %v4596_v5  ;;  %v4065_v5 = vld [vmem:[%s4917_s14 + $0x70] sm:$0x1e] }
 0x21b   : > { %2527 = vmatpush1.bf16.msra.mxu0 %v4597_v7  ;;  %2908 = vmatpush1.bf16.msra.mxu1 %v4597_v7  ;;  %v4642_v7 = vld [vmem:[%s6674_s1 + $0x3c4] ss:$8 sps:$4 sm:$0xff]  }
 0x21c   : > { %2528 = vmatprep.subr.bf16.mxu0 %v4598_v9  ;;  %2909 = vmatprep.subr.bf16.mxu1 %v4598_v9  ;;  %v2779_v9 = vpack.c.bf16 %v4065_v5, %v4065_v5  ;;  %v4690_v5 = vld [vmem:[%s6674_s1 + $0x144] ss:$8 sps:$4 sm:$0xff]  }
 0x21f   : > { %2529 = vmatpush1.bf16.msra.mxu0 %v4599_v10  ;;  %2910 = vmatpush1.bf16.msra.mxu1 %v4599_v10  ;;  %v4643_v10 = vld [vmem:[%s6674_s1 + $0x3c0] ss:$8 sps:$4 sm:$0xff]  }
 0x220   : > { %2530 = vmatprep.subr.bf16.mxu0 %v4600_v11  ;;  %2911 = vmatprep.subr.bf16.mxu1 %v4600_v11  ;;  %v4644_v11 = vld [vmem:[%s6674_s1 + $0x3d4] ss:$8 sps:$4 sm:$0xff]  }
 0x223   : > { %2531 = vmatpush1.bf16.msra.mxu0 %v4601_v14  ;;  %2912 = vmatpush1.bf16.msra.mxu1 %v4601_v14  ;;  %v2798_v14 = vshll.u32 %v2779_v9, 16 }
 0x224   : > { %2532 = vmatprep.subr.bf16.mxu0 %v4602_v15  ;;  %2913 = vmatprep.subr.bf16.mxu1 %v4602_v15  ;;  %v4645_v15 = vld [vmem:[%s6674_s1 + $0x3d0] ss:$8 sps:$4 sm:$0xff]  }
 0x227   : > { %2533 = vmatpush1.bf16.msra.mxu0 %v4603_v55  ;;  %2914 = vmatpush1.bf16.msra.mxu1 %v4603_v55  ;;  %v4646_v55 = vld [vmem:[%s6674_s1 + $0x3e4] ss:$8 sps:$4 sm:$0xff]  }
 0x228   : > { %2534 = vmatprep.subr.bf16.mxu0 %v4604_v17  ;;  %2915 = vmatprep.subr.bf16.mxu1 %v4604_v17  ;;  %v2796_v17 = vshrl.u32 %v2779_v9, 16  ;;  %v4692_v9 = vld [vmem:[%s6674_s1 + $0x154] ss:$8 sps:$4 sm:$0xff]  }
 0x22b   : > { %2535 = vmatpush1.bf16.msra.mxu0 %v4605_v2  ;;  %2916 = vmatpush1.bf16.msra.mxu1 %v4605_v2  ;;  %v2800_v2 = vrot.slane %v2798_v14, 1 }
 0x22c   : > { %2536 = vmatprep.subr.bf16.mxu0 %v4606_v18  ;;  %2917 = vmatprep.subr.bf16.mxu1 %v4606_v18  ;;  %v4647_v18 = vld [vmem:[%s6674_s1 + $0x3e0] ss:$8 sps:$4 sm:$0xff]  }
 0x22f   : > { %2537 = vmatpush1.bf16.msra.mxu0 %v4607_v6  ;;  %2918 = vmatpush1.bf16.msra.mxu1 %v4607_v6  ;;  %v4648_v6 = vld [vmem:[%s6674_s1 + $0x3f4] ss:$8 sps:$4 sm:$0xff]  }
 0x230   : > { %2538 = vmatprep.subr.bf16.mxu0 %v4608_v19  ;;  %2919 = vmatprep.subr.bf16.mxu1 %v4608_v19  ;;  %v5939_v19 = vor.u32 %v2800_v2, %v2796_v17 }
 0x233   : > { %2539 = vmatpush1.bf16.msra.mxu0 %v4609_v20  ;;  %2920 = vmatpush1.bf16.msra.mxu1 %v4609_v20  ;;  %v4060_v20 = vld [vmem:[%s4917_s14 + $0x68] sm:$0xf] }
 0x234   : > { %2540 = vmatprep.subr.bf16.mxu0 %v4610_v22  ;;  %2921 = vmatprep.subr.bf16.mxu1 %v4610_v22  ;;  %v4650_v22 = vld [vmem:[%s6674_s1 + $0x4] ss:$8 sps:$4 sm:$0xff]   ;;  %v5948_v23 = vpack.c.bf16 %v4060_v20, %v4060_v20 }
 0x237   : > { %2541 = vmatpush1.bf16.msra.mxu0 %v4611_v25  ;;  %2922 = vmatpush1.bf16.msra.mxu1 %v4611_v25  ;;  %v4652_v25 = vld [vmem:[%s6674_s1 + $0x14] ss:$8 sps:$4 sm:$0xff]  }
 0x238   : > { %2542 = vmatprep.subr.bf16.mxu0 %v4612_v29  ;;  %2923 = vmatprep.subr.bf16.mxu1 %v4612_v29  ;;  %v4654_v29 = vld [vmem:[%s6674_s1 + $0x24] ss:$8 sps:$4 sm:$0xff]  }
 0x23b   : > { %2543 = vmatpush1.bf16.msra.mxu0 %v4613_v33  ;;  %2924 = vmatpush1.bf16.msra.mxu1 %v4613_v33  ;;  %v4658_v33 = vld [vmem:[%s6674_s1 + $0x44] ss:$8 sps:$4 sm:$0xff]  }
 0x23c   : > { %2544 = vmatprep.subr.bf16.mxu0 %v4614_v8  ;;  %2925 = vmatprep.subr.bf16.mxu1 %v4614_v8  ;;  %v4659_v8 = vld [vmem:[%s6674_s1 + $0x40] ss:$8 sps:$4 sm:$0xff]  }
 0x23f   : > { %2545 = vmatpush1.bf16.msra.mxu0 %v4615_v37  ;;  %2926 = vmatpush1.bf16.msra.mxu1 %v4615_v37  ;;  %v4663_v37 = vld [vmem:[%s6674_s1 + $0x60] ss:$8 sps:$4 sm:$0xff]  }
 0x240   : > { %2546 = vmatprep.subr.bf16.mxu0 %v4616_v38  ;;  %2927 = vmatprep.subr.bf16.mxu1 %v4616_v38  ;;  %v4664_v38 = vld [vmem:[%s6674_s1 + $0x74] ss:$8 sps:$4 sm:$0xff]  }
 0x243   : > { %2547 = vmatpush1.bf16.msra.mxu0 %v4617_v42  ;;  %2928 = vmatpush1.bf16.msra.mxu1 %v4617_v42  ;;  %v4667_v42 = vld [vmem:[%s6674_s1 + $0x80] ss:$8 sps:$4 sm:$0xff]  }
 0x244   : > { %2557 = vmatprep.subr.bf16.mxu0 %v4618_v43  ;;  %2938 = vmatprep.subr.bf16.mxu1 %v4618_v43  ;;  %v4668_v43 = vld [vmem:[%s6674_s1 + $0x94] ss:$8 sps:$4 sm:$0xff]  }
 0x246   : > { %2549 = vmatmul.mubr.bf16.vlgmr.msra.gmra.mrb[4].mxu0 %v5628_v13  ;;  %2930 = vmatmul.mubr.bf16.vlgmr.msra.gmra.mrb[4].mxu1 %v5834_v41  ;;  %v4621_v13 = vld [vmem:[%s6674_s1 + $0x310] ss:$8 sps:$4 sm:$0xff]  }
 0x247   : > { %2558 = vmatpush1.bf16.msra.mxu0 %v4619_v45  ;;  %2939 = vmatpush1.bf16.msra.mxu1 %v4619_v45  ;;  %v4669_v45 = vld [vmem:[%s6674_s1 + $0x90] ss:$8 sps:$4 sm:$0xff]  }
 0x248   : > { %2559 = vmatprep.subr.bf16.mxu0 %v4620_v47  ;;  %2940 = vmatprep.subr.bf16.mxu1 %v4620_v47  ;;  %v4670_v47 = vld [vmem:[%s6674_s1 + $0xa4] ss:$8 sps:$4 sm:$0xff]  }
 0x249   : > { %2589 = vmatprep.mubr.bf16.mxu0 %v5636_v16  ;;  %2970 = vmatprep.mubr.bf16.mxu1 %v5842_v44  ;;  %v4624_v16 = vld [vmem:[%s6674_s1 + $0x334] ss:$8 sps:$4 sm:$0xff]  }
 0x24b   : > { %2560 = vmatpush1.bf16.msra.mxu0 %v4621_v13  ;;  %2941 = vmatpush1.bf16.msra.mxu1 %v4621_v13  ;;  %v4671_v13 = vld [vmem:[%s6674_s1 + $0xa0] ss:$8 sps:$4 sm:$0xff]  }
 0x24c   : > { %2561 = vmatprep.subr.bf16.mxu0 %v4622_v48  ;;  %2942 = vmatprep.subr.bf16.mxu1 %v4622_v48  ;;  %v4672_v48 = vld [vmem:[%s6674_s1 + $0xb4] ss:$8 sps:$4 sm:$0xff]  }
 0x24f   : > { %2562 = vmatpush1.bf16.msra.mxu0 %v4623_v49  ;;  %2943 = vmatpush1.bf16.msra.mxu1 %v4623_v49  ;;  %v4673_v49 = vld [vmem:[%s6674_s1 + $0xb0] ss:$8 sps:$4 sm:$0xff]  }
 0x250   : > { %2563 = vmatprep.subr.bf16.mxu0 %v4624_v16  ;;  %2944 = vmatprep.subr.bf16.mxu1 %v4624_v16  ;;  %v4674_v16 = vld [vmem:[%s6674_s1 + $0xc4] ss:$8 sps:$4 sm:$0xff]  }
 0x253   : > { %2564 = vmatpush1.bf16.msra.mxu0 %v4625_v52  ;;  %2945 = vmatpush1.bf16.msra.mxu1 %v4625_v52  ;;  %v4675_v52 = vld [vmem:[%s6674_s1 + $0xc0] ss:$8 sps:$4 sm:$0xff]  }
 0x254   : > { %2565 = vmatprep.subr.bf16.mxu0 %v4626_v53  ;;  %2946 = vmatprep.subr.bf16.mxu1 %v4626_v53  ;;  %v4676_v53 = vld [vmem:[%s6674_s1 + $0xd4] ss:$8 sps:$4 sm:$0xff]  }
 0x257   : > { %2566 = vmatpush1.bf16.msra.mxu0 %v4627_v27  ;;  %2947 = vmatpush1.bf16.msra.mxu1 %v4627_v27  ;;  %v4677_v27 = vld [vmem:[%s6674_s1 + $0xd0] ss:$8 sps:$4 sm:$0xff]  }
 0x258   : > { %2567 = vmatprep.subr.bf16.mxu0 %v4628_v54  ;;  %2948 = vmatprep.subr.bf16.mxu1 %v4628_v54  ;;  %v4678_v54 = vld [vmem:[%s6674_s1 + $0xe4] ss:$8 sps:$4 sm:$0xff]  }
 0x25b   : > { %2568 = vmatpush1.bf16.msra.mxu0 %v4629_v34  ;;  %2949 = vmatpush1.bf16.msra.mxu1 %v4629_v34  ;;  %v4679_v34 = vld [vmem:[%s6674_s1 + $0xe0] ss:$8 sps:$4 sm:$0xff]  }
 0x25c   : > { %2569 = vmatprep.subr.bf16.mxu0 %v4630_v56  ;;  %2950 = vmatprep.subr.bf16.mxu1 %v4630_v56  ;;  %v4059_v56 = vld [vmem:[%s4917_s14 + $0x60] sm:$0xf] }
 0x25f   : > { %2570 = vmatpush1.bf16.msra.mxu0 %v4631_v57  ;;  %2951 = vmatpush1.bf16.msra.mxu1 %v4631_v57  ;;  %v4680_v57 = vld [vmem:[%s6674_s1 + $0xf4] ss:$8 sps:$4 sm:$0xff]  }
 0x260   : > { %2571 = vmatprep.subr.bf16.mxu0 %v4632_v59  ;;  %2952 = vmatprep.subr.bf16.mxu1 %v4632_v59  ;;  %v6045_v59 = vpack.c.bf16 %v4059_v56, %v4059_v56 }
 0x263   : > { %2572 = vmatpush1.bf16.msra.mxu0 %v4633_v61  ;;  %2953 = vmatpush1.bf16.msra.mxu1 %v4633_v61  ;;  %v4062_v61 = vld [vmem:[%s4917_s14 + $0x78] sm:$0xf] }
 0x264   : > { %2573 = vmatprep.subr.bf16.mxu0 %v4634_v62  ;;  %2954 = vmatprep.subr.bf16.mxu1 %v4634_v62  ;;  %v4681_v62 = vld [vmem:[%s6674_s1 + $0xf0] ss:$8 sps:$4 sm:$0xff]  }
 0x267   : > { %2574 = vmatpush1.bf16.msra.mxu0 %v4635_v51  ;;  %2955 = vmatpush1.bf16.msra.mxu1 %v4635_v51  ;;  %v4682_v51 = vld [vmem:[%s6674_s1 + $0x104] ss:$8 sps:$4 sm:$0xff]  }
 0x268   : > { %2575 = vmatprep.subr.bf16.mxu0 %v4636_v63  ;;  %2956 = vmatprep.subr.bf16.mxu1 %v4636_v63  ;;  %v6054_v63 = vpack.c.bf16 %v4062_v61, %v4062_v61 }
 0x26b   : > { %2576 = vmatpush1.bf16.msra.mxu0 %v4637_v0  ;;  %2957 = vmatpush1.bf16.msra.mxu1 %v4637_v0  ;;  %v4683_v0 = vld [vmem:[%s6674_s1 + $0x100] ss:$8 sps:$4 sm:$0xff]  }
 0x26c   : > { %2577 = vmatprep.subr.bf16.mxu0 %v4638_v31  ;;  %2958 = vmatprep.subr.bf16.mxu1 %v4638_v31  ;;  %v4684_v31 = vld [vmem:[%s6674_s1 + $0x114] ss:$8 sps:$4 sm:$0xff]  }
 0x26f   : > { %2578 = vmatpush1.bf16.msra.mxu0 %v4639_v1  ;;  %2959 = vmatpush1.bf16.msra.mxu1 %v4639_v1  ;;  %v4686_v1 = vld [vmem:[%s6674_s1 + $0x124] ss:$8 sps:$4 sm:$0xff]  }
 0x270   : > { %2579 = vmatprep.subr.bf16.mxu0 %v4640_v3  ;;  %2960 = vmatprep.subr.bf16.mxu1 %v4640_v3  ;;  %v4687_v3 = vld [vmem:[%s6674_s1 + $0x120] ss:$8 sps:$4 sm:$0xff]  }
 0x273   : > { %2580 = vmatpush1.bf16.msra.mxu0 %v4641_v4  ;;  %2961 = vmatpush1.bf16.msra.mxu1 %v4641_v4  ;;  %v4689_v4 = vld [vmem:[%s6674_s1 + $0x130] ss:$8 sps:$4 sm:$0xff]  }
 0x274   : > { %2581 = vmatprep.subr.bf16.mxu0 %v4642_v7  ;;  %2962 = vmatprep.subr.bf16.mxu1 %v4642_v7  ;;  %v4691_v7 = vld [vmem:[%s6674_s1 + $0x140] ss:$8 sps:$4 sm:$0xff]  }
 0x277   : > { %2582 = vmatpush1.bf16.msra.mxu0 %v4643_v10  ;;  %2963 = vmatpush1.bf16.msra.mxu1 %v4643_v10 }
 0x278   : > { %2583 = vmatprep.subr.bf16.mxu0 %v4644_v11  ;;  %2964 = vmatprep.subr.bf16.mxu1 %v4644_v11 }
 0x27b   : > { %2584 = vmatpush1.bf16.msra.mxu0 %v4645_v15  ;;  %2965 = vmatpush1.bf16.msra.mxu1 %v4645_v15 }
 0x27c   : > { %2585 = vmatprep.subr.bf16.mxu0 %v4646_v55  ;;  %2966 = vmatprep.subr.bf16.mxu1 %v4646_v55 }
 0x27f   : > { %2586 = vmatpush1.bf16.msra.mxu0 %v4647_v18  ;;  %2967 = vmatpush1.bf16.msra.mxu1 %v4647_v18 }
 0x280   : > { %2587 = vmatprep.subr.bf16.mxu0 %v4648_v6  ;;  %2968 = vmatprep.subr.bf16.mxu1 %v4648_v6 }
 0x283   : > { %2588 = vmatpush1.bf16.msra.mxu0 %v4649_v21  ;;  %2969 = vmatpush1.bf16.msra.mxu1 %v4649_v21 }
 0x284   : > { %2598 = vmatprep.subr.bf16.mxu0 %v4650_v22  ;;  %2979 = vmatprep.subr.bf16.mxu1 %v4650_v22 }
 0x286   : > { %2590 = vmatmul.mubr.bf16.vlgmr.msra.gmra.mrb[4].mxu0 %v5731_v58  ;;  %2971 = vmatmul.mubr.bf16.vlgmr.msra.gmra.mrb[4].mxu1 %v5939_v19  ;;  %v4653_v58 = vld [vmem:[%s6674_s1 + $0x10] ss:$8 sps:$4 sm:$0xff]  }
 0x287   : > { %2599 = vmatpush1.bf16.msra.mxu0 %v4651_v24  ;;  %2980 = vmatpush1.bf16.msra.mxu1 %v4651_v24 }
 0x288   : > { %2600 = vmatprep.subr.bf16.mxu0 %v4652_v25  ;;  %2981 = vmatprep.subr.bf16.mxu1 %v4652_v25 }
 0x289   : > { %2630 = vmatprep.mubr.bf16.mxu0 %v5319_v12  ;;  %3011 = vmatprep.mubr.bf16.mxu1 %v5948_v23  ;;  %v4656_v12 = vld [vmem:[%s6674_s1 + $0x34] ss:$8 sps:$4 sm:$0xff]  }
 0x28b   : > { %2601 = vmatpush1.bf16.msra.mxu0 %v4653_v58  ;;  %2982 = vmatpush1.bf16.msra.mxu1 %v4653_v58  ;;  %v4693_v58 = vld [vmem:[%s6674_s1 + $0x150] ss:$8 sps:$4 sm:$0xff]  }
 0x28c   : > { %2602 = vmatprep.subr.bf16.mxu0 %v4654_v29  ;;  %2983 = vmatprep.subr.bf16.mxu1 %v4654_v29 }
 0x28f   : > { %2603 = vmatpush1.bf16.msra.mxu0 %v4655_v30  ;;  %2984 = vmatpush1.bf16.msra.mxu1 %v4655_v30 }
 0x290   : > { %2604 = vmatprep.subr.bf16.mxu0 %v4656_v12  ;;  %2985 = vmatprep.subr.bf16.mxu1 %v4656_v12 }
 0x293   : > { %2605 = vmatpush1.bf16.msra.mxu0 %v4657_v32  ;;  %2986 = vmatpush1.bf16.msra.mxu1 %v4657_v32 }
 0x294   : > { %2606 = vmatprep.subr.bf16.mxu0 %v4658_v33  ;;  %2987 = vmatprep.subr.bf16.mxu1 %v4658_v33 }
 0x297   : > { %2607 = vmatpush1.bf16.msra.mxu0 %v4659_v8  ;;  %2988 = vmatpush1.bf16.msra.mxu1 %v4659_v8 }
 0x298   : > { %2608 = vmatprep.subr.bf16.mxu0 %v4660_v35  ;;  %2989 = vmatprep.subr.bf16.mxu1 %v4660_v35  ;;  %v4694_v35 = vld [vmem:[%s6674_s1 + $0x164] ss:$8 sps:$4 sm:$0xff]  }
 0x29b   : > { %2609 = vmatpush1.bf16.msra.mxu0 %v4661_v28  ;;  %2990 = vmatpush1.bf16.msra.mxu1 %v4661_v28 }
 0x29c   : > { %2610 = vmatprep.subr.bf16.mxu0 %v4662_v36  ;;  %2991 = vmatprep.subr.bf16.mxu1 %v4662_v36 }
 0x29f   : > { %2611 = vmatpush1.bf16.msra.mxu0 %v4663_v37  ;;  %2992 = vmatpush1.bf16.msra.mxu1 %v4663_v37 }
 0x2a0   : > { %2612 = vmatprep.subr.bf16.mxu0 %v4664_v38  ;;  %2993 = vmatprep.subr.bf16.mxu1 %v4664_v38 }
 0x2a3   : > { %2613 = vmatpush1.bf16.msra.mxu0 %v4665_v39  ;;  %2994 = vmatpush1.bf16.msra.mxu1 %v4665_v39 }
 0x2a4   : > { %2614 = vmatprep.subr.bf16.mxu0 %v4666_v40  ;;  %2995 = vmatprep.subr.bf16.mxu1 %v4666_v40 }
 0x2a7   : > { %2615 = vmatpush1.bf16.msra.mxu0 %v4667_v42  ;;  %2996 = vmatpush1.bf16.msra.mxu1 %v4667_v42 }
 0x2a8   : > { %2616 = vmatprep.subr.bf16.mxu0 %v4668_v43  ;;  %2997 = vmatprep.subr.bf16.mxu1 %v4668_v43 }
 0x2ab   : > { %2617 = vmatpush1.bf16.msra.mxu0 %v4669_v45  ;;  %2998 = vmatpush1.bf16.msra.mxu1 %v4669_v45 }
 0x2ac   : > { %2618 = vmatprep.subr.bf16.mxu0 %v4670_v47  ;;  %2999 = vmatprep.subr.bf16.mxu1 %v4670_v47 }
 0x2af   : > { %2619 = vmatpush1.bf16.msra.mxu0 %v4671_v13  ;;  %3000 = vmatpush1.bf16.msra.mxu1 %v4671_v13 }
 0x2b0   : > { %2620 = vmatprep.subr.bf16.mxu0 %v4672_v48  ;;  %3001 = vmatprep.subr.bf16.mxu1 %v4672_v48 }
 0x2b3   : > { %2621 = vmatpush1.bf16.msra.mxu0 %v4673_v49  ;;  %3002 = vmatpush1.bf16.msra.mxu1 %v4673_v49  ;;  %v4695_v49 = vld [vmem:[%s6674_s1 + $0x160] ss:$8 sps:$4 sm:$0xff]  }
 0x2b4   : > { %2622 = vmatprep.subr.bf16.mxu0 %v4674_v16  ;;  %3003 = vmatprep.subr.bf16.mxu1 %v4674_v16 }
 0x2b7   : > { %2623 = vmatpush1.bf16.msra.mxu0 %v4675_v52  ;;  %3004 = vmatpush1.bf16.msra.mxu1 %v4675_v52 }
 0x2b8   : > { %2624 = vmatprep.subr.bf16.mxu0 %v4676_v53  ;;  %3005 = vmatprep.subr.bf16.mxu1 %v4676_v53 }
 0x2bb   : > { %2625 = vmatpush1.bf16.msra.mxu0 %v4677_v27  ;;  %3006 = vmatpush1.bf16.msra.mxu1 %v4677_v27 }
 0x2bc   : > { %2626 = vmatprep.subr.bf16.mxu0 %v4678_v54  ;;  %3007 = vmatprep.subr.bf16.mxu1 %v4678_v54  ;;  %v4696_v54 = vld [vmem:[%s6674_s1 + $0x174] ss:$8 sps:$4 sm:$0xff]  }
 0x2bf   : > { %2627 = vmatpush1.bf16.msra.mxu0 %v4679_v34  ;;  %3008 = vmatpush1.bf16.msra.mxu1 %v4679_v34 }
 0x2c0   : > { %2628 = vmatprep.subr.bf16.mxu0 %v4680_v57  ;;  %3009 = vmatprep.subr.bf16.mxu1 %v4680_v57 }
 0x2c3   : > { %2629 = vmatpush1.bf16.msra.mxu0 %v4681_v62  ;;  %3010 = vmatpush1.bf16.msra.mxu1 %v4681_v62 }
 0x2c4   : > { %2639 = vmatprep.subr.bf16.mxu0 %v4682_v51  ;;  %3020 = vmatprep.subr.bf16.mxu1 %v4682_v51 }
 0x2c6   : > { %2631 = vmatmul.mubr.bf16.vlgmr.msra.gmra.mrb[4].mxu0 %v5415_v46  ;;  %3012 = vmatmul.mubr.bf16.vlgmr.msra.gmra.mrb[4].mxu1 %v6045_v59  ;;  %v4685_v46 = vld [vmem:[%s6674_s1 + $0x110] ss:$8 sps:$4 sm:$0xff]  }
 0x2c7   : > { %2640 = vmatpush1.bf16.msra.mxu0 %v4683_v0  ;;  %3021 = vmatpush1.bf16.msra.mxu1 %v4683_v0 }
 0x2c8   : > { %2641 = vmatprep.subr.bf16.mxu0 %v4684_v31  ;;  %3022 = vmatprep.subr.bf16.mxu1 %v4684_v31 }
 0x2c9   : > { %2671 = vmatprep.mubr.bf16.mxu0 %v5424_v50  ;;  %3052 = vmatprep.mubr.bf16.mxu1 %v6054_v63  ;;  %v4688_v50 = vld [vmem:[%s6674_s1 + $0x134] ss:$8 sps:$4 sm:$0xff]  }
 0x2cb   : > { %2642 = vmatpush1.bf16.msra.mxu0 %v4685_v46  ;;  %3023 = vmatpush1.bf16.msra.mxu1 %v4685_v46 }
 0x2cc   : > { %2643 = vmatprep.subr.bf16.mxu0 %v4686_v1  ;;  %3024 = vmatprep.subr.bf16.mxu1 %v4686_v1 }
 0x2cf   : > { %2644 = vmatpush1.bf16.msra.mxu0 %v4687_v3  ;;  %3025 = vmatpush1.bf16.msra.mxu1 %v4687_v3 }
 0x2d0   : > { %2645 = vmatprep.subr.bf16.mxu0 %v4688_v50  ;;  %3026 = vmatprep.subr.bf16.mxu1 %v4688_v50 }
 0x2d3   : > { %2646 = vmatpush1.bf16.msra.mxu0 %v4689_v4  ;;  %3027 = vmatpush1.bf16.msra.mxu1 %v4689_v4  ;;  %v4697_v4 = vld [vmem:[%s6674_s1 + $0x170] ss:$8 sps:$4 sm:$0xff]  }
 0x2d4   : > { %2647 = vmatprep.subr.bf16.mxu0 %v4690_v5  ;;  %3028 = vmatprep.subr.bf16.mxu1 %v4690_v5 }
 0x2d7   : > { %2648 = vmatpush1.bf16.msra.mxu0 %v4691_v7  ;;  %3029 = vmatpush1.bf16.msra.mxu1 %v4691_v7 }
 0x2d8   : > { %2649 = vmatprep.subr.bf16.mxu0 %v4692_v9  ;;  %3030 = vmatprep.subr.bf16.mxu1 %v4692_v9 }
 0x2d9   : > { %v6090_v10 = vpop.f32.mrb[0].mxu0  ;;  %v6092_v11 = vpop.f32.mrb[0].mxu1 }
 0x2da   : > { %v3279_v14 = vsel %vm3278_vm0, %v6090_v10, 0.0  ;;  %v3293_v15 = vmul.f32 %v6090_v10, %v6090_v10  ;;  %v3309_v55 = vsel %vm3278_vm0, %v6092_v11, 0.0  ;;  %v3325_v17 = vmul.f32 %v6092_v11, %v6092_v11  ;;  %v6102_v2 = vpop.f32.mrb[1].mxu0  ;;  %v6104_v18 = vpop.f32.mrb[1].mxu1 }
 0x2db   : > { %v3280_v6 = vrot.slane %v3279_v14, 4  ;;  %v3310_v20 = vrot.slane %v3309_v55, 4  ;;  %v3286_v21 = vsel %vm3278_vm0, %v6102_v2, 0.0  ;;  %v3294_v22 = vmul.f32 %v6102_v2, %v6102_v2  ;;  %v2130_v24 = vpop.f32.mrb[2].mxu0  ;;  %v2511_v25 = vpop.f32.mrb[2].mxu1  ;;  %2650 = vmatpush1.bf16.msra.mxu0 %v4693_v58  ;;  %3031 = vmatpush1.bf16.msra.mxu1 %v4693_v58 }
 0x2dc   : > { %v3295_v29 = vsel %vm3278_vm0, %v3293_v15, 0.0  ;;  %v3327_v30 = vsel %vm3278_vm0, %v3325_v17, 0.0  ;;  %v3287_v12 = vrot.slane %v3286_v21, 4  ;;  %v3316_v32 = vsel %vm3278_vm0, %v6104_v18, 0.0  ;;  %v2131_v33 = vpop.f32.mrb[3].mxu0  ;;  %v2512_v8 = vpop.f32.mrb[3].mxu1  ;;  %2651 = vmatprep.subr.bf16.mxu0 %v4694_v35  ;;  %3032 = vmatprep.subr.bf16.mxu1 %v4694_v35 }
 0x2dd   : > { %v3281_v28 = vadd.f32 %v3280_v6, %v3279_v14  ;;  %v3296_v36 = vrot.slane %v3295_v29, 4  ;;  %v3311_v37 = vadd.f32 %v3310_v20, %v3309_v55  ;;  %v3328_v38 = vrot.slane %v3327_v30, 4  ;;  %v4698_v15 = vld [vmem:[%s6674_s1 + $0x184] ss:$8 sps:$4 sm:$0xff]   ;;  %v4700_v35 = vld [vmem:[%s6674_s1 + $0x194] ss:$8 sps:$4 sm:$0xff]  }
 0x2de   : > { %v3288_v39 = vadd.f32 %v3287_v12, %v3286_v21  ;;  %v3302_v40 = vsel %vm3278_vm0, %v3294_v22, 0.0  ;;  %v3317_v42 = vrot.slane %v3316_v32, 4  ;;  %v3326_v43 = vmul.f32 %v6104_v18, %v6104_v18  ;;  %v4699_v12 = vld [vmem:[%s6674_s1 + $0x180] ss:$8 sps:$4 sm:$0xff]  }
 0x2df   : > { %v3282_v45 = vrot.slane %v3281_v28, 2  ;;  %v3297_v47 = vadd.f32 %v3296_v36, %v3295_v29  ;;  %v3312_v13 = vrot.slane %v3311_v37, 2  ;;  %v3329_v48 = vadd.f32 %v3328_v38, %v3327_v30  ;;  %2652 = vmatpush1.bf16.msra.mxu0 %v4695_v49  ;;  %3033 = vmatpush1.bf16.msra.mxu1 %v4695_v49  ;;  %v4707_v49 = vld [vmem:[%s6674_s1 + $0x1c0] ss:$8 sps:$4 sm:$0xff]  }
 0x2e0   : > { %v3289_v16 = vrot.slane %v3288_v39, 2  ;;  %v3303_v52 = vrot.slane %v3302_v40, 4  ;;  %v3318_v53 = vadd.f32 %v3317_v42, %v3316_v32  ;;  %v3334_v27 = vsel %vm3278_vm0, %v3326_v43, 0.0  ;;  %2653 = vmatprep.subr.bf16.mxu0 %v4696_v54  ;;  %3034 = vmatprep.subr.bf16.mxu1 %v4696_v54  ;;  %v4702_v42 = vld [vmem:[%s6674_s1 + $0x1a4] ss:$8 sps:$4 sm:$0xff]  }
 0x2e1   : > { %v3283_v34 = vadd.f32 %v3282_v45, %v3281_v28  ;;  %v3298_v56 = vrot.slane %v3297_v47, 2  ;;  %v3313_v57 = vadd.f32 %v3312_v13, %v3311_v37  ;;  %v3330_v61 = vrot.slane %v3329_v48, 2  ;;  %v4703_v45 = vld [vmem:[%s6674_s1 + $0x1a0] ss:$8 sps:$4 sm:$0xff]   ;;  %v4705_v13 = vld [vmem:[%s6674_s1 + $0x1b0] ss:$8 sps:$4 sm:$0xff]  }
 0x2e2   : > { %v3290_v62 = vadd.f32 %v3289_v16, %v3288_v39  ;;  %v3304_v51 = vadd.f32 %v3303_v52, %v3302_v40  ;;  %v3319_v0 = vrot.slane %v3318_v53, 2  ;;  %v3335_v31 = vrot.slane %v3334_v27, 4  ;;  %v4701_v39 = vld [vmem:[%s6674_s1 + $0x190] ss:$8 sps:$4 sm:$0xff]   ;;  %v4708_v16 = vld [vmem:[%s6674_s1 + $0x1d4] ss:$8 sps:$4 sm:$0xff]  }
 0x2e3   : > { %v3284_v46 = vrot.slane %v3283_v34, 1  ;;  %v3299_v1 = vadd.f32 %v3298_v56, %v3297_v47  ;;  %v3314_v3 = vrot.slane %v3313_v57, 1  ;;  %v3331_v50 = vadd.f32 %v3330_v61, %v3329_v48  ;;  %2654 = vmatpush1.bf16.msra.mxu0 %v4697_v4  ;;  %3035 = vmatpush1.bf16.msra.mxu1 %v4697_v4  ;;  %v4704_v47 = vld [vmem:[%s6674_s1 + $0x1b4] ss:$8 sps:$4 sm:$0xff]   ;;  %v4706_v48 = vld [vmem:[%s6674_s1 + $0x1c4] ss:$8 sps:$4 sm:$0xff]  }
 0x2e4   : > { %v3291_v5 = vrot.slane %v3290_v62, 1  ;;  %v3305_v7 = vrot.slane %v3304_v51, 2  ;;  %v3320_v9 = vadd.f32 %v3319_v0, %v3318_v53  ;;  %v3336_v14 = vadd.f32 %v3335_v31, %v3334_v27  ;;  %2655 = vmatprep.subr.bf16.mxu0 %v4698_v15  ;;  %3036 = vmatprep.subr.bf16.mxu1 %v4698_v15  ;;  %v4709_v52 = vld [vmem:[%s6674_s1 + $0x1d0] ss:$8 sps:$4 sm:$0xff]   ;;  %v4710_v53 = vld [vmem:[%s6674_s1 + $0x1e4] ss:$8 sps:$4 sm:$0xff]  }
 0x2e5   : > { %v3285_v55 = vadd.f32 %v3284_v46, %v3283_v34  ;;  %v3300_v17 = vrot.slane %v3299_v1, 1  ;;  %v3315_v6 = vadd.f32 %v3314_v3, %v3313_v57  ;;  %v3332_v20 = vrot.slane %v3331_v50, 1  ;;  %v4711_v27 = vld [vmem:[%s6674_s1 + $0x1e0] ss:$8 sps:$4 sm:$0xff]   ;;  %v4061_v54 = vld [vmem:[%s4917_s14 + $0x70] sm:$0xf] }
 0x2e6   : > { %v3292_v21 = vadd.f32 %v3291_v5, %v3290_v62  ;;  %v3306_v22 = vadd.f32 %v3305_v7, %v3304_v51  ;;  %v3321_v24 = vrot.slane %v3320_v9, 1  ;;  %v3337_v25 = vrot.slane %v3336_v14, 2  ;;  %v4712_v34 = vld [vmem:[%s6674_s1 + $0x1f4] ss:$8 sps:$4 sm:$0xff]   ;;  %v4068_v57 = vld [vmem:[%s4917_s14 + $0x88] sm:$0xf] }
 0x2e7   : > { %v3301_v58 = vadd.f32 %v3300_v17, %v3299_v1  ;;  %v6136_v29 = vadd.f32 %v3315_v6, %v3285_v55  ;;  %v3333_v30 = vadd.f32 %v3332_v20, %v3331_v50  ;;  %2656 = vmatpush1.bf16.msra.mxu0 %v4699_v12  ;;  %3037 = vmatpush1.bf16.msra.mxu1 %v4699_v12  ;;  %v4713_v61 = vld [vmem:[%s6674_s1 + $0x1f0] ss:$8 sps:$4 sm:$0xff]   ;;  %v4714_v62 = vld [vmem:[%s6674_s1 + $0x404] ss:$8 sps:$4 sm:$0xff]   ;;  %v4715_v0 = vld [vmem:[%s6674_s1 + $0x400] ss:$8 sps:$4 sm:$0xff]  }
 0x2e8   : > { %v3307_v32 = vrot.slane %v3306_v22, 1  ;;  %v3322_v33 = vadd.f32 %v3321_v24, %v3320_v9  ;;  %v3338_v8 = vadd.f32 %v3337_v25, %v3336_v14  ;;  %2657 = vmatprep.subr.bf16.mxu0 %v4700_v35  ;;  %3038 = vmatprep.subr.bf16.mxu1 %v4700_v35  ;;  %v6187_v56 = vpack.c.bf16 %v4061_v54, %v4061_v54  ;;  %v4716_v31 = vld [vmem:[%s6674_s1 + $0x414] ss:$8 sps:$4 sm:$0xff]   ;;  %v4718_v46 = vld [vmem:[%s6674_s1 + $0x424] ss:$8 sps:$4 sm:$0xff]  }
 0x2e9   : > { %v6144_v28 = vadd.f32 %v3333_v30, %v3301_v58  ;;  %v3067_v51 = vpack.c.bf16 %v4068_v57, %v4068_v57  ;;  %v4719_v1 = vld [vmem:[%s6674_s1 + $0x420] ss:$8 sps:$4 sm:$0xff]   ;;  %v4721_v3 = vld [vmem:[%s6674_s1 + $0x430] ss:$8 sps:$4 sm:$0xff]   ;;  %v4722_v50 = vld [vmem:[%s6674_s1 + $0x444] ss:$8 sps:$4 sm:$0xff]  }
 0x2ea   : > { %v3308_v36 = vadd.f32 %v3307_v32, %v3306_v22  ;;  %v6146_v37 = vadd.f32 %v3322_v33, %v3292_v21  ;;  %v3339_v38 = vrot.slane %v3338_v8, 1  ;;  %v4723_v4 = vld [vmem:[%s6674_s1 + $0x440] ss:$8 sps:$4 sm:$0xff]   ;;  %v4724_v5 = vld [vmem:[%s6674_s1 + $0x454] ss:$8 sps:$4 sm:$0xff]  }
 0x2eb   : > { %2658 = vmatpush1.bf16.msra.mxu0 %v4701_v39  ;;  %3039 = vmatpush1.bf16.msra.mxu1 %v4701_v39  ;;  %v4725_v7 = vld [vmem:[%s6674_s1 + $0x450] ss:$8 sps:$4 sm:$0xff]   ;;  %v4726_v9 = vld [vmem:[%s6674_s1 + $0x464] ss:$8 sps:$4 sm:$0xff]   ;;  %v4727_v14 = vld [vmem:[%s6674_s1 + $0x460] ss:$8 sps:$4 sm:$0xff]  }
 0x2ec   : > { %v3340_v40 = vadd.f32 %v3339_v38, %v3338_v8  ;;  %2659 = vmatprep.subr.bf16.mxu0 %v4702_v42  ;;  %3040 = vmatprep.subr.bf16.mxu1 %v4702_v42  ;;  %v4728_v15 = vld [vmem:[%s6674_s1 + $0x474] ss:$8 sps:$4 sm:$0xff]   ;;  %v4729_v55 = vld [vmem:[%s6674_s1 + $0x470] ss:$8 sps:$4 sm:$0xff]   ;;  %v4730_v17 = vld [vmem:[%s6674_s1 + $0x484] ss:$8 sps:$4 sm:$0xff]  }
 0x2ed   : > { %v4731_v6 = vld [vmem:[%s6674_s1 + $0x480] ss:$8 sps:$4 sm:$0xff]   ;;  %v4732_v20 = vld [vmem:[%s6674_s1 + $0x494] ss:$8 sps:$4 sm:$0xff]   ;;  %v4733_v21 = vld [vmem:[%s6674_s1 + $0x490] ss:$8 sps:$4 sm:$0xff]  }
 0x2ee   : > { %v6154_v43 = vadd.f32 %v3340_v40, %v3308_v36  ;;  %v4734_v22 = vld [vmem:[%s6674_s1 + $0x4a4] ss:$8 sps:$4 sm:$0xff]   ;;  %v4735_v24 = vld [vmem:[%s6674_s1 + $0x4a0] ss:$8 sps:$4 sm:$0xff]   ;;  %v4736_v25 = vld [vmem:[%s6674_s1 + $0x4b4] ss:$8 sps:$4 sm:$0xff]  }
 0x2ef   : > { %2660 = vmatpush1.bf16.msra.mxu0 %v4703_v45  ;;  %3041 = vmatpush1.bf16.msra.mxu1 %v4703_v45  ;;  %v4737_v58 = vld [vmem:[%s6674_s1 + $0x4b0] ss:$8 sps:$4 sm:$0xff]   ;;  %v4738_v30 = vld [vmem:[%s6674_s1 + $0x4c4] ss:$8 sps:$4 sm:$0xff]   ;;  %v4739_v12 = vld [vmem:[%s6674_s1 + $0x4c0] ss:$8 sps:$4 sm:$0xff]  }
 0x2f0   : > { %2661 = vmatprep.subr.bf16.mxu0 %v4704_v47  ;;  %3042 = vmatprep.subr.bf16.mxu1 %v4704_v47  ;;  %v4740_v32 = vld [vmem:[%s6674_s1 + $0x4d4] ss:$8 sps:$4 sm:$0xff]   ;;  %v4741_v33 = vld [vmem:[%s6674_s1 + $0x4d0] ss:$8 sps:$4 sm:$0xff]   ;;  %v4742_v8 = vld [vmem:[%s6674_s1 + $0x4e4] ss:$8 sps:$4 sm:$0xff]  }
 0x2f1   : > { %v4743_v35 = vld [vmem:[%s6674_s1 + $0x4e0] ss:$8 sps:$4 sm:$0xff]   ;;  %v4744_v38 = vld [vmem:[%s6674_s1 + $0x4f4] ss:$8 sps:$4 sm:$0xff]   ;;  %v4070_v40 = vld [vmem:[%s4917_s14 + $0x98] sm:$0xf] }
 0x2f2   : > { %v4067_v36 = vld [vmem:[%s4917_s14 + $0x80] sm:$0xf]  ;;  %v4745_v42 = vld [vmem:[%s6674_s1 + $0x4f0] ss:$8 sps:$4 sm:$0xff]   ;;  %v4746_v45 = vld [vmem:[%s6674_s1 + $0x504] ss:$8 sps:$4 sm:$0xff]   ;;  %v3069_v47 = vpack.c.bf16 %v4070_v40, %v4070_v40 }
 0x2f3   : > { %2662 = vmatpush1.bf16.msra.mxu0 %v4705_v13  ;;  %3043 = vmatpush1.bf16.msra.mxu1 %v4705_v13  ;;  %v3066_v39 = vpack.c.bf16 %v4067_v36, %v4067_v36  ;;  %v4747_v13 = vld [vmem:[%s6674_s1 + $0x500] ss:$8 sps:$4 sm:$0xff]   ;;  %v4756_v54 = vld [vmem:[%s6674_s1 + $0x554] ss:$8 sps:$4 sm:$0xff]   ;;  %v4758_v57 = vld [vmem:[%s6674_s1 + $0x564] ss:$8 sps:$4 sm:$0xff]  }
 0x2f4   : > { %2663 = vmatprep.subr.bf16.mxu0 %v4706_v48  ;;  %3044 = vmatprep.subr.bf16.mxu1 %v4706_v48  ;;  %v4748_v48 = vld [vmem:[%s6674_s1 + $0x514] ss:$8 sps:$4 sm:$0xff]   ;;  %v4785_v36 = vld [vmem:[%s6674_s1 + $0x630] ss:$8 sps:$4 sm:$0xff]  }
 0x2f5   : > { %v4788_v40 = vld [vmem:[%s6674_s1 + $0x654] ss:$8 sps:$4 sm:$0xff]  }
 0x2f7   : > { %2664 = vmatpush1.bf16.msra.mxu0 %v4707_v49  ;;  %3045 = vmatpush1.bf16.msra.mxu1 %v4707_v49  ;;  %v4750_v49 = vld [vmem:[%s6674_s1 + $0x524] ss:$8 sps:$4 sm:$0xff]  }
 0x2f8   : > { %2665 = vmatprep.subr.bf16.mxu0 %v4708_v16  ;;  %3046 = vmatprep.subr.bf16.mxu1 %v4708_v16  ;;  %v4751_v16 = vld [vmem:[%s6674_s1 + $0x520] ss:$8 sps:$4 sm:$0xff]  }
 0x2fb   : > { %2666 = vmatpush1.bf16.msra.mxu0 %v4709_v52  ;;  %3047 = vmatpush1.bf16.msra.mxu1 %v4709_v52  ;;  %v4753_v52 = vld [vmem:[%s6674_s1 + $0x530] ss:$8 sps:$4 sm:$0xff]  }
 0x2fc   : > { %2667 = vmatprep.subr.bf16.mxu0 %v4710_v53  ;;  %3048 = vmatprep.subr.bf16.mxu1 %v4710_v53  ;;  %v4754_v53 = vld [vmem:[%s6674_s1 + $0x544] ss:$8 sps:$4 sm:$0xff]  }
 0x2ff   : > { %2668 = vmatpush1.bf16.msra.mxu0 %v4711_v27  ;;  %3049 = vmatpush1.bf16.msra.mxu1 %v4711_v27  ;;  %v4755_v27 = vld [vmem:[%s6674_s1 + $0x540] ss:$8 sps:$4 sm:$0xff]  }
 0x300   : > { %2669 = vmatprep.subr.bf16.mxu0 %v4712_v34  ;;  %3050 = vmatprep.subr.bf16.mxu1 %v4712_v34  ;;  %v4757_v34 = vld [vmem:[%s6674_s1 + $0x550] ss:$8 sps:$4 sm:$0xff]  }
 0x303   : > { %2670 = vmatpush1.bf16.msra.mxu0 %v4713_v61  ;;  %3051 = vmatpush1.bf16.msra.mxu1 %v4713_v61  ;;  %v4759_v61 = vld [vmem:[%s6674_s1 + $0x560] ss:$8 sps:$4 sm:$0xff]  }
 0x304   : > { %2689 = vmatprep.subr.bf16.mxu0 %v4714_v62  ;;  %3070 = vmatprep.subr.bf16.mxu1 %v4714_v62  ;;  %v4760_v62 = vld [vmem:[%s6674_s1 + $0x574] ss:$8 sps:$4 sm:$0xff]  }
 0x306   : > { %2672 = vmatmul.mubr.bf16.vlgmr.msra.gmra.mrb[4].mxu0 %v5522_v26  ;;  %3053 = vmatmul.mubr.bf16.vlgmr.msra.gmra.mrb[4].mxu1 %v6187_v56  ;;  %v4717_v26 = vld [vmem:[%s6674_s1 + $0x410] ss:$8 sps:$4 sm:$0xff]  }
 0x307   : > { %2690 = vmatpush1.bf16.msra.mxu0 %v4715_v0  ;;  %3071 = vmatpush1.bf16.msra.mxu1 %v4715_v0  ;;  %v4762_v0 = vld [vmem:[%s6674_s1 + $0x584] ss:$8 sps:$4 sm:$0xff]  }
 0x308   : > { %2691 = vmatprep.subr.bf16.mxu0 %v4716_v31  ;;  %3072 = vmatprep.subr.bf16.mxu1 %v4716_v31  ;;  %v4763_v31 = vld [vmem:[%s6674_s1 + $0x580] ss:$8 sps:$4 sm:$0xff]  }
 0x309   : > { %2721 = vmatprep.mubr.bf16.mxu0 %v5948_v23  ;;  %3102 = vmatprep.mubr.bf16.mxu1 %v3067_v51  ;;  %v4720_v23 = vld [vmem:[%s6674_s1 + $0x434] ss:$8 sps:$4 sm:$0xff]   ;;  %v4761_v51 = vld [vmem:[%s6674_s1 + $0x570] ss:$8 sps:$4 sm:$0xff]  }
 0x30b   : > { %2692 = vmatpush1.bf16.msra.mxu0 %v4717_v26  ;;  %3073 = vmatpush1.bf16.msra.mxu1 %v4717_v26  ;;  %v4764_v26 = vld [vmem:[%s6674_s1 + $0x594] ss:$8 sps:$4 sm:$0xff]  }
 0x30c   : > { %2693 = vmatprep.subr.bf16.mxu0 %v4718_v46  ;;  %3074 = vmatprep.subr.bf16.mxu1 %v4718_v46  ;;  %v4765_v46 = vld [vmem:[%s6674_s1 + $0x590] ss:$8 sps:$4 sm:$0xff]  }
 0x30f   : > { %2694 = vmatpush1.bf16.msra.mxu0 %v4719_v1  ;;  %3075 = vmatpush1.bf16.msra.mxu1 %v4719_v1  ;;  %v4766_v1 = vld [vmem:[%s6674_s1 + $0x5a4] ss:$8 sps:$4 sm:$0xff]  }
 0x310   : > { %2695 = vmatprep.subr.bf16.mxu0 %v4720_v23  ;;  %3076 = vmatprep.subr.bf16.mxu1 %v4720_v23  ;;  %v4767_v23 = vld [vmem:[%s6674_s1 + $0x5a0] ss:$8 sps:$4 sm:$0xff]  }
 0x313   : > { %2696 = vmatpush1.bf16.msra.mxu0 %v4721_v3  ;;  %3077 = vmatpush1.bf16.msra.mxu1 %v4721_v3  ;;  %v4768_v3 = vld [vmem:[%s6674_s1 + $0x5b4] ss:$8 sps:$4 sm:$0xff]  }
 0x314   : > { %2697 = vmatprep.subr.bf16.mxu0 %v4722_v50  ;;  %3078 = vmatprep.subr.bf16.mxu1 %v4722_v50  ;;  %v4769_v50 = vld [vmem:[%s6674_s1 + $0x5b0] ss:$8 sps:$4 sm:$0xff]  }
 0x317   : > { %2698 = vmatpush1.bf16.msra.mxu0 %v4723_v4  ;;  %3079 = vmatpush1.bf16.msra.mxu1 %v4723_v4  ;;  %v4770_v4 = vld [vmem:[%s6674_s1 + $0x5c4] ss:$8 sps:$4 sm:$0xff]  }
 0x318   : > { %2699 = vmatprep.subr.bf16.mxu0 %v4724_v5  ;;  %3080 = vmatprep.subr.bf16.mxu1 %v4724_v5  ;;  %v4072_v5 = vld [vmem:[%s4917_s14 + $0x88] sm:$0x1e] }
 0x31b   : > { %2700 = vmatpush1.bf16.msra.mxu0 %v4725_v7  ;;  %3081 = vmatpush1.bf16.msra.mxu1 %v4725_v7  ;;  %v4771_v7 = vld [vmem:[%s6674_s1 + $0x5c0] ss:$8 sps:$4 sm:$0xff]  }
 0x31c   : > { %2701 = vmatprep.subr.bf16.mxu0 %v4726_v9  ;;  %3082 = vmatprep.subr.bf16.mxu1 %v4726_v9  ;;  %v4772_v9 = vld [vmem:[%s6674_s1 + $0x5d4] ss:$8 sps:$4 sm:$0xff]  }
 0x31f   : > { %2702 = vmatpush1.bf16.msra.mxu0 %v4727_v14  ;;  %3083 = vmatpush1.bf16.msra.mxu1 %v4727_v14  ;;  %v3159_v14 = vpack.c.bf16 %v4072_v5, %v4072_v5  ;;  %v4808_v5 = vld [vmem:[%s6674_s1 + $0x6f4] ss:$8 sps:$4 sm:$0xff]  }
 0x320   : > { %2703 = vmatprep.subr.bf16.mxu0 %v4728_v15  ;;  %3084 = vmatprep.subr.bf16.mxu1 %v4728_v15  ;;  %v4773_v15 = vld [vmem:[%s6674_s1 + $0x5d0] ss:$8 sps:$4 sm:$0xff]  }
 0x323   : > { %2704 = vmatpush1.bf16.msra.mxu0 %v4729_v55  ;;  %3085 = vmatpush1.bf16.msra.mxu1 %v4729_v55  ;;  %v4774_v55 = vld [vmem:[%s6674_s1 + $0x5e4] ss:$8 sps:$4 sm:$0xff]  }
 0x324   : > { %2705 = vmatprep.subr.bf16.mxu0 %v4730_v17  ;;  %3086 = vmatprep.subr.bf16.mxu1 %v4730_v17  ;;  %v3172_v17 = vshll.u32 %v3159_v14, 16 }
 0x327   : > { %2706 = vmatpush1.bf16.msra.mxu0 %v4731_v6  ;;  %3087 = vmatpush1.bf16.msra.mxu1 %v4731_v6  ;;  %v4775_v6 = vld [vmem:[%s6674_s1 + $0x5e0] ss:$8 sps:$4 sm:$0xff]  }
 0x328   : > { %2707 = vmatprep.subr.bf16.mxu0 %v4732_v20  ;;  %3088 = vmatprep.subr.bf16.mxu1 %v4732_v20  ;;  %v4069_v20 = vld [vmem:[%s4917_s14 + $0x90] sm:$0xf] }
 0x32b   : > { %2708 = vmatpush1.bf16.msra.mxu0 %v4733_v21  ;;  %3089 = vmatpush1.bf16.msra.mxu1 %v4733_v21  ;;  %v4776_v21 = vld [vmem:[%s6674_s1 + $0x5f4] ss:$8 sps:$4 sm:$0xff]  }
 0x32c   : > { %2709 = vmatprep.subr.bf16.mxu0 %v4734_v22  ;;  %3090 = vmatprep.subr.bf16.mxu1 %v4734_v22  ;;  %v3170_v22 = vshrl.u32 %v3159_v14, 16 }
 0x32f   : > { %2710 = vmatpush1.bf16.msra.mxu0 %v4735_v24  ;;  %3091 = vmatpush1.bf16.msra.mxu1 %v4735_v24  ;;  %v3174_v24 = vrot.slane %v3172_v17, 1 }
 0x330   : > { %2711 = vmatprep.subr.bf16.mxu0 %v4736_v25  ;;  %3092 = vmatprep.subr.bf16.mxu1 %v4736_v25  ;;  %v3068_v25 = vpack.c.bf16 %v4069_v20, %v4069_v20  ;;  %v4812_v20 = vld [vmem:[%s6674_s1 + $0x714] ss:$8 sps:$4 sm:$0xff]  }
 0x333   : > { %2712 = vmatpush1.bf16.msra.mxu0 %v4737_v58  ;;  %3093 = vmatpush1.bf16.msra.mxu1 %v4737_v58  ;;  %v4777_v58 = vld [vmem:[%s6674_s1 + $0x5f0] ss:$8 sps:$4 sm:$0xff]  }
 0x334   : > { %2713 = vmatprep.subr.bf16.mxu0 %v4738_v30  ;;  %3094 = vmatprep.subr.bf16.mxu1 %v4738_v30  ;;  %v4778_v30 = vld [vmem:[%s6674_s1 + $0x604] ss:$8 sps:$4 sm:$0xff]  }
 0x337   : > { %2714 = vmatpush1.bf16.msra.mxu0 %v4739_v12  ;;  %3095 = vmatpush1.bf16.msra.mxu1 %v4739_v12  ;;  %v3175_v12 = vor.u32 %v3174_v24, %v3170_v22  ;;  %v4815_v22 = vld [vmem:[%s6674_s1 + $0x720] ss:$8 sps:$4 sm:$0xff]   ;;  %v4817_v24 = vld [vmem:[%s6674_s1 + $0x730] ss:$8 sps:$4 sm:$0xff]  }
 0x338   : > { %2715 = vmatprep.subr.bf16.mxu0 %v4740_v32  ;;  %3096 = vmatprep.subr.bf16.mxu1 %v4740_v32  ;;  %v4779_v32 = vld [vmem:[%s6674_s1 + $0x600] ss:$8 sps:$4 sm:$0xff]  }
 0x33b   : > { %2716 = vmatpush1.bf16.msra.mxu0 %v4741_v33  ;;  %3097 = vmatpush1.bf16.msra.mxu1 %v4741_v33  ;;  %v4780_v33 = vld [vmem:[%s6674_s1 + $0x614] ss:$8 sps:$4 sm:$0xff]  }
 0x33c   : > { %2717 = vmatprep.subr.bf16.mxu0 %v4742_v8  ;;  %3098 = vmatprep.subr.bf16.mxu1 %v4742_v8  ;;  %v4782_v8 = vld [vmem:[%s6674_s1 + $0x624] ss:$8 sps:$4 sm:$0xff]  }
 0x33f   : > { %2718 = vmatpush1.bf16.msra.mxu0 %v4743_v35  ;;  %3099 = vmatpush1.bf16.msra.mxu1 %v4743_v35  ;;  %v4783_v35 = vld [vmem:[%s6674_s1 + $0x620] ss:$8 sps:$4 sm:$0xff]  }
 0x340   : > { %2719 = vmatprep.subr.bf16.mxu0 %v4744_v38  ;;  %3100 = vmatprep.subr.bf16.mxu1 %v4744_v38  ;;  %v4786_v38 = vld [vmem:[%s6674_s1 + $0x644] ss:$8 sps:$4 sm:$0xff]  }
 0x343   : > { %2720 = vmatpush1.bf16.msra.mxu0 %v4745_v42  ;;  %3101 = vmatpush1.bf16.msra.mxu1 %v4745_v42  ;;  %v4789_v42 = vld [vmem:[%s6674_s1 + $0x650] ss:$8 sps:$4 sm:$0xff]  }
 0x344   : > { %2730 = vmatprep.subr.bf16.mxu0 %v4746_v45  ;;  %3111 = vmatprep.subr.bf16.mxu1 %v4746_v45  ;;  %v4790_v45 = vld [vmem:[%s6674_s1 + $0x664] ss:$8 sps:$4 sm:$0xff]  }
 0x346   : > { %2722 = vmatmul.mubr.bf16.vlgmr.msra.gmra.mrb[4].mxu0 %v6045_v59  ;;  %3103 = vmatmul.mubr.bf16.vlgmr.msra.gmra.mrb[4].mxu1 %v3066_v39  ;;  %v4749_v59 = vld [vmem:[%s6674_s1 + $0x510] ss:$8 sps:$4 sm:$0xff]   ;;  %v4787_v39 = vld [vmem:[%s6674_s1 + $0x640] ss:$8 sps:$4 sm:$0xff]  }
 0x347   : > { %2731 = vmatpush1.bf16.msra.mxu0 %v4747_v13  ;;  %3112 = vmatpush1.bf16.msra.mxu1 %v4747_v13  ;;  %v4792_v13 = vld [vmem:[%s6674_s1 + $0x674] ss:$8 sps:$4 sm:$0xff]  }
 0x348   : > { %2732 = vmatprep.subr.bf16.mxu0 %v4748_v48  ;;  %3113 = vmatprep.subr.bf16.mxu1 %v4748_v48  ;;  %v4793_v48 = vld [vmem:[%s6674_s1 + $0x670] ss:$8 sps:$4 sm:$0xff]  }
 0x349   : > { %2762 = vmatprep.mubr.bf16.mxu0 %v6054_v63  ;;  %3143 = vmatprep.mubr.bf16.mxu1 %v3069_v47  ;;  %v4752_v63 = vld [vmem:[%s6674_s1 + $0x534] ss:$8 sps:$4 sm:$0xff]   ;;  %v4791_v47 = vld [vmem:[%s6674_s1 + $0x660] ss:$8 sps:$4 sm:$0xff]  }
 0x34b   : > { %2733 = vmatpush1.bf16.msra.mxu0 %v4749_v59  ;;  %3114 = vmatpush1.bf16.msra.mxu1 %v4749_v59  ;;  %v4794_v59 = vld [vmem:[%s6674_s1 + $0x684] ss:$8 sps:$4 sm:$0xff]  }
 0x34c   : > { %2734 = vmatprep.subr.bf16.mxu0 %v4750_v49  ;;  %3115 = vmatprep.subr.bf16.mxu1 %v4750_v49  ;;  %v4795_v49 = vld [vmem:[%s6674_s1 + $0x680] ss:$8 sps:$4 sm:$0xff]  }
 0x34f   : > { %2735 = vmatpush1.bf16.msra.mxu0 %v4751_v16  ;;  %3116 = vmatpush1.bf16.msra.mxu1 %v4751_v16  ;;  %v4796_v16 = vld [vmem:[%s6674_s1 + $0x694] ss:$8 sps:$4 sm:$0xff]  }
 0x350   : > { %2736 = vmatprep.subr.bf16.mxu0 %v4752_v63  ;;  %3117 = vmatprep.subr.bf16.mxu1 %v4752_v63  ;;  %v4797_v63 = vld [vmem:[%s6674_s1 + $0x690] ss:$8 sps:$4 sm:$0xff]  }
 0x353   : > { %2737 = vmatpush1.bf16.msra.mxu0 %v4753_v52  ;;  %3118 = vmatpush1.bf16.msra.mxu1 %v4753_v52  ;;  %v4798_v52 = vld [vmem:[%s6674_s1 + $0x6a4] ss:$8 sps:$4 sm:$0xff]  }
 0x354   : > { %2738 = vmatprep.subr.bf16.mxu0 %v4754_v53  ;;  %3119 = vmatprep.subr.bf16.mxu1 %v4754_v53  ;;  %v4799_v53 = vld [vmem:[%s6674_s1 + $0x6a0] ss:$8 sps:$4 sm:$0xff]  }
 0x357   : > { %2739 = vmatpush1.bf16.msra.mxu0 %v4755_v27  ;;  %3120 = vmatpush1.bf16.msra.mxu1 %v4755_v27  ;;  %v4800_v27 = vld [vmem:[%s6674_s1 + $0x6b4] ss:$8 sps:$4 sm:$0xff]  }
 0x358   : > { %2740 = vmatprep.subr.bf16.mxu0 %v4756_v54  ;;  %3121 = vmatprep.subr.bf16.mxu1 %v4756_v54  ;;  %v4801_v54 = vld [vmem:[%s6674_s1 + $0x6b0] ss:$8 sps:$4 sm:$0xff]  }
 0x35b   : > { %2741 = vmatpush1.bf16.msra.mxu0 %v4757_v34  ;;  %3122 = vmatpush1.bf16.msra.mxu1 %v4757_v34  ;;  %v4071_v34 = vld [vmem:[%s4917_s14 + $0x80] sm:$0x1e] }
 0x35c   : > { %2742 = vmatprep.subr.bf16.mxu0 %v4758_v57  ;;  %3123 = vmatprep.subr.bf16.mxu1 %v4758_v57  ;;  %v4802_v57 = vld [vmem:[%s6674_s1 + $0x6c4] ss:$8 sps:$4 sm:$0xff]  }
 0x35f   : > { %2743 = vmatpush1.bf16.msra.mxu0 %v4759_v61  ;;  %3124 = vmatpush1.bf16.msra.mxu1 %v4759_v61  ;;  %v3158_v61 = vpack.c.bf16 %v4071_v34, %v4071_v34  ;;  %v4840_v34 = vld [vmem:[%s6674_s1 + $0x7f4] ss:$8 sps:$4 sm:$0xff]  }
 0x360   : > { %2744 = vmatprep.subr.bf16.mxu0 %v4760_v62  ;;  %3125 = vmatprep.subr.bf16.mxu1 %v4760_v62  ;;  %v4074_v62 = vld [vmem:[%s4917_s14 + $0x98] sm:$0x1e] }
 0x363   : > { %2745 = vmatpush1.bf16.msra.mxu0 %v4761_v51  ;;  %3126 = vmatpush1.bf16.msra.mxu1 %v4761_v51  ;;  %v4803_v51 = vld [vmem:[%s6674_s1 + $0x6c0] ss:$8 sps:$4 sm:$0xff]  }
 0x364   : > { %2746 = vmatprep.subr.bf16.mxu0 %v4762_v0  ;;  %3127 = vmatprep.subr.bf16.mxu1 %v4762_v0  ;;  %v4804_v0 = vld [vmem:[%s6674_s1 + $0x6d4] ss:$8 sps:$4 sm:$0xff]  }
 0x367   : > { %2747 = vmatpush1.bf16.msra.mxu0 %v4763_v31  ;;  %3128 = vmatpush1.bf16.msra.mxu1 %v4763_v31  ;;  %v3161_v31 = vpack.c.bf16 %v4074_v62, %v4074_v62 }
 0x368   : > { %2748 = vmatprep.subr.bf16.mxu0 %v4764_v26  ;;  %3129 = vmatprep.subr.bf16.mxu1 %v4764_v26  ;;  %v3165_v26 = vshll.u32 %v3158_v61, 16 }
 0x36b   : > { %2749 = vmatpush1.bf16.msra.mxu0 %v4765_v46  ;;  %3130 = vmatpush1.bf16.msra.mxu1 %v4765_v46  ;;  %v4805_v46 = vld [vmem:[%s6674_s1 + $0x6d0] ss:$8 sps:$4 sm:$0xff]  }
 0x36c   : > { %2750 = vmatprep.subr.bf16.mxu0 %v4766_v1  ;;  %3131 = vmatprep.subr.bf16.mxu1 %v4766_v1  ;;  %v4806_v1 = vld [vmem:[%s6674_s1 + $0x6e4] ss:$8 sps:$4 sm:$0xff]  }
 0x36f   : > { %2751 = vmatpush1.bf16.msra.mxu0 %v4767_v23  ;;  %3132 = vmatpush1.bf16.msra.mxu1 %v4767_v23  ;;  %v3186_v23 = vshll.u32 %v3161_v31, 16 }
 0x370   : > { %2752 = vmatprep.subr.bf16.mxu0 %v4768_v3  ;;  %3133 = vmatprep.subr.bf16.mxu1 %v4768_v3  ;;  %v3163_v3 = vshrl.u32 %v3158_v61, 16  ;;  %v4841_v61 = vld [vmem:[%s6674_s1 + $0x7f0] ss:$8 sps:$4 sm:$0xff]  }
 0x373   : > { %2753 = vmatpush1.bf16.msra.mxu0 %v4769_v50  ;;  %3134 = vmatpush1.bf16.msra.mxu1 %v4769_v50  ;;  %v3167_v50 = vrot.slane %v3165_v26, 1 }
 0x374   : > { %2754 = vmatprep.subr.bf16.mxu0 %v4770_v4  ;;  %3135 = vmatprep.subr.bf16.mxu1 %v4770_v4  ;;  %v4807_v4 = vld [vmem:[%s6674_s1 + $0x6e0] ss:$8 sps:$4 sm:$0xff]  }
 0x375   : > { %v3168_v14 = vor.u32 %v3167_v50, %v3163_v3 }
 0x377   : > { %2755 = vmatpush1.bf16.msra.mxu0 %v4771_v7  ;;  %3136 = vmatpush1.bf16.msra.mxu1 %v4771_v7  ;;  %v3184_v7 = vshrl.u32 %v3161_v31, 16 }
 0x378   : > { %2756 = vmatprep.subr.bf16.mxu0 %v4772_v9  ;;  %3137 = vmatprep.subr.bf16.mxu1 %v4772_v9  ;;  %v3188_v9 = vrot.slane %v3186_v23, 1 }
 0x37a   : > { %v3189_v17 = vor.u32 %v3188_v9, %v3184_v7 }
 0x37b   : > { %2757 = vmatpush1.bf16.msra.mxu0 %v4773_v15  ;;  %3138 = vmatpush1.bf16.msra.mxu1 %v4773_v15  ;;  %v4809_v15 = vld [vmem:[%s6674_s1 + $0x6f0] ss:$8 sps:$4 sm:$0xff]  }
 0x37c   : > { %2758 = vmatprep.subr.bf16.mxu0 %v4774_v55  ;;  %3139 = vmatprep.subr.bf16.mxu1 %v4774_v55  ;;  %v4810_v55 = vld [vmem:[%s6674_s1 + $0x704] ss:$8 sps:$4 sm:$0xff]  }
 0x37f   : > { %2759 = vmatpush1.bf16.msra.mxu0 %v4775_v6  ;;  %3140 = vmatpush1.bf16.msra.mxu1 %v4775_v6  ;;  %v4811_v6 = vld [vmem:[%s6674_s1 + $0x700] ss:$8 sps:$4 sm:$0xff]  }
 0x380   : > { %2760 = vmatprep.subr.bf16.mxu0 %v4776_v21  ;;  %3141 = vmatprep.subr.bf16.mxu1 %v4776_v21  ;;  %v4814_v21 = vld [vmem:[%s6674_s1 + $0x724] ss:$8 sps:$4 sm:$0xff]  }
 0x383   : > { %2761 = vmatpush1.bf16.msra.mxu0 %v4777_v58  ;;  %3142 = vmatpush1.bf16.msra.mxu1 %v4777_v58  ;;  %v4819_v58 = vld [vmem:[%s6674_s1 + $0x740] ss:$8 sps:$4 sm:$0xff]  }
 0x384   : > { %2813 = vmatprep.subr.bf16.mxu0 %v4778_v30  ;;  %3194 = vmatprep.subr.bf16.mxu1 %v4778_v30  ;;  %v4820_v30 = vld [vmem:[%s6674_s1 + $0x754] ss:$8 sps:$4 sm:$0xff]  }
 0x386   : > { %2763 = vmatmul.mubr.bf16.vlgmr.msra.gmra.mrb[4].mxu0 %v6187_v56  ;;  %3144 = vmatmul.mubr.bf16.vlgmr.msra.gmra.mrb[4].mxu1 %v3068_v25  ;;  %v4781_v56 = vld [vmem:[%s6674_s1 + $0x610] ss:$8 sps:$4 sm:$0xff]   ;;  %v4818_v25 = vld [vmem:[%s6674_s1 + $0x744] ss:$8 sps:$4 sm:$0xff]  }
 0x387   : > { %2814 = vmatpush1.bf16.msra.mxu0 %v4779_v32  ;;  %3195 = vmatpush1.bf16.msra.mxu1 %v4779_v32  ;;  %v4822_v32 = vld [vmem:[%s6674_s1 + $0x764] ss:$8 sps:$4 sm:$0xff]  }
 0x388   : > { %2815 = vmatprep.subr.bf16.mxu0 %v4780_v33  ;;  %3196 = vmatprep.subr.bf16.mxu1 %v4780_v33  ;;  %v4823_v33 = vld [vmem:[%s6674_s1 + $0x760] ss:$8 sps:$4 sm:$0xff]  }
 0x389   : > { %2845 = vmatprep.mubr.bf16.mxu0 %v5736_v60  ;;  %3226 = vmatprep.mubr.bf16.mxu1 %v3175_v12  ;;  %v4784_v60 = vld [vmem:[%s6674_s1 + $0x634] ss:$8 sps:$4 sm:$0xff]   ;;  %v4821_v12 = vld [vmem:[%s6674_s1 + $0x750] ss:$8 sps:$4 sm:$0xff]  }
 0x38b   : > { %2816 = vmatpush1.bf16.msra.mxu0 %v4781_v56  ;;  %3197 = vmatpush1.bf16.msra.mxu1 %v4781_v56  ;;  %v4824_v56 = vld [vmem:[%s6674_s1 + $0x774] ss:$8 sps:$4 sm:$0xff]  }
 0x38c   : > { %2817 = vmatprep.subr.bf16.mxu0 %v4782_v8  ;;  %3198 = vmatprep.subr.bf16.mxu1 %v4782_v8  ;;  %v4825_v8 = vld [vmem:[%s6674_s1 + $0x770] ss:$8 sps:$4 sm:$0xff]  }
 0x38f   : > { %2818 = vmatpush1.bf16.msra.mxu0 %v4783_v35  ;;  %3199 = vmatpush1.bf16.msra.mxu1 %v4783_v35  ;;  %v4826_v35 = vld [vmem:[%s6674_s1 + $0x784] ss:$8 sps:$4 sm:$0xff]  }
 0x390   : > { %2819 = vmatprep.subr.bf16.mxu0 %v4784_v60  ;;  %3200 = vmatprep.subr.bf16.mxu1 %v4784_v60  ;;  %v4827_v60 = vld [vmem:[%s6674_s1 + $0x780] ss:$8 sps:$4 sm:$0xff]  }
 0x393   : > { %2820 = vmatpush1.bf16.msra.mxu0 %v4785_v36  ;;  %3201 = vmatpush1.bf16.msra.mxu1 %v4785_v36  ;;  %v4828_v36 = vld [vmem:[%s6674_s1 + $0x794] ss:$8 sps:$4 sm:$0xff]  }
 0x394   : > { %2821 = vmatprep.subr.bf16.mxu0 %v4786_v38  ;;  %3202 = vmatprep.subr.bf16.mxu1 %v4786_v38  ;;  %v4829_v38 = vld [vmem:[%s6674_s1 + $0x790] ss:$8 sps:$4 sm:$0xff]  }
 0x397   : > { %2822 = vmatpush1.bf16.msra.mxu0 %v4787_v39  ;;  %3203 = vmatpush1.bf16.msra.mxu1 %v4787_v39  ;;  %v4830_v39 = vld [vmem:[%s6674_s1 + $0x7a4] ss:$8 sps:$4 sm:$0xff]  }
 0x398   : > { %2823 = vmatprep.subr.bf16.mxu0 %v4788_v40  ;;  %3204 = vmatprep.subr.bf16.mxu1 %v4788_v40  ;;  %v4831_v40 = vld [vmem:[%s6674_s1 + $0x7a0] ss:$8 sps:$4 sm:$0xff]  }
 0x39b   : > { %2824 = vmatpush1.bf16.msra.mxu0 %v4789_v42  ;;  %3205 = vmatpush1.bf16.msra.mxu1 %v4789_v42  ;;  %v4832_v42 = vld [vmem:[%s6674_s1 + $0x7b4] ss:$8 sps:$4 sm:$0xff]  }
 0x39c   : > { %2825 = vmatprep.subr.bf16.mxu0 %v4790_v45  ;;  %3206 = vmatprep.subr.bf16.mxu1 %v4790_v45  ;;  %v4833_v45 = vld [vmem:[%s6674_s1 + $0x7b0] ss:$8 sps:$4 sm:$0xff]  }
 0x39f   : > { %2826 = vmatpush1.bf16.msra.mxu0 %v4791_v47  ;;  %3207 = vmatpush1.bf16.msra.mxu1 %v4791_v47  ;;  %v4073_v47 = vld [vmem:[%s4917_s14 + $0x90] sm:$0x1e] }
 0x3a0   : > { %2827 = vmatprep.subr.bf16.mxu0 %v4792_v13  ;;  %3208 = vmatprep.subr.bf16.mxu1 %v4792_v13  ;;  %v4834_v13 = vld [vmem:[%s6674_s1 + $0x7c4] ss:$8 sps:$4 sm:$0xff]  }
 0x3a3   : > { %2828 = vmatpush1.bf16.msra.mxu0 %v4793_v48  ;;  %3209 = vmatpush1.bf16.msra.mxu1 %v4793_v48  ;;  %v3160_v48 = vpack.c.bf16 %v4073_v47, %v4073_v47 }
 0x3a4   : > { %2829 = vmatprep.subr.bf16.mxu0 %v4794_v59  ;;  %3210 = vmatprep.subr.bf16.mxu1 %v4794_v59  ;;  %v4835_v59 = vld [vmem:[%s6674_s1 + $0x7c0] ss:$8 sps:$4 sm:$0xff]  }
 0x3a7   : > { %2830 = vmatpush1.bf16.msra.mxu0 %v4795_v49  ;;  %3211 = vmatpush1.bf16.msra.mxu1 %v4795_v49  ;;  %v4836_v49 = vld [vmem:[%s6674_s1 + $0x7d4] ss:$8 sps:$4 sm:$0xff]  }
 0x3a8   : > { %2831 = vmatprep.subr.bf16.mxu0 %v4796_v16  ;;  %3212 = vmatprep.subr.bf16.mxu1 %v4796_v16  ;;  %v3179_v16 = vshll.u32 %v3160_v48, 16 }
 0x3ab   : > { %2832 = vmatpush1.bf16.msra.mxu0 %v4797_v63  ;;  %3213 = vmatpush1.bf16.msra.mxu1 %v4797_v63  ;;  %v4837_v63 = vld [vmem:[%s6674_s1 + $0x7d0] ss:$8 sps:$4 sm:$0xff]  }
 0x3ac   : > { %2833 = vmatprep.subr.bf16.mxu0 %v4798_v52  ;;  %3214 = vmatprep.subr.bf16.mxu1 %v4798_v52  ;;  %v4838_v52 = vld [vmem:[%s6674_s1 + $0x7e4] ss:$8 sps:$4 sm:$0xff]  }
 0x3af   : > { %2834 = vmatpush1.bf16.msra.mxu0 %v4799_v53  ;;  %3215 = vmatpush1.bf16.msra.mxu1 %v4799_v53  ;;  %v3177_v53 = vshrl.u32 %v3160_v48, 16 }
 0x3b0   : > { %2835 = vmatprep.subr.bf16.mxu0 %v4800_v27  ;;  %3216 = vmatprep.subr.bf16.mxu1 %v4800_v27  ;;  %v3181_v27 = vrot.slane %v3179_v16, 1 }
 0x3b3   : > { %2836 = vmatpush1.bf16.msra.mxu0 %v4801_v54  ;;  %3217 = vmatpush1.bf16.msra.mxu1 %v4801_v54  ;;  %v4839_v54 = vld [vmem:[%s6674_s1 + $0x7e0] ss:$8 sps:$4 sm:$0xff]  }
 0x3b4   : > { %2837 = vmatprep.subr.bf16.mxu0 %v4802_v57  ;;  %3218 = vmatprep.subr.bf16.mxu1 %v4802_v57  ;;  %v3182_v57 = vor.u32 %v3181_v27, %v3177_v53 }
 0x3b7   : > { %2838 = vmatpush1.bf16.msra.mxu0 %v4803_v51  ;;  %3219 = vmatpush1.bf16.msra.mxu1 %v4803_v51 }
 0x3b8   : > { %2839 = vmatprep.subr.bf16.mxu0 %v4804_v0  ;;  %3220 = vmatprep.subr.bf16.mxu1 %v4804_v0 }
 0x3bb   : > { %2840 = vmatpush1.bf16.msra.mxu0 %v4805_v46  ;;  %3221 = vmatpush1.bf16.msra.mxu1 %v4805_v46 }
 0x3bc   : > { %2841 = vmatprep.subr.bf16.mxu0 %v4806_v1  ;;  %3222 = vmatprep.subr.bf16.mxu1 %v4806_v1 }
 0x3bf   : > { %2842 = vmatpush1.bf16.msra.mxu0 %v4807_v4  ;;  %3223 = vmatpush1.bf16.msra.mxu1 %v4807_v4 }
 0x3c0   : > { %2843 = vmatprep.subr.bf16.mxu0 %v4808_v5  ;;  %3224 = vmatprep.subr.bf16.mxu1 %v4808_v5 }
 0x3c3   : > { %2844 = vmatpush1.bf16.msra.mxu0 %v4809_v15  ;;  %3225 = vmatpush1.bf16.msra.mxu1 %v4809_v15 }
 0x3c4   : > { %2854 = vmatprep.subr.bf16.mxu0 %v4810_v55  ;;  %3235 = vmatprep.subr.bf16.mxu1 %v4810_v55 }
 0x3c6   : > { %2846 = vmatmul.mubr.bf16.vlgmr.msra.gmra.mrb[4].mxu0 %v5834_v41  ;;  %3227 = vmatmul.mubr.bf16.vlgmr.msra.gmra.mrb[4].mxu1 %v3168_v14  ;;  %v4813_v41 = vld [vmem:[%s6674_s1 + $0x710] ss:$8 sps:$4 sm:$0xff]  }
 0x3c7   : > { %2855 = vmatpush1.bf16.msra.mxu0 %v4811_v6  ;;  %3236 = vmatpush1.bf16.msra.mxu1 %v4811_v6 }
 0x3c8   : > { %2856 = vmatprep.subr.bf16.mxu0 %v4812_v20  ;;  %3237 = vmatprep.subr.bf16.mxu1 %v4812_v20 }
 0x3c9   : > { %2886 = vmatprep.mubr.bf16.mxu0 %v5842_v44  ;;  %3267 = vmatprep.mubr.bf16.mxu1 %v3189_v17  ;;  %v4816_v44 = vld [vmem:[%s6674_s1 + $0x734] ss:$8 sps:$4 sm:$0xff]  }
 0x3cb   : > { %2857 = vmatpush1.bf16.msra.mxu0 %v4813_v41  ;;  %3238 = vmatpush1.bf16.msra.mxu1 %v4813_v41 }
 0x3cc   : > { %2858 = vmatprep.subr.bf16.mxu0 %v4814_v21  ;;  %3239 = vmatprep.subr.bf16.mxu1 %v4814_v21 }
 0x3cf   : > { %2859 = vmatpush1.bf16.msra.mxu0 %v4815_v22  ;;  %3240 = vmatpush1.bf16.msra.mxu1 %v4815_v22 }
 0x3d0   : > { %2860 = vmatprep.subr.bf16.mxu0 %v4816_v44  ;;  %3241 = vmatprep.subr.bf16.mxu1 %v4816_v44 }
 0x3d3   : > { %2861 = vmatpush1.bf16.msra.mxu0 %v4817_v24  ;;  %3242 = vmatpush1.bf16.msra.mxu1 %v4817_v24 }
 0x3d4   : > { %2862 = vmatprep.subr.bf16.mxu0 %v4818_v25  ;;  %3243 = vmatprep.subr.bf16.mxu1 %v4818_v25 }
 0x3d7   : > { %2863 = vmatpush1.bf16.msra.mxu0 %v4819_v58  ;;  %3244 = vmatpush1.bf16.msra.mxu1 %v4819_v58 }
 0x3d8   : > { %2864 = vmatprep.subr.bf16.mxu0 %v4820_v30  ;;  %3245 = vmatprep.subr.bf16.mxu1 %v4820_v30 }
 0x3db   : > { %2865 = vmatpush1.bf16.msra.mxu0 %v4821_v12  ;;  %3246 = vmatpush1.bf16.msra.mxu1 %v4821_v12 }
 0x3dc   : > { %2866 = vmatprep.subr.bf16.mxu0 %v4822_v32  ;;  %3247 = vmatprep.subr.bf16.mxu1 %v4822_v32 }
 0x3df   : > { %2867 = vmatpush1.bf16.msra.mxu0 %v4823_v33  ;;  %3248 = vmatpush1.bf16.msra.mxu1 %v4823_v33 }
 0x3e0   : > { %2868 = vmatprep.subr.bf16.mxu0 %v4824_v56  ;;  %3249 = vmatprep.subr.bf16.mxu1 %v4824_v56 }
 0x3e3   : > { %2869 = vmatpush1.bf16.msra.mxu0 %v4825_v8  ;;  %3250 = vmatpush1.bf16.msra.mxu1 %v4825_v8 }
 0x3e4   : > { %2870 = vmatprep.subr.bf16.mxu0 %v4826_v35  ;;  %3251 = vmatprep.subr.bf16.mxu1 %v4826_v35 }
 0x3e7   : > { %2871 = vmatpush1.bf16.msra.mxu0 %v4827_v60  ;;  %3252 = vmatpush1.bf16.msra.mxu1 %v4827_v60 }
 0x3e8   : > { %2872 = vmatprep.subr.bf16.mxu0 %v4828_v36  ;;  %3253 = vmatprep.subr.bf16.mxu1 %v4828_v36 }
 0x3eb   : > { %2873 = vmatpush1.bf16.msra.mxu0 %v4829_v38  ;;  %3254 = vmatpush1.bf16.msra.mxu1 %v4829_v38 }
 0x3ec   : > { %2874 = vmatprep.subr.bf16.mxu0 %v4830_v39  ;;  %3255 = vmatprep.subr.bf16.mxu1 %v4830_v39 }
 0x3ef   : > { %2875 = vmatpush1.bf16.msra.mxu0 %v4831_v40  ;;  %3256 = vmatpush1.bf16.msra.mxu1 %v4831_v40 }
 0x3f0   : > { %2876 = vmatprep.subr.bf16.mxu0 %v4832_v42  ;;  %3257 = vmatprep.subr.bf16.mxu1 %v4832_v42 }
 0x3f3   : > { %2877 = vmatpush1.bf16.msra.mxu0 %v4833_v45  ;;  %3258 = vmatpush1.bf16.msra.mxu1 %v4833_v45 }
 0x3f4   : > { %2878 = vmatprep.subr.bf16.mxu0 %v4834_v13  ;;  %3259 = vmatprep.subr.bf16.mxu1 %v4834_v13 }
 0x3f7   : > { %2879 = vmatpush1.bf16.msra.mxu0 %v4835_v59  ;;  %3260 = vmatpush1.bf16.msra.mxu1 %v4835_v59 }
 0x3f8   : > { %2880 = vmatprep.subr.bf16.mxu0 %v4836_v49  ;;  %3261 = vmatprep.subr.bf16.mxu1 %v4836_v49 }
 0x3fb   : > { %2881 = vmatpush1.bf16.msra.mxu0 %v4837_v63  ;;  %3262 = vmatpush1.bf16.msra.mxu1 %v4837_v63 }
 0x3fc   : > { %2882 = vmatprep.subr.bf16.mxu0 %v4838_v52  ;;  %3263 = vmatprep.subr.bf16.mxu1 %v4838_v52 }
 0x3ff   : > { %2883 = vmatpush1.bf16.msra.mxu0 %v4839_v54  ;;  %3264 = vmatpush1.bf16.msra.mxu1 %v4839_v54 }
 0x400   : > { %2884 = vmatprep.subr.bf16.mxu0 %v4840_v34  ;;  %3265 = vmatprep.subr.bf16.mxu1 %v4840_v34 }
 0x403   : > { %2885 = vmatpush1.bf16.msra.mxu0 %v4841_v61  ;;  %3266 = vmatpush1.bf16.msra.mxu1 %v4841_v61 }
 0x406   : > { %2887 = vmatmul.mubr.bf16.vlgmr.msra.gmra.mrb[4].mxu0 %v5939_v19  ;;  %3268 = vmatmul.mubr.bf16.vlgmr.msra.gmra.mrb[4].mxu1 %v3182_v57 }
 0x4d9   : > { %v6594_v62 = vpop.f32.mrb[4].mxu0  ;;  %v6596_v51 = vpop.f32.mrb[4].mxu1 }
 0x4da   : > { %v3343_v0 = vsel %vm3278_vm0, %v6594_v62, 0.0  ;;  %v3359_v31 = vmul.f32 %v6594_v62, %v6594_v62  ;;  %v3377_v26 = vsel %vm3278_vm0, %v6596_v51, 0.0  ;;  %v3393_v46 = vmul.f32 %v6596_v51, %v6596_v51  ;;  %v6606_v1 = vpop.f32.mrb[5].mxu0  ;;  %v6608_v19 = vpop.f32.mrb[5].mxu1 }
 0x4db   : > { %v3344_v23 = vrot.slane %v3343_v0, 4  ;;  %v3378_v3 = vrot.slane %v3377_v26, 4  ;;  %v3350_v50 = vsel %vm3278_vm0, %v6606_v1, 0.0  ;;  %v3360_v4 = vmul.f32 %v6606_v1, %v6606_v1  ;;  %v2892_v5 = vpop.f32.mrb[6].mxu0  ;;  %v3273_v7 = vpop.f32.mrb[6].mxu1 }
 0x4dc   : > { %v3361_v9 = vsel %vm3278_vm0, %v3359_v31, 0.0  ;;  %v3395_v14 = vsel %vm3278_vm0, %v3393_v46, 0.0  ;;  %v3351_v15 = vrot.slane %v3350_v50, 4  ;;  %v3384_v55 = vsel %vm3278_vm0, %v6608_v19, 0.0  ;;  %v2893_v17 = vpop.f32.mrb[7].mxu0  ;;  %v3274_v6 = vpop.f32.mrb[7].mxu1 }
 0x4dd   : > { %v3345_v20 = vadd.f32 %v3344_v23, %v3343_v0  ;;  %v3362_v41 = vrot.slane %v3361_v9, 4  ;;  %v3379_v21 = vadd.f32 %v3378_v3, %v3377_v26  ;;  %v3396_v22 = vrot.slane %v3395_v14, 4 }
 0x4de   : > { %v3352_v44 = vadd.f32 %v3351_v15, %v3350_v50  ;;  %v3368_v24 = vsel %vm3278_vm0, %v3360_v4, 0.0  ;;  %v3385_v25 = vrot.slane %v3384_v55, 4  ;;  %v3394_v58 = vmul.f32 %v6608_v19, %v6608_v19 }
 0x4df   : > { %v3346_v30 = vrot.slane %v3345_v20, 2  ;;  %v3363_v12 = vadd.f32 %v3362_v41, %v3361_v9  ;;  %v3380_v32 = vrot.slane %v3379_v21, 2  ;;  %v3397_v33 = vadd.f32 %v3396_v22, %v3395_v14 }
 0x4e0   : > { %v3353_v56 = vrot.slane %v3352_v44, 2  ;;  %v3369_v8 = vrot.slane %v3368_v24, 4  ;;  %v3386_v35 = vadd.f32 %v3385_v25, %v3384_v55  ;;  %v3402_v60 = vsel %vm3278_vm0, %v3394_v58, 0.0 }
 0x4e1   : > { %v3347_v36 = vadd.f32 %v3346_v30, %v3345_v20  ;;  %v3364_v38 = vrot.slane %v3363_v12, 2  ;;  %v3381_v39 = vadd.f32 %v3380_v32, %v3379_v21  ;;  %v3398_v40 = vrot.slane %v3397_v33, 2 }
 0x4e2   : > { %v3354_v42 = vadd.f32 %v3353_v56, %v3352_v44  ;;  %v3370_v45 = vadd.f32 %v3369_v8, %v3368_v24  ;;  %v3387_v47 = vrot.slane %v3386_v35, 2  ;;  %v3403_v13 = vrot.slane %v3402_v60, 4 }
 0x4e3   : > { %v3348_v48 = vrot.slane %v3347_v36, 1  ;;  %v3365_v59 = vadd.f32 %v3364_v38, %v3363_v12  ;;  %v3382_v49 = vrot.slane %v3381_v39, 1  ;;  %v3399_v16 = vadd.f32 %v3398_v40, %v3397_v33 }
 0x4e4   : > { %v3355_v63 = vrot.slane %v3354_v42, 1  ;;  %v3371_v52 = vrot.slane %v3370_v45, 2  ;;  %v3388_v53 = vadd.f32 %v3387_v47, %v3386_v35  ;;  %v3404_v27 = vadd.f32 %v3403_v13, %v3402_v60  ;;  %v3429_v47 = vld [vmem:[%s6675_s2] sm:$0xf] }
 0x4e5   : > { %v3349_v54 = vadd.f32 %v3348_v48, %v3347_v36  ;;  %v3366_v34 = vrot.slane %v3365_v59, 1  ;;  %v3400_v57 = vrot.slane %v3399_v16, 1  ;;  %v3383_v3 = vadd.f32 %v3382_v49, %v3381_v39  ;;  %v3485_v48 = vld [vmem:[%s6675_s2 + $0x10] sm:$0xf] }
 0x4e6   : > { %v3356_v61 = vadd.f32 %v3355_v63, %v3354_v42  ;;  %v3372_v0 = vadd.f32 %v3371_v52, %v3370_v45  ;;  %v3389_v31 = vrot.slane %v3388_v53, 1  ;;  %v3405_v26 = vrot.slane %v3404_v27, 2 }
 0x4e7   : > { %v3357_v46 = vadd.f32 %v3349_v54, %v6136_v29  ;;  %v3367_v23 = vadd.f32 %v3366_v34, %v3365_v59  ;;  %v3401_v15 = vadd.f32 %v3400_v57, %v3399_v16 }
 0x4e8   : > { %v3358_v50 = vadd.f32 %v3356_v61, %v6146_v37  ;;  %v3373_v4 = vrot.slane %v3372_v0, 1  ;;  %v3390_v5 = vadd.f32 %v3389_v31, %v3388_v53  ;;  %v3406_v7 = vadd.f32 %v3405_v26, %v3404_v27  ;;  %v3430_v61 = vld [vmem:[%s6675_s2 + $0x8] sm:$0xf] }
 0x4e9   : > { %v3375_v9 = vadd.f32 %v3367_v23, %v6144_v28  ;;  %v3391_v14 = vadd.f32 %v3383_v3, %v3357_v46 }
 0x4ea   : > { %v3374_v55 = vadd.f32 %v3373_v4, %v3372_v0  ;;  %v3392_v17 = vadd.f32 %v3390_v5, %v3358_v50  ;;  %v3407_v6 = vrot.slane %v3406_v7, 1  ;;  %v3486_v4 = vld [vmem:[%s6675_s2 + $0x18] sm:$0xf] }
 0x4eb   : > { %v3409_v20 = vadd.f32 %v3401_v15, %v3375_v9  ;;  %v3411_v41 = vmul.f32 0.0625, %v3391_v14 }
 0x4ec   : > { %v3376_v21 = vadd.f32 %v3374_v55, %v6154_v43  ;;  %v3408_v22 = vadd.f32 %v3407_v6, %v3406_v7  ;;  %v3412_v29 = vmul.f32 0.0625, %v3392_v17 }
 0x4ed   : > { %v3413_v44 = vmul.f32 0.0625, %v3409_v20  ;;  %v3415_v24 = vmul.f32 %v3411_v41, %v3411_v41  ;;  %v3505_v37 = vsub.f32 %v6596_v51, %v3411_v41  ;;  %v3423_v25 = vsub.f32 %v6090_v10, %v3411_v41 }
 0x4ee   : > { %v3410_v58 = vadd.f32 %v3408_v22, %v3376_v21  ;;  %v3416_v30 = vmul.f32 %v3412_v29, %v3412_v29  ;;  %v3506_v28 = vsub.f32 %v6608_v19, %v3412_v29  ;;  %v3424_v12 = vsub.f32 %v6102_v2, %v3412_v29  ;;  %v3511_v19 = vld [vmem:[%s6675_s2 + $0x10] sm:$0xf0]  ;;  %v3512_v2 = vld [vmem:[%s6675_s2 + $0x18] sm:$0xf0] }
 0x4ef   : > { %v3417_v32 = vsub.f32 %v3413_v44, %v3415_v24  ;;  %v3447_v33 = vsub.f32 %v6092_v11, %v3411_v41  ;;  %v3448_v56 = vsub.f32 %v6104_v18, %v3412_v29  ;;  %v3479_v43 = vsub.f32 %v6594_v62, %v3411_v41  ;;  %v3453_v11 = vld [vmem:[%s6675_s2] sm:$0xf0]  ;;  %v3454_v18 = vld [vmem:[%s6675_s2 + $0x8] sm:$0xf0] }
 0x4f0   : > { %v3414_v8 = vmul.f32 0.0625, %v3410_v58  ;;  %v3480_v35 = vsub.f32 %v6606_v1, %v3412_v29  ;;  %v3515_v1 = vrot.slane %v3511_v19, 4  ;;  %v3457_v36 = vrot.slane %v3453_v11, 4 }
 0x4f1   : > { %v3419_v60 = vadd.f32 1e-05, %v3417_v32  ;;  %v3516_v45 = vrot.slane %v3512_v2, 4  ;;  %v3458_v13 = vrot.slane %v3454_v18, 4 }
 0x4f2   : > { %v3418_v51 = vsub.f32 %v3414_v8, %v3416_v30 }
 0x4f3   : > { %4582 = vrsqrt.f32 %v3419_v60 }
 0x4f4   : > { %v3420_v10 = vadd.f32 1e-05, %v3418_v51 }
 0x4f6   : > { %4584 = vrsqrt.f32 %v3420_v10 }
 0x4fd   : > { %v4583_v62 = vpop.eup %4582 }
 0x4fe   : > { %v3507_v38 = vmul.f32 %v4583_v62, %v3505_v37  ;;  %v3425_v39 = vmul.f32 %v4583_v62, %v3423_v25  ;;  %v3449_v40 = vmul.f32 %v4583_v62, %v3447_v33  ;;  %v3481_v42 = vmul.f32 %v4583_v62, %v3479_v43 }
 0x500   : > { %v4585_v59 = vpop.eup %4584  ;;  %v3509_v49 = vmax.f32 %v3507_v38, 0.0  ;;  %v3427_v16 = vmax.f32 %v3425_v39, 0.0  ;;  %v3451_v63 = vmax.f32 %v3449_v40, 0.0  ;;  %v3483_v52 = vmax.f32 %v3481_v42, 0.0 }
 0x501   : > { %v3508_v53 = vmul.f32 %v4585_v59, %v3506_v28  ;;  %v3426_v27 = vmul.f32 %v4585_v59, %v3424_v12  ;;  %v3450_v54 = vmul.f32 %v4585_v59, %v3448_v56  ;;  %v3482_v34 = vmul.f32 %v4585_v59, %v3480_v35 }
 0x502   : > { %v3519_v57 = vmul.f32 %v3515_v1, %v3509_v49  ;;  %v3431_v0 = vmul.f32 %v3429_v47, %v3427_v16  ;;  %v3461_v31 = vmul.f32 %v3457_v36, %v3451_v63  ;;  %v3487_v26 = vmul.f32 %v3485_v48, %v3483_v52 }
 0x503   : > { %v3510_v46 = vmax.f32 %v3508_v53, 0.0  ;;  %v3428_v23 = vmax.f32 %v3426_v27, 0.0  ;;  %v3452_v3 = vmax.f32 %v3450_v54, 0.0  ;;  %v3484_v50 = vmax.f32 %v3482_v34, 0.0 }
 0x504   : > { %v3433_v5 = vsel %vm3278_vm0, %v3431_v0, 0.0  ;;  %v3463_v7 = vsel %vm3278_vm0, %v3461_v31, 0.0  ;;  %v3489_v9 = vsel %vm3278_vm0, %v3487_v26, 0.0  ;;  %v3521_v14 = vsel %vm3278_vm0, %v3519_v57, 0.0 }
 0x505   : > { %v3520_v15 = vmul.f32 %v3516_v45, %v3510_v46  ;;  %v3432_v55 = vmul.f32 %v3430_v61, %v3428_v23  ;;  %v3434_v17 = vrot.slane %v3433_v5, 4  ;;  %v3462_v6 = vmul.f32 %v3458_v13, %v3452_v3 }
 0x506   : > { %v3464_v20 = vrot.slane %v3463_v7, 4  ;;  %v3488_v41 = vmul.f32 %v3486_v4, %v3484_v50  ;;  %v3490_v21 = vrot.slane %v3489_v9, 4  ;;  %v3522_v22 = vrot.slane %v3521_v14, 4 }
 0x507   : > { %v3435_v29 = vadd.f32 %v3434_v17, %v3433_v5  ;;  %v3440_v44 = vsel %vm3278_vm0, %v3432_v55, 0.0  ;;  %v3470_v24 = vsel %vm3278_vm0, %v3462_v6, 0.0  ;;  %v3528_v37 = vsel %vm3278_vm0, %v3520_v15, 0.0 }
 0x508   : > { %v3441_v25 = vrot.slane %v3440_v44, 4  ;;  %v3465_v58 = vadd.f32 %v3464_v20, %v3463_v7  ;;  %v3471_v30 = vrot.slane %v3470_v24, 4  ;;  %v3491_v28 = vadd.f32 %v3490_v21, %v3489_v9 }
 0x509   : > { %v3436_v12 = vrot.slane %v3435_v29, 2  ;;  %v3496_v32 = vsel %vm3278_vm0, %v3488_v41, 0.0  ;;  %v3523_v33 = vadd.f32 %v3522_v22, %v3521_v14  ;;  %v3529_v56 = vrot.slane %v3528_v37, 4 }
 0x50a   : > { %v3442_v43 = vadd.f32 %v3441_v25, %v3440_v44  ;;  %v3466_v8 = vrot.slane %v3465_v58, 2  ;;  %v3472_v35 = vadd.f32 %v3471_v30, %v3470_v24  ;;  %v3492_v60 = vrot.slane %v3491_v28, 2 }
 0x50b   : > { %v3437_v51 = vadd.f32 %v3436_v12, %v3435_v29  ;;  %v3497_v10 = vrot.slane %v3496_v32, 4  ;;  %v3524_v19 = vrot.slane %v3523_v33, 2  ;;  %v3530_v11 = vadd.f32 %v3529_v56, %v3528_v37 }
 0x50c   : > { %v3443_v2 = vrot.slane %v3442_v43, 2  ;;  %v3467_v18 = vadd.f32 %v3466_v8, %v3465_v58  ;;  %v3473_v62 = vrot.slane %v3472_v35, 2  ;;  %v3493_v1 = vadd.f32 %v3492_v60, %v3491_v28 }
 0x50d   : > { %v3438_v36 = vrot.slane %v3437_v51, 1  ;;  %v3498_v38 = vadd.f32 %v3497_v10, %v3496_v32  ;;  %v3525_v39 = vadd.f32 %v3524_v19, %v3523_v33  ;;  %v3531_v40 = vrot.slane %v3530_v11, 2 }
 0x50e   : > { %v3444_v42 = vadd.f32 %v3443_v2, %v3442_v43  ;;  %v3468_v45 = vrot.slane %v3467_v18, 1  ;;  %v3474_v47 = vadd.f32 %v3473_v62, %v3472_v35  ;;  %v3494_v13 = vrot.slane %v3493_v1, 1 }
 0x50f   : > { %v3439_v48 = vadd.f32 %v3438_v36, %v3437_v51  ;;  %v3499_v59 = vrot.slane %v3498_v38, 2  ;;  %v3532_v49 = vadd.f32 %v3531_v40, %v3530_v11  ;;  %v3526_v53 = vrot.slane %v3525_v39, 1 }
 0x510   : > { %v3445_v16 = vrot.slane %v3444_v42, 1  ;;  %v3469_v63 = vadd.f32 %v3468_v45, %v3467_v18  ;;  %v3475_v52 = vrot.slane %v3474_v47, 1  ;;  %v3495_v61 = vadd.f32 %v3494_v13, %v3493_v1 }
 0x511   : > { %v3500_v27 = vadd.f32 %v3499_v59, %v3498_v38  ;;  %v3533_v31 = vrot.slane %v3532_v49, 1  ;;  %v3527_v23 = vadd.f32 %v3526_v53, %v3525_v39 }
 0x512   : > { %v3446_v54 = vadd.f32 %v3445_v16, %v3444_v42  ;;  %v3476_v34 = vadd.f32 %v3475_v52, %v3474_v47  ;;  %v3477_v57 = vadd.f32 %v3469_v63, %v3439_v48 }
 0x513   : > { %v3501_v0 = vrot.slane %v3500_v27, 1  ;;  %v3534_v5 = vadd.f32 %v3533_v31, %v3532_v49 }
 0x514   : > { %v3478_v26 = vadd.f32 %v3476_v34, %v3446_v54  ;;  %v3503_v46 = vadd.f32 %v3495_v61, %v3477_v57 }
 0x515   : > { %v3502_v3 = vadd.f32 %v3501_v0, %v3500_v27 }
 0x516   : > { %v3535_v50 = vadd.f32 %v3527_v23, %v3503_v46 }
 0x517   : > { %v3504_v4 = vadd.f32 %v3502_v3, %v3478_v26 }
 0x519   : > { %v3536_v7 = vadd.f32 %v3534_v5, %v3504_v4 }
 0x51b   : > { %v3537_v9 = vadd.f32 %v3536_v7, %v3535_v50 }
 0x51d   : > { %3538 = vadd.xlane.f32.xlu0 %v3537_v9 }
 0x5aa   : > { %v3539_v14 = vpop.xlane.xlu0 %3538 }
 0x5ab   : > { %3541 = vst.msk [vmem:[%s166_s25] sm:$0x1] %vm3540_vm1, %v3539_v14 }
 0x5ac PF: > { %s13_s12 = sadd.s32 1, %s4848_s12  }
 0x5ad   : > { %p10_p4 = scmp.ge.s32.totalorder %s13_s12, 4  }
 0x5af   :  { %12 = sbr.rel (!%p10_p4) target bundleno = 1 (0x1), region = 69 }

</bundles_post_ra>
